<compile_context>
chip_gen: v7x
topology: tpu7x:2x2x1
jax: 0.10.0
libtpu: 0.0.40
codegen_flags: <defaults>
</compile_context>

<pallas_src>
import math

import jax
import jax.numpy as jnp
from jax import lax
from jax.experimental import pallas as pl
from jax.experimental.pallas import tpu as pltpu

D_MODEL = 32
N_HEAD = 4
D_HEAD = D_MODEL // N_HEAD
D_FFN = 64
NUM_LAYERS = 2
LN_EPS = 1e-5
_SM_SCALE = 1.0 / math.sqrt(D_HEAD)

# Slab packing below assumes the FFN hidden dim is exactly 2*C.
assert D_FFN == 2 * D_MODEL


# ------------------------------ kernel helpers -------------------------------

def _swap01(x):
    """(A, B, D) -> (B, A, D); lane (last) dim untouched."""
    if hasattr(pltpu, "einshape"):
        return pltpu.einshape("abd->bad", x)
    return jnp.swapaxes(x, 0, 1)  # fallback for older jax versions


def _layer_norm(x, g, b):
    mu = jnp.mean(x, axis=-1, keepdims=True)
    var = jnp.mean(jnp.square(x - mu), axis=-1, keepdims=True)
    return (x - mu) * lax.rsqrt(var + LN_EPS) * g + b


def _attn(qh, kh, vh):
    """Head-batched attention.  qh: (H, Lq, Dh), kh/vh: (H, Lk, Dh)."""
    s = jnp.einsum("hqd,hkd->hqk", qh, kh,
                   preferred_element_type=jnp.float32) * _SM_SCALE
    s = s - jnp.max(s, axis=-1, keepdims=True)
    p = jnp.exp(s)
    p = p / jnp.sum(p, axis=-1, keepdims=True)
    return jnp.einsum("hqk,hkd->hqd", p, vh, preferred_element_type=jnp.float32)


# --------------------------- fused decoder kernel ----------------------------

def _make_decoder_kernel(n, lq, lm):
    c, h, L = D_MODEL, N_HEAD, NUM_LAYERS

    def kernel(src_ref, pos_ref, mem_ref, pos_mem_ref,
               sa_w_ref, cf_w_ref, ckv_w_ref, w2_ref, bias_ref, out_ref):
        tgt = src_ref[...]                       # (n*lq, c)
        pos = pos_ref[...]                       # (n*lq, c)
        mem = mem_ref[...]                       # (n*lm, c)
        mem_pos = mem + pos_mem_ref[...]         # (n*lm, c)

        # ---- cross-attn K/V for ALL layers, hoisted (independent of tgt) ----
        # ckv columns: [Wk_l0 | Wk_l1 | Wv_l0 | Wv_l1]; last row = biases.
        ckv = ckv_w_ref[...]                                        # (c+1, 4c)
        kv_in = jnp.concatenate([mem_pos, mem], axis=0)             # (2*n*lm, c)
        kv_all = (jnp.dot(kv_in, ckv[:c, :],
                          preferred_element_type=jnp.float32)
                  + ckv[c:c + 1, :])                                # (2*n*lm, 4c)
        # head-major (2*L*h, 2*n*lm, Dh); only the mem_pos rows of the K column
        # blocks and the mem rows of the V column blocks are consumed below.
        kv_h = _swap01(kv_all.reshape(2 * n * lm, 2 * L * h, D_HEAD))

        for l in range(L):                       # static unroll over layers
            sa_l = sa_w_ref[l]                   # (c, 4c): [wq|wk|wv|wo]
            cf_l = cf_w_ref[l]                   # (c, 4c): [c_wq|c_wo|w1]
            w2_l = w2_ref[l]                     # (d_ffn, c)
            bl = bias_ref[l]                     # (4, 4c)

            # ----------------- self attention -----------------
            q_in = tgt + pos
            qk = (jnp.dot(q_in, sa_l[:, :2 * c],
                          preferred_element_type=jnp.float32)
                  + bl[0:1, :2 * c])                               # (n*lq, 2c)
            v = (jnp.dot(tgt, sa_l[:, 2 * c:3 * c],
                         preferred_element_type=jnp.float32)
                 + bl[0:1, 2 * c:3 * c])                           # (n*lq, c)
            qk_h = _swap01(qk.reshape(n * lq, 2 * h, D_HEAD))      # (2h, n*lq, d)
            v_h = _swap01(v.reshape(n * lq, h, D_HEAD))            # (h, n*lq, d)
            outs = []
            for b in range(n):                   # per-batch softmax blocks
                r = slice(b * lq, (b + 1) * lq)
                outs.append(_attn(qk_h[:h, r], qk_h[h:, r], v_h[:, r]))
            o = _swap01(jnp.concatenate(outs, axis=1)).reshape(n * lq, c)
            sa_out = (jnp.dot(o, sa_l[:, 3 * c:],
                              preferred_element_type=jnp.float32)
                      + bl[0:1, 3 * c:])
            tgt = _layer_norm(tgt + sa_out, bl[2:3, :c], bl[2:3, c:2 * c])

            # ----------------- cross attention -----------------
            # TODO(synk): original layer uses MSDeformAttn bilinear sampling at
            # reference_points / spatial_shapes; dense multi-head attention
            # over the flattened multi-scale memory is used as a stand-in.
            qc = (jnp.dot(tgt + pos, cf_l[:, :c],
                          preferred_element_type=jnp.float32)
                  + bl[1:2, :c])                                   # (n*lq, c)
            qc_h = _swap01(qc.reshape(n * lq, h, D_HEAD))
            outs = []
            for b in range(n):
                rq_ = slice(b * lq, (b + 1) * lq)
                rk = slice(b * lm, (b + 1) * lm)                   # mem_pos rows
                rv = slice(n * lm + b * lm, n * lm + (b + 1) * lm)  # mem rows
                kc_b = kv_h[l * h:(l + 1) * h, rk]
                vc_b = kv_h[(L + l) * h:(L + l + 1) * h, rv]
                outs.append(_attn(qc_h[:, rq_], kc_b, vc_b))
            o = _swap01(jnp.concatenate(outs, axis=1)).reshape(n * lq, c)
            ca_out = (jnp.dot(o, cf_l[:, c:2 * c],
                              preferred_element_type=jnp.float32)
                      + bl[1:2, c:2 * c])
            tgt = _layer_norm(tgt + ca_out, bl[2:3, 2 * c:3 * c], bl[2:3, 3 * c:])

            # ----------------- FFN -----------------
            hid = (jnp.dot(tgt, cf_l[:, 2 * c:],
                           preferred_element_type=jnp.float32)
                   + bl[1:2, 2 * c:])
            hid = jnp.maximum(hid, 0.0)
            f = (jnp.dot(hid, w2_l, preferred_element_type=jnp.float32)
                 + bl[3:4, 2 * c:3 * c])
            tgt = _layer_norm(tgt + f, bl[3:4, :c], bl[3:4, c:2 * c])

        out_ref[...] = tgt

    return kernel


# --------------------------------- wrapper -----------------------------------

def transformer_decoder_forward(src, memorys, spatial_shapes, spatial_shape_grids,
                                level_start_index_grid, level_start_index,
                                pos_embed, pos_memory, reference_points,
                                valid_ratios, packed):
    # TODO(synk): reference_points / valid_ratios / spatial_shapes /
    # level_start_index feed MSDeformAttn sampling in the original layer and
    # are unused by the dense cross-attention stand-in.
    del spatial_shapes, spatial_shape_grids, level_start_index_grid
    del level_start_index, reference_points, valid_ratios

    n, lq, c = src.shape
    lm = memorys.shape[1]

    out = pl.pallas_call(
        _make_decoder_kernel(n, lq, lm),
        out_shape=jax.ShapeDtypeStruct((n * lq, c), jnp.float32),
    )(src.reshape(n * lq, c),
      pos_embed.reshape(n * lq, c),
      memorys.reshape(n * lm, c),
      pos_memory.reshape(n * lm, c),
      packed["sa_w"], packed["cf_w"], packed["ckv_w"],
      packed["w2"], packed["bias"])
    return out.reshape(n, lq, c)


# ------------------------------ parameter init -------------------------------

def _xavier(key, shape):
    fan_in, fan_out = shape
    limit = (6.0 / (fan_in + fan_out)) ** 0.5
    return jax.random.uniform(key, shape, jnp.float32, -limit, limit)


def _make_attn_params(key):
    ks = jax.random.split(key, 4)
    z = jnp.zeros((D_MODEL,), jnp.float32)
    return dict(
        wq=_xavier(ks[0], (D_MODEL, D_MODEL)), bq=z,
        wk=_xavier(ks[1], (D_MODEL, D_MODEL)), bk=z,
        wv=_xavier(ks[2], (D_MODEL, D_MODEL)), bv=z,
        wo=_xavier(ks[3], (D_MODEL, D_MODEL)), bo=z,
    )


def _make_layer_params(key):
    ks = jax.random.split(key, 4)
    ones = jnp.ones((D_MODEL,), jnp.float32)
    zeros = jnp.zeros((D_MODEL,), jnp.float32)
    return dict(
        self_attn=_make_attn_params(ks[0]),
        cross_attn=_make_attn_params(ks[1]),
        w1=_xavier(ks[2], (D_MODEL, D_FFN)), b1=jnp.zeros((D_FFN,), jnp.float32),
        w2=_xavier(ks[3], (D_FFN, D_MODEL)), b2=jnp.zeros((D_MODEL,), jnp.float32),
        ln1_g=ones, ln1_b=zeros,
        ln2_g=ones, ln2_b=zeros,
        ln3_g=ones, ln3_b=zeros,
    )


def pack_layer_params(layer_params):
    """Pack all per-layer params into 5 lane-dense slabs (see kernel layout)."""
    def stack(fn):
        return jnp.stack([fn(p) for p in layer_params], axis=0)

    # Per-layer (C, 4C) slabs.
    sa_w = stack(lambda p: jnp.concatenate(
        [p["self_attn"]["wq"], p["self_attn"]["wk"],
         p["self_attn"]["wv"], p["self_attn"]["wo"]], axis=1))
    cf_w = stack(lambda p: jnp.concatenate(
        [p["cross_attn"]["wq"], p["cross_attn"]["wo"], p["w1"]], axis=1))
    w2 = stack(lambda p: p["w2"])                                    # (L, D_FFN, C)

    # Cross-attn K/V weights for all layers + bias row: (C+1, 2*L*C).
    ckv_rows = jnp.concatenate(
        [p["cross_attn"]["wk"] for p in layer_params]
        + [p["cross_attn"]["wv"] for p in layer_params], axis=1)
    ckv_bias = jnp.concatenate(
        [p["cross_attn"]["bk"] for p in layer_params]
        + [p["cross_attn"]["bv"] for p in layer_params]).reshape(1, -1)
    ckv_w = jnp.concatenate([ckv_rows, ckv_bias], axis=0)

    # All biases + LayerNorm params: (L, 4, 4C).
    def bias_rows(p):
        r0 = jnp.concatenate([p["self_attn"]["bq"], p["self_attn"]["bk"],
                              p["self_attn"]["bv"], p["self_attn"]["bo"]])
        r1 = jnp.concatenate([p["cross_attn"]["bq"], p["cross_attn"]["bo"],
                              p["b1"]])
        r2 = jnp.concatenate([p["ln1_g"], p["ln1_b"], p["ln2_g"], p["ln2_b"]])
        r3 = jnp.concatenate([p["ln3_g"], p["ln3_b"], p["b2"],
                              jnp.zeros((D_MODEL,), jnp.float32)])
        return jnp.stack([r0, r1, r2, r3], axis=0)
    bias = stack(bias_rows)

    return dict(sa_w=sa_w, cf_w=cf_w, ckv_w=ckv_w, w2=w2, bias=bias)


# ----------------------------------- main -------------------------------------

if __name__ == "__main__":
    N, LQ = 2, 8
    spatial_shapes = jnp.array([[4, 4], [2, 2]], jnp.int32)       # 2 levels
    level_start_index = jnp.array([0, 16], jnp.int32)
    spatial_shape_grids = jnp.array([[2, 2], [1, 1]], jnp.int32)
    level_start_index_grid = jnp.array([0, 4], jnp.int32)
    LM = 4 * 4 + 2 * 2                                            # 20

    keys = iter(jax.random.split(jax.random.PRNGKey(0), 16))
    src = jax.random.normal(next(keys), (N, LQ, D_MODEL), jnp.float32)
    memorys = jax.random.normal(next(keys), (N, LM, D_MODEL), jnp.float32)
    pos_embed = jax.random.normal(next(keys), (N, LQ, D_MODEL), jnp.float32)
    pos_memory = jax.random.normal(next(keys), (N, LM, D_MODEL), jnp.float32)
    reference_points = jax.random.uniform(next(keys), (N, LQ, 2), jnp.float32)
    valid_ratios = jnp.ones((N, 2, 2), jnp.float32)

    layer_params = [_make_layer_params(next(keys)) for _ in range(NUM_LAYERS)]
    packed = pack_layer_params(layer_params)

    out = transformer_decoder_forward(
        src, memorys, spatial_shapes, spatial_shape_grids,
        level_start_index_grid, level_start_index,
        pos_embed, pos_memory, reference_points, valid_ratios, packed)
    out = jax.block_until_ready(out)
    assert out.shape == (N, LQ, D_MODEL) and out.dtype == jnp.float32
    assert bool(jnp.all(jnp.isfinite(out)))
    print("KERNEL_OK")
</pallas_src>

<mosaic_0001>
module attributes {stable_mosaic.version = 11 : i64} {
  func.func @kernel(%arg0: memref<16x32xf32, #tpu.memory_space<vmem>>, %arg1: memref<16x32xf32, #tpu.memory_space<vmem>>, %arg2: memref<40x32xf32, #tpu.memory_space<vmem>>, %arg3: memref<40x32xf32, #tpu.memory_space<vmem>>, %arg4: memref<2x32x128xf32, #tpu.memory_space<vmem>>, %arg5: memref<2x32x128xf32, #tpu.memory_space<vmem>>, %arg6: memref<33x128xf32, #tpu.memory_space<vmem>>, %arg7: memref<2x64x32xf32, #tpu.memory_space<vmem>>, %arg8: memref<2x4x128xf32, #tpu.memory_space<vmem>>, %arg9: memref<16x32xf32, #tpu.memory_space<vmem>>) attributes {dimension_semantics = [], scalar_prefetch = 0 : i64, scratch_operands = 0 : i64, tpu.core_type = #tpu.core_type<tc>} {
    %c0 = arith.constant 0 : index
    %c0_0 = arith.constant 0 : index
    %0 = vector.load %arg0[%c0, %c0_0] : memref<16x32xf32, #tpu.memory_space<vmem>>, vector<16x32xf32>
    %c0_1 = arith.constant 0 : index
    %c0_2 = arith.constant 0 : index
    %1 = vector.load %arg1[%c0_1, %c0_2] : memref<16x32xf32, #tpu.memory_space<vmem>>, vector<16x32xf32>
    %c0_3 = arith.constant 0 : index
    %c0_4 = arith.constant 0 : index
    %2 = vector.load %arg2[%c0_3, %c0_4] : memref<40x32xf32, #tpu.memory_space<vmem>>, vector<40x32xf32>
    %c0_5 = arith.constant 0 : index
    %c0_6 = arith.constant 0 : index
    %3 = vector.load %arg3[%c0_5, %c0_6] : memref<40x32xf32, #tpu.memory_space<vmem>>, vector<40x32xf32>
    %4 = arith.addf %2, %3 : vector<40x32xf32>
    %c0_7 = arith.constant 0 : index
    %c0_8 = arith.constant 0 : index
    %5 = vector.load %arg6[%c0_7, %c0_8] : memref<33x128xf32, #tpu.memory_space<vmem>>, vector<33x128xf32>
    %6 = tpu.concatenate %4, %2 in 0 : vector<40x32xf32>, vector<40x32xf32> -> vector<80x32xf32>
    %7 = vector.extract_strided_slice %5 {offsets = [0, 0], sizes = [32, 128], strides = [1, 1]} : vector<33x128xf32> to vector<32x128xf32>
    %cst = arith.constant dense<0.000000e+00> : vector<80x128xf32>
    %8 = tpu.matmul %6, %7, %cst {dimension_numbers = #tpu.dot_dimension_numbers<[1], [0], [0], [1], [0, 0, 1, 1], [], []>} : vector<80x32xf32>, vector<32x128xf32>, vector<80x128xf32> -> vector<80x128xf32>
    %9 = vector.extract_strided_slice %5 {offsets = [32, 0], sizes = [1, 128], strides = [1, 1]} : vector<33x128xf32> to vector<1x128xf32>
    %10 = vector.broadcast %9 : vector<1x128xf32> to vector<80x128xf32>
    %11 = arith.addf %8, %10 : vector<80x128xf32>
    %12 = vector.shape_cast %11 : vector<80x128xf32> to vector<80x16x8xf32>
    %13 = tpu.transpose %12, [1, 0, 2] : vector<80x16x8xf32> -> vector<16x80x8xf32>
    %c0_9 = arith.constant 0 : index
    %c0_10 = arith.constant 0 : index
    %c0_11 = arith.constant 0 : index
    %14 = vector.load %arg4[%c0_9, %c0_10, %c0_11] : memref<2x32x128xf32, #tpu.memory_space<vmem>>, vector<1x32x128xf32>
    %15 = vector.shape_cast %14 : vector<1x32x128xf32> to vector<32x128xf32>
    %c0_12 = arith.constant 0 : index
    %c0_13 = arith.constant 0 : index
    %c0_14 = arith.constant 0 : index
    %16 = vector.load %arg5[%c0_12, %c0_13, %c0_14] : memref<2x32x128xf32, #tpu.memory_space<vmem>>, vector<1x32x128xf32>
    %17 = vector.shape_cast %16 : vector<1x32x128xf32> to vector<32x128xf32>
    %c0_15 = arith.constant 0 : index
    %c0_16 = arith.constant 0 : index
    %c0_17 = arith.constant 0 : index
    %18 = vector.load %arg7[%c0_15, %c0_16, %c0_17] : memref<2x64x32xf32, #tpu.memory_space<vmem>>, vector<1x64x32xf32>
    %19 = vector.shape_cast %18 : vector<1x64x32xf32> to vector<64x32xf32>
    %c0_18 = arith.constant 0 : index
    %c0_19 = arith.constant 0 : index
    %c0_20 = arith.constant 0 : index
    %20 = vector.load %arg8[%c0_18, %c0_19, %c0_20] : memref<2x4x128xf32, #tpu.memory_space<vmem>>, vector<1x4x128xf32>
    %21 = vector.shape_cast %20 : vector<1x4x128xf32> to vector<4x128xf32>
    %22 = arith.addf %0, %1 : vector<16x32xf32>
    %23 = vector.extract_strided_slice %15 {offsets = [0, 0], sizes = [32, 64], strides = [1, 1]} : vector<32x128xf32> to vector<32x64xf32>
    %cst_21 = arith.constant dense<0.000000e+00> : vector<16x64xf32>
    %24 = tpu.matmul %22, %23, %cst_21 {dimension_numbers = #tpu.dot_dimension_numbers<[1], [0], [0], [1], [0, 0, 1, 1], [], []>} : vector<16x32xf32>, vector<32x64xf32>, vector<16x64xf32> -> vector<16x64xf32>
    %25 = vector.extract_strided_slice %21 {offsets = [0, 0], sizes = [1, 64], strides = [1, 1]} : vector<4x128xf32> to vector<1x64xf32>
    %26 = vector.broadcast %25 : vector<1x64xf32> to vector<16x64xf32>
    %27 = arith.addf %24, %26 : vector<16x64xf32>
    %28 = vector.extract_strided_slice %15 {offsets = [0, 64], sizes = [32, 32], strides = [1, 1]} : vector<32x128xf32> to vector<32x32xf32>
    %cst_22 = arith.constant dense<0.000000e+00> : vector<16x32xf32>
    %29 = tpu.matmul %0, %28, %cst_22 {dimension_numbers = #tpu.dot_dimension_numbers<[1], [0], [0], [1], [0, 0, 1, 1], [], []>} : vector<16x32xf32>, vector<32x32xf32>, vector<16x32xf32> -> vector<16x32xf32>
    %30 = vector.extract_strided_slice %21 {offsets = [0, 64], sizes = [1, 32], strides = [1, 1]} : vector<4x128xf32> to vector<1x32xf32>
    %31 = vector.broadcast %30 : vector<1x32xf32> to vector<16x32xf32>
    %32 = arith.addf %29, %31 : vector<16x32xf32>
    %33 = vector.shape_cast %27 : vector<16x64xf32> to vector<16x8x8xf32>
    %34 = tpu.transpose %33, [1, 0, 2] : vector<16x8x8xf32> -> vector<8x16x8xf32>
    %35 = vector.shape_cast %32 : vector<16x32xf32> to vector<16x4x8xf32>
    %36 = tpu.transpose %35, [1, 0, 2] : vector<16x4x8xf32> -> vector<4x16x8xf32>
    %37 = vector.extract_strided_slice %34 {offsets = [0, 0, 0], sizes = [4, 8, 8], strides = [1, 1, 1]} : vector<8x16x8xf32> to vector<4x8x8xf32>
    %38 = vector.extract_strided_slice %34 {offsets = [4, 0, 0], sizes = [4, 8, 8], strides = [1, 1, 1]} : vector<8x16x8xf32> to vector<4x8x8xf32>
    %39 = vector.extract_strided_slice %36 {offsets = [0, 0, 0], sizes = [4, 8, 8], strides = [1, 1, 1]} : vector<4x16x8xf32> to vector<4x8x8xf32>
    "tpu.trace_start"() <{level = 10 : i32, message = "hqd,hkd->hqk"}> : () -> ()
    %cst_23 = arith.constant dense<0.000000e+00> : vector<4x8x8xf32>
    %40 = tpu.matmul %37, %38, %cst_23 {dimension_numbers = #tpu.dot_dimension_numbers<[2], [2], [1], [1], [0, 0, 0, 1, 1, 1], [0], [0]>} : vector<4x8x8xf32>, vector<4x8x8xf32>, vector<4x8x8xf32> -> vector<4x8x8xf32>
    "tpu.trace_stop"() : () -> ()
    %cst_24 = arith.constant 0.353553385 : f32
    %41 = vector.broadcast %cst_24 : f32 to vector<4x8x8xf32>
    %42 = arith.mulf %40, %41 : vector<4x8x8xf32>
    %cst_25 = arith.constant dense<0xFF800000> : vector<4x8xf32>
    %43 = vector.multi_reduction <maximumf>, %42, %cst_25 [2] : vector<4x8x8xf32> to vector<4x8xf32>
    %44 = vector.shape_cast %43 : vector<4x8xf32> to vector<4x8x1xf32>
    %45 = vector.broadcast %44 : vector<4x8x1xf32> to vector<4x8x8xf32>
    %46 = arith.subf %42, %45 : vector<4x8x8xf32>
    %47 = math.exp %46 : vector<4x8x8xf32>
    %cst_26 = arith.constant dense<0.000000e+00> : vector<4x8xf32>
    %48 = vector.multi_reduction <add>, %47, %cst_26 [2] : vector<4x8x8xf32> to vector<4x8xf32>
    %49 = vector.shape_cast %48 : vector<4x8xf32> to vector<4x8x1xf32>
    %50 = vector.broadcast %49 : vector<4x8x1xf32> to vector<4x8x8xf32>
    %51 = arith.divf %47, %50 : vector<4x8x8xf32>
    "tpu.trace_start"() <{level = 10 : i32, message = "hqk,hkd->hqd"}> : () -> ()
    %cst_27 = arith.constant dense<0.000000e+00> : vector<4x8x8xf32>
    %52 = tpu.matmul %51, %39, %cst_27 {dimension_numbers = #tpu.dot_dimension_numbers<[2], [1], [1], [2], [0, 0, 0, 1, 1, 2], [0], [0]>} : vector<4x8x8xf32>, vector<4x8x8xf32>, vector<4x8x8xf32> -> vector<4x8x8xf32>
    "tpu.trace_stop"() : () -> ()
    %53 = vector.extract_strided_slice %34 {offsets = [0, 8, 0], sizes = [4, 8, 8], strides = [1, 1, 1]} : vector<8x16x8xf32> to vector<4x8x8xf32>
    %54 = vector.extract_strided_slice %34 {offsets = [4, 8, 0], sizes = [4, 8, 8], strides = [1, 1, 1]} : vector<8x16x8xf32> to vector<4x8x8xf32>
    %55 = vector.extract_strided_slice %36 {offsets = [0, 8, 0], sizes = [4, 8, 8], strides = [1, 1, 1]} : vector<4x16x8xf32> to vector<4x8x8xf32>
    "tpu.trace_start"() <{level = 10 : i32, message = "hqd,hkd->hqk"}> : () -> ()
    %cst_28 = arith.constant dense<0.000000e+00> : vector<4x8x8xf32>
    %56 = tpu.matmul %53, %54, %cst_28 {dimension_numbers = #tpu.dot_dimension_numbers<[2], [2], [1], [1], [0, 0, 0, 1, 1, 1], [0], [0]>} : vector<4x8x8xf32>, vector<4x8x8xf32>, vector<4x8x8xf32> -> vector<4x8x8xf32>
    "tpu.trace_stop"() : () -> ()
    %cst_29 = arith.constant 0.353553385 : f32
    %57 = vector.broadcast %cst_29 : f32 to vector<4x8x8xf32>
    %58 = arith.mulf %56, %57 : vector<4x8x8xf32>
    %cst_30 = arith.constant dense<0xFF800000> : vector<4x8xf32>
    %59 = vector.multi_reduction <maximumf>, %58, %cst_30 [2] : vector<4x8x8xf32> to vector<4x8xf32>
    %60 = vector.shape_cast %59 : vector<4x8xf32> to vector<4x8x1xf32>
    %61 = vector.broadcast %60 : vector<4x8x1xf32> to vector<4x8x8xf32>
    %62 = arith.subf %58, %61 : vector<4x8x8xf32>
    %63 = math.exp %62 : vector<4x8x8xf32>
    %cst_31 = arith.constant dense<0.000000e+00> : vector<4x8xf32>
    %64 = vector.multi_reduction <add>, %63, %cst_31 [2] : vector<4x8x8xf32> to vector<4x8xf32>
    %65 = vector.shape_cast %64 : vector<4x8xf32> to vector<4x8x1xf32>
    %66 = vector.broadcast %65 : vector<4x8x1xf32> to vector<4x8x8xf32>
    %67 = arith.divf %63, %66 : vector<4x8x8xf32>
    "tpu.trace_start"() <{level = 10 : i32, message = "hqk,hkd->hqd"}> : () -> ()
    %cst_32 = arith.constant dense<0.000000e+00> : vector<4x8x8xf32>
    %68 = tpu.matmul %67, %55, %cst_32 {dimension_numbers = #tpu.dot_dimension_numbers<[2], [1], [1], [2], [0, 0, 0, 1, 1, 2], [0], [0]>} : vector<4x8x8xf32>, vector<4x8x8xf32>, vector<4x8x8xf32> -> vector<4x8x8xf32>
    "tpu.trace_stop"() : () -> ()
    %69 = tpu.concatenate %52, %68 in 1 : vector<4x8x8xf32>, vector<4x8x8xf32> -> vector<4x16x8xf32>
    %70 = tpu.transpose %69, [1, 0, 2] : vector<4x16x8xf32> -> vector<16x4x8xf32>
    %71 = vector.shape_cast %70 : vector<16x4x8xf32> to vector<16x32xf32>
    %72 = vector.extract_strided_slice %15 {offsets = [0, 96], sizes = [32, 32], strides = [1, 1]} : vector<32x128xf32> to vector<32x32xf32>
    %cst_33 = arith.constant dense<0.000000e+00> : vector<16x32xf32>
    %73 = tpu.matmul %71, %72, %cst_33 {dimension_numbers = #tpu.dot_dimension_numbers<[1], [0], [0], [1], [0, 0, 1, 1], [], []>} : vector<16x32xf32>, vector<32x32xf32>, vector<16x32xf32> -> vector<16x32xf32>
    %74 = vector.extract_strided_slice %21 {offsets = [0, 96], sizes = [1, 32], strides = [1, 1]} : vector<4x128xf32> to vector<1x32xf32>
    %75 = vector.broadcast %74 : vector<1x32xf32> to vector<16x32xf32>
    %76 = arith.addf %73, %75 : vector<16x32xf32>
    %77 = arith.addf %0, %76 : vector<16x32xf32>
    %78 = vector.extract_strided_slice %21 {offsets = [2, 0], sizes = [1, 32], strides = [1, 1]} : vector<4x128xf32> to vector<1x32xf32>
    %79 = vector.extract_strided_slice %21 {offsets = [2, 32], sizes = [1, 32], strides = [1, 1]} : vector<4x128xf32> to vector<1x32xf32>
    %cst_34 = arith.constant dense<0.000000e+00> : vector<16xf32>
    %80 = vector.multi_reduction <add>, %77, %cst_34 [1] : vector<16x32xf32> to vector<16xf32>
    %81 = vector.shape_cast %80 : vector<16xf32> to vector<16x1xf32>
    %cst_35 = arith.constant 3.200000e+01 : f32
    %82 = vector.broadcast %cst_35 : f32 to vector<16x1xf32>
    %83 = arith.divf %81, %82 : vector<16x1xf32>
    %84 = vector.broadcast %83 : vector<16x1xf32> to vector<16x32xf32>
    %85 = arith.subf %77, %84 : vector<16x32xf32>
    %86 = arith.mulf %85, %85 : vector<16x32xf32>
    %cst_36 = arith.constant dense<0.000000e+00> : vector<16xf32>
    %87 = vector.multi_reduction <add>, %86, %cst_36 [1] : vector<16x32xf32> to vector<16xf32>
    %88 = vector.shape_cast %87 : vector<16xf32> to vector<16x1xf32>
    %cst_37 = arith.constant 3.200000e+01 : f32
    %89 = vector.broadcast %cst_37 : f32 to vector<16x1xf32>
    %90 = arith.divf %88, %89 : vector<16x1xf32>
    %91 = vector.broadcast %83 : vector<16x1xf32> to vector<16x32xf32>
    %92 = arith.subf %77, %91 : vector<16x32xf32>
    %cst_38 = arith.constant 9.99999974E-6 : f32
    %93 = vector.broadcast %cst_38 : f32 to vector<16x1xf32>
    %94 = arith.addf %90, %93 : vector<16x1xf32>
    %95 = math.rsqrt %94 : vector<16x1xf32>
    %96 = vector.broadcast %95 : vector<16x1xf32> to vector<16x32xf32>
    %97 = arith.mulf %92, %96 : vector<16x32xf32>
    %98 = vector.broadcast %78 : vector<1x32xf32> to vector<16x32xf32>
    %99 = arith.mulf %97, %98 : vector<16x32xf32>
    %100 = vector.broadcast %79 : vector<1x32xf32> to vector<16x32xf32>
    %101 = arith.addf %99, %100 : vector<16x32xf32>
    %102 = arith.addf %101, %1 : vector<16x32xf32>
    %103 = vector.extract_strided_slice %17 {offsets = [0, 0], sizes = [32, 32], strides = [1, 1]} : vector<32x128xf32> to vector<32x32xf32>
    %cst_39 = arith.constant dense<0.000000e+00> : vector<16x32xf32>
    %104 = tpu.matmul %102, %103, %cst_39 {dimension_numbers = #tpu.dot_dimension_numbers<[1], [0], [0], [1], [0, 0, 1, 1], [], []>} : vector<16x32xf32>, vector<32x32xf32>, vector<16x32xf32> -> vector<16x32xf32>
    %105 = vector.extract_strided_slice %21 {offsets = [1, 0], sizes = [1, 32], strides = [1, 1]} : vector<4x128xf32> to vector<1x32xf32>
    %106 = vector.broadcast %105 : vector<1x32xf32> to vector<16x32xf32>
    %107 = arith.addf %104, %106 : vector<16x32xf32>
    %108 = vector.shape_cast %107 : vector<16x32xf32> to vector<16x4x8xf32>
    %109 = tpu.transpose %108, [1, 0, 2] : vector<16x4x8xf32> -> vector<4x16x8xf32>
    %110 = vector.extract_strided_slice %13 {offsets = [0, 0, 0], sizes = [4, 20, 8], strides = [1, 1, 1]} : vector<16x80x8xf32> to vector<4x20x8xf32>
    %111 = vector.extract_strided_slice %13 {offsets = [8, 40, 0], sizes = [4, 20, 8], strides = [1, 1, 1]} : vector<16x80x8xf32> to vector<4x20x8xf32>
    %112 = vector.extract_strided_slice %109 {offsets = [0, 0, 0], sizes = [4, 8, 8], strides = [1, 1, 1]} : vector<4x16x8xf32> to vector<4x8x8xf32>
    "tpu.trace_start"() <{level = 10 : i32, message = "hqd,hkd->hqk"}> : () -> ()
    %cst_40 = arith.constant dense<0.000000e+00> : vector<4x8x20xf32>
    %113 = tpu.matmul %112, %110, %cst_40 {dimension_numbers = #tpu.dot_dimension_numbers<[2], [2], [1], [1], [0, 0, 0, 1, 1, 1], [0], [0]>} : vector<4x8x8xf32>, vector<4x20x8xf32>, vector<4x8x20xf32> -> vector<4x8x20xf32>
    "tpu.trace_stop"() : () -> ()
    %cst_41 = arith.constant 0.353553385 : f32
    %114 = vector.broadcast %cst_41 : f32 to vector<4x8x20xf32>
    %115 = arith.mulf %113, %114 : vector<4x8x20xf32>
    %cst_42 = arith.constant dense<0xFF800000> : vector<4x8xf32>
    %116 = vector.multi_reduction <maximumf>, %115, %cst_42 [2] : vector<4x8x20xf32> to vector<4x8xf32>
    %117 = vector.shape_cast %116 : vector<4x8xf32> to vector<4x8x1xf32>
    %118 = vector.broadcast %117 : vector<4x8x1xf32> to vector<4x8x20xf32>
    %119 = arith.subf %115, %118 : vector<4x8x20xf32>
    %120 = math.exp %119 : vector<4x8x20xf32>
    %cst_43 = arith.constant dense<0.000000e+00> : vector<4x8xf32>
    %121 = vector.multi_reduction <add>, %120, %cst_43 [2] : vector<4x8x20xf32> to vector<4x8xf32>
    %122 = vector.shape_cast %121 : vector<4x8xf32> to vector<4x8x1xf32>
    %123 = vector.broadcast %122 : vector<4x8x1xf32> to vector<4x8x20xf32>
    %124 = arith.divf %120, %123 : vector<4x8x20xf32>
    "tpu.trace_start"() <{level = 10 : i32, message = "hqk,hkd->hqd"}> : () -> ()
    %cst_44 = arith.constant dense<0.000000e+00> : vector<4x8x8xf32>
    %125 = tpu.matmul %124, %111, %cst_44 {dimension_numbers = #tpu.dot_dimension_numbers<[2], [1], [1], [2], [0, 0, 0, 1, 1, 2], [0], [0]>} : vector<4x8x20xf32>, vector<4x20x8xf32>, vector<4x8x8xf32> -> vector<4x8x8xf32>
    "tpu.trace_stop"() : () -> ()
    %126 = vector.extract_strided_slice %13 {offsets = [0, 20, 0], sizes = [4, 20, 8], strides = [1, 1, 1]} : vector<16x80x8xf32> to vector<4x20x8xf32>
    %127 = vector.extract_strided_slice %13 {offsets = [8, 60, 0], sizes = [4, 20, 8], strides = [1, 1, 1]} : vector<16x80x8xf32> to vector<4x20x8xf32>
    %128 = vector.extract_strided_slice %109 {offsets = [0, 8, 0], sizes = [4, 8, 8], strides = [1, 1, 1]} : vector<4x16x8xf32> to vector<4x8x8xf32>
    "tpu.trace_start"() <{level = 10 : i32, message = "hqd,hkd->hqk"}> : () -> ()
    %cst_45 = arith.constant dense<0.000000e+00> : vector<4x8x20xf32>
    %129 = tpu.matmul %128, %126, %cst_45 {dimension_numbers = #tpu.dot_dimension_numbers<[2], [2], [1], [1], [0, 0, 0, 1, 1, 1], [0], [0]>} : vector<4x8x8xf32>, vector<4x20x8xf32>, vector<4x8x20xf32> -> vector<4x8x20xf32>
    "tpu.trace_stop"() : () -> ()
    %cst_46 = arith.constant 0.353553385 : f32
    %130 = vector.broadcast %cst_46 : f32 to vector<4x8x20xf32>
    %131 = arith.mulf %129, %130 : vector<4x8x20xf32>
    %cst_47 = arith.constant dense<0xFF800000> : vector<4x8xf32>
    %132 = vector.multi_reduction <maximumf>, %131, %cst_47 [2] : vector<4x8x20xf32> to vector<4x8xf32>
    %133 = vector.shape_cast %132 : vector<4x8xf32> to vector<4x8x1xf32>
    %134 = vector.broadcast %133 : vector<4x8x1xf32> to vector<4x8x20xf32>
    %135 = arith.subf %131, %134 : vector<4x8x20xf32>
    %136 = math.exp %135 : vector<4x8x20xf32>
    %cst_48 = arith.constant dense<0.000000e+00> : vector<4x8xf32>
    %137 = vector.multi_reduction <add>, %136, %cst_48 [2] : vector<4x8x20xf32> to vector<4x8xf32>
    %138 = vector.shape_cast %137 : vector<4x8xf32> to vector<4x8x1xf32>
    %139 = vector.broadcast %138 : vector<4x8x1xf32> to vector<4x8x20xf32>
    %140 = arith.divf %136, %139 : vector<4x8x20xf32>
    "tpu.trace_start"() <{level = 10 : i32, message = "hqk,hkd->hqd"}> : () -> ()
    %cst_49 = arith.constant dense<0.000000e+00> : vector<4x8x8xf32>
    %141 = tpu.matmul %140, %127, %cst_49 {dimension_numbers = #tpu.dot_dimension_numbers<[2], [1], [1], [2], [0, 0, 0, 1, 1, 2], [0], [0]>} : vector<4x8x20xf32>, vector<4x20x8xf32>, vector<4x8x8xf32> -> vector<4x8x8xf32>
    "tpu.trace_stop"() : () -> ()
    %142 = tpu.concatenate %125, %141 in 1 : vector<4x8x8xf32>, vector<4x8x8xf32> -> vector<4x16x8xf32>
    %143 = tpu.transpose %142, [1, 0, 2] : vector<4x16x8xf32> -> vector<16x4x8xf32>
    %144 = vector.shape_cast %143 : vector<16x4x8xf32> to vector<16x32xf32>
    %145 = vector.extract_strided_slice %17 {offsets = [0, 32], sizes = [32, 32], strides = [1, 1]} : vector<32x128xf32> to vector<32x32xf32>
    %cst_50 = arith.constant dense<0.000000e+00> : vector<16x32xf32>
    %146 = tpu.matmul %144, %145, %cst_50 {dimension_numbers = #tpu.dot_dimension_numbers<[1], [0], [0], [1], [0, 0, 1, 1], [], []>} : vector<16x32xf32>, vector<32x32xf32>, vector<16x32xf32> -> vector<16x32xf32>
    %147 = vector.extract_strided_slice %21 {offsets = [1, 32], sizes = [1, 32], strides = [1, 1]} : vector<4x128xf32> to vector<1x32xf32>
    %148 = vector.broadcast %147 : vector<1x32xf32> to vector<16x32xf32>
    %149 = arith.addf %146, %148 : vector<16x32xf32>
    %150 = arith.addf %101, %149 : vector<16x32xf32>
    %151 = vector.extract_strided_slice %21 {offsets = [2, 64], sizes = [1, 32], strides = [1, 1]} : vector<4x128xf32> to vector<1x32xf32>
    %152 = vector.extract_strided_slice %21 {offsets = [2, 96], sizes = [1, 32], strides = [1, 1]} : vector<4x128xf32> to vector<1x32xf32>
    %cst_51 = arith.constant dense<0.000000e+00> : vector<16xf32>
    %153 = vector.multi_reduction <add>, %150, %cst_51 [1] : vector<16x32xf32> to vector<16xf32>
    %154 = vector.shape_cast %153 : vector<16xf32> to vector<16x1xf32>
    %cst_52 = arith.constant 3.200000e+01 : f32
    %155 = vector.broadcast %cst_52 : f32 to vector<16x1xf32>
    %156 = arith.divf %154, %155 : vector<16x1xf32>
    %157 = vector.broadcast %156 : vector<16x1xf32> to vector<16x32xf32>
    %158 = arith.subf %150, %157 : vector<16x32xf32>
    %159 = arith.mulf %158, %158 : vector<16x32xf32>
    %cst_53 = arith.constant dense<0.000000e+00> : vector<16xf32>
    %160 = vector.multi_reduction <add>, %159, %cst_53 [1] : vector<16x32xf32> to vector<16xf32>
    %161 = vector.shape_cast %160 : vector<16xf32> to vector<16x1xf32>
    %cst_54 = arith.constant 3.200000e+01 : f32
    %162 = vector.broadcast %cst_54 : f32 to vector<16x1xf32>
    %163 = arith.divf %161, %162 : vector<16x1xf32>
    %164 = vector.broadcast %156 : vector<16x1xf32> to vector<16x32xf32>
    %165 = arith.subf %150, %164 : vector<16x32xf32>
    %cst_55 = arith.constant 9.99999974E-6 : f32
    %166 = vector.broadcast %cst_55 : f32 to vector<16x1xf32>
    %167 = arith.addf %163, %166 : vector<16x1xf32>
    %168 = math.rsqrt %167 : vector<16x1xf32>
    %169 = vector.broadcast %168 : vector<16x1xf32> to vector<16x32xf32>
    %170 = arith.mulf %165, %169 : vector<16x32xf32>
    %171 = vector.broadcast %151 : vector<1x32xf32> to vector<16x32xf32>
    %172 = arith.mulf %170, %171 : vector<16x32xf32>
    %173 = vector.broadcast %152 : vector<1x32xf32> to vector<16x32xf32>
    %174 = arith.addf %172, %173 : vector<16x32xf32>
    %175 = vector.extract_strided_slice %17 {offsets = [0, 64], sizes = [32, 64], strides = [1, 1]} : vector<32x128xf32> to vector<32x64xf32>
    %cst_56 = arith.constant dense<0.000000e+00> : vector<16x64xf32>
    %176 = tpu.matmul %174, %175, %cst_56 {dimension_numbers = #tpu.dot_dimension_numbers<[1], [0], [0], [1], [0, 0, 1, 1], [], []>} : vector<16x32xf32>, vector<32x64xf32>, vector<16x64xf32> -> vector<16x64xf32>
    %177 = vector.extract_strided_slice %21 {offsets = [1, 64], sizes = [1, 64], strides = [1, 1]} : vector<4x128xf32> to vector<1x64xf32>
    %178 = vector.broadcast %177 : vector<1x64xf32> to vector<16x64xf32>
    %179 = arith.addf %176, %178 : vector<16x64xf32>
    %cst_57 = arith.constant 0.000000e+00 : f32
    %180 = vector.broadcast %cst_57 : f32 to vector<16x64xf32>
    %181 = arith.maximumf %179, %180 : vector<16x64xf32>
    %cst_58 = arith.constant dense<0.000000e+00> : vector<16x32xf32>
    %182 = tpu.matmul %181, %19, %cst_58 {dimension_numbers = #tpu.dot_dimension_numbers<[1], [0], [0], [1], [0, 0, 1, 1], [], []>} : vector<16x64xf32>, vector<64x32xf32>, vector<16x32xf32> -> vector<16x32xf32>
    %183 = vector.extract_strided_slice %21 {offsets = [3, 64], sizes = [1, 32], strides = [1, 1]} : vector<4x128xf32> to vector<1x32xf32>
    %184 = vector.broadcast %183 : vector<1x32xf32> to vector<16x32xf32>
    %185 = arith.addf %182, %184 : vector<16x32xf32>
    %186 = arith.addf %174, %185 : vector<16x32xf32>
    %187 = vector.extract_strided_slice %21 {offsets = [3, 0], sizes = [1, 32], strides = [1, 1]} : vector<4x128xf32> to vector<1x32xf32>
    %188 = vector.extract_strided_slice %21 {offsets = [3, 32], sizes = [1, 32], strides = [1, 1]} : vector<4x128xf32> to vector<1x32xf32>
    %cst_59 = arith.constant dense<0.000000e+00> : vector<16xf32>
    %189 = vector.multi_reduction <add>, %186, %cst_59 [1] : vector<16x32xf32> to vector<16xf32>
    %190 = vector.shape_cast %189 : vector<16xf32> to vector<16x1xf32>
    %cst_60 = arith.constant 3.200000e+01 : f32
    %191 = vector.broadcast %cst_60 : f32 to vector<16x1xf32>
    %192 = arith.divf %190, %191 : vector<16x1xf32>
    %193 = vector.broadcast %192 : vector<16x1xf32> to vector<16x32xf32>
    %194 = arith.subf %186, %193 : vector<16x32xf32>
    %195 = arith.mulf %194, %194 : vector<16x32xf32>
    %cst_61 = arith.constant dense<0.000000e+00> : vector<16xf32>
    %196 = vector.multi_reduction <add>, %195, %cst_61 [1] : vector<16x32xf32> to vector<16xf32>
    %197 = vector.shape_cast %196 : vector<16xf32> to vector<16x1xf32>
    %cst_62 = arith.constant 3.200000e+01 : f32
    %198 = vector.broadcast %cst_62 : f32 to vector<16x1xf32>
    %199 = arith.divf %197, %198 : vector<16x1xf32>
    %200 = vector.broadcast %192 : vector<16x1xf32> to vector<16x32xf32>
    %201 = arith.subf %186, %200 : vector<16x32xf32>
    %cst_63 = arith.constant 9.99999974E-6 : f32
    %202 = vector.broadcast %cst_63 : f32 to vector<16x1xf32>
    %203 = arith.addf %199, %202 : vector<16x1xf32>
    %204 = math.rsqrt %203 : vector<16x1xf32>
    %205 = vector.broadcast %204 : vector<16x1xf32> to vector<16x32xf32>
    %206 = arith.mulf %201, %205 : vector<16x32xf32>
    %207 = vector.broadcast %187 : vector<1x32xf32> to vector<16x32xf32>
    %208 = arith.mulf %206, %207 : vector<16x32xf32>
    %209 = vector.broadcast %188 : vector<1x32xf32> to vector<16x32xf32>
    %210 = arith.addf %208, %209 : vector<16x32xf32>
    %c1 = arith.constant 1 : index
    %c0_64 = arith.constant 0 : index
    %c0_65 = arith.constant 0 : index
    %211 = vector.load %arg4[%c1, %c0_64, %c0_65] : memref<2x32x128xf32, #tpu.memory_space<vmem>>, vector<1x32x128xf32>
    %212 = vector.shape_cast %211 : vector<1x32x128xf32> to vector<32x128xf32>
    %c1_66 = arith.constant 1 : index
    %c0_67 = arith.constant 0 : index
    %c0_68 = arith.constant 0 : index
    %213 = vector.load %arg5[%c1_66, %c0_67, %c0_68] : memref<2x32x128xf32, #tpu.memory_space<vmem>>, vector<1x32x128xf32>
    %214 = vector.shape_cast %213 : vector<1x32x128xf32> to vector<32x128xf32>
    %c1_69 = arith.constant 1 : index
    %c0_70 = arith.constant 0 : index
    %c0_71 = arith.constant 0 : index
    %215 = vector.load %arg7[%c1_69, %c0_70, %c0_71] : memref<2x64x32xf32, #tpu.memory_space<vmem>>, vector<1x64x32xf32>
    %216 = vector.shape_cast %215 : vector<1x64x32xf32> to vector<64x32xf32>
    %c1_72 = arith.constant 1 : index
    %c0_73 = arith.constant 0 : index
    %c0_74 = arith.constant 0 : index
    %217 = vector.load %arg8[%c1_72, %c0_73, %c0_74] : memref<2x4x128xf32, #tpu.memory_space<vmem>>, vector<1x4x128xf32>
    %218 = vector.shape_cast %217 : vector<1x4x128xf32> to vector<4x128xf32>
    %219 = arith.addf %210, %1 : vector<16x32xf32>
    %220 = vector.extract_strided_slice %212 {offsets = [0, 0], sizes = [32, 64], strides = [1, 1]} : vector<32x128xf32> to vector<32x64xf32>
    %cst_75 = arith.constant dense<0.000000e+00> : vector<16x64xf32>
    %221 = tpu.matmul %219, %220, %cst_75 {dimension_numbers = #tpu.dot_dimension_numbers<[1], [0], [0], [1], [0, 0, 1, 1], [], []>} : vector<16x32xf32>, vector<32x64xf32>, vector<16x64xf32> -> vector<16x64xf32>
    %222 = vector.extract_strided_slice %218 {offsets = [0, 0], sizes = [1, 64], strides = [1, 1]} : vector<4x128xf32> to vector<1x64xf32>
    %223 = vector.broadcast %222 : vector<1x64xf32> to vector<16x64xf32>
    %224 = arith.addf %221, %223 : vector<16x64xf32>
    %225 = vector.extract_strided_slice %212 {offsets = [0, 64], sizes = [32, 32], strides = [1, 1]} : vector<32x128xf32> to vector<32x32xf32>
    %cst_76 = arith.constant dense<0.000000e+00> : vector<16x32xf32>
    %226 = tpu.matmul %210, %225, %cst_76 {dimension_numbers = #tpu.dot_dimension_numbers<[1], [0], [0], [1], [0, 0, 1, 1], [], []>} : vector<16x32xf32>, vector<32x32xf32>, vector<16x32xf32> -> vector<16x32xf32>
    %227 = vector.extract_strided_slice %218 {offsets = [0, 64], sizes = [1, 32], strides = [1, 1]} : vector<4x128xf32> to vector<1x32xf32>
    %228 = vector.broadcast %227 : vector<1x32xf32> to vector<16x32xf32>
    %229 = arith.addf %226, %228 : vector<16x32xf32>
    %230 = vector.shape_cast %224 : vector<16x64xf32> to vector<16x8x8xf32>
    %231 = tpu.transpose %230, [1, 0, 2] : vector<16x8x8xf32> -> vector<8x16x8xf32>
    %232 = vector.shape_cast %229 : vector<16x32xf32> to vector<16x4x8xf32>
    %233 = tpu.transpose %232, [1, 0, 2] : vector<16x4x8xf32> -> vector<4x16x8xf32>
    %234 = vector.extract_strided_slice %231 {offsets = [0, 0, 0], sizes = [4, 8, 8], strides = [1, 1, 1]} : vector<8x16x8xf32> to vector<4x8x8xf32>
    %235 = vector.extract_strided_slice %231 {offsets = [4, 0, 0], sizes = [4, 8, 8], strides = [1, 1, 1]} : vector<8x16x8xf32> to vector<4x8x8xf32>
    %236 = vector.extract_strided_slice %233 {offsets = [0, 0, 0], sizes = [4, 8, 8], strides = [1, 1, 1]} : vector<4x16x8xf32> to vector<4x8x8xf32>
    "tpu.trace_start"() <{level = 10 : i32, message = "hqd,hkd->hqk"}> : () -> ()
    %cst_77 = arith.constant dense<0.000000e+00> : vector<4x8x8xf32>
    %237 = tpu.matmul %234, %235, %cst_77 {dimension_numbers = #tpu.dot_dimension_numbers<[2], [2], [1], [1], [0, 0, 0, 1, 1, 1], [0], [0]>} : vector<4x8x8xf32>, vector<4x8x8xf32>, vector<4x8x8xf32> -> vector<4x8x8xf32>
    "tpu.trace_stop"() : () -> ()
    %cst_78 = arith.constant 0.353553385 : f32
    %238 = vector.broadcast %cst_78 : f32 to vector<4x8x8xf32>
    %239 = arith.mulf %237, %238 : vector<4x8x8xf32>
    %cst_79 = arith.constant dense<0xFF800000> : vector<4x8xf32>
    %240 = vector.multi_reduction <maximumf>, %239, %cst_79 [2] : vector<4x8x8xf32> to vector<4x8xf32>
    %241 = vector.shape_cast %240 : vector<4x8xf32> to vector<4x8x1xf32>
    %242 = vector.broadcast %241 : vector<4x8x1xf32> to vector<4x8x8xf32>
    %243 = arith.subf %239, %242 : vector<4x8x8xf32>
    %244 = math.exp %243 : vector<4x8x8xf32>
    %cst_80 = arith.constant dense<0.000000e+00> : vector<4x8xf32>
    %245 = vector.multi_reduction <add>, %244, %cst_80 [2] : vector<4x8x8xf32> to vector<4x8xf32>
    %246 = vector.shape_cast %245 : vector<4x8xf32> to vector<4x8x1xf32>
    %247 = vector.broadcast %246 : vector<4x8x1xf32> to vector<4x8x8xf32>
    %248 = arith.divf %244, %247 : vector<4x8x8xf32>
    "tpu.trace_start"() <{level = 10 : i32, message = "hqk,hkd->hqd"}> : () -> ()
    %cst_81 = arith.constant dense<0.000000e+00> : vector<4x8x8xf32>
    %249 = tpu.matmul %248, %236, %cst_81 {dimension_numbers = #tpu.dot_dimension_numbers<[2], [1], [1], [2], [0, 0, 0, 1, 1, 2], [0], [0]>} : vector<4x8x8xf32>, vector<4x8x8xf32>, vector<4x8x8xf32> -> vector<4x8x8xf32>
    "tpu.trace_stop"() : () -> ()
    %250 = vector.extract_strided_slice %231 {offsets = [0, 8, 0], sizes = [4, 8, 8], strides = [1, 1, 1]} : vector<8x16x8xf32> to vector<4x8x8xf32>
    %251 = vector.extract_strided_slice %231 {offsets = [4, 8, 0], sizes = [4, 8, 8], strides = [1, 1, 1]} : vector<8x16x8xf32> to vector<4x8x8xf32>
    %252 = vector.extract_strided_slice %233 {offsets = [0, 8, 0], sizes = [4, 8, 8], strides = [1, 1, 1]} : vector<4x16x8xf32> to vector<4x8x8xf32>
    "tpu.trace_start"() <{level = 10 : i32, message = "hqd,hkd->hqk"}> : () -> ()
    %cst_82 = arith.constant dense<0.000000e+00> : vector<4x8x8xf32>
    %253 = tpu.matmul %250, %251, %cst_82 {dimension_numbers = #tpu.dot_dimension_numbers<[2], [2], [1], [1], [0, 0, 0, 1, 1, 1], [0], [0]>} : vector<4x8x8xf32>, vector<4x8x8xf32>, vector<4x8x8xf32> -> vector<4x8x8xf32>
    "tpu.trace_stop"() : () -> ()
    %cst_83 = arith.constant 0.353553385 : f32
    %254 = vector.broadcast %cst_83 : f32 to vector<4x8x8xf32>
    %255 = arith.mulf %253, %254 : vector<4x8x8xf32>
    %cst_84 = arith.constant dense<0xFF800000> : vector<4x8xf32>
    %256 = vector.multi_reduction <maximumf>, %255, %cst_84 [2] : vector<4x8x8xf32> to vector<4x8xf32>
    %257 = vector.shape_cast %256 : vector<4x8xf32> to vector<4x8x1xf32>
    %258 = vector.broadcast %257 : vector<4x8x1xf32> to vector<4x8x8xf32>
    %259 = arith.subf %255, %258 : vector<4x8x8xf32>
    %260 = math.exp %259 : vector<4x8x8xf32>
    %cst_85 = arith.constant dense<0.000000e+00> : vector<4x8xf32>
    %261 = vector.multi_reduction <add>, %260, %cst_85 [2] : vector<4x8x8xf32> to vector<4x8xf32>
    %262 = vector.shape_cast %261 : vector<4x8xf32> to vector<4x8x1xf32>
    %263 = vector.broadcast %262 : vector<4x8x1xf32> to vector<4x8x8xf32>
    %264 = arith.divf %260, %263 : vector<4x8x8xf32>
    "tpu.trace_start"() <{level = 10 : i32, message = "hqk,hkd->hqd"}> : () -> ()
    %cst_86 = arith.constant dense<0.000000e+00> : vector<4x8x8xf32>
    %265 = tpu.matmul %264, %252, %cst_86 {dimension_numbers = #tpu.dot_dimension_numbers<[2], [1], [1], [2], [0, 0, 0, 1, 1, 2], [0], [0]>} : vector<4x8x8xf32>, vector<4x8x8xf32>, vector<4x8x8xf32> -> vector<4x8x8xf32>
    "tpu.trace_stop"() : () -> ()
    %266 = tpu.concatenate %249, %265 in 1 : vector<4x8x8xf32>, vector<4x8x8xf32> -> vector<4x16x8xf32>
    %267 = tpu.transpose %266, [1, 0, 2] : vector<4x16x8xf32> -> vector<16x4x8xf32>
    %268 = vector.shape_cast %267 : vector<16x4x8xf32> to vector<16x32xf32>
    %269 = vector.extract_strided_slice %212 {offsets = [0, 96], sizes = [32, 32], strides = [1, 1]} : vector<32x128xf32> to vector<32x32xf32>
    %cst_87 = arith.constant dense<0.000000e+00> : vector<16x32xf32>
    %270 = tpu.matmul %268, %269, %cst_87 {dimension_numbers = #tpu.dot_dimension_numbers<[1], [0], [0], [1], [0, 0, 1, 1], [], []>} : vector<16x32xf32>, vector<32x32xf32>, vector<16x32xf32> -> vector<16x32xf32>
    %271 = vector.extract_strided_slice %218 {offsets = [0, 96], sizes = [1, 32], strides = [1, 1]} : vector<4x128xf32> to vector<1x32xf32>
    %272 = vector.broadcast %271 : vector<1x32xf32> to vector<16x32xf32>
    %273 = arith.addf %270, %272 : vector<16x32xf32>
    %274 = arith.addf %210, %273 : vector<16x32xf32>
    %275 = vector.extract_strided_slice %218 {offsets = [2, 0], sizes = [1, 32], strides = [1, 1]} : vector<4x128xf32> to vector<1x32xf32>
    %276 = vector.extract_strided_slice %218 {offsets = [2, 32], sizes = [1, 32], strides = [1, 1]} : vector<4x128xf32> to vector<1x32xf32>
    %cst_88 = arith.constant dense<0.000000e+00> : vector<16xf32>
    %277 = vector.multi_reduction <add>, %274, %cst_88 [1] : vector<16x32xf32> to vector<16xf32>
    %278 = vector.shape_cast %277 : vector<16xf32> to vector<16x1xf32>
    %cst_89 = arith.constant 3.200000e+01 : f32
    %279 = vector.broadcast %cst_89 : f32 to vector<16x1xf32>
    %280 = arith.divf %278, %279 : vector<16x1xf32>
    %281 = vector.broadcast %280 : vector<16x1xf32> to vector<16x32xf32>
    %282 = arith.subf %274, %281 : vector<16x32xf32>
    %283 = arith.mulf %282, %282 : vector<16x32xf32>
    %cst_90 = arith.constant dense<0.000000e+00> : vector<16xf32>
    %284 = vector.multi_reduction <add>, %283, %cst_90 [1] : vector<16x32xf32> to vector<16xf32>
    %285 = vector.shape_cast %284 : vector<16xf32> to vector<16x1xf32>
    %cst_91 = arith.constant 3.200000e+01 : f32
    %286 = vector.broadcast %cst_91 : f32 to vector<16x1xf32>
    %287 = arith.divf %285, %286 : vector<16x1xf32>
    %288 = vector.broadcast %280 : vector<16x1xf32> to vector<16x32xf32>
    %289 = arith.subf %274, %288 : vector<16x32xf32>
    %cst_92 = arith.constant 9.99999974E-6 : f32
    %290 = vector.broadcast %cst_92 : f32 to vector<16x1xf32>
    %291 = arith.addf %287, %290 : vector<16x1xf32>
    %292 = math.rsqrt %291 : vector<16x1xf32>
    %293 = vector.broadcast %292 : vector<16x1xf32> to vector<16x32xf32>
    %294 = arith.mulf %289, %293 : vector<16x32xf32>
    %295 = vector.broadcast %275 : vector<1x32xf32> to vector<16x32xf32>
    %296 = arith.mulf %294, %295 : vector<16x32xf32>
    %297 = vector.broadcast %276 : vector<1x32xf32> to vector<16x32xf32>
    %298 = arith.addf %296, %297 : vector<16x32xf32>
    %299 = arith.addf %298, %1 : vector<16x32xf32>
    %300 = vector.extract_strided_slice %214 {offsets = [0, 0], sizes = [32, 32], strides = [1, 1]} : vector<32x128xf32> to vector<32x32xf32>
    %cst_93 = arith.constant dense<0.000000e+00> : vector<16x32xf32>
    %301 = tpu.matmul %299, %300, %cst_93 {dimension_numbers = #tpu.dot_dimension_numbers<[1], [0], [0], [1], [0, 0, 1, 1], [], []>} : vector<16x32xf32>, vector<32x32xf32>, vector<16x32xf32> -> vector<16x32xf32>
    %302 = vector.extract_strided_slice %218 {offsets = [1, 0], sizes = [1, 32], strides = [1, 1]} : vector<4x128xf32> to vector<1x32xf32>
    %303 = vector.broadcast %302 : vector<1x32xf32> to vector<16x32xf32>
    %304 = arith.addf %301, %303 : vector<16x32xf32>
    %305 = vector.shape_cast %304 : vector<16x32xf32> to vector<16x4x8xf32>
    %306 = tpu.transpose %305, [1, 0, 2] : vector<16x4x8xf32> -> vector<4x16x8xf32>
    %307 = vector.extract_strided_slice %13 {offsets = [4, 0, 0], sizes = [4, 20, 8], strides = [1, 1, 1]} : vector<16x80x8xf32> to vector<4x20x8xf32>
    %308 = vector.extract_strided_slice %13 {offsets = [12, 40, 0], sizes = [4, 20, 8], strides = [1, 1, 1]} : vector<16x80x8xf32> to vector<4x20x8xf32>
    %309 = vector.extract_strided_slice %306 {offsets = [0, 0, 0], sizes = [4, 8, 8], strides = [1, 1, 1]} : vector<4x16x8xf32> to vector<4x8x8xf32>
    "tpu.trace_start"() <{level = 10 : i32, message = "hqd,hkd->hqk"}> : () -> ()
    %cst_94 = arith.constant dense<0.000000e+00> : vector<4x8x20xf32>
    %310 = tpu.matmul %309, %307, %cst_94 {dimension_numbers = #tpu.dot_dimension_numbers<[2], [2], [1], [1], [0, 0, 0, 1, 1, 1], [0], [0]>} : vector<4x8x8xf32>, vector<4x20x8xf32>, vector<4x8x20xf32> -> vector<4x8x20xf32>
    "tpu.trace_stop"() : () -> ()
    %cst_95 = arith.constant 0.353553385 : f32
    %311 = vector.broadcast %cst_95 : f32 to vector<4x8x20xf32>
    %312 = arith.mulf %310, %311 : vector<4x8x20xf32>
    %cst_96 = arith.constant dense<0xFF800000> : vector<4x8xf32>
    %313 = vector.multi_reduction <maximumf>, %312, %cst_96 [2] : vector<4x8x20xf32> to vector<4x8xf32>
    %314 = vector.shape_cast %313 : vector<4x8xf32> to vector<4x8x1xf32>
    %315 = vector.broadcast %314 : vector<4x8x1xf32> to vector<4x8x20xf32>
    %316 = arith.subf %312, %315 : vector<4x8x20xf32>
    %317 = math.exp %316 : vector<4x8x20xf32>
    %cst_97 = arith.constant dense<0.000000e+00> : vector<4x8xf32>
    %318 = vector.multi_reduction <add>, %317, %cst_97 [2] : vector<4x8x20xf32> to vector<4x8xf32>
    %319 = vector.shape_cast %318 : vector<4x8xf32> to vector<4x8x1xf32>
    %320 = vector.broadcast %319 : vector<4x8x1xf32> to vector<4x8x20xf32>
    %321 = arith.divf %317, %320 : vector<4x8x20xf32>
    "tpu.trace_start"() <{level = 10 : i32, message = "hqk,hkd->hqd"}> : () -> ()
    %cst_98 = arith.constant dense<0.000000e+00> : vector<4x8x8xf32>
    %322 = tpu.matmul %321, %308, %cst_98 {dimension_numbers = #tpu.dot_dimension_numbers<[2], [1], [1], [2], [0, 0, 0, 1, 1, 2], [0], [0]>} : vector<4x8x20xf32>, vector<4x20x8xf32>, vector<4x8x8xf32> -> vector<4x8x8xf32>
    "tpu.trace_stop"() : () -> ()
    %323 = vector.extract_strided_slice %13 {offsets = [4, 20, 0], sizes = [4, 20, 8], strides = [1, 1, 1]} : vector<16x80x8xf32> to vector<4x20x8xf32>
    %324 = vector.extract_strided_slice %13 {offsets = [12, 60, 0], sizes = [4, 20, 8], strides = [1, 1, 1]} : vector<16x80x8xf32> to vector<4x20x8xf32>
    %325 = vector.extract_strided_slice %306 {offsets = [0, 8, 0], sizes = [4, 8, 8], strides = [1, 1, 1]} : vector<4x16x8xf32> to vector<4x8x8xf32>
    "tpu.trace_start"() <{level = 10 : i32, message = "hqd,hkd->hqk"}> : () -> ()
    %cst_99 = arith.constant dense<0.000000e+00> : vector<4x8x20xf32>
    %326 = tpu.matmul %325, %323, %cst_99 {dimension_numbers = #tpu.dot_dimension_numbers<[2], [2], [1], [1], [0, 0, 0, 1, 1, 1], [0], [0]>} : vector<4x8x8xf32>, vector<4x20x8xf32>, vector<4x8x20xf32> -> vector<4x8x20xf32>
    "tpu.trace_stop"() : () -> ()
    %cst_100 = arith.constant 0.353553385 : f32
    %327 = vector.broadcast %cst_100 : f32 to vector<4x8x20xf32>
    %328 = arith.mulf %326, %327 : vector<4x8x20xf32>
    %cst_101 = arith.constant dense<0xFF800000> : vector<4x8xf32>
    %329 = vector.multi_reduction <maximumf>, %328, %cst_101 [2] : vector<4x8x20xf32> to vector<4x8xf32>
    %330 = vector.shape_cast %329 : vector<4x8xf32> to vector<4x8x1xf32>
    %331 = vector.broadcast %330 : vector<4x8x1xf32> to vector<4x8x20xf32>
    %332 = arith.subf %328, %331 : vector<4x8x20xf32>
    %333 = math.exp %332 : vector<4x8x20xf32>
    %cst_102 = arith.constant dense<0.000000e+00> : vector<4x8xf32>
    %334 = vector.multi_reduction <add>, %333, %cst_102 [2] : vector<4x8x20xf32> to vector<4x8xf32>
    %335 = vector.shape_cast %334 : vector<4x8xf32> to vector<4x8x1xf32>
    %336 = vector.broadcast %335 : vector<4x8x1xf32> to vector<4x8x20xf32>
    %337 = arith.divf %333, %336 : vector<4x8x20xf32>
    "tpu.trace_start"() <{level = 10 : i32, message = "hqk,hkd->hqd"}> : () -> ()
    %cst_103 = arith.constant dense<0.000000e+00> : vector<4x8x8xf32>
    %338 = tpu.matmul %337, %324, %cst_103 {dimension_numbers = #tpu.dot_dimension_numbers<[2], [1], [1], [2], [0, 0, 0, 1, 1, 2], [0], [0]>} : vector<4x8x20xf32>, vector<4x20x8xf32>, vector<4x8x8xf32> -> vector<4x8x8xf32>
    "tpu.trace_stop"() : () -> ()
    %339 = tpu.concatenate %322, %338 in 1 : vector<4x8x8xf32>, vector<4x8x8xf32> -> vector<4x16x8xf32>
    %340 = tpu.transpose %339, [1, 0, 2] : vector<4x16x8xf32> -> vector<16x4x8xf32>
    %341 = vector.shape_cast %340 : vector<16x4x8xf32> to vector<16x32xf32>
    %342 = vector.extract_strided_slice %214 {offsets = [0, 32], sizes = [32, 32], strides = [1, 1]} : vector<32x128xf32> to vector<32x32xf32>
    %cst_104 = arith.constant dense<0.000000e+00> : vector<16x32xf32>
    %343 = tpu.matmul %341, %342, %cst_104 {dimension_numbers = #tpu.dot_dimension_numbers<[1], [0], [0], [1], [0, 0, 1, 1], [], []>} : vector<16x32xf32>, vector<32x32xf32>, vector<16x32xf32> -> vector<16x32xf32>
    %344 = vector.extract_strided_slice %218 {offsets = [1, 32], sizes = [1, 32], strides = [1, 1]} : vector<4x128xf32> to vector<1x32xf32>
    %345 = vector.broadcast %344 : vector<1x32xf32> to vector<16x32xf32>
    %346 = arith.addf %343, %345 : vector<16x32xf32>
    %347 = arith.addf %298, %346 : vector<16x32xf32>
    %348 = vector.extract_strided_slice %218 {offsets = [2, 64], sizes = [1, 32], strides = [1, 1]} : vector<4x128xf32> to vector<1x32xf32>
    %349 = vector.extract_strided_slice %218 {offsets = [2, 96], sizes = [1, 32], strides = [1, 1]} : vector<4x128xf32> to vector<1x32xf32>
    %cst_105 = arith.constant dense<0.000000e+00> : vector<16xf32>
    %350 = vector.multi_reduction <add>, %347, %cst_105 [1] : vector<16x32xf32> to vector<16xf32>
    %351 = vector.shape_cast %350 : vector<16xf32> to vector<16x1xf32>
    %cst_106 = arith.constant 3.200000e+01 : f32
    %352 = vector.broadcast %cst_106 : f32 to vector<16x1xf32>
    %353 = arith.divf %351, %352 : vector<16x1xf32>
    %354 = vector.broadcast %353 : vector<16x1xf32> to vector<16x32xf32>
    %355 = arith.subf %347, %354 : vector<16x32xf32>
    %356 = arith.mulf %355, %355 : vector<16x32xf32>
    %cst_107 = arith.constant dense<0.000000e+00> : vector<16xf32>
    %357 = vector.multi_reduction <add>, %356, %cst_107 [1] : vector<16x32xf32> to vector<16xf32>
    %358 = vector.shape_cast %357 : vector<16xf32> to vector<16x1xf32>
    %cst_108 = arith.constant 3.200000e+01 : f32
    %359 = vector.broadcast %cst_108 : f32 to vector<16x1xf32>
    %360 = arith.divf %358, %359 : vector<16x1xf32>
    %361 = vector.broadcast %353 : vector<16x1xf32> to vector<16x32xf32>
    %362 = arith.subf %347, %361 : vector<16x32xf32>
    %cst_109 = arith.constant 9.99999974E-6 : f32
    %363 = vector.broadcast %cst_109 : f32 to vector<16x1xf32>
    %364 = arith.addf %360, %363 : vector<16x1xf32>
    %365 = math.rsqrt %364 : vector<16x1xf32>
    %366 = vector.broadcast %365 : vector<16x1xf32> to vector<16x32xf32>
    %367 = arith.mulf %362, %366 : vector<16x32xf32>
    %368 = vector.broadcast %348 : vector<1x32xf32> to vector<16x32xf32>
    %369 = arith.mulf %367, %368 : vector<16x32xf32>
    %370 = vector.broadcast %349 : vector<1x32xf32> to vector<16x32xf32>
    %371 = arith.addf %369, %370 : vector<16x32xf32>
    %372 = vector.extract_strided_slice %214 {offsets = [0, 64], sizes = [32, 64], strides = [1, 1]} : vector<32x128xf32> to vector<32x64xf32>
    %cst_110 = arith.constant dense<0.000000e+00> : vector<16x64xf32>
    %373 = tpu.matmul %371, %372, %cst_110 {dimension_numbers = #tpu.dot_dimension_numbers<[1], [0], [0], [1], [0, 0, 1, 1], [], []>} : vector<16x32xf32>, vector<32x64xf32>, vector<16x64xf32> -> vector<16x64xf32>
    %374 = vector.extract_strided_slice %218 {offsets = [1, 64], sizes = [1, 64], strides = [1, 1]} : vector<4x128xf32> to vector<1x64xf32>
    %375 = vector.broadcast %374 : vector<1x64xf32> to vector<16x64xf32>
    %376 = arith.addf %373, %375 : vector<16x64xf32>
    %cst_111 = arith.constant 0.000000e+00 : f32
    %377 = vector.broadcast %cst_111 : f32 to vector<16x64xf32>
    %378 = arith.maximumf %376, %377 : vector<16x64xf32>
    %cst_112 = arith.constant dense<0.000000e+00> : vector<16x32xf32>
    %379 = tpu.matmul %378, %216, %cst_112 {dimension_numbers = #tpu.dot_dimension_numbers<[1], [0], [0], [1], [0, 0, 1, 1], [], []>} : vector<16x64xf32>, vector<64x32xf32>, vector<16x32xf32> -> vector<16x32xf32>
    %380 = vector.extract_strided_slice %218 {offsets = [3, 64], sizes = [1, 32], strides = [1, 1]} : vector<4x128xf32> to vector<1x32xf32>
    %381 = vector.broadcast %380 : vector<1x32xf32> to vector<16x32xf32>
    %382 = arith.addf %379, %381 : vector<16x32xf32>
    %383 = arith.addf %371, %382 : vector<16x32xf32>
    %384 = vector.extract_strided_slice %218 {offsets = [3, 0], sizes = [1, 32], strides = [1, 1]} : vector<4x128xf32> to vector<1x32xf32>
    %385 = vector.extract_strided_slice %218 {offsets = [3, 32], sizes = [1, 32], strides = [1, 1]} : vector<4x128xf32> to vector<1x32xf32>
    %cst_113 = arith.constant dense<0.000000e+00> : vector<16xf32>
    %386 = vector.multi_reduction <add>, %383, %cst_113 [1] : vector<16x32xf32> to vector<16xf32>
    %387 = vector.shape_cast %386 : vector<16xf32> to vector<16x1xf32>
    %cst_114 = arith.constant 3.200000e+01 : f32
    %388 = vector.broadcast %cst_114 : f32 to vector<16x1xf32>
    %389 = arith.divf %387, %388 : vector<16x1xf32>
    %390 = vector.broadcast %389 : vector<16x1xf32> to vector<16x32xf32>
    %391 = arith.subf %383, %390 : vector<16x32xf32>
    %392 = arith.mulf %391, %391 : vector<16x32xf32>
    %cst_115 = arith.constant dense<0.000000e+00> : vector<16xf32>
    %393 = vector.multi_reduction <add>, %392, %cst_115 [1] : vector<16x32xf32> to vector<16xf32>
    %394 = vector.shape_cast %393 : vector<16xf32> to vector<16x1xf32>
    %cst_116 = arith.constant 3.200000e+01 : f32
    %395 = vector.broadcast %cst_116 : f32 to vector<16x1xf32>
    %396 = arith.divf %394, %395 : vector<16x1xf32>
    %397 = vector.broadcast %389 : vector<16x1xf32> to vector<16x32xf32>
    %398 = arith.subf %383, %397 : vector<16x32xf32>
    %cst_117 = arith.constant 9.99999974E-6 : f32
    %399 = vector.broadcast %cst_117 : f32 to vector<16x1xf32>
    %400 = arith.addf %396, %399 : vector<16x1xf32>
    %401 = math.rsqrt %400 : vector<16x1xf32>
    %402 = vector.broadcast %401 : vector<16x1xf32> to vector<16x32xf32>
    %403 = arith.mulf %398, %402 : vector<16x32xf32>
    %404 = vector.broadcast %384 : vector<1x32xf32> to vector<16x32xf32>
    %405 = arith.mulf %403, %404 : vector<16x32xf32>
    %406 = vector.broadcast %385 : vector<1x32xf32> to vector<16x32xf32>
    %407 = arith.addf %405, %406 : vector<16x32xf32>
    %c0_118 = arith.constant 0 : index
    %c0_119 = arith.constant 0 : index
    %408 = vector.load %arg9[%c0_118, %c0_119] : memref<16x32xf32, #tpu.memory_space<vmem>>, vector<16x32xf32>
    tpu.vector_store %arg9[%c0_118, %c0_119], %407 {strides = array<i32>} : memref<16x32xf32, #tpu.memory_space<vmem>>, vector<16x32xf32>,
    return
  }
}

</mosaic_0001>

<bundles_post_ra>
// kernel: tpu_custom_call.1
= control target key start
LH: loop header
LB: loop body
LE: loop exit
PB: predicated region body
PF: predicated region fallthrough
CT: control target
= control target key end

     0   :  { %vm61_vm0 = vcmask 261120   ;;  %s18164_s0 = inlined_call_operand.vmem [shape: f32[16,32], index: 0, kind: input, shape index: {}]   ;;  %s18165_s1 = inlined_call_operand.vmem [shape: f32[16,32], index: 1, kind: input, shape index: {}]   ;;  %s18166_s2 = inlined_call_operand.vmem [shape: f32[40,32], index: 2, kind: input, shape index: {}]   ;;  %s18167_s3 = inlined_call_operand.vmem [shape: f32[40,32], index: 3, kind: input, shape index: {}]   ;;  %s18168_s4 = inlined_call_operand.vmem [shape: f32[2,32,128], index: 4, kind: input, shape index: {}]   ;;  %s18169_s5 = inlined_call_operand.vmem [shape: f32[2,32,128], index: 5, kind: input, shape index: {}]   ;;  %s18170_s6 = inlined_call_operand.vmem [shape: f32[33,128], index: 6, kind: input, shape index: {}]   ;;  %s18171_s7 = inlined_call_operand.vmem [shape: f32[2,64,32], index: 7, kind: input, shape index: {}]   ;;  %s18172_s8 = inlined_call_operand.vmem [shape: f32[2,4,128], index: 8, kind: input, shape index: {}]   ;;  %s18173_s9 = inlined_call_operand.hbm [shape: f32[16,32], index: 9, kind: output, shape index: {}]  }
   0x1   :  { %v52_v0 = vld [vmem:[%s18170_s6] sm:$0xff]  ;;  %v53_v1 = vld [vmem:[%s18170_s6 + $0x8] sm:$0xff]  ;;  %v54_v2 = vld [vmem:[%s18170_s6 + $0x10] sm:$0xff] }
   0x2   :  { %v14996_v3 = vpack.c.bf16 %v53_v1, %v52_v0  ;;  %v55_v4 = vld [vmem:[%s18170_s6 + $0x18] sm:$0xff]  ;;  %v15640_v5 = vld [vmem:[%s18166_s2 + $0x8] sm:$0xff]  ;;  %v3162_v7 = vld [vmem:[%s18168_s4] sm:$0xff] }
   0x3   :  { %v15000_v6 = vpack.c.bf16 %v55_v4, %v54_v2  ;;  %14372 = vmatprep.mubr.msk.f32.mxu1 %vm61_vm0, %v15640_v5  ;;  %v3163_v8 = vld [vmem:[%s18168_s4 + $0x8] sm:$0xff]  ;;  %v15653_v10 = vld [vmem:[%s18168_s4 + $0x10] sm:$0xff]  ;;  %v15658_v11 = vld [vmem:[%s18168_s4 + $0x18] sm:$0xff] }
   0x4   :  { %15244 = vmatprep.subr.bf16.mxu1 %v14996_v3  ;;  %14997 = vmatprep.subr.bf16.mxu0 %v14996_v3  ;;  %v15004_v9 = vpack.c.bf16 %v3163_v8, %v3162_v7 }
   0x5   :  { %15246 = vmatpush3.bf16.msra.mxu1 %v14996_v3  ;;  %14999 = vmatpush3.bf16.msra.mxu0 %v14996_v3 }
   0x6   :  { %15245 = vmatprep.subr.bf16.mxu1 %v15000_v6  ;;  %15001 = vmatprep.subr.bf16.mxu0 %v15000_v6 }
   0x7   :  { %14 = vsyncpa [#allocation3], 0  ;;  %v39_v12 = vld [vmem:[%s18166_s2 + $0x10] sm:$0xff]  ;;  %v40_v13 = vld [vmem:[%s18166_s2 + $0x18] sm:$0xff]  ;;  %v15008_v14 = vpack.c.bf16 %v15658_v11, %v15653_v10  ;;  %v15270_v22 = vpack.i.bf16 %v3163_v8, %v3162_v7  ;;  %s15553_s20 = smov 64   ;;  %v447_v23 = vlaneseq  ;;  %s15554_s27 = smov 80   ;;  %v15275_v50 = vpack.i.bf16 %v15658_v11, %v15653_v10 }
   0x8   :  { %v33_v15 = vld [vmem:[%s18164_s0] sm:$0xff]  ;;  %v15682_v19 = vld [vmem:[%s18164_s0 + $0x8] sm:$0xff]  ;;  %v44_v40 = vld [vmem:[%s18167_s3 + $0x10] sm:$0xff]  ;;  %s15555_s28 = smov 96   ;;  %s15556_s16 = smov 72   ;;  %v15560_v51 = vmov 0.0  }
   0x9   :  { %15247 = vmatpush3.bf16.msra.mxu1 %v15000_v6  ;;  %15003 = vmatpush3.bf16.msra.mxu0 %v15000_v6  ;;  %v35_v16 = vld [vmem:[%s18165_s1] sm:$0xff]  ;;  %v36_v20 = vld [vmem:[%s18165_s1 + $0x8] sm:$0xff]  ;;  %v15693_v28 = vshrl.u32 %v447_v23, 7  ;;  %v49_v44 = vadd.f32 %v44_v40, %v39_v12  ;;  %v45_v45 = vld [vmem:[%s18167_s3 + $0x18] sm:$0xff]  ;;  %s15557_s17 = smov 88   ;;  %s15561_s18 = smov 104  }
   0xa   :  { %15005 = vmatprep.subr.bf16.mxu1 %v15004_v9  ;;  %v41_v17 = vld [vmem:[%s18166_s2 + $0x20] sm:$0xff]  ;;  %v3179_v18 = vadd.f32 %v35_v16, %v33_v15  ;;  %v3180_v21 = vadd.f32 %v36_v20, %v15682_v19  ;;  %15271 = vrot.lane.b32.xlu0 %v15270_v22, %s15553_s20  ;;  %v43_v39 = vld [vmem:[%s18167_s3 + $0x8] sm:$0xff]  ;;  %v50_v48 = vadd.f32 %v45_v45, %v40_v13  ;;  %vm15562_vm1 = vmmov 0   ;;  %s15565_s24 = smov 32   ;;  %s15566_s25 = smov 8  }
   0xb   :  { %v3183_v31 = vsub.s32 0, %v15693_v28  ;;  %v3178_v32 = vld [vmem:[%s18172_s8] sm:$0xf]  ;;  %v48_v41 = vadd.f32 %v43_v39, %v15640_v5  ;;  %14410 = vmatprep.subr.mxu0 %v15560_v51  ;;  %v15563_v52 = vmov 1983009808   ;;  %vm4247_vm2 = vcmask 64512  }
   0xc   :  { %14373 = vmatmul.mubr.msk.f32.vlgmr.msra.gmra.mrb[0].mxu1 %vm61_vm0, %v39_v12  ;;  %v37_v42 = vld [vmem:[%s18166_s2] sm:$0xff]  ;;  %s15558_s2 = smov 120   ;;  %v445_v53 = vunpack.c.l.s4 %v15563_v52  ;;  %v15564_v54 = vmov 1934713408   ;;  %s15567_s26 = smov 16   ;;  %vm5834_vm3 = vcmask 130048   ;;  %vm16321_vm5 = vmpackc.low %vm4247_vm2, %vm4247_vm2 }
   0xd   :  { %15007 = vmatpush3.bf16.msra.mxu1 %v15004_v9  ;;  %14375 = vmatprep.mubr.msk.f32.mxu1 %vm61_vm0, %v40_v13  ;;  %v15709_v35 = vrot.slane %v3178_v32, %v3183_v31  ;;  %v42_v43 = vld [vmem:[%s18167_s3] sm:$0xff]  ;;  %v509_v55 = vunpack.c.l.s4 %v15564_v54  ;;  %s15568_s29 = smov 24   ;;  %vm5837_vm4 = vcmask 195584   ;;  %s15570_s30 = smov 56   ;;  %vm6688_vm6 = vcmask 162816  }
   0xe   :  { %15009 = vmatprep.subr.bf16.mxu1 %v15008_v14  ;;  %v47_v46 = vadd.f32 %v42_v43, %v37_v42  ;;  %v46_v47 = vld [vmem:[%s18167_s3 + $0x20] sm:$0xff]  ;;  %s15559_s3 = smov 112   ;;  %v446_v56 = vunpack.c.0.s8 %v445_v53  ;;  %s15571_s10 = smov 48   ;;  %vm6736_vm7 = vcmask 1043456   ;;  %vm8313_vm8 = vcmask 523264  }
   0xf   :  { %v51_v49 = vadd.f32 %v46_v47, %v41_v17  ;;  %v510_v59 = vunpack.c.0.s8 %v509_v55  ;;  %s15572_s11 = smov 40  }
  0x10   :  { %14376 = vmatmul.mubr.msk.f32.gmra.mrb[2].mxu1 %vm61_vm0, %v41_v17  ;;  %14363 = vmatprep.mubr.msk.f32.mxu0 %vm61_vm0, %v47_v46  ;;  %v15762_v60 = vsub.s32 %v446_v56, %v15693_v28 }
  0x11   :  { %15011 = vmatpush3.bf16.msra.mxu1 %v15008_v14  ;;  %14386 = vmatprep.mubr.msk.f32.mxu1 %vm61_vm0, %v3179_v18  ;;  %v15765_v3 = vsub.s32 %v510_v59, %v15693_v28 }
  0x12   :  { %14364 = vmatmul.mubr.msk.f32.vlgmr.msra.gmra.mrb[0].mxu0 %vm61_vm0, %v48_v41 }
  0x13   :  { %14366 = vmatprep.mubr.msk.f32.mxu0 %vm61_vm0, %v49_v44 }
  0x14   :  { %14387 = vmatmul.mubr.msk.f32.vlgmr.msra.gmra.mrb[4].mxu1 %vm61_vm0, %v3180_v21 }
  0x15   :  { %14397 = vmatprep.mubr.msk.f32.mxu1 %vm61_vm0, %v33_v15 }
  0x16   :  { %14367 = vmatmul.mubr.msk.f32.gmra.mrb[2].mxu0 %vm61_vm0, %v50_v48 }
  0x17   :  { %14369 = vmatprep.mubr.msk.f32.mxu0 %vm61_vm0, %v51_v49 }
  0x1a   :  { %14370 = vmatmul.mubr.msk.f32.gmra.mrb[4].mxu0 %vm61_vm0, %v37_v42 }
  0x1b   :  { %14412 = vmatprep.mubr.msk.f32.mxu0 %vm15562_vm1, %v15560_v51 }
  0x7c   :  { %v15272_v24 = vpop.permute.xlu0 %15271 }
  0x7d   :  { %v15274_v25 = vunpack.i.h.bf16 %v15272_v24  ;;  %v15273_v26 = vunpack.i.l.bf16 %v15272_v24 }
  0x7f   :  { %v15012_v27 = vpack.c.bf16 %v15274_v25, %v15273_v26 }
  0x81   :  { %15013 = vmatprep.subr.bf16.mxu1 %v15012_v27 }
  0x82   :  { %15015 = vmatpush3.bf16.msra.mxu1 %v15012_v27 }
  0xdf   :  { %v15695_v29 = vpop.f32.mrb[0].mxu1 }
  0xe0   :  { %v15697_v30 = vpop.f32.mrb[1].mxu1 }
  0xe3   :  { %v15703_v33 = vpop.f32.mrb[2].mxu1 }
  0xe4   :  { %v15705_v34 = vpop.f32.mrb[3].mxu1 }
  0xe7   :  { %v15711_v36 = vpop.f32.mrb[4].mxu1 }
  0xe8   :  { %v3257_v37 = vpop.f32.mrb[5].mxu1 }
  0xe9   :  { %v15714_v38 = vadd.f32 %v3257_v37, %v15709_v35 }
  0xeb   :  { %3399 = vrot.lane.b32.xlu1 %v15714_v38, %s15554_s27  ;;  %3387 = vrot.lane.b32.xlu0 %v15714_v38, %s15555_s28 }
  0xef   :  { %3405 = vrot.lane.b32.xlu1 %v15714_v38, %s15556_s16  ;;  %3393 = vrot.lane.b32.xlu0 %v15714_v38, %s15557_s17 }
  0xf3   :  { %3369 = vrot.lane.b32.xlu1 %v15714_v38, %s15558_s2  ;;  %3375 = vrot.lane.b32.xlu0 %v15714_v38, %s15559_s3 }
  0xf7   :  { %3381 = vrot.lane.b32.xlu1 %v15714_v38, %s15561_s18  ;;  %15276 = vrot.lane.b32.xlu0 %v15275_v50, %s15553_s20 }
 0x15d   :  { %v3400_v57 = vpop.permute.xlu1 %3399  ;;  %v3388_v58 = vpop.permute.xlu0 %3387 }
 0x15e   :  { %v3443_v61 = vcombine.low %v3388_v58, %v3400_v57  ;;  %v3444_v62 = vcombine.high %v3388_v58, %v3400_v57 }
 0x160   :  { %v3451_v4 = vrot.slane %v3443_v61, %v15762_v60  ;;  %v3458_v5 = vrot.slane %v3444_v62, %v15762_v60 }
 0x161   :  { %v3406_v63 = vpop.permute.xlu1 %3405  ;;  %v3394_v0 = vpop.permute.xlu0 %3393 }
 0x162   :  { %v3459_v1 = vcombine.low %v3394_v0, %v3406_v63  ;;  %v3460_v2 = vcombine.high %v3394_v0, %v3406_v63 }
 0x164   :  { %v3467_v6 = vrot.slane %v3459_v1, %v15762_v60  ;;  %v3474_v7 = vrot.slane %v3460_v2, %v15762_v60 }
 0x165   :  { %v3370_v8 = vpop.permute.xlu1 %3369  ;;  %v3376_v9 = vpop.permute.xlu0 %3375 }
 0x166   :  { %v3507_v10 = vcombine.low %v3451_v4, %v3467_v6  ;;  %v3508_v11 = vcombine.high %v3451_v4, %v3467_v6  ;;  %v3523_v12 = vcombine.low %v3458_v5, %v3474_v7  ;;  %v3524_v13 = vcombine.high %v3458_v5, %v3474_v7 }
 0x167   :  { %v3411_v14 = vcombine.low %v15714_v38, %v3376_v9  ;;  %v3412_v20 = vcombine.high %v15714_v38, %v3376_v9 }
 0x168   :  { %v3515_v15 = vrot.slane %v3507_v10, %v15765_v3  ;;  %v3522_v16 = vrot.slane %v3508_v11, %v15765_v3  ;;  %v3531_v17 = vrot.slane %v3523_v12, %v15765_v3  ;;  %v3538_v18 = vrot.slane %v3524_v13, %v15765_v3 }
 0x169   :  { %v3419_v21 = vrot.slane %v3411_v14, %v15762_v60  ;;  %v3382_v22 = vpop.permute.xlu1 %3381  ;;  %v15277_v23 = vpop.permute.xlu0 %15276  ;;  %v3426_v44 = vrot.slane %v3412_v20, %v15762_v60 }
 0x16a   :  { %v13809_v24 = vcombine.low %v3515_v15, %v3522_v16  ;;  %v13811_v25 = vcombine.high %v3515_v15, %v3522_v16  ;;  %v13813_v26 = vcombine.low %v3531_v17, %v3538_v18  ;;  %v13815_v27 = vcombine.high %v3531_v17, %v3538_v18 }
 0x16b   :  { %v3427_v32 = vcombine.low %v3370_v8, %v3382_v22  ;;  %v3428_v37 = vcombine.high %v3370_v8, %v3382_v22  ;;  %v15279_v39 = vunpack.i.h.bf16 %v15277_v23  ;;  %v15278_v40 = vunpack.i.l.bf16 %v15277_v23 }
 0x16c   :  { %v3698_v41 = vrot.slane %v13809_v24, %v15762_v60  ;;  %v3714_v42 = vrot.slane %v13811_v25, %v15762_v60  ;;  %v3730_v43 = vrot.slane %v13813_v26, %v15762_v60  ;;  %v3746_v38 = vrot.slane %v13815_v27, %v15762_v60  ;;  %v15826_v27 = vpop.f32.mrb[0].mxu0 }
 0x16d   :  { %v3435_v45 = vrot.slane %v3427_v32, %v15762_v60  ;;  %v3442_v46 = vrot.slane %v3428_v37, %v15762_v60  ;;  %v15016_v47 = vpack.c.bf16 %v15279_v39, %v15278_v40  ;;  %v15828_v32 = vpop.f32.mrb[1].mxu0 }
 0x16e   :  { %v3763_v48 = vcombine.low %v3698_v41, %v3714_v42  ;;  %v3764_v49 = vcombine.high %v3698_v41, %v3714_v42  ;;  %v3795_v50 = vcombine.low %v3730_v43, %v3746_v38  ;;  %v3796_v52 = vcombine.high %v3730_v43, %v3746_v38  ;;  %v15830_v37 = vpop.f32.mrb[2].mxu0 }
 0x16f   :  { %v3475_v53 = vcombine.low %v3419_v21, %v3435_v45  ;;  %v3476_v54 = vcombine.high %v3419_v21, %v3435_v45  ;;  %v3491_v55 = vcombine.low %v3426_v44, %v3442_v46  ;;  %v3492_v56 = vcombine.high %v3426_v44, %v3442_v46  ;;  %15017 = vmatprep.subr.bf16.mxu1 %v15016_v47  ;;  %v15832_v39 = vpop.f32.mrb[3].mxu0 }
 0x170   :  { %15019 = vmatpush3.bf16.msra.mxu1 %v15016_v47  ;;  %v3778_v57 = vrot.slane %v3764_v49, %v15765_v3  ;;  %v3810_v58 = vrot.slane %v3796_v52, %v15765_v3  ;;  %v3771_v1 = vrot.slane %v3763_v48, %v15765_v3  ;;  %v3803_v2 = vrot.slane %v3795_v50, %v15765_v3  ;;  %v15834_v40 = vpop.f32.mrb[4].mxu0 }
 0x171   :  { %v3483_v59 = vrot.slane %v3475_v53, %v15765_v3  ;;  %v3490_v61 = vrot.slane %v3476_v54, %v15765_v3  ;;  %v3499_v62 = vrot.slane %v3491_v55, %v15765_v3  ;;  %v3506_v63 = vrot.slane %v3492_v56, %v15765_v3  ;;  %14400 = vmatprep.subr.mxu1 %v15560_v51  ;;  %v15836_v41 = vpop.f32.mrb[5].mxu0 }
 0x172   :  { %v3817_v0 = vcombine.low %v3778_v57, %v3810_v58  ;;  %v3815_v12 = vcombine.low %v3771_v1, %v3803_v2  ;;  %v3816_v23 = vcombine.high %v3771_v1, %v3803_v2  ;;  %v3818_v25 = vcombine.high %v3778_v57, %v3810_v58 }
 0x173   :  { %v13808_v4 = vcombine.low %v3483_v59, %v3490_v61  ;;  %v13810_v5 = vcombine.high %v3483_v59, %v3490_v61  ;;  %v13812_v6 = vcombine.low %v3499_v62, %v3506_v63  ;;  %v13814_v7 = vcombine.high %v3499_v62, %v3506_v63  ;;  %14398 = vmatmul.mubr.msk.f32.vlgmr.msra.gmra.mrb[6].mxu1 %vm61_vm0, %v15682_v19 }
 0x174   :  { %14411 = vmatpush3.xpose.msk.msra.mxu0 %vm4247_vm2, %v3817_v0  ;;  %14402 = vmatprep.mubr.msk.f32.mxu1 %vm15562_vm1, %v15560_v51  ;;  %v15852_v63 = vadd.f32 %v15711_v36, %v15709_v35 }
 0x175   :  { %v3691_v8 = vrot.slane %v13808_v4, %v15762_v60  ;;  %v3707_v9 = vrot.slane %v13810_v5, %v15762_v60  ;;  %v3723_v10 = vrot.slane %v13812_v6, %v15762_v60  ;;  %v3739_v11 = vrot.slane %v13814_v7, %v15762_v60  ;;  %14420 = vmatprep.subr.mxu0 %v15560_v51 }
 0x177   :  { %v3747_v13 = vcombine.low %v3691_v8, %v3707_v9  ;;  %v3748_v14 = vcombine.high %v3691_v8, %v3707_v9  ;;  %v3779_v15 = vcombine.low %v3723_v10, %v3739_v11  ;;  %v3780_v19 = vcombine.high %v3723_v10, %v3739_v11 }
 0x179   :  { %v3762_v16 = vrot.slane %v3748_v14, %v15765_v3  ;;  %v3794_v17 = vrot.slane %v3780_v19, %v15765_v3  ;;  %14401 = vmatpush3.xpose.msk.msra.mxu1 %vm4247_vm2, %v3815_v12  ;;  %v3755_v18 = vrot.slane %v3747_v13, %v15765_v3  ;;  %v3787_v20 = vrot.slane %v3779_v15, %v15765_v3 }
 0x17a   :  { %14405 = vmatprep.subr.mxu1 %v15560_v51 }
 0x17b   :  { %v3811_v21 = vcombine.low %v3755_v18, %v3787_v20  ;;  %v3813_v22 = vcombine.low %v3762_v16, %v3794_v17  ;;  %v3812_v24 = vcombine.high %v3755_v18, %v3787_v20  ;;  %v3814_v26 = vcombine.high %v3762_v16, %v3794_v17 }
 0x17d   :  { %14403 = vmatmul.mubr.msk.f32.vlgmr.msra.gmra.mrb[8].mxu1 %vm4247_vm2, %v3811_v21  ;;  %14413 = vmatmul.mubr.msk.f32.vlgmr.msra.gmra.mrb[6].mxu0 %vm4247_vm2, %v3813_v22 }
 0x17e   :  { %14406 = vmatpush3.xpose.msk.msra.mxu1 %vm4247_vm2, %v3816_v23  ;;  %14407 = vmatprep.mubr.msk.f32.mxu1 %vm15562_vm1, %v15560_v51 }
 0x17f   :  { %14415 = vmatprep.subr.mxu1 %v15560_v51  ;;  %14422 = vmatprep.mubr.msk.f32.mxu0 %vm15562_vm1, %v15560_v51 }
 0x181   :  { %14408 = vmatmul.mubr.msk.f32.vlgmr.msra.gmra.mrb[10].mxu1 %vm4247_vm2, %v3812_v24 }
 0x182   :  { %14416 = vmatpush3.xpose.msk.msra.mxu1 %vm4247_vm2, %v3818_v25  ;;  %14417 = vmatprep.mubr.msk.f32.mxu1 %vm15562_vm1, %v15560_v51 }
 0x183   :  { %14425 = vmatprep.subr.mxu1 %v15560_v51 }
 0x185   :  { %14418 = vmatmul.mubr.msk.f32.vlgmr.msra.gmra.mrb[12].mxu1 %vm4247_vm2, %v3814_v26 }
 0x186   :  { %14427 = vmatprep.mubr.msk.f32.mxu1 %vm15562_vm1, %v15560_v51 }
 0x246   :  { %v15838_v42 = vpop.f32.mrb[6].mxu1 }
 0x247   :  { %v3358_v43 = vpop.f32.mrb[7].mxu1 }
 0x250   :  { %v4320_v38 = vpop.f32.mrb[8].mxu1  ;;  %v4472_v44 = vpop.f32.mrb[6].mxu0 }
 0x251   :  { %v4552_v45 = vmul.f32 0.35355338, %v4320_v38  ;;  %v14404_v46 = vpop.f32.mrb[9].mxu1  ;;  %v14414_v47 = vpop.f32.mrb[7].mxu0  ;;  %v4554_v53 = vmul.f32 0.35355338, %v4472_v44 }
 0x253   :  { %v4556_v48 = vsel %vm4247_vm2, %v4552_v45, -inf  ;;  %v4562_v57 = vsel %vm4247_vm2, %v4554_v53, -inf }
 0x254   :  { %4557 = vmax.xlane.f32.xlu1 %v4556_v48  ;;  %v4396_v49 = vpop.f32.mrb[10].mxu1 }
 0x255   :  { %v4553_v50 = vmul.f32 0.35355338, %v4396_v49  ;;  %v14409_v52 = vpop.f32.mrb[11].mxu1 }
 0x257   :  { %v4559_v54 = vsel %vm4247_vm2, %v4553_v50, -inf }
 0x258   :  { %4560 = vmax.xlane.f32.xlu0 %v4559_v54  ;;  %v4548_v55 = vpop.f32.mrb[12].mxu1 }
 0x259   :  { %v14419_v56 = vpop.f32.mrb[13].mxu1  ;;  %v15865_v0 = vmul.f32 0.35355338, %v4548_v55 }
 0x25b   :  { %v4565_v36 = vsel %vm4247_vm2, %v15865_v0, -inf }
 0x25c   :  { %4563 = vmax.xlane.f32.xlu0 %v4562_v57 }
 0x272   :  { %3283 = vrot.lane.b32.xlu0 %v15709_v35, %s15553_s20 }
 0x2e1   :  { %v4558_v1 = vpop.xlane.xlu1 %4557 }
 0x2e2   :  { %v4568_v2 = vsub.f32 %v4552_v45, %v4558_v1 }
 0x2e4   :  { %v4572_v4 = vmul.f32 1.442695, %v4568_v2 }
 0x2e5   :  { %v4561_v58 = vpop.xlane.xlu0 %4560 }
 0x2e6   :  { %15350 = vpow2.f32 %v4572_v4  ;;  %v4569_v6 = vsub.f32 %v4553_v50, %v4561_v58 }
 0x2e8   :  { %v4574_v8 = vmul.f32 1.442695, %v4569_v6 }
 0x2e9   :  { %v4564_v59 = vpop.xlane.xlu0 %4563 }
 0x2ea   :  { %v4570_v5 = vsub.f32 %v4554_v53, %v4564_v59 }
 0x2ec   :  { %v4576_v7 = vmul.f32 1.442695, %v4570_v5 }
 0x2ed   :  { %v15845_v61 = vpop.permute.xlu0 %3283 }
 0x2ee   :  { %v3359_v62 = vadd.f32 %v3358_v43, %v15845_v61  ;;  %15352 = vpow2.f32 %v4576_v7 }
 0x2ef   :  { %15354 = vpow2.f32 %v4574_v8 }
 0x2f0   :  { %3963 = vrot.lane.b32.xlu0 %v3359_v62, %s15559_s3  ;;  %3957 = vrot.lane.b32.xlu1 %v3359_v62, %s15558_s2  ;;  %v15871_v9 = vpop.eup %15350 }
 0x2f1   :  { %v4580_v10 = vsel %vm4247_vm2, %v15871_v9, 0.0 }
 0x2f4   :  { %3969 = vrot.lane.b32.xlu0 %v3359_v62, %s15561_s18  ;;  %3401 = vrot.lane.b32.xlu1 %v15852_v63, %s15554_s27 }
 0x2f8   :  { %3389 = vrot.lane.b32.xlu0 %v15852_v63, %s15555_s28  ;;  %v15875_v11 = vpop.eup %15352 }
 0x2f9   :  { %v4586_v12 = vsel %vm4247_vm2, %v15875_v11, 0.0  ;;  %v15879_v13 = vpop.eup %15354 }
 0x2fa   :  { %v4583_v14 = vsel %vm4247_vm2, %v15879_v13, 0.0 }
 0x2fc   :  { %3395 = vrot.lane.b32.xlu0 %v15852_v63, %s15557_s17 }
 0x300   :  { %3407 = vrot.lane.b32.xlu0 %v15852_v63, %s15556_s16 }
 0x304   :  { %3377 = vrot.lane.b32.xlu0 %v15852_v63, %s15559_s3 }
 0x318   :  { %4566 = vmax.xlane.f32.xlu1 %v4565_v36 }
 0x329   :  { %3371 = vrot.lane.b32.xlu1 %v15852_v63, %s15558_s2 }
 0x34d   :  { %4581 = vadd.xlane.f32.xlu1 %v4580_v10 }
 0x351   :  { %4587 = vadd.xlane.f32.xlu1 %v4586_v12 }
 0x355   :  { %4584 = vadd.xlane.f32.xlu1 %v4583_v14 }
 0x362   :  { %v3964_v15 = vpop.permute.xlu0 %3963  ;;  %v3958_v17 = vpop.permute.xlu1 %3957 }
 0x363   :  { %v3975_v19 = vcombine.low %v3359_v62, %v3964_v15  ;;  %v3976_v16 = vcombine.high %v3359_v62, %v3964_v15 }
 0x365   :  { %v3983_v22 = vrot.slane %v3975_v19, %v15762_v60  ;;  %v3990_v23 = vrot.slane %v3976_v16, %v15762_v60 }
 0x366   :  { %v3970_v18 = vpop.permute.xlu0 %3969  ;;  %v3402_v56 = vpop.permute.xlu1 %3401 }
 0x367   :  { %v3991_v20 = vcombine.low %v3958_v17, %v3970_v18  ;;  %v3992_v21 = vcombine.high %v3958_v17, %v3970_v18 }
 0x369   :  { %v3999_v24 = vrot.slane %v3991_v20, %v15762_v60  ;;  %v4006_v25 = vrot.slane %v3992_v21, %v15762_v60 }
 0x36a   :  { %v3390_v26 = vpop.permute.xlu0 %3389 }
 0x36b   :  { %v4007_v43 = vcombine.low %v3983_v22, %v3999_v24  ;;  %v4008_v38 = vcombine.high %v3983_v22, %v3999_v24  ;;  %v4023_v44 = vcombine.low %v3990_v23, %v4006_v25  ;;  %v4024_v45 = vcombine.high %v3990_v23, %v4006_v25 }
 0x36c   :  { %v3579_v57 = vcombine.low %v3390_v26, %v3402_v56  ;;  %v3580_v58 = vcombine.high %v3390_v26, %v3402_v56 }
 0x36d   :  { %v4015_v46 = vrot.slane %v4007_v43, %v15765_v3  ;;  %v4022_v47 = vrot.slane %v4008_v38, %v15765_v3  ;;  %v4031_v48 = vrot.slane %v4023_v44, %v15765_v3  ;;  %v4038_v49 = vrot.slane %v4024_v45, %v15765_v3 }
 0x36e   :  { %v3396_v50 = vpop.permute.xlu0 %3395  ;;  %v3587_v8 = vrot.slane %v3579_v57, %v15762_v60  ;;  %v3594_v10 = vrot.slane %v3580_v58, %v15762_v60 }
 0x36f   :  { %v4111_v52 = vcombine.low %v4015_v46, %v4022_v47  ;;  %v13824_v53 = vcombine.high %v4015_v46, %v4022_v47  ;;  %v4127_v54 = vcombine.low %v4031_v48, %v4038_v49  ;;  %v13825_v55 = vcombine.high %v4031_v48, %v4038_v49 }
 0x371   :  { %v4118_v59 = vrot.slane %v4111_v52, %v15762_v60  ;;  %v4126_v62 = vrot.slane %v13824_v53, %v15762_v60  ;;  %v4134_v36 = vrot.slane %v4127_v54, %v15762_v60  ;;  %v4142_v1 = vrot.slane %v13825_v55, %v15762_v60 }
 0x372   :  { %v3408_v2 = vpop.permute.xlu0 %3407 }
 0x373   :  { %v3595_v4 = vcombine.low %v3396_v50, %v3408_v2  ;;  %v3596_v5 = vcombine.high %v3396_v50, %v3408_v2  ;;  %v4143_v6 = vcombine.low %v4118_v59, %v4126_v62  ;;  %v4159_v7 = vcombine.low %v4134_v36, %v4142_v1 }
 0x374   :  { %v4144_v12 = vcombine.high %v4118_v59, %v4126_v62  ;;  %v4160_v14 = vcombine.high %v4134_v36, %v4142_v1 }
 0x375   :  { %v3603_v15 = vrot.slane %v3595_v4, %v15762_v60  ;;  %v3610_v19 = vrot.slane %v3596_v5, %v15762_v60  ;;  %v4151_v16 = vrot.slane %v4143_v6, %v15765_v3  ;;  %v4167_v17 = vrot.slane %v4159_v7, %v15765_v3 }
 0x376   :  { %v15902_v18 = vrot.slane %v4144_v12, %v15765_v3  ;;  %v15905_v20 = vrot.slane %v4160_v14, %v15765_v3 }
 0x377   :  { %v3643_v21 = vcombine.low %v3587_v8, %v3603_v15  ;;  %v3644_v22 = vcombine.high %v3587_v8, %v3603_v15  ;;  %v3659_v23 = vcombine.low %v3594_v10, %v3610_v19  ;;  %v3660_v24 = vcombine.high %v3594_v10, %v3610_v19 }
 0x378   :  { %v4175_v25 = vcombine.low %v4151_v16, %v4167_v17  ;;  %v4176_v26 = vcombine.high %v4151_v16, %v4167_v17  ;;  %v4177_v46 = vcombine.low %v15902_v18, %v15905_v20  ;;  %v4178_v52 = vcombine.high %v15902_v18, %v15905_v20 }
 0x379   :  { %v3651_v43 = vrot.slane %v3643_v21, %v15765_v3  ;;  %v3658_v38 = vrot.slane %v3644_v22, %v15765_v3  ;;  %v3667_v44 = vrot.slane %v3659_v23, %v15765_v3  ;;  %v3674_v45 = vrot.slane %v3660_v24, %v15765_v3 }
 0x37a   :  { %14421 = vmatpush3.msra.mxu0 %v4175_v25  ;;  %14426 = vmatpush3.msra.mxu1 %v4176_v26 }
 0x37b   :  { %v13817_v47 = vcombine.low %v3651_v43, %v3658_v38  ;;  %v13819_v48 = vcombine.high %v3651_v43, %v3658_v38  ;;  %v13821_v49 = vcombine.low %v3667_v44, %v3674_v45  ;;  %v13823_v50 = vcombine.high %v3667_v44, %v3674_v45  ;;  %14430 = vmatprep.subr.mxu0 %v15560_v51 }
 0x37c   :  { %14435 = vmatprep.subr.mxu1 %v15560_v51 }
 0x37d   :  { %v3834_v53 = vrot.slane %v13817_v47, %v15762_v60  ;;  %v3850_v54 = vrot.slane %v13819_v48, %v15762_v60  ;;  %v3866_v55 = vrot.slane %v13821_v49, %v15762_v60  ;;  %v3882_v56 = vrot.slane %v13823_v50, %v15762_v60 }
 0x37f   :  { %v3899_v57 = vcombine.low %v3834_v53, %v3850_v54  ;;  %v3900_v58 = vcombine.high %v3834_v53, %v3850_v54  ;;  %v3931_v59 = vcombine.low %v3866_v55, %v3882_v56  ;;  %v3932_v62 = vcombine.high %v3866_v55, %v3882_v56 }
 0x381   :  { %v15922_v36 = vrot.slane %v3899_v57, %v15765_v3  ;;  %v15925_v1 = vrot.slane %v3931_v59, %v15765_v3  ;;  %v15928_v2 = vrot.slane %v3900_v58, %v15765_v3  ;;  %v15931_v4 = vrot.slane %v3932_v62, %v15765_v3 }
 0x383   :  { %v3952_v5 = vcombine.high %v15922_v36, %v15925_v1  ;;  %v3953_v6 = vcombine.low %v15928_v2, %v15931_v4  ;;  %v3954_v7 = vcombine.high %v15928_v2, %v15931_v4 }
 0x3a5   :  { %v4567_v8 = vpop.xlane.xlu1 %4566 }
 0x3a6   :  { %v4571_v10 = vsub.f32 %v15865_v0, %v4567_v8 }
 0x3a8   :  { %v4578_v12 = vmul.f32 1.442695, %v4571_v10 }
 0x3a9   :  { %v3372_v19 = vpop.permute.xlu1 %3371 }
 0x3aa   :  { %15356 = vpow2.f32 %v4578_v12 }
 0x3b4   :  { %v15357_v14 = vpop.eup %15356 }
 0x3b5   :  { %v4589_v15 = vsel %vm4247_vm2, %v15357_v14, 0.0 }
 0x3b6   :  { %4590 = vadd.xlane.f32.xlu1 %v4589_v15 }
 0x3c7   :  { %3383 = vrot.lane.b32.xlu1 %v15852_v63, %s15561_s18 }
 0x3da   :  { %v4582_v16 = vpop.xlane.xlu1 %4581 }
 0x3db   :  { %15358 = vrcp.f32 %v4582_v16 }
 0x3de   :  { %v4588_v17 = vpop.xlane.xlu1 %4587 }
 0x3df   :  { %15360 = vrcp.f32 %v4588_v17 }
 0x3e2   :  { %v4585_v18 = vpop.xlane.xlu1 %4584 }
 0x3e3   :  { %15362 = vrcp.f32 %v4585_v18 }
 0x3e5   :  { %v15359_v20 = vpop.eup %15358 }
 0x3e6   :  { %v4593_v21 = vmul.f32 %v15359_v20, %v15871_v9  ;;  %v3951_v9 = vcombine.low %v15922_v36, %v15925_v1 }
 0x3e8   :  { %14423 = vmatmul.mubr.msk.f32.vlgmr.msra.gmra.mrb[8].mxu0 %vm4247_vm2, %v4593_v21 }
 0x3e9   :  { %v15361_v0 = vpop.eup %15360  ;;  %14431 = vmatpush3.msra.mxu0 %v4177_v46  ;;  %14432 = vmatprep.mubr.msk.f32.mxu0 %vm15562_vm1, %v15560_v51 }
 0x3ea   :  { %v4597_v22 = vmul.f32 %v15361_v0, %v15875_v11  ;;  %14440 = vmatprep.subr.mxu0 %v15560_v51  ;;  %v3378_v11 = vpop.permute.xlu0 %3377 }
 0x3eb   :  { %v3547_v26 = vcombine.low %v15852_v63, %v3378_v11  ;;  %v3548_v43 = vcombine.high %v15852_v63, %v3378_v11 }
 0x3ec   :  { %14433 = vmatmul.mubr.msk.f32.vlgmr.msra.gmra.mrb[10].mxu0 %vm4247_vm2, %v4597_v22 }
 0x3ed   :  { %v15363_v23 = vpop.eup %15362  ;;  %14442 = vmatprep.mubr.msk.f32.mxu0 %vm15562_vm1, %v15560_v51  ;;  %v3555_v45 = vrot.slane %v3547_v26, %v15762_v60  ;;  %v3562_v46 = vrot.slane %v3548_v43, %v15762_v60 }
 0x3ee   :  { %v4595_v24 = vmul.f32 %v15363_v23, %v15879_v13 }
 0x3f0   :  { %14441 = vmatpush3.xpose.msk.msra.mxu0 %vm4247_vm2, %v3951_v9  ;;  %14428 = vmatmul.mubr.msk.f32.vlgmr.msra.gmra.mrb[14].mxu1 %vm4247_vm2, %v4595_v24 }
 0x3f1   :  { %14436 = vmatpush3.msra.mxu1 %v4178_v52  ;;  %14437 = vmatprep.mubr.msk.f32.mxu1 %vm15562_vm1, %v15560_v51 }
 0x3f2   :  { %14445 = vmatprep.subr.mxu1 %v15560_v51  ;;  %14450 = vmatprep.subr.mxu0 %v15560_v51 }
 0x443   :  { %v4591_v25 = vpop.xlane.xlu1 %4590 }
 0x444   :  { %15364 = vrcp.f32 %v4591_v25 }
 0x447   :  { %v3384_v13 = vpop.permute.xlu1 %3383 }
 0x448   :  { %v3563_v38 = vcombine.low %v3372_v19, %v3384_v13  ;;  %v3564_v44 = vcombine.high %v3372_v19, %v3384_v13 }
 0x44a   :  { %v3571_v47 = vrot.slane %v3563_v38, %v15762_v60  ;;  %v3578_v48 = vrot.slane %v3564_v44, %v15762_v60 }
 0x44c   :  { %v3611_v49 = vcombine.low %v3555_v45, %v3571_v47  ;;  %v3612_v50 = vcombine.high %v3555_v45, %v3571_v47  ;;  %v3627_v52 = vcombine.low %v3562_v46, %v3578_v48  ;;  %v3628_v53 = vcombine.high %v3562_v46, %v3578_v48 }
 0x44e   :  { %v15365_v54 = vpop.eup %15364  ;;  %v3619_v55 = vrot.slane %v3611_v49, %v15765_v3  ;;  %v3626_v63 = vrot.slane %v3612_v50, %v15765_v3  ;;  %v3635_v56 = vrot.slane %v3627_v52, %v15765_v3  ;;  %v3642_v57 = vrot.slane %v3628_v53, %v15765_v3 }
 0x44f   :  { %v4599_v58 = vmul.f32 %v15365_v54, %v15357_v14 }
 0x450   :  { %v13816_v59 = vcombine.low %v3619_v55, %v3626_v63  ;;  %v13818_v62 = vcombine.high %v3619_v55, %v3626_v63  ;;  %v13820_v8 = vcombine.low %v3635_v56, %v3642_v57  ;;  %v13822_v10 = vcombine.high %v3635_v56, %v3642_v57 }
 0x451   :  { %14438 = vmatmul.mubr.msk.f32.vlgmr.msra.gmra.mrb[16].mxu1 %vm4247_vm2, %v4599_v58 }
 0x452   :  { %v3827_v12 = vrot.slane %v13816_v59, %v15762_v60  ;;  %v3843_v15 = vrot.slane %v13818_v62, %v15762_v60  ;;  %v3859_v19 = vrot.slane %v13820_v8, %v15762_v60  ;;  %v3875_v16 = vrot.slane %v13822_v10, %v15762_v60  ;;  %14446 = vmatpush3.xpose.msk.msra.mxu1 %vm4247_vm2, %v3952_v5 }
 0x453   :  { %14447 = vmatprep.mubr.msk.f32.mxu1 %vm15562_vm1, %v15560_v51  ;;  %14455 = vmatprep.subr.mxu1 %v15560_v51 }
 0x454   :  { %v3883_v14 = vcombine.low %v3827_v12, %v3843_v15  ;;  %v3884_v17 = vcombine.high %v3827_v12, %v3843_v15  ;;  %v3915_v18 = vcombine.low %v3859_v19, %v3875_v16  ;;  %v3916_v20 = vcombine.high %v3859_v19, %v3875_v16 }
 0x456   :  { %v3891_v21 = vrot.slane %v3883_v14, %v15765_v3  ;;  %v3923_v0 = vrot.slane %v3915_v18, %v15765_v3  ;;  %v3898_v9 = vrot.slane %v3884_v17, %v15765_v3  ;;  %v3930_v36 = vrot.slane %v3916_v20, %v15765_v3 }
 0x458   :  { %v3947_v22 = vcombine.low %v3891_v21, %v3923_v0  ;;  %v3948_v23 = vcombine.high %v3891_v21, %v3923_v0  ;;  %v3949_v1 = vcombine.low %v3898_v9, %v3930_v36  ;;  %v3950_v5 = vcombine.high %v3898_v9, %v3930_v36 }
 0x45a   :  { %14443 = vmatmul.mubr.msk.f32.vlgmr.msra.gmra.mrb[12].mxu0 %vm4247_vm2, %v3947_v22  ;;  %14448 = vmatmul.mubr.msk.f32.vlgmr.msra.gmra.mrb[18].mxu1 %vm4247_vm2, %v3948_v23 }
 0x45b   :  { %14451 = vmatpush3.xpose.msk.msra.mxu0 %vm4247_vm2, %v3953_v6  ;;  %14456 = vmatpush3.xpose.msk.msra.mxu1 %vm4247_vm2, %v3954_v7 }
 0x45c   :  { %14452 = vmatprep.mubr.msk.f32.mxu0 %vm15562_vm1, %v15560_v51  ;;  %14457 = vmatprep.mubr.msk.f32.mxu1 %vm15562_vm1, %v15560_v51 }
 0x45d   :  { %14460 = vmatprep.subr.mxu0 %v15560_v51  ;;  %14465 = vmatprep.subr.mxu1 %v15560_v51 }
 0x45e   :  { %14453 = vmatmul.mubr.msk.f32.vlgmr.msra.gmra.mrb[14].mxu0 %vm4247_vm2, %v3949_v1  ;;  %14458 = vmatmul.mubr.msk.f32.vlgmr.msra.gmra.mrb[20].mxu1 %vm4247_vm2, %v3950_v5 }
 0x45f   :  { %14462 = vmatprep.mubr.msk.f32.mxu0 %vm15562_vm1, %v15560_v51  ;;  %14467 = vmatprep.mubr.msk.f32.mxu1 %vm15562_vm1, %v15560_v51 }
 0x4bb   :  { %v4669_v2 = vpop.f32.mrb[8].mxu0 }
 0x4bc   :  { %v14424_v4 = vpop.f32.mrb[9].mxu0 }
 0x4bf   :  { %v4815_v6 = vpop.f32.mrb[10].mxu0 }
 0x4c0   :  { %v5536_v7 = vcombine.low %v4669_v2, %v4815_v6  ;;  %v5537_v24 = vcombine.high %v4669_v2, %v4815_v6  ;;  %v14434_v11 = vpop.f32.mrb[11].mxu0 }
 0x4c2   :  { %v5544_v45 = vrot.slane %v5536_v7, %v15762_v60  ;;  %v5551_v46 = vrot.slane %v5537_v24, %v15762_v60 }
 0x4c3   :  { %v4742_v25 = vpop.f32.mrb[14].mxu1 }
 0x4c4   :  { %v14429_v26 = vpop.f32.mrb[15].mxu1 }
 0x524   :  { %v4888_v43 = vpop.f32.mrb[16].mxu1 }
 0x525   :  { %v5552_v13 = vcombine.low %v4742_v25, %v4888_v43  ;;  %v5553_v38 = vcombine.high %v4742_v25, %v4888_v43  ;;  %v14439_v44 = vpop.f32.mrb[17].mxu1 }
 0x527   :  { %v5560_v47 = vrot.slane %v5552_v13, %v15762_v60  ;;  %v5567_v48 = vrot.slane %v5553_v38, %v15762_v60 }
 0x529   :  { %v5568_v49 = vcombine.low %v5544_v45, %v5560_v47  ;;  %v5569_v50 = vcombine.high %v5544_v45, %v5560_v47  ;;  %v5584_v52 = vcombine.low %v5551_v46, %v5567_v48  ;;  %v5585_v53 = vcombine.high %v5551_v46, %v5567_v48 }
 0x52a   :  { %v3364_v47 = vadd.f32 %v15838_v42, %v15845_v61 }
 0x52b   :  { %v5576_v54 = vrot.slane %v5568_v49, %v15765_v3  ;;  %v5583_v55 = vrot.slane %v5569_v50, %v15765_v3  ;;  %v5592_v63 = vrot.slane %v5584_v52, %v15765_v3  ;;  %v5599_v56 = vrot.slane %v5585_v53, %v15765_v3 }
 0x52d   :  { %v5672_v57 = vcombine.low %v5576_v54, %v5583_v55  ;;  %v13852_v58 = vcombine.high %v5576_v54, %v5583_v55  ;;  %v5688_v59 = vcombine.low %v5592_v63, %v5599_v56  ;;  %v13853_v62 = vcombine.high %v5592_v63, %v5599_v56  ;;  %v4964_v8 = vpop.f32.mrb[12].mxu0  ;;  %v5040_v10 = vpop.f32.mrb[18].mxu1 }
 0x52e   :  { %v5196_v12 = vmul.f32 0.35355338, %v4964_v8  ;;  %v5197_v15 = vmul.f32 0.35355338, %v5040_v10  ;;  %v14444_v19 = vpop.f32.mrb[13].mxu0  ;;  %v14449_v16 = vpop.f32.mrb[19].mxu1 }
 0x52f   :  { %v5679_v14 = vrot.slane %v5672_v57, %v15762_v60  ;;  %v5687_v17 = vrot.slane %v13852_v58, %v15762_v60  ;;  %v5695_v18 = vrot.slane %v5688_v59, %v15762_v60  ;;  %v5703_v20 = vrot.slane %v13853_v62, %v15762_v60  ;;  %v15502_v16 = vld [vmem:[%s18168_s4] sm:$0xff] }
 0x530   :  { %v5200_v21 = vsel %vm4247_vm2, %v5196_v12, -inf  ;;  %v5203_v0 = vsel %vm4247_vm2, %v5197_v15, -inf }
 0x531   :  { %5201 = vmax.xlane.f32.xlu0 %v5200_v21  ;;  %v5116_v22 = vpop.f32.mrb[14].mxu0  ;;  %5204 = vmax.xlane.f32.xlu1 %v5203_v0  ;;  %v5192_v23 = vpop.f32.mrb[20].mxu1  ;;  %v5704_v9 = vcombine.low %v5679_v14, %v5687_v17  ;;  %v5720_v36 = vcombine.low %v5695_v18, %v5703_v20  ;;  %v5705_v1 = vcombine.high %v5679_v14, %v5687_v17  ;;  %v15503_v14 = vld [vmem:[%s18168_s4 + $0x8] sm:$0xff] }
 0x532   :  { %v5198_v5 = vmul.f32 0.35355338, %v5116_v22  ;;  %v14454_v2 = vpop.f32.mrb[15].mxu0  ;;  %v14459_v4 = vpop.f32.mrb[21].mxu1  ;;  %v5721_v6 = vcombine.high %v5695_v18, %v5703_v20  ;;  %v5199_v25 = vmul.f32 0.35355338, %v5192_v23  ;;  %v15280_v17 = vpack.i.bf16 %v15503_v14, %v15502_v16 }
 0x533   :  { %v16024_v7 = vrot.slane %v5704_v9, %v15765_v3  ;;  %v16027_v24 = vrot.slane %v5720_v36, %v15765_v3  ;;  %v5719_v11 = vrot.slane %v5705_v1, %v15765_v3 }
 0x534   :  { %v5206_v26 = vsel %vm4247_vm2, %v5198_v5, -inf  ;;  %v5735_v43 = vrot.slane %v5721_v6, %v15765_v3  ;;  %v5209_v46 = vsel %vm4247_vm2, %v5199_v25, -inf }
 0x535   :  { %5207 = vmax.xlane.f32.xlu0 %v5206_v26  ;;  %v5737_v13 = vcombine.high %v16024_v7, %v16027_v24  ;;  %v5736_v38 = vcombine.low %v16024_v7, %v16027_v24  ;;  %v15504_v7 = vld [vmem:[%s18168_s4 + $0x10] sm:$0xff]  ;;  %v15505_v24 = vld [vmem:[%s18168_s4 + $0x18] sm:$0xff] }
 0x536   :  { %v5738_v44 = vcombine.low %v5719_v11, %v5735_v43  ;;  %v5739_v45 = vcombine.high %v5719_v11, %v5735_v43 }
 0x539   :  { %5210 = vmax.xlane.f32.xlu0 %v5209_v46 }
 0x542   :  { %3959 = vrot.lane.b32.xlu1 %v3364_v47, %s15558_s2 }
 0x5be   :  { %v5202_v48 = vpop.xlane.xlu0 %5201  ;;  %v5205_v49 = vpop.xlane.xlu1 %5204 }
 0x5bf   :  { %v5212_v50 = vsub.f32 %v5196_v12, %v5202_v48  ;;  %v5213_v52 = vsub.f32 %v5197_v15, %v5205_v49 }
 0x5c1   :  { %v5216_v53 = vmul.f32 1.442695, %v5212_v50  ;;  %v5218_v54 = vmul.f32 1.442695, %v5213_v52 }
 0x5c2   :  { %v5208_v55 = vpop.xlane.xlu0 %5207  ;;  %v3960_v18 = vpop.permute.xlu1 %3959 }
 0x5c3   :  { %15366 = vpow2.f32 %v5216_v53  ;;  %v5214_v63 = vsub.f32 %v5198_v5, %v5208_v55 }
 0x5c4   :  { %15368 = vpow2.f32 %v5218_v54 }
 0x5c5   :  { %v5220_v56 = vmul.f32 1.442695, %v5214_v63 }
 0x5c6   :  { %v5211_v57 = vpop.xlane.xlu0 %5210 }
 0x5c7   :  { %15370 = vpow2.f32 %v5220_v56  ;;  %v5215_v58 = vsub.f32 %v5199_v25, %v5211_v57 }
 0x5c9   :  { %v5222_v59 = vmul.f32 1.442695, %v5215_v58 }
 0x5cb   :  { %15372 = vpow2.f32 %v5222_v59 }
 0x5cd   :  { %v16040_v62 = vpop.eup %15366 }
 0x5ce   :  { %v16042_v42 = vpop.eup %15368  ;;  %v5224_v61 = vsel %vm4247_vm2, %v16040_v62, 0.0 }
 0x5cf   :  { %5225 = vadd.xlane.f32.xlu1 %v5224_v61  ;;  %v5227_v8 = vsel %vm4247_vm2, %v16042_v42, 0.0 }
 0x5d0   :  { %5228 = vadd.xlane.f32.xlu0 %v5227_v8 }
 0x5d1   :  { %v16048_v10 = vpop.eup %15370 }
 0x5d2   :  { %v5230_v12 = vsel %vm4247_vm2, %v16048_v10, 0.0 }
 0x5d3   :  { %5231 = vadd.xlane.f32.xlu1 %v5230_v12 }
 0x5d5   :  { %v16052_v15 = vpop.eup %15372 }
 0x5d6   :  { %v5233_v19 = vsel %vm4247_vm2, %v16052_v15, 0.0 }
 0x5d7   :  { %5234 = vadd.xlane.f32.xlu0 %v5233_v19 }
 0x5e4   :  { %3971 = vrot.lane.b32.xlu1 %v3364_v47, %s15561_s18 }
 0x5e8   :  { %15281 = vrot.lane.b32.xlu1 %v15280_v17, %s15565_s24 }
 0x5ec   :  { %5810 = vrot.lane.b32.xlu1 %v5737_v13, %s15566_s25 }
 0x5ed   :  { %3965 = vrot.lane.b32.xlu0 %v3364_v47, %s15559_s3 }
 0x5f0   :  { %5818 = vrot.lane.b32.xlu1 %v5738_v44, %s15567_s26 }
 0x5f4   :  { %5826 = vrot.lane.b32.xlu1 %v5739_v45, %s15568_s29 }
 0x5f8   :  { %5852 = vrot.lane.b32.xlu1 %v15709_v35, %s15565_s24 }
 0x65c   :  { %v5226_v20 = vpop.xlane.xlu1 %5225 }
 0x65d   :  { %v5229_v21 = vpop.xlane.xlu0 %5228  ;;  %15374 = vrcp.f32 %v5226_v20 }
 0x65e   :  { %15376 = vrcp.f32 %v5229_v21 }
 0x660   :  { %v5232_v0 = vpop.xlane.xlu1 %5231 }
 0x661   :  { %15378 = vrcp.f32 %v5232_v0 }
 0x664   :  { %v3972_v22 = vpop.permute.xlu1 %3971  ;;  %v5235_v23 = vpop.xlane.xlu0 %5234 }
 0x665   :  { %v4059_v9 = vcombine.low %v3960_v18, %v3972_v22  ;;  %v4060_v36 = vcombine.high %v3960_v18, %v3972_v22  ;;  %15380 = vrcp.f32 %v5235_v23 }
 0x667   :  { %v4067_v4 = vrot.slane %v4059_v9, %v15762_v60  ;;  %v4074_v6 = vrot.slane %v4060_v36, %v15762_v60  ;;  %v15375_v58 = vpop.eup %15374 }
 0x668   :  { %v3966_v1 = vpop.permute.xlu0 %3965  ;;  %v16072_v11 = vpop.permute.xlu1 %15281  ;;  %v5237_v9 = vmul.f32 %v15375_v58, %v16040_v62 }
 0x669   :  { %v4043_v5 = vcombine.low %v3364_v47, %v3966_v1  ;;  %v4044_v2 = vcombine.high %v3364_v47, %v3966_v1  ;;  %v15377_v12 = vpop.eup %15376 }
 0x66a   :  { %v5239_v36 = vmul.f32 %v15377_v12, %v16042_v42 }
 0x66b   :  { %v4051_v35 = vrot.slane %v4043_v5, %v15762_v60  ;;  %v4058_v25 = vrot.slane %v4044_v2, %v15762_v60  ;;  %v15379_v18 = vpop.eup %15378 }
 0x66c   :  { %v5811_v54 = vpop.permute.xlu1 %5810  ;;  %v5241_v42 = vmul.f32 %v15379_v18, %v16048_v10  ;;  %v15284_v10 = vunpack.i.h.bf16 %v16072_v11 }
 0x66d   :  { %v4075_v26 = vcombine.low %v4051_v35, %v4067_v4  ;;  %v4076_v43 = vcombine.high %v4051_v35, %v4067_v4  ;;  %v4091_v13 = vcombine.low %v4058_v25, %v4074_v6  ;;  %v4092_v44 = vcombine.high %v4058_v25, %v4074_v6 }
 0x66e   :  { %v5832_v62 = vsel %vm4247_vm2, %v5736_v38, %v5811_v54  ;;  %v15285_v38 = vpack.i.bf16 %v15505_v24, %v15504_v7 }
 0x66f   :  { %v4083_v45 = vrot.slane %v4075_v26, %v15765_v3  ;;  %v4090_v46 = vrot.slane %v4076_v43, %v15765_v3  ;;  %v4099_v47 = vrot.slane %v4091_v13, %v15765_v3  ;;  %v4106_v48 = vrot.slane %v4092_v44, %v15765_v3  ;;  %v15381_v23 = vpop.eup %15380 }
 0x670   :  { %v5819_v16 = vpop.permute.xlu1 %5818  ;;  %v5243_v4 = vmul.f32 %v15381_v23, %v16052_v15  ;;  %15286 = vrot.lane.b32.xlu0 %v15285_v38, %s15565_s24  ;;  %v15283_v15 = vunpack.i.l.bf16 %v16072_v11 }
 0x671   :  { %v4179_v49 = vcombine.low %v4083_v45, %v4090_v46  ;;  %v13826_v50 = vcombine.high %v4083_v45, %v4090_v46  ;;  %v4195_v52 = vcombine.low %v4099_v47, %v4106_v48  ;;  %v13827_v53 = vcombine.high %v4099_v47, %v4106_v48 }
 0x672   :  { %v5835_v6 = vsel %vm5834_vm3, %v5832_v62, %v5819_v16  ;;  %v15020_v25 = vpack.c.bf16 %v15284_v10, %v15283_v15 }
 0x673   :  { %v4186_v55 = vrot.slane %v4179_v49, %v15762_v60  ;;  %v4194_v63 = vrot.slane %v13826_v50, %v15762_v60  ;;  %v4202_v56 = vrot.slane %v4195_v52, %v15762_v60  ;;  %v4210_v57 = vrot.slane %v13827_v53, %v15762_v60 }
 0x674   :  { %v5827_v2 = vpop.permute.xlu1 %5826 }
 0x675   :  { %v4211_v59 = vcombine.low %v4186_v55, %v4194_v63  ;;  %v4227_v61 = vcombine.low %v4202_v56, %v4210_v57  ;;  %v4212_v8 = vcombine.high %v4186_v55, %v4194_v63  ;;  %v4228_v19 = vcombine.high %v4202_v56, %v4210_v57 }
 0x676   :  { %v5838_v35 = vsel %vm5837_vm4, %v5835_v6, %v5827_v2 }
 0x677   :  { %v4219_v14 = vrot.slane %v4211_v59, %v15765_v3  ;;  %v4235_v17 = vrot.slane %v4227_v61, %v15765_v3  ;;  %v4226_v20 = vrot.slane %v4212_v8, %v15765_v3  ;;  %v4242_v21 = vrot.slane %v4228_v19, %v15765_v3 }
 0x679   :  { %v4243_v0 = vcombine.low %v4219_v14, %v4235_v17  ;;  %v4244_v22 = vcombine.high %v4219_v14, %v4235_v17  ;;  %v4245_v1 = vcombine.low %v4226_v20, %v4242_v21  ;;  %v4246_v5 = vcombine.high %v4226_v20, %v4242_v21 }
 0x67b   :  { %14461 = vmatpush3.msra.mxu0 %v4243_v0  ;;  %14466 = vmatpush3.msra.mxu1 %v4244_v22 }
 0x67c   :  { %14463 = vmatmul.mubr.msk.f32.vlgmr.msra.gmra.mrb[16].mxu0 %vm4247_vm2, %v5237_v9  ;;  %14468 = vmatmul.mubr.msk.f32.vlgmr.msra.gmra.mrb[22].mxu1 %vm4247_vm2, %v5239_v36 }
 0x67d   :  { %14470 = vmatprep.subr.mxu0 %v15560_v51  ;;  %14475 = vmatprep.subr.mxu1 %v15560_v51 }
 0x67e   :  { %14471 = vmatpush3.msra.mxu0 %v4245_v1  ;;  %14476 = vmatpush3.msra.mxu1 %v4246_v5 }
 0x67f   :  { %14472 = vmatprep.mubr.msk.f32.mxu0 %vm15562_vm1, %v15560_v51  ;;  %14477 = vmatprep.mubr.msk.f32.mxu1 %vm15562_vm1, %v15560_v51 }
 0x680   :  { %14473 = vmatmul.mubr.msk.f32.vlgmr.msra.gmra.mrb[18].mxu0 %vm4247_vm2, %v5241_v42  ;;  %14478 = vmatmul.mubr.msk.f32.vlgmr.msra.gmra.mrb[24].mxu1 %vm4247_vm2, %v5243_v4 }
 0x681   :  { %14488 = vmatprep.mubr.msk.f32.mxu0 %vm61_vm0, %v5838_v35  ;;  %15021 = vmatprep.subr.bf16.mxu0 %v15020_v25 }
 0x682   :  { %15023 = vmatpush3.bf16.msra.mxu0 %v15020_v25 }
 0x6e2   :  { %v15287_v45 = vpop.permute.xlu0 %15286 }
 0x6e3   :  { %v15289_v46 = vunpack.i.h.bf16 %v15287_v45  ;;  %v15288_v47 = vunpack.i.l.bf16 %v15287_v45 }
 0x6e5   :  { %v15024_v56 = vpack.c.bf16 %v15289_v46, %v15288_v47  ;;  %v5853_v46 = vpop.permute.xlu1 %5852 }
 0x6e7   :  { %15025 = vmatprep.subr.bf16.mxu0 %v15024_v56 }
 0x6e8   :  { %15027 = vmatpush3.bf16.msra.mxu0 %v15024_v56 }
 0x74f   :  { %v5313_v26 = vpop.f32.mrb[16].mxu0  ;;  %v5386_v43 = vpop.f32.mrb[22].mxu1 }
 0x750   :  { %v14464_v13 = vpop.f32.mrb[17].mxu0  ;;  %v14469_v44 = vpop.f32.mrb[23].mxu1 }
 0x753   :  { %v5459_v48 = vpop.f32.mrb[18].mxu0  ;;  %v5532_v49 = vpop.f32.mrb[24].mxu1 }
 0x754   :  { %v5604_v50 = vcombine.low %v5313_v26, %v5459_v48  ;;  %v5605_v52 = vcombine.high %v5313_v26, %v5459_v48  ;;  %v5620_v53 = vcombine.low %v5386_v43, %v5532_v49  ;;  %v5621_v54 = vcombine.high %v5386_v43, %v5532_v49  ;;  %v14474_v55 = vpop.f32.mrb[19].mxu0  ;;  %v14479_v63 = vpop.f32.mrb[25].mxu1 }
 0x756   :  { %v5612_v11 = vrot.slane %v5604_v50, %v15762_v60  ;;  %v5619_v57 = vrot.slane %v5605_v52, %v15762_v60  ;;  %v5628_v58 = vrot.slane %v5620_v53, %v15762_v60  ;;  %v5635_v59 = vrot.slane %v5621_v54, %v15762_v60  ;;  %v15506_v52 = vld [vmem:[%s18164_s0 + $0x8] sm:$0xff]  ;;  %v15507_v54 = vld [vmem:[%s18164_s0] sm:$0xff] }
 0x758   :  { %v5636_v61 = vcombine.low %v5612_v11, %v5628_v58  ;;  %v5637_v8 = vcombine.high %v5612_v11, %v5628_v58  ;;  %v5652_v12 = vcombine.low %v5619_v57, %v5635_v59  ;;  %v5653_v19 = vcombine.high %v5619_v57, %v5635_v59  ;;  %v16155_v57 = vld [vmem:[%s18172_s8] sm:$0xf] }
 0x759   :  { %v5967_v11 = vsub.s32 2, %v15693_v28  ;;  %v16167_v59 = vld [vmem:[%s18170_s6 + $0x20] ss:$0 sm:$0xff] }
 0x75a   :  { %v5644_v16 = vrot.slane %v5636_v61, %v15765_v3  ;;  %v5651_v14 = vrot.slane %v5637_v8, %v15765_v3  ;;  %v5660_v17 = vrot.slane %v5652_v12, %v15765_v3  ;;  %v5667_v18 = vrot.slane %v5653_v19, %v15765_v3 }
 0x75b   :  { %v16160_v58 = vrot.slane %v16155_v57, %v5967_v11  ;;  %v16171_v61 = vadd.f32 %v15826_v27, %v16167_v59  ;;  %v16177_v8 = vadd.f32 %v16167_v59, %v15828_v32  ;;  %v16185_v12 = vadd.f32 %v16167_v59, %v15832_v39 }
 0x75c   :  { %v5740_v20 = vcombine.low %v5644_v16, %v5651_v14  ;;  %v13854_v21 = vcombine.high %v5644_v16, %v5651_v14  ;;  %v5756_v0 = vcombine.low %v5660_v17, %v5667_v18  ;;  %v13855_v22 = vcombine.high %v5660_v17, %v5667_v18 }
 0x75e   :  { %v5747_v23 = vrot.slane %v5740_v20, %v15762_v60  ;;  %v5755_v9 = vrot.slane %v13854_v21, %v15762_v60  ;;  %v5763_v36 = vrot.slane %v5756_v0, %v15762_v60  ;;  %v5771_v1 = vrot.slane %v13855_v22, %v15762_v60  ;;  %v3166_v0 = vld [vmem:[%s18169_s5] sm:$0xff]  ;;  %v3167_v22 = vld [vmem:[%s18169_s5 + $0x8] sm:$0xff] }
 0x760   :  { %v5772_v5 = vcombine.low %v5747_v23, %v5755_v9  ;;  %v5788_v2 = vcombine.low %v5763_v36, %v5771_v1  ;;  %v5773_v62 = vcombine.high %v5747_v23, %v5755_v9  ;;  %v5789_v42 = vcombine.high %v5763_v36, %v5771_v1  ;;  %v3168_v9 = vld [vmem:[%s18169_s5 + $0x10] sm:$0xff]  ;;  %v3169_v36 = vld [vmem:[%s18169_s5 + $0x18] sm:$0xff] }
 0x761   :  { %v15028_v23 = vpack.c.bf16 %v3167_v22, %v3166_v0  ;;  %v15032_v1 = vpack.c.bf16 %v3169_v36, %v3168_v9 }
 0x762   :  { %v5780_v4 = vrot.slane %v5772_v5, %v15765_v3  ;;  %v5796_v6 = vrot.slane %v5788_v2, %v15765_v3  ;;  %v5787_v35 = vrot.slane %v5773_v62, %v15765_v3  ;;  %v5803_v7 = vrot.slane %v5789_v42, %v15765_v3 }
 0x763   :  { %15029 = vmatprep.subr.bf16.mxu1 %v15028_v23  ;;  %v15569_v5 = vmov 0.0|0.0  }
 0x764   :  { %v5805_v24 = vcombine.high %v5780_v4, %v5796_v6  ;;  %v5806_v38 = vcombine.low %v5787_v35, %v5803_v7  ;;  %v5807_v10 = vcombine.high %v5787_v35, %v5803_v7  ;;  %v5804_v15 = vcombine.low %v5780_v4, %v5796_v6  ;;  %15031 = vmatpush3.bf16.msra.mxu1 %v15028_v23 }
 0x765   :  { %15033 = vmatprep.subr.bf16.mxu1 %v15032_v1  ;;  %15036 = vmatprep.subr.bf16.mxu0 %v15569_v5 }
 0x766   :  { %5812 = vrot.lane.b32.xlu0 %v5805_v24, %s15566_s25 }
 0x768   :  { %15035 = vmatpush3.bf16.msra.mxu1 %v15032_v1 }
 0x769   :  { %15040 = vmatprep.subr.bf16.mxu1 %v15569_v5 }
 0x76a   :  { %5820 = vrot.lane.b32.xlu0 %v5806_v38, %s15567_s26 }
 0x76e   :  { %5828 = vrot.lane.b32.xlu0 %v5807_v10, %s15568_s29 }
 0x7d8   :  { %v5813_v25 = vpop.permute.xlu0 %5812 }
 0x7d9   :  { %v5833_v43 = vsel %vm4247_vm2, %v5804_v15, %v5813_v25 }
 0x7dc   :  { %v5821_v26 = vpop.permute.xlu0 %5820 }
 0x7dd   :  { %v5836_v13 = vsel %vm5834_vm3, %v5833_v43, %v5821_v26 }
 0x7e0   :  { %v5829_v44 = vpop.permute.xlu0 %5828 }
 0x7e1   :  { %v5839_v45 = vsel %vm5837_vm4, %v5836_v13, %v5829_v44 }
 0x7e2   :  { %14489 = vmatmul.mubr.msk.f32.vlgmr.msra.gmra.mrb[20].mxu0 %vm61_vm0, %v5839_v45 }
 0x7e3   :  { %14508 = vmatprep.mubr.msk.f32.mxu0 %vm15562_vm1, %v15560_v51 }
 0x8b5   :  { %v14490_v47 = vpop.f32.mrb[20].mxu0 }
 0x8b6   :  { %v5933_v48 = vadd.f32 %v14490_v47, %v5853_v46  ;;  %v5927_v49 = vpop.f32.mrb[21].mxu0 }
 0x8b7   :  { %v5928_v50 = vadd.f32 %v5927_v49, %v5853_v46 }
 0x8b8   :  { %v5937_v53 = vadd.f32 %v15506_v52, %v5933_v48 }
 0x8b9   :  { %v5936_v55 = vadd.f32 %v15507_v54, %v5928_v50 }
 0x8ba   :  { %v5941_v63 = vsel %vm61_vm0, %v5937_v53, 0.0 }
 0x8bb   :  { %5942 = vadd.xlane.f32.xlu1 %v5941_v63  ;;  %v5938_v56 = vsel %vm61_vm0, %v5936_v55, 0.0 }
 0x8bc   :  { %5939 = vadd.xlane.f32.xlu0 %v5938_v56 }
 0x8cc   :  { %5972 = vrot.lane.b32.xlu1 %v16160_v58, %s15555_s28 }
 0x8d0   :  { %219 = vrot.lane.b32.xlu1 %v16171_v61, %s15558_s2 }
 0x8d4   :  { %232 = vrot.lane.b32.xlu1 %v16177_v8, %s15559_s3 }
 0x8d8   :  { %247 = vrot.lane.b32.xlu1 %v16177_v8, %s15561_s18 }
 0x8dc   :  { %221 = vrot.lane.b32.xlu1 %v16185_v12, %s15558_s2 }
 0x8e0   :  { %251 = vrot.lane.b32.xlu1 %v16185_v12, %s15561_s18 }
 0x948   :  { %v5943_v27 = vpop.xlane.xlu1 %5942 }
 0x949   :  { %v5946_v19 = vmul.f32 0.03125, %v5943_v27  ;;  %v5940_v32 = vpop.xlane.xlu0 %5939 }
 0x94a   :  { %v5945_v16 = vmul.f32 0.03125, %v5940_v32 }
 0x94b   :  { %v16191_v14 = vsub.f32 %v5937_v53, %v5946_v19 }
 0x94c   :  { %v16193_v17 = vsub.f32 %v5936_v55, %v5945_v16  ;;  %v16223_v2 = vpop.permute.xlu1 %5972 }
 0x94d   :  { %v5950_v20 = vmul.f32 %v16191_v14, %v16191_v14 }
 0x94e   :  { %v5949_v18 = vmul.f32 %v16193_v17, %v16193_v17 }
 0x94f   :  { %v5954_v21 = vsel %vm61_vm0, %v5950_v20, 0.0 }
 0x950   :  { %v5951_v39 = vsel %vm61_vm0, %v5949_v18, 0.0  ;;  %v220_v62 = vpop.permute.xlu1 %219 }
 0x951   :  { %5952 = vadd.xlane.f32.xlu0 %v5951_v39 }
 0x954   :  { %v233_v42 = vpop.permute.xlu1 %232 }
 0x955   :  { %5955 = vadd.xlane.f32.xlu0 %v5954_v21  ;;  %v442_v15 = vcombine.low %v16177_v8, %v233_v42  ;;  %v443_v25 = vcombine.high %v16177_v8, %v233_v42 }
 0x957   :  { %v450_v46 = vrot.slane %v442_v15, %v15762_v60  ;;  %v457_v47 = vrot.slane %v443_v25, %v15762_v60 }
 0x958   :  { %v248_v4 = vpop.permute.xlu1 %247 }
 0x95c   :  { %v222_v7 = vpop.permute.xlu1 %221 }
 0x960   :  { %v252_v13 = vpop.permute.xlu1 %251 }
 0x961   :  { %v730_v50 = vcombine.low %v222_v7, %v252_v13  ;;  %v731_v52 = vcombine.high %v222_v7, %v252_v13 }
 0x963   :  { %v16238_v21 = vrot.slane %v730_v50, %v15762_v60  ;;  %v16241_v0 = vrot.slane %v731_v52, %v15762_v60 }
 0x96b   :  { %217 = vrot.lane.b32.xlu0 %v16177_v8, %s15558_s2 }
 0x96f   :  { %234 = vrot.lane.b32.xlu0 %v16171_v61, %s15559_s3 }
 0x973   :  { %249 = vrot.lane.b32.xlu0 %v16171_v61, %s15561_s18 }
 0x977   :  { %236 = vrot.lane.b32.xlu0 %v16185_v12, %s15559_s3 }
 0x9de   :  { %v5953_v6 = vpop.xlane.xlu0 %5952 }
 0x9df   :  { %v5957_v35 = vmul.f32 0.03125, %v5953_v6 }
 0x9e1   :  { %v5959_v24 = vadd.f32 1e-05, %v5957_v35 }
 0x9e2   :  { %v5956_v38 = vpop.xlane.xlu0 %5955 }
 0x9e3   :  { %15382 = vrsqrt.f32 %v5959_v24  ;;  %v5958_v10 = vmul.f32 0.03125, %v5956_v38 }
 0x9e5   :  { %v5960_v26 = vadd.f32 1e-05, %v5958_v10 }
 0x9e6   :  { %v218_v43 = vpop.permute.xlu0 %217 }
 0x9e7   :  { %15384 = vrsqrt.f32 %v5960_v26  ;;  %v458_v44 = vcombine.low %v218_v43, %v248_v4  ;;  %v459_v45 = vcombine.high %v218_v43, %v248_v4 }
 0x9e9   :  { %v466_v48 = vrot.slane %v458_v44, %v15762_v60  ;;  %v473_v49 = vrot.slane %v459_v45, %v15762_v60 }
 0x9ea   :  { %v235_v53 = vpop.permute.xlu0 %234 }
 0x9eb   :  { %v506_v54 = vcombine.low %v450_v46, %v466_v48  ;;  %v507_v55 = vcombine.high %v450_v46, %v466_v48  ;;  %v522_v63 = vcombine.low %v457_v47, %v473_v49  ;;  %v523_v56 = vcombine.high %v457_v47, %v473_v49 }
 0x9ec   :  { %v578_v27 = vcombine.low %v16171_v61, %v235_v53  ;;  %v579_v19 = vcombine.high %v16171_v61, %v235_v53 }
 0x9ed   :  { %v15383_v32 = vpop.eup %15382  ;;  %v514_v16 = vrot.slane %v506_v54, %v15765_v3  ;;  %v521_v18 = vrot.slane %v507_v55, %v15765_v3  ;;  %v530_v39 = vrot.slane %v522_v63, %v15765_v3  ;;  %v537_v20 = vrot.slane %v523_v56, %v15765_v3  ;;  %v15509_v63 = vld [vmem:[%s18165_s1] sm:$0xff] }
 0x9ee   :  { %v586_v22 = vrot.slane %v578_v27, %v15762_v60  ;;  %v250_v23 = vpop.permute.xlu0 %249  ;;  %v5963_v9 = vmul.f32 %v15383_v32, %v16193_v17  ;;  %v593_v6 = vrot.slane %v579_v19, %v15762_v60 }
 0x9ef   :  { %v13724_v36 = vcombine.low %v514_v16, %v521_v18  ;;  %v13726_v1 = vcombine.high %v514_v16, %v521_v18  ;;  %v13728_v42 = vcombine.low %v530_v39, %v537_v20  ;;  %v13730_v4 = vcombine.high %v530_v39, %v537_v20 }
 0x9f0   :  { %v594_v35 = vcombine.low %v220_v62, %v250_v23  ;;  %v595_v7 = vcombine.high %v220_v62, %v250_v23  ;;  %v5969_v24 = vmul.f32 %v16160_v58, %v5963_v9 }
 0x9f1   :  { %v15385_v38 = vpop.eup %15384  ;;  %v16248_v10 = vrot.slane %v13724_v36, %v15762_v60  ;;  %v16251_v15 = vrot.slane %v13726_v1, %v15762_v60  ;;  %v16254_v25 = vrot.slane %v13728_v42, %v15762_v60  ;;  %v16257_v17 = vrot.slane %v13730_v4, %v15762_v60  ;;  %v15510_v36 = vld [vmem:[%s18165_s1 + $0x8] sm:$0xff] }
 0x9f2   :  { %v5964_v26 = vmul.f32 %v15385_v38, %v16191_v14  ;;  %v602_v43 = vrot.slane %v594_v35, %v15762_v60  ;;  %v609_v62 = vrot.slane %v595_v7, %v15762_v60  ;;  %v237_v13 = vpop.permute.xlu0 %236  ;;  %v16263_v44 = vadd.f32 %v16223_v2, %v5969_v24 }
 0x9f3   :  { %v1866_v45 = vcombine.low %v16248_v10, %v16251_v15  ;;  %v1867_v46 = vcombine.high %v16248_v10, %v16251_v15  ;;  %v1898_v47 = vcombine.low %v16254_v25, %v16257_v17  ;;  %v1899_v14 = vcombine.high %v16254_v25, %v16257_v17 }
 0x9f4   :  { %v5970_v48 = vmul.f32 %v16160_v58, %v5964_v26  ;;  %v642_v49 = vcombine.low %v586_v22, %v602_v43  ;;  %v643_v50 = vcombine.high %v586_v22, %v602_v43  ;;  %v658_v52 = vcombine.low %v593_v6, %v609_v62 }
 0x9f5   :  { %v659_v53 = vcombine.high %v593_v6, %v609_v62  ;;  %v714_v54 = vcombine.low %v16185_v12, %v237_v13  ;;  %v715_v55 = vcombine.high %v16185_v12, %v237_v13  ;;  %v5977_v56 = vadd.f32 %v15509_v63, %v16263_v44 }
 0x9f6   :  { %v650_v27 = vrot.slane %v642_v49, %v15765_v3  ;;  %v657_v19 = vrot.slane %v643_v50, %v15765_v3  ;;  %v666_v32 = vrot.slane %v658_v52, %v15765_v3  ;;  %v16284_v16 = vadd.f32 %v16223_v2, %v5970_v48 }
 0x9f7   :  { %v673_v18 = vrot.slane %v659_v53, %v15765_v3  ;;  %v722_v39 = vrot.slane %v714_v54, %v15762_v60  ;;  %v729_v20 = vrot.slane %v715_v55, %v15762_v60  ;;  %14499 = vmatprep.mubr.msk.f32.mxu1 %vm61_vm0, %v5977_v56  ;;  %v1874_v22 = vrot.slane %v1866_v45, %v15765_v3 }
 0x9f8   :  { %v13732_v23 = vcombine.low %v650_v27, %v657_v19  ;;  %v13734_v9 = vcombine.high %v650_v27, %v657_v19  ;;  %v5978_v1 = vadd.f32 %v15510_v36, %v16284_v16  ;;  %v1906_v2 = vrot.slane %v1898_v47, %v15765_v3 }
 0x9f9   :  { %v13736_v42 = vcombine.low %v666_v32, %v673_v18  ;;  %v13738_v4 = vcombine.high %v666_v32, %v673_v18  ;;  %v778_v6 = vcombine.low %v722_v39, %v16238_v21  ;;  %v779_v35 = vcombine.high %v722_v39, %v16238_v21 }
 0x9fa   :  { %v1946_v7 = vrot.slane %v13732_v23, %v15762_v60  ;;  %v1962_v24 = vrot.slane %v13734_v9, %v15762_v60  ;;  %v794_v38 = vcombine.low %v729_v20, %v16241_v0  ;;  %v795_v10 = vcombine.high %v729_v20, %v16241_v0  ;;  %14500 = vmatmul.mubr.msk.f32.vlgmr.msra.gmra.mrb[26].mxu1 %vm61_vm0, %v5978_v1 }
 0x9fb   :  { %v1978_v15 = vrot.slane %v13736_v42, %v15762_v60  ;;  %v1994_v25 = vrot.slane %v13738_v4, %v15762_v60  ;;  %v786_v17 = vrot.slane %v778_v6, %v15765_v3  ;;  %v793_v26 = vrot.slane %v779_v35, %v15765_v3  ;;  %14517 = vmatprep.mubr.msk.f32.mxu1 %vm15562_vm1, %v15560_v51 }
 0x9fc   :  { %v2002_v21 = vcombine.low %v1946_v7, %v1962_v24  ;;  %v2003_v43 = vcombine.high %v1946_v7, %v1962_v24  ;;  %v802_v62 = vrot.slane %v794_v38, %v15765_v3  ;;  %v809_v13 = vrot.slane %v795_v10, %v15765_v3 }
 0x9fd   :  { %v2034_v0 = vcombine.low %v1978_v15, %v1994_v25  ;;  %v2035_v45 = vcombine.high %v1978_v15, %v1994_v25  ;;  %v13740_v47 = vcombine.low %v786_v17, %v793_v26  ;;  %v13742_v48 = vcombine.high %v786_v17, %v793_v26 }
 0x9fe   :  { %v13744_v49 = vcombine.low %v802_v62, %v809_v13  ;;  %v13746_v50 = vcombine.high %v802_v62, %v809_v13  ;;  %v2010_v52 = vrot.slane %v2002_v21, %v15765_v3  ;;  %v1930_v55 = vcombine.low %v1874_v22, %v1906_v2 }
 0x9ff   :  { %v2082_v53 = vrot.slane %v13740_v47, %v15762_v60  ;;  %v2098_v54 = vrot.slane %v13742_v48, %v15762_v60  ;;  %v2042_v63 = vrot.slane %v2034_v0, %v15765_v3  ;;  %v1881_v19 = vrot.slane %v1867_v46, %v15765_v3 }
 0xa00   :  { %v2114_v56 = vrot.slane %v13744_v49, %v15762_v60  ;;  %v2130_v27 = vrot.slane %v13746_v50, %v15762_v60  ;;  %v1913_v32 = vrot.slane %v1899_v14, %v15765_v3  ;;  %v1931_v20 = vcombine.high %v1874_v22, %v1906_v2 }
 0xa01   :  { %v2139_v18 = vcombine.high %v2082_v53, %v2098_v54  ;;  %v2066_v39 = vcombine.low %v2010_v52, %v2042_v63  ;;  %v2067_v23 = vcombine.high %v2010_v52, %v2042_v63  ;;  %v2138_v9 = vcombine.low %v2082_v53, %v2098_v54 }
 0xa02   :  { %v2171_v36 = vcombine.high %v2114_v56, %v2130_v27  ;;  %v1932_v42 = vcombine.low %v1881_v19, %v1913_v32  ;;  %v2017_v4 = vrot.slane %v2003_v43, %v15765_v3  ;;  %v2170_v6 = vcombine.low %v2114_v56, %v2130_v27 }
 0xa03   :  { %v15037_v35 = vpack.c.bf16 %v2066_v39, %v1930_v55  ;;  %v15041_v46 = vpack.c.bf16 %v2067_v23, %v1931_v20  ;;  %v2049_v14 = vrot.slane %v2035_v45, %v15765_v3  ;;  %v1933_v7 = vcombine.high %v1881_v19, %v1913_v32 }
 0xa04   :  { %v2153_v22 = vrot.slane %v2139_v18, %v15765_v3  ;;  %v2185_v2 = vrot.slane %v2171_v36, %v15765_v3  ;;  %v2146_v10 = vrot.slane %v2138_v9, %v15765_v3  ;;  %v2178_v25 = vrot.slane %v2170_v6, %v15765_v3 }
 0xa05   :  { %15039 = vmatpush3.bf16.xpose.msk.msra.mxu0 %vm16321_vm5, %v15037_v35  ;;  %15043 = vmatpush3.bf16.xpose.msk.msra.mxu1 %vm16321_vm5, %v15041_v46  ;;  %v2068_v24 = vcombine.low %v2017_v4, %v2049_v14  ;;  %v2069_v38 = vcombine.high %v2017_v4, %v2049_v14  ;;  %v5981_v13 = vsub.s32 1, %v15693_v28  ;;  %v16364_v49 = vadd.f32 %v16167_v59, %v15697_v30 }
 0xa06   :  { %14506 = vmatprep.subr.mxu0 %v15560_v51  ;;  %14515 = vmatprep.subr.mxu1 %v15560_v51  ;;  %v16336_v15 = vcombine.low %v2153_v22, %v2185_v2  ;;  %v16339_v21 = vcombine.high %v2153_v22, %v2185_v2  ;;  %v16341_v43 = vcombine.low %v2146_v10, %v2178_v25 }
 0xa07   :  { %v15045_v17 = vpack.c.bf16 %v2068_v24, %v1932_v42  ;;  %v15049_v26 = vpack.c.bf16 %v2069_v38, %v1933_v7  ;;  %v16343_v62 = vcombine.high %v2146_v10, %v2178_v25  ;;  %v16355_v0 = vrot.slane %v16155_v57, %v5981_v13 }
 0xa08   :  { %v16371_v57 = vadd.f32 %v15834_v40, %v16167_v59 }
 0xa0d   :  { %14507 = vmatpush3.xpose.msk.msra.mxu0 %vm4247_vm2, %v16341_v43  ;;  %14516 = vmatpush3.xpose.msk.msra.mxu1 %vm4247_vm2, %v16343_v62 }
 0xa0e   :  { %15044 = vmatprep.subr.bf16.mxu0 %v15569_v5  ;;  %15048 = vmatprep.subr.bf16.mxu1 %v15569_v5 }
 0xacd   :  { %v16357_v45 = vpop.f32.mrb[26].mxu1 }
 0xace   :  { %v6055_v47 = vpop.f32.mrb[27].mxu1 }
 0xacf   :  { %v6056_v48 = vadd.f32 %v6055_v47, %v16355_v0 }
 0xad1   :  { %6072 = vrot.lane.b32.xlu1 %v6056_v48, %s15559_s3  ;;  %6066 = vrot.lane.b32.xlu0 %v6056_v48, %s15558_s2 }
 0xad5   :  { %324 = vrot.lane.b32.xlu1 %v16364_v49, %s15553_s20  ;;  %6078 = vrot.lane.b32.xlu0 %v6056_v48, %s15561_s18 }
 0xad9   :  { %337 = vrot.lane.b32.xlu1 %v16371_v57, %s15570_s30  ;;  %322 = vrot.lane.b32.xlu0 %v16371_v57, %s15553_s20 }
 0xb43   :  { %v6073_v50 = vpop.permute.xlu1 %6072  ;;  %v6067_v52 = vpop.permute.xlu0 %6066 }
 0xb44   :  { %v6084_v30 = vcombine.low %v6056_v48, %v6073_v50  ;;  %v6085_v53 = vcombine.high %v6056_v48, %v6073_v50 }
 0xb46   :  { %v6092_v56 = vrot.slane %v6084_v30, %v15762_v60  ;;  %v6099_v27 = vrot.slane %v6085_v53, %v15762_v60 }
 0xb47   :  { %v6079_v54 = vpop.permute.xlu0 %6078 }
 0xb48   :  { %v6100_v55 = vcombine.low %v6067_v52, %v6079_v54  ;;  %v6101_v63 = vcombine.high %v6067_v52, %v6079_v54 }
 0xb4a   :  { %v6108_v40 = vrot.slane %v6100_v55, %v15762_v60  ;;  %v6115_v19 = vrot.slane %v6101_v63, %v15762_v60 }
 0xb4c   :  { %v6116_v32 = vcombine.low %v6092_v56, %v6108_v40  ;;  %v6117_v18 = vcombine.high %v6092_v56, %v6108_v40  ;;  %v6132_v39 = vcombine.low %v6099_v27, %v6115_v19  ;;  %v6133_v20 = vcombine.high %v6099_v27, %v6115_v19 }
 0xb4e   :  { %v6124_v23 = vrot.slane %v6116_v32, %v15765_v3  ;;  %v6131_v9 = vrot.slane %v6117_v18, %v15765_v3  ;;  %v6140_v36 = vrot.slane %v6132_v39, %v15765_v3  ;;  %v6147_v42 = vrot.slane %v6133_v20, %v15765_v3 }
 0xb50   :  { %v6220_v4 = vcombine.low %v6124_v23, %v6131_v9  ;;  %v13860_v6 = vcombine.high %v6124_v23, %v6131_v9  ;;  %v6236_v35 = vcombine.low %v6140_v36, %v6147_v42  ;;  %v13861_v46 = vcombine.high %v6140_v36, %v6147_v42 }
 0xb51   :  { %v16427_v9 = vadd.f32 %v15695_v29, %v16167_v59  ;;  %v16447_v29 = vadd.f32 %v16167_v59, %v15836_v41  ;;  %v16467_v41 = vadd.f32 %v16357_v45, %v16355_v0 }
 0xb52   :  { %v6227_v14 = vrot.slane %v6220_v4, %v15762_v60  ;;  %v6235_v7 = vrot.slane %v13860_v6, %v15762_v60  ;;  %v6243_v22 = vrot.slane %v6236_v35, %v15762_v60  ;;  %v6251_v2 = vrot.slane %v13861_v46, %v15762_v60  ;;  %v323_v46 = vpop.permute.xlu0 %322 }
 0xb53   :  { %v16455_v35 = vadd.f32 %v15830_v37, %v16167_v59  ;;  %v16475_v37 = vpop.permute.xlu1 %324 }
 0xb54   :  { %v6252_v24 = vcombine.low %v6227_v14, %v6235_v7  ;;  %v6268_v38 = vcombine.low %v6243_v22, %v6251_v2  ;;  %v6253_v50 = vcombine.high %v6227_v14, %v6235_v7  ;;  %v6269_v52 = vcombine.high %v6243_v22, %v6251_v2 }
 0xb56   :  { %v6260_v10 = vrot.slane %v6252_v24, %v15765_v3  ;;  %v6276_v25 = vrot.slane %v6268_v38, %v15765_v3  ;;  %v6267_v30 = vrot.slane %v6253_v50, %v15765_v3  ;;  %v6283_v53 = vrot.slane %v6269_v52, %v15765_v3 }
 0xb57   :  { %v338_v59 = vpop.permute.xlu1 %337 }
 0xb58   :  { %v6284_v47 = vcombine.low %v6260_v10, %v6276_v25  ;;  %v6285_v48 = vcombine.high %v6260_v10, %v6276_v25 }
 0xb5a   :  { %14509 = vmatmul.mubr.msk.f32.vlgmr.msra.gmra.mrb[22].mxu0 %vm4247_vm2, %v6284_v47  ;;  %14518 = vmatmul.mubr.msk.f32.vlgmr.msra.gmra.mrb[28].mxu1 %vm4247_vm2, %v6285_v48 }
 0xb5b   :  { %15047 = vmatpush3.bf16.xpose.msk.msra.mxu0 %vm16321_vm5, %v15045_v17  ;;  %15051 = vmatpush3.bf16.xpose.msk.msra.mxu1 %vm16321_vm5, %v15049_v26  ;;  %v6286_v17 = vcombine.low %v6267_v30, %v6283_v53  ;;  %v6287_v26 = vcombine.high %v6267_v30, %v6283_v53 }
 0xb5c   :  { %14524 = vmatprep.subr.mxu0 %v15560_v51  ;;  %14533 = vmatprep.subr.mxu1 %v15560_v51 }
 0xb5d   :  { %14526 = vmatprep.mubr.msk.f32.mxu0 %vm15562_vm1, %v15560_v51  ;;  %14535 = vmatprep.mubr.msk.f32.mxu1 %vm15562_vm1, %v15560_v51 }
 0xb63   :  { %14525 = vmatpush3.xpose.msk.msra.mxu0 %vm4247_vm2, %v16336_v15  ;;  %14534 = vmatpush3.xpose.msk.msra.mxu1 %vm4247_vm2, %v16339_v21 }
 0xb64   :  { %15052 = vmatprep.subr.bf16.mxu0 %v15569_v5  ;;  %15055 = vmatprep.subr.bf16.mxu1 %v15569_v5 }
 0xb66   :  { %14527 = vmatmul.mubr.msk.f32.vlgmr.msra.gmra.mrb[24].mxu0 %vm4247_vm2, %v6286_v17  ;;  %14536 = vmatmul.mubr.msk.f32.vlgmr.msra.gmra.mrb[30].mxu1 %vm4247_vm2, %v6287_v26 }
 0xb67   :  { %14544 = vmatprep.mubr.msk.f32.mxu0 %vm15562_vm1, %v15560_v51  ;;  %14553 = vmatprep.mubr.msk.f32.mxu1 %vm15562_vm1, %v15560_v51 }
 0xc2d   :  { %v6434_v54 = vpop.f32.mrb[22].mxu0  ;;  %v6516_v55 = vpop.f32.mrb[28].mxu1 }
 0xc2e   :  { %v6684_v63 = vmul.f32 0.35355338, %v6434_v54  ;;  %v6685_v56 = vmul.f32 0.35355338, %v6516_v55  ;;  %v14510_v27 = vpop.f32.mrb[23].mxu0  ;;  %v14519_v40 = vpop.f32.mrb[29].mxu1 }
 0xc30   :  { %v6692_v19 = vsel %vm6688_vm6, %v6685_v56, -inf  ;;  %v6689_v32 = vsel %vm6688_vm6, %v6684_v63, -inf }
 0xc31   :  { %6693 = vmax.xlane.f32.xlu0 %v6692_v19  ;;  %6690 = vmax.xlane.f32.xlu1 %v6689_v32 }
 0xc39   :  { %v6598_v18 = vpop.f32.mrb[24].mxu0  ;;  %v6680_v39 = vpop.f32.mrb[30].mxu1 }
 0xc3a   :  { %v14528_v20 = vpop.f32.mrb[25].mxu0  ;;  %v14537_v23 = vpop.f32.mrb[31].mxu1  ;;  %v16431_v36 = vmul.f32 0.35355338, %v6598_v18  ;;  %v16435_v4 = vmul.f32 0.35355338, %v6680_v39 }
 0xc3c   :  { %v6695_v42 = vsel %vm6688_vm6, %v16431_v36, -inf  ;;  %v6698_v6 = vsel %vm6688_vm6, %v16435_v4, -inf }
 0xc42   :  { %352 = vrot.lane.b32.xlu1 %v16371_v57, %s15571_s10 }
 0xc46   :  { %367 = vrot.lane.b32.xlu1 %v16371_v57, %s15572_s11 }
 0xc47   :  { %339 = vrot.lane.b32.xlu0 %v16364_v49, %s15570_s30 }
 0xc4a   :  { %326 = vrot.lane.b32.xlu1 %v16427_v9, %s15553_s20 }
 0xc66   :  { %6696 = vmax.xlane.f32.xlu0 %v6695_v42 }
 0xc6e   :  { %6699 = vmax.xlane.f32.xlu1 %v6698_v6 }
 0xc7c   :  { %354 = vrot.lane.b32.xlu0 %v16364_v49, %s15571_s10 }
 0xc7f   :  { %356 = vrot.lane.b32.xlu1 %v16427_v9, %s15571_s10 }
 0xc80   :  { %369 = vrot.lane.b32.xlu0 %v16364_v49, %s15572_s11 }
 0xc83   :  { %225 = vrot.lane.b32.xlu1 %v16447_v29, %s15558_s2 }
 0xc84   :  { %341 = vrot.lane.b32.xlu0 %v16427_v9, %s15570_s30 }
 0xc87   :  { %238 = vrot.lane.b32.xlu1 %v16455_v35, %s15559_s3 }
 0xc88   :  { %371 = vrot.lane.b32.xlu0 %v16427_v9, %s15572_s11 }
 0xc8b   :  { %253 = vrot.lane.b32.xlu1 %v16455_v35, %s15561_s18 }
 0xc8c   :  { %223 = vrot.lane.b32.xlu0 %v16455_v35, %s15558_s2 }
 0xc8f   :  { %6068 = vrot.lane.b32.xlu1 %v16467_v41, %s15558_s2 }
 0xc90   :  { %240 = vrot.lane.b32.xlu0 %v16447_v29, %s15559_s3 }
 0xc94   :  { %255 = vrot.lane.b32.xlu0 %v16447_v29, %s15561_s18 }
 0xcbe   :  { %v6691_v14 = vpop.xlane.xlu1 %6690  ;;  %v6694_v7 = vpop.xlane.xlu0 %6693 }
 0xcbf   :  { %v6701_v22 = vsub.f32 %v6684_v63, %v6691_v14  ;;  %v6702_v2 = vsub.f32 %v6685_v56, %v6694_v7 }
 0xcc1   :  { %v6705_v24 = vmul.f32 1.442695, %v6701_v22  ;;  %v6707_v45 = vmul.f32 1.442695, %v6702_v2 }
 0xcc2   :  { %v353_v38 = vpop.permute.xlu1 %352 }
 0xcc3   :  { %15386 = vpow2.f32 %v6705_v24  ;;  %v1122_v10 = vcombine.low %v323_v46, %v353_v38  ;;  %v1123_v25 = vcombine.high %v323_v46, %v353_v38 }
 0xcc4   :  { %15388 = vpow2.f32 %v6707_v45 }
 0xcc5   :  { %v1130_v52 = vrot.slane %v1122_v10, %v15762_v60  ;;  %v1137_v30 = vrot.slane %v1123_v25, %v15762_v60 }
 0xcc6   :  { %v368_v47 = vpop.permute.xlu1 %367 }
 0xcc7   :  { %v1138_v48 = vcombine.low %v338_v59, %v368_v47  ;;  %v1139_v50 = vcombine.high %v338_v59, %v368_v47  ;;  %v340_v47 = vpop.permute.xlu0 %339 }
 0xcc9   :  { %v1146_v53 = vrot.slane %v1138_v48, %v15762_v60  ;;  %v1153_v17 = vrot.slane %v1139_v50, %v15762_v60 }
 0xccb   :  { %v1186_v26 = vcombine.low %v1130_v52, %v1146_v53  ;;  %v1187_v54 = vcombine.high %v1130_v52, %v1146_v53  ;;  %v1202_v55 = vcombine.low %v1137_v30, %v1153_v17  ;;  %v1203_v63 = vcombine.high %v1137_v30, %v1153_v17  ;;  %v327_v30 = vpop.permute.xlu1 %326 }
 0xccd   :  { %v16481_v56 = vpop.eup %15386  ;;  %v1194_v27 = vrot.slane %v1186_v26, %v15765_v3  ;;  %v1201_v40 = vrot.slane %v1187_v54, %v15765_v3  ;;  %v1210_v19 = vrot.slane %v1202_v55, %v15765_v3  ;;  %v1217_v32 = vrot.slane %v1203_v63, %v15765_v3 }
 0xcce   :  { %v16487_v18 = vpop.eup %15388  ;;  %v6713_v39 = vsel %vm6688_vm6, %v16481_v56, 0.0 }
 0xccf   :  { %v13764_v20 = vcombine.low %v1194_v27, %v1201_v40  ;;  %v13766_v23 = vcombine.high %v1194_v27, %v1201_v40  ;;  %v13768_v42 = vcombine.low %v1210_v19, %v1217_v32  ;;  %v13770_v6 = vcombine.high %v1210_v19, %v1217_v32  ;;  %6714 = vadd.xlane.f32.xlu0 %v6713_v39 }
 0xcd0   :  { %v6716_v59 = vsel %vm6688_vm6, %v16487_v18, 0.0 }
 0xcd1   :  { %v16494_v46 = vrot.slane %v13764_v20, %v15762_v60  ;;  %v16497_v14 = vrot.slane %v13766_v23, %v15762_v60  ;;  %v16500_v7 = vrot.slane %v13768_v42, %v15762_v60  ;;  %v16503_v22 = vrot.slane %v13770_v6, %v15762_v60  ;;  %6717 = vadd.xlane.f32.xlu1 %v6716_v59 }
 0xcd3   :  { %v2547_v2 = vcombine.high %v16494_v46, %v16497_v14  ;;  %v2579_v24 = vcombine.high %v16500_v7, %v16503_v22 }
 0xcd5   :  { %v16510_v45 = vrot.slane %v2547_v2, %v15765_v3  ;;  %v16513_v38 = vrot.slane %v2579_v24, %v15765_v3 }
 0xcd7   :  { %v2612_v10 = vcombine.low %v16510_v45, %v16513_v38  ;;  %v2613_v25 = vcombine.high %v16510_v45, %v16513_v38 }
 0xcf3   :  { %v6697_v48 = vpop.xlane.xlu0 %6696 }
 0xcf4   :  { %v6703_v50 = vsub.f32 %v16431_v36, %v6697_v48 }
 0xcf6   :  { %v6709_v52 = vmul.f32 1.442695, %v6703_v50 }
 0xcf7   :  { %v355_v53 = vpop.permute.xlu0 %354 }
 0xcf8   :  { %15390 = vpow2.f32 %v6709_v52  ;;  %v1258_v17 = vcombine.low %v16475_v37, %v355_v53  ;;  %v1259_v26 = vcombine.high %v16475_v37, %v355_v53 }
 0xcfa   :  { %v1266_v36 = vrot.slane %v1258_v17, %v15762_v60  ;;  %v1273_v20 = vrot.slane %v1259_v26, %v15762_v60 }
 0xcfb   :  { %v6700_v54 = vpop.xlane.xlu1 %6699  ;;  %v370_v55 = vpop.permute.xlu0 %369 }
 0xcfc   :  { %v6704_v63 = vsub.f32 %v16435_v4, %v6700_v54  ;;  %v1274_v27 = vcombine.low %v340_v47, %v370_v55  ;;  %v1275_v40 = vcombine.high %v340_v47, %v370_v55 }
 0xcfe   :  { %v6711_v19 = vmul.f32 1.442695, %v6704_v63  ;;  %v1282_v32 = vrot.slane %v1274_v27, %v15762_v60  ;;  %v1289_v39 = vrot.slane %v1275_v40, %v15762_v60 }
 0xcff   :  { %v357_v23 = vpop.permute.xlu1 %356  ;;  %v342_v42 = vpop.permute.xlu0 %341 }
 0xd00   :  { %15392 = vpow2.f32 %v6711_v19  ;;  %v1322_v6 = vcombine.low %v1266_v36, %v1282_v32  ;;  %v1323_v37 = vcombine.high %v1266_v36, %v1282_v32  ;;  %v1338_v59 = vcombine.low %v1273_v20, %v1289_v39 }
 0xd01   :  { %v1339_v2 = vcombine.high %v1273_v20, %v1289_v39  ;;  %v1394_v4 = vcombine.low %v327_v30, %v357_v23  ;;  %v1395_v47 = vcombine.high %v327_v30, %v357_v23 }
 0xd02   :  { %v16527_v24 = vpop.eup %15390  ;;  %v1330_v17 = vrot.slane %v1322_v6, %v15765_v3  ;;  %v1337_v26 = vrot.slane %v1323_v37, %v15765_v3  ;;  %v1346_v54 = vrot.slane %v1338_v59, %v15765_v3 }
 0xd03   :  { %v372_v48 = vpop.permute.xlu0 %371  ;;  %v6719_v50 = vsel %vm6688_vm6, %v16527_v24, 0.0  ;;  %v1353_v55 = vrot.slane %v1339_v2, %v15765_v3  ;;  %v1402_v63 = vrot.slane %v1394_v4, %v15762_v60  ;;  %v1409_v27 = vrot.slane %v1395_v47, %v15762_v60 }
 0xd04   :  { %v1410_v52 = vcombine.low %v342_v42, %v372_v48  ;;  %v1411_v53 = vcombine.high %v342_v42, %v372_v48  ;;  %6720 = vadd.xlane.f32.xlu1 %v6719_v50  ;;  %v13772_v20 = vcombine.low %v1330_v17, %v1337_v26  ;;  %v13774_v23 = vcombine.high %v1330_v17, %v1337_v26 }
 0xd05   :  { %v13776_v42 = vcombine.low %v1346_v54, %v1353_v55  ;;  %v13778_v6 = vcombine.high %v1346_v54, %v1353_v55 }
 0xd06   :  { %v1418_v30 = vrot.slane %v1410_v52, %v15762_v60  ;;  %v1425_v40 = vrot.slane %v1411_v53, %v15762_v60  ;;  %v2626_v17 = vrot.slane %v13772_v20, %v15762_v60  ;;  %v2642_v26 = vrot.slane %v13774_v23, %v15762_v60 }
 0xd07   :  { %v2658_v54 = vrot.slane %v13776_v42, %v15762_v60  ;;  %v2674_v55 = vrot.slane %v13778_v6, %v15762_v60  ;;  %v2546_v20 = vcombine.low %v16494_v46, %v16497_v14  ;;  %v2578_v23 = vcombine.low %v16500_v7, %v16503_v22 }
 0xd08   :  { %v1458_v19 = vcombine.low %v1402_v63, %v1418_v30  ;;  %v1459_v32 = vcombine.high %v1402_v63, %v1418_v30  ;;  %v1474_v39 = vcombine.low %v1409_v27, %v1425_v40  ;;  %v1475_v36 = vcombine.high %v1409_v27, %v1425_v40 }
 0xd0a   :  { %v16539_v37 = vpop.eup %15392  ;;  %v1466_v59 = vrot.slane %v1458_v19, %v15765_v3  ;;  %v1473_v2 = vrot.slane %v1459_v32, %v15765_v3  ;;  %v1482_v4 = vrot.slane %v1474_v39, %v15765_v3  ;;  %v1489_v47 = vrot.slane %v1475_v36, %v15765_v3 }
 0xd0b   :  { %v6722_v48 = vsel %vm6688_vm6, %v16539_v37, 0.0  ;;  %v2682_v36 = vcombine.low %v2626_v17, %v2642_v26 }
 0xd0c   :  { %v13780_v50 = vcombine.low %v1466_v59, %v1473_v2  ;;  %v13782_v52 = vcombine.high %v1466_v59, %v1473_v2  ;;  %v13784_v53 = vcombine.low %v1482_v4, %v1489_v47  ;;  %v13786_v63 = vcombine.high %v1482_v4, %v1489_v47  ;;  %6723 = vadd.xlane.f32.xlu0 %v6722_v48 }
 0xd0d   :  { %v2714_v59 = vcombine.low %v2658_v54, %v2674_v55  ;;  %v2690_v42 = vrot.slane %v2682_v36, %v15765_v3  ;;  %v2554_v4 = vrot.slane %v2546_v20, %v15765_v3  ;;  %v2586_v47 = vrot.slane %v2578_v23, %v15765_v3 }
 0xd0e   :  { %v2762_v27 = vrot.slane %v13780_v50, %v15762_v60  ;;  %v2778_v30 = vrot.slane %v13782_v52, %v15762_v60  ;;  %v2794_v40 = vrot.slane %v13784_v53, %v15762_v60  ;;  %v2810_v19 = vrot.slane %v13786_v63, %v15762_v60 }
 0xd0f   :  { %v2722_v6 = vrot.slane %v2714_v59, %v15765_v3  ;;  %v2610_v53 = vcombine.low %v2554_v4, %v2586_v47  ;;  %v2611_v46 = vcombine.high %v2554_v4, %v2586_v47  ;;  %v2683_v36 = vcombine.high %v2626_v17, %v2642_v26 }
 0xd10   :  { %v2819_v32 = vcombine.high %v2762_v27, %v2778_v30  ;;  %v2851_v39 = vcombine.high %v2794_v40, %v2810_v19  ;;  %v2818_v2 = vcombine.low %v2762_v27, %v2778_v30  ;;  %v2850_v48 = vcombine.low %v2794_v40, %v2810_v19 }
 0xd11   :  { %v2746_v50 = vcombine.low %v2690_v42, %v2722_v6  ;;  %v2747_v52 = vcombine.high %v2690_v42, %v2722_v6  ;;  %v2697_v30 = vrot.slane %v2683_v36, %v15765_v3  ;;  %v2715_v40 = vcombine.high %v2658_v54, %v2674_v55  ;;  %v226_v42 = vpop.permute.xlu1 %225  ;;  %v224_v6 = vpop.permute.xlu0 %223 }
 0xd12   :  { %v2826_v14 = vrot.slane %v2818_v2, %v15765_v3  ;;  %v2858_v63 = vrot.slane %v2850_v48, %v15765_v3  ;;  %v2833_v19 = vrot.slane %v2819_v32, %v15765_v3  ;;  %v2865_v20 = vrot.slane %v2851_v39, %v15765_v3 }
 0xd13   :  { %v15053_v7 = vpack.c.bf16 %v2746_v50, %v2610_v53  ;;  %v15056_v22 = vpack.c.bf16 %v2747_v52, %v2611_v46  ;;  %v2729_v17 = vrot.slane %v2715_v40, %v15765_v3 }
 0xd14   :  { %v16567_v59 = vcombine.low %v2826_v14, %v2858_v63  ;;  %v16569_v27 = vcombine.high %v2826_v14, %v2858_v63  ;;  %v16583_v26 = vcombine.low %v2833_v19, %v2865_v20  ;;  %v16585_v23 = vcombine.high %v2833_v19, %v2865_v20 }
 0xd15   :  { %6080 = vrot.lane.b32.xlu1 %v16467_v41, %s15561_s18  ;;  %15054 = vmatpush3.bf16.msra.mxu0 %v15053_v7  ;;  %v2748_v54 = vcombine.low %v2697_v30, %v2729_v17  ;;  %v2749_v55 = vcombine.high %v2697_v30, %v2729_v17  ;;  %v239_v2 = vpop.permute.xlu1 %238  ;;  %v241_v4 = vpop.permute.xlu0 %240 }
 0xd16   :  { %15057 = vmatpush3.bf16.msra.mxu1 %v15056_v22  ;;  %14542 = vmatprep.subr.mxu0 %v15560_v51  ;;  %v986_v7 = vcombine.low %v16447_v29, %v241_v4  ;;  %v987_v22 = vcombine.high %v16447_v29, %v241_v4  ;;  %v850_v63 = vcombine.low %v16455_v35, %v239_v2 }
 0xd17   :  { %14551 = vmatprep.subr.mxu1 %v15560_v51  ;;  %v15059_v32 = vpack.c.bf16 %v2748_v54, %v2612_v10  ;;  %v15062_v39 = vpack.c.bf16 %v2749_v55, %v2613_v25  ;;  %v851_v36 = vcombine.high %v16455_v35, %v239_v2 }
 0xd18   :  { %v994_v17 = vrot.slane %v986_v7, %v15762_v60  ;;  %v1001_v54 = vrot.slane %v987_v22, %v15762_v60  ;;  %v858_v55 = vrot.slane %v850_v63, %v15762_v60 }
 0xd19   :  { %14543 = vmatpush3.msk.msra.mxu0 %vm6736_vm7, %v16567_v59  ;;  %v254_v47 = vpop.permute.xlu1 %253  ;;  %v256_v48 = vpop.permute.xlu0 %255 }
 0xd1a   :  { %14552 = vmatpush3.msk.msra.mxu1 %vm6736_vm7, %v16569_v27  ;;  %15058 = vmatprep.subr.bf16.mxu0 %v15569_v5  ;;  %v866_v38 = vcombine.low %v224_v6, %v254_v47  ;;  %v867_v25 = vcombine.high %v224_v6, %v254_v47 }
 0xd1b   :  { %15061 = vmatprep.subr.bf16.mxu1 %v15569_v5 }
 0xd1c   :  { %v874_v19 = vrot.slane %v866_v38, %v15762_v60  ;;  %v881_v20 = vrot.slane %v867_v25, %v15762_v60 }
 0xd1d   :  { %v16595_v50 = vpop.permute.xlu1 %6068 }
 0xd1e   :  { %v914_v4 = vcombine.low %v858_v55, %v874_v19  ;;  %v915_v47 = vcombine.high %v858_v55, %v874_v19 }
 0xd22   :  { %6074 = vrot.lane.b32.xlu0 %v16467_v41, %s15559_s3 }
 0xd5c   :  { %v6715_v52 = vpop.xlane.xlu0 %6714 }
 0xd5d   :  { %15394 = vrcp.f32 %v6715_v52 }
 0xd5e   :  { %v6718_v53 = vpop.xlane.xlu1 %6717 }
 0xd5f   :  { %15396 = vrcp.f32 %v6718_v53 }
 0xd67   :  { %v15395_v46 = vpop.eup %15394 }
 0xd68   :  { %v6726_v14 = vmul.f32 %v15395_v46, %v16481_v56  ;;  %v1002_v56 = vcombine.low %v226_v42, %v256_v48 }
 0xd69   :  { %v15397_v10 = vpop.eup %15396 }
 0xd6a   :  { %14545 = vmatmul.mubr.msk.f32.vlgmr.msra.gmra.mrb[26].mxu0 %vm6688_vm6, %v6726_v14  ;;  %v6728_v45 = vmul.f32 %v15397_v10, %v16487_v18  ;;  %v1003_v18 = vcombine.high %v226_v42, %v256_v48  ;;  %v1010_v30 = vrot.slane %v1002_v56, %v15762_v60  ;;  %v929_v56 = vrot.slane %v915_v47, %v15765_v3 }
 0xd6b   :  { %15060 = vmatpush3.bf16.msra.mxu0 %v15059_v32  ;;  %14562 = vmatprep.mubr.msk.f32.mxu0 %vm15562_vm1, %v15560_v51  ;;  %v865_v32 = vrot.slane %v851_v36, %v15762_v60 }
 0xd6c   :  { %14554 = vmatmul.mubr.msk.f32.vlgmr.msra.gmra.mrb[32].mxu1 %vm6688_vm6, %v6728_v45  ;;  %14560 = vmatprep.subr.mxu0 %v15560_v51  ;;  %v1017_v40 = vrot.slane %v1003_v18, %v15762_v60  ;;  %v1051_v42 = vcombine.high %v994_v17, %v1010_v30  ;;  %v922_v45 = vrot.slane %v914_v4, %v15765_v3 }
 0xd6d   :  { %15063 = vmatpush3.bf16.msra.mxu1 %v15062_v39  ;;  %14571 = vmatprep.mubr.msk.f32.mxu1 %vm15562_vm1, %v15560_v51  ;;  %v1050_v39 = vcombine.low %v994_v17, %v1010_v30  ;;  %v930_v48 = vcombine.low %v865_v32, %v881_v20  ;;  %v931_v52 = vcombine.high %v865_v32, %v881_v20 }
 0xd6e   :  { %14569 = vmatprep.subr.mxu1 %v15560_v51  ;;  %v1066_v6 = vcombine.low %v1001_v54, %v1017_v40  ;;  %v1067_v2 = vcombine.high %v1001_v54, %v1017_v40  ;;  %v1065_v46 = vrot.slane %v1051_v42, %v15765_v3  ;;  %v13748_v36 = vcombine.low %v922_v45, %v929_v56 }
 0xd6f   :  { %14561 = vmatpush3.msk.msra.mxu0 %vm6736_vm7, %v16583_v26  ;;  %v1058_v53 = vrot.slane %v1050_v39, %v15765_v3  ;;  %v938_v18 = vrot.slane %v930_v48, %v15765_v3  ;;  %v945_v38 = vrot.slane %v931_v52, %v15765_v3  ;;  %v13750_v30 = vcombine.high %v922_v45, %v929_v56 }
 0xd70   :  { %15064 = vmatprep.subr.bf16.mxu0 %v15569_v5  ;;  %v1074_v14 = vrot.slane %v1066_v6, %v15765_v3  ;;  %v1081_v10 = vrot.slane %v1067_v2, %v15765_v3  ;;  %v2218_v32 = vrot.slane %v13748_v36, %v15762_v60 }
 0xd71   :  { %14570 = vmatpush3.msk.msra.mxu1 %vm6736_vm7, %v16585_v23  ;;  %v13756_v25 = vcombine.low %v1058_v53, %v1065_v46  ;;  %v13758_v7 = vcombine.high %v1058_v53, %v1065_v46  ;;  %v13752_v40 = vcombine.low %v938_v18, %v945_v38  ;;  %v13754_v19 = vcombine.high %v938_v18, %v945_v38 }
 0xd72   :  { %15068 = vmatprep.subr.bf16.mxu1 %v15569_v5  ;;  %v13760_v22 = vcombine.low %v1074_v14, %v1081_v10  ;;  %v13762_v63 = vcombine.high %v1074_v14, %v1081_v10  ;;  %v2234_v39 = vrot.slane %v13750_v30, %v15762_v60 }
 0xd73   :  { %v2354_v20 = vrot.slane %v13756_v25, %v15762_v60  ;;  %v2370_v17 = vrot.slane %v13758_v7, %v15762_v60  ;;  %v2250_v42 = vrot.slane %v13752_v40, %v15762_v60  ;;  %v2266_v6 = vrot.slane %v13754_v19, %v15762_v60 }
 0xd74   :  { %v2386_v54 = vrot.slane %v13760_v22, %v15762_v60  ;;  %v2402_v55 = vrot.slane %v13762_v63, %v15762_v60  ;;  %v2274_v47 = vcombine.low %v2218_v32, %v2234_v39  ;;  %v7040_v22 = vrot.slane %v16341_v43, 4 }
 0xd75   :  { %v2410_v2 = vcombine.low %v2354_v20, %v2370_v17  ;;  %v2306_v48 = vcombine.low %v2250_v42, %v2266_v6  ;;  %v2411_v63 = vcombine.high %v2354_v20, %v2370_v17 }
 0xd76   :  { %v2442_v4 = vcombine.low %v2386_v54, %v2402_v55  ;;  %v2282_v46 = vrot.slane %v2274_v47, %v15765_v3  ;;  %v2443_v36 = vcombine.high %v2386_v54, %v2402_v55 }
 0xd77   :  { %v2418_v52 = vrot.slane %v2410_v2, %v15765_v3  ;;  %v2314_v14 = vrot.slane %v2306_v48, %v15765_v3  ;;  %v2307_v48 = vcombine.high %v2250_v42, %v2266_v6  ;;  %v2425_v55 = vrot.slane %v2411_v63, %v15765_v3 }
 0xd78   :  { %v2450_v53 = vrot.slane %v2442_v4, %v15765_v3  ;;  %v2275_v4 = vcombine.high %v2218_v32, %v2234_v39 }
 0xd79   :  { %v2338_v56 = vcombine.low %v2282_v46, %v2314_v14  ;;  %v2339_v43 = vcombine.high %v2282_v46, %v2314_v14  ;;  %v2321_v6 = vrot.slane %v2307_v48, %v15765_v3 }
 0xd7a   :  { %v2474_v45 = vcombine.low %v2418_v52, %v2450_v53  ;;  %v2475_v19 = vcombine.high %v2418_v52, %v2450_v53  ;;  %v2457_v52 = vrot.slane %v2443_v36, %v15765_v3 }
 0xd7b   :  { %v7041_v7 = vrot.slane %v2338_v56, 4  ;;  %v7127_v53 = vrot.slane %v2339_v43, 4 }
 0xd7c   :  { %v16645_v18 = vrot.slane %v2474_v45, 4  ;;  %v2476_v63 = vcombine.low %v2425_v55, %v2457_v52 }
 0xd7d   :  { %v7042_v56 = vsel %vm6736_vm7, %v7040_v22, %v7041_v7 }
 0xd7e   :  { %v7044_v40 = vsel %vm6736_vm7, %v7041_v7, %v16645_v18  ;;  %v7126_v7 = vrot.slane %v16343_v62, 4 }
 0xd7f   :  { %v15065_v54 = vpack.c.bf16 %v7044_v40, %v7042_v56 }
 0xd91   :  { %v6721_v10 = vpop.xlane.xlu1 %6720 }
 0xd92   :  { %15398 = vrcp.f32 %v6721_v10 }
 0xd95   :  { %v6081_v38 = vpop.permute.xlu1 %6080 }
 0xd96   :  { %v6168_v30 = vcombine.low %v16595_v50, %v6081_v38  ;;  %v6169_v47 = vcombine.high %v16595_v50, %v6081_v38  ;;  %v7129_v50 = vrot.slane %v2475_v19, 4 }
 0xd98   :  { %v6176_v32 = vrot.slane %v6168_v30, %v15762_v60  ;;  %v6183_v39 = vrot.slane %v6169_v47, %v15762_v60  ;;  %v7130_v22 = vsel %vm6736_vm7, %v7127_v53, %v7129_v50  ;;  %v7128_v47 = vsel %vm6736_vm7, %v7126_v7, %v7127_v53 }
 0xd99   :  { %v6724_v25 = vpop.xlane.xlu0 %6723  ;;  %v15069_v43 = vpack.c.bf16 %v7130_v22, %v7128_v47 }
 0xd9a   :  { %15400 = vrcp.f32 %v6724_v25 }
 0xd9c   :  { %v15399_v2 = vpop.eup %15398 }
 0xd9d   :  { %v6075_v10 = vpop.permute.xlu0 %6074  ;;  %v6730_v45 = vmul.f32 %v15399_v2, %v16527_v24 }
 0xd9e   :  { %v6152_v20 = vcombine.low %v16467_v41, %v6075_v10  ;;  %v6153_v17 = vcombine.high %v16467_v41, %v6075_v10  ;;  %v2289_v41 = vrot.slane %v2275_v4, %v15765_v3 }
 0xd9f   :  { %14563 = vmatmul.mubr.msk.f32.vlgmr.msra.gmra.mrb[28].mxu0 %vm6688_vm6, %v6730_v45 }
 0xda0   :  { %v6160_v24 = vrot.slane %v6152_v20, %v15762_v60  ;;  %v6167_v42 = vrot.slane %v6153_v17, %v15762_v60  ;;  %15067 = vmatpush3.bf16.xpose.msk.msra.mxu0 %vm16321_vm5, %v15065_v54  ;;  %14580 = vmatprep.mubr.msk.f32.mxu0 %vm15562_vm1, %v15560_v51  ;;  %v2340_v48 = vcombine.low %v2289_v41, %v2321_v6  ;;  %v7215_v20 = vrot.slane %v2476_v63, 4 }
 0xda1   :  { %14578 = vmatprep.subr.mxu0 %v15560_v51  ;;  %v2477_v17 = vcombine.high %v2425_v55, %v2457_v52  ;;  %v7212_v52 = vrot.slane %v16336_v15, 4 }
 0xda2   :  { %v6184_v46 = vcombine.low %v6160_v24, %v6176_v32  ;;  %v6185_v14 = vcombine.high %v6160_v24, %v6176_v32  ;;  %v6200_v38 = vcombine.low %v6167_v42, %v6183_v39  ;;  %v6201_v25 = vcombine.high %v6167_v42, %v6183_v39 }
 0xda3   :  { %v2341_v24 = vcombine.high %v2289_v41, %v2321_v6  ;;  %v7213_v55 = vrot.slane %v2340_v48, 4  ;;  %v7298_v6 = vrot.slane %v16339_v21, 4 }
 0xda4   :  { %v15401_v36 = vpop.eup %15400  ;;  %v6192_v30 = vrot.slane %v6184_v46, %v15765_v3  ;;  %v6199_v40 = vrot.slane %v6185_v14, %v15765_v3  ;;  %v6208_v19 = vrot.slane %v6200_v38, %v15765_v3  ;;  %v6215_v2 = vrot.slane %v6201_v25, %v15765_v3 }
 0xda5   :  { %v6732_v4 = vmul.f32 %v15401_v36, %v16539_v37  ;;  %v7216_v14 = vsel %vm6736_vm7, %v7213_v55, %v7215_v20  ;;  %v7301_v38 = vrot.slane %v2477_v17, 4  ;;  %v7299_v25 = vrot.slane %v2341_v24, 4 }
 0xda6   :  { %v6288_v10 = vcombine.low %v6192_v30, %v6199_v40  ;;  %v13862_v45 = vcombine.high %v6192_v30, %v6199_v40  ;;  %v6304_v62 = vcombine.low %v6208_v19, %v6215_v2  ;;  %v13863_v56 = vcombine.high %v6208_v19, %v6215_v2 }
 0xda7   :  { %14572 = vmatmul.mubr.msk.f32.vlgmr.msra.gmra.mrb[34].mxu1 %vm6688_vm6, %v6732_v4  ;;  %v7214_v41 = vsel %vm6736_vm7, %v7212_v52, %v7213_v55  ;;  %v7302_v15 = vsel %vm6736_vm7, %v7299_v25, %v7301_v38  ;;  %v7300_v63 = vsel %vm6736_vm7, %v7298_v6, %v7299_v25 }
 0xda8   :  { %v6295_v54 = vrot.slane %v6288_v10, %v15762_v60  ;;  %v6303_v32 = vrot.slane %v13862_v45, %v15762_v60  ;;  %v6311_v39 = vrot.slane %v6304_v62, %v15762_v60  ;;  %v6319_v37 = vrot.slane %v13863_v56, %v15762_v60  ;;  %14579 = vmatpush3.xpose.msk.msra.mxu0 %vm4247_vm2, %v16645_v18 }
 0xda9   :  { %15071 = vmatpush3.bf16.xpose.msk.msra.mxu1 %vm16321_vm5, %v15069_v43  ;;  %15072 = vmatprep.subr.bf16.mxu0 %v15569_v5  ;;  %v15073_v22 = vpack.c.bf16 %v7216_v14, %v7214_v41  ;;  %v15077_v21 = vpack.c.bf16 %v7302_v15, %v7300_v63 }
 0xdaa   :  { %v6320_v42 = vcombine.low %v6295_v54, %v6303_v32  ;;  %v6336_v53 = vcombine.low %v6311_v39, %v6319_v37  ;;  %14587 = vmatprep.subr.mxu1 %v15560_v51  ;;  %14589 = vmatprep.mubr.msk.f32.mxu1 %vm15562_vm1, %v15560_v51  ;;  %v6321_v36 = vcombine.high %v6295_v54, %v6303_v32 }
 0xdab   :  { %v6337_v30 = vcombine.high %v6311_v39, %v6319_v37 }
 0xdac   :  { %v6328_v46 = vrot.slane %v6320_v42, %v15765_v3  ;;  %v6344_v18 = vrot.slane %v6336_v53, %v15765_v3 }
 0xdad   :  { %v6351_v19 = vrot.slane %v6337_v30, %v15765_v3 }
 0xdae   :  { %v6352_v7 = vcombine.low %v6328_v46, %v6344_v18  ;;  %v6353_v40 = vcombine.high %v6328_v46, %v6344_v18 }
 0xdb0   :  { %14581 = vmatmul.mubr.msk.f32.vlgmr.msra.gmra.mrb[30].mxu0 %vm4247_vm2, %v6352_v7 }
 0xdb1   :  { %14588 = vmatpush3.xpose.msk.msra.mxu1 %vm4247_vm2, %v7129_v50  ;;  %15075 = vmatpush3.bf16.xpose.msk.msra.mxu0 %vm16321_vm5, %v15073_v22  ;;  %v6335_v50 = vrot.slane %v6321_v36, %v15765_v3 }
 0xdb2   :  { %15076 = vmatprep.subr.bf16.mxu1 %v15569_v5  ;;  %14596 = vmatprep.subr.mxu0 %v15560_v51 }
 0xdb3   :  { %14598 = vmatprep.mubr.msk.f32.mxu0 %vm15562_vm1, %v15560_v51  ;;  %v6354_v2 = vcombine.low %v6335_v50, %v6351_v19  ;;  %v6355_v4 = vcombine.high %v6335_v50, %v6351_v19 }
 0xdb4   :  { %14590 = vmatmul.mubr.msk.f32.vlgmr.msra.gmra.mrb[36].mxu1 %vm4247_vm2, %v6353_v40 }
 0xdb5   :  { %15079 = vmatpush3.bf16.xpose.msk.msra.mxu1 %vm16321_vm5, %v15077_v21  ;;  %14607 = vmatprep.mubr.msk.f32.mxu1 %vm15562_vm1, %v15560_v51 }
 0xdb6   :  { %14605 = vmatprep.subr.mxu1 %v15560_v51 }
 0xdb9   :  { %14597 = vmatpush3.xpose.msk.msra.mxu0 %vm4247_vm2, %v7215_v20 }
 0xdba   :  { %15080 = vmatprep.subr.bf16.mxu0 %v15569_v5 }
 0xdbc   :  { %14599 = vmatmul.mubr.msk.f32.vlgmr.msra.gmra.mrb[32].mxu0 %vm4247_vm2, %v6354_v2 }
 0xdbd   :  { %14606 = vmatpush3.xpose.msk.msra.mxu1 %vm4247_vm2, %v7301_v38  ;;  %14616 = vmatprep.mubr.msk.f32.mxu0 %vm15562_vm1, %v15560_v51 }
 0xdbe   :  { %15083 = vmatprep.subr.bf16.mxu1 %v15569_v5 }
 0xdc0   :  { %14608 = vmatmul.mubr.msk.f32.vlgmr.msra.gmra.mrb[38].mxu1 %vm4247_vm2, %v6355_v4 }
 0xdc1   :  { %14625 = vmatprep.mubr.msk.f32.mxu1 %vm15562_vm1, %v15560_v51 }
 0xe3d   :  { %v6806_v47 = vpop.f32.mrb[26].mxu0 }
 0xe3e   :  { %v14546_v48 = vpop.f32.mrb[27].mxu0 }
 0xe3f   :  { %v6882_v10 = vpop.f32.mrb[32].mxu1 }
 0xe40   :  { %v14555_v45 = vpop.f32.mrb[33].mxu1 }
 0xe72   :  { %v6958_v62 = vpop.f32.mrb[28].mxu0 }
 0xe73   :  { %v7766_v56 = vcombine.low %v6806_v47, %v6958_v62  ;;  %v7767_v43 = vcombine.high %v6806_v47, %v6958_v62  ;;  %v14564_v20 = vpop.f32.mrb[29].mxu0 }
 0xe75   :  { %v7774_v37 = vrot.slane %v7766_v56, %v15762_v60  ;;  %v7781_v24 = vrot.slane %v7767_v43, %v15762_v60 }
 0xe7a   :  { %v7034_v17 = vpop.f32.mrb[34].mxu1 }
 0xe7b   :  { %v7782_v54 = vcombine.low %v6882_v10, %v7034_v17  ;;  %v7783_v32 = vcombine.high %v6882_v10, %v7034_v17  ;;  %v14573_v39 = vpop.f32.mrb[35].mxu1 }
 0xe7d   :  { %v7790_v42 = vrot.slane %v7782_v54, %v15762_v60  ;;  %v7797_v53 = vrot.slane %v7783_v32, %v15762_v60 }
 0xe7f   :  { %v7798_v55 = vcombine.low %v7774_v37, %v7790_v42  ;;  %v7799_v52 = vcombine.high %v7774_v37, %v7790_v42  ;;  %v7814_v46 = vcombine.low %v7781_v24, %v7797_v53  ;;  %v7815_v18 = vcombine.high %v7781_v24, %v7797_v53 }
 0xe81   :  { %v7806_v14 = vrot.slane %v7798_v55, %v15765_v3  ;;  %v7813_v38 = vrot.slane %v7799_v52, %v15765_v3  ;;  %v7822_v25 = vrot.slane %v7814_v46, %v15765_v3  ;;  %v7829_v7 = vrot.slane %v7815_v18, %v15765_v3 }
 0xe83   :  { %v7902_v41 = vcombine.low %v7806_v14, %v7813_v38  ;;  %v13912_v6 = vcombine.high %v7806_v14, %v7813_v38  ;;  %v7918_v22 = vcombine.low %v7822_v25, %v7829_v7  ;;  %v13913_v15 = vcombine.high %v7822_v25, %v7829_v7  ;;  %v7120_v63 = vpop.f32.mrb[30].mxu0  ;;  %v15511_v7 = vld [vmem:[%s18170_s6 + $0x20] ss:$0 sm:$0xff] }
 0xe84   :  { %v7382_v36 = vmul.f32 0.35355338, %v7120_v63  ;;  %v14582_v30 = vpop.f32.mrb[31].mxu0 }
 0xe85   :  { %v7909_v40 = vrot.slane %v7902_v41, %v15762_v60  ;;  %v7917_v21 = vrot.slane %v13912_v6, %v15762_v60  ;;  %v7925_v50 = vrot.slane %v7918_v22, %v15762_v60  ;;  %v7933_v19 = vrot.slane %v13913_v15, %v15762_v60 }
 0xe86   :  { %v7386_v2 = vsel %vm6688_vm6, %v7382_v36, -inf  ;;  %v16765_v41 = vadd.f32 %v15511_v7, %v15705_v34  ;;  %v16772_v6 = vadd.f32 %v15511_v7, %v15703_v33 }
 0xe87   :  { %v7206_v4 = vpop.f32.mrb[36].mxu1  ;;  %7387 = vmax.xlane.f32.xlu0 %v7386_v2  ;;  %v7934_v47 = vcombine.low %v7909_v40, %v7917_v21  ;;  %v7950_v48 = vcombine.low %v7925_v50, %v7933_v19  ;;  %v7935_v10 = vcombine.high %v7909_v40, %v7917_v21  ;;  %v7951_v45 = vcombine.high %v7925_v50, %v7933_v19 }
 0xe88   :  { %v7383_v62 = vmul.f32 0.35355338, %v7206_v4  ;;  %v14591_v56 = vpop.f32.mrb[37].mxu1 }
 0xe89   :  { %v16739_v43 = vrot.slane %v7934_v47, %v15765_v3  ;;  %v16742_v20 = vrot.slane %v7950_v48, %v15765_v3  ;;  %v16745_v17 = vrot.slane %v7935_v10, %v15765_v3  ;;  %v16748_v54 = vrot.slane %v7951_v45, %v15765_v3 }
 0xe8a   :  { %v7389_v32 = vsel %vm6688_vm6, %v7383_v62, -inf }
 0xe8b   :  { %7390 = vmax.xlane.f32.xlu1 %v7389_v32  ;;  %v7967_v39 = vcombine.high %v16739_v43, %v16742_v20  ;;  %v7968_v37 = vcombine.low %v16745_v17, %v16748_v54  ;;  %v7969_v24 = vcombine.high %v16745_v17, %v16748_v54  ;;  %v7966_v42 = vcombine.low %v16739_v43, %v16742_v20 }
 0xe8f   :  { %v7292_v53 = vpop.f32.mrb[32].mxu0 }
 0xe90   :  { %v7384_v55 = vmul.f32 0.35355338, %v7292_v53  ;;  %v14600_v52 = vpop.f32.mrb[33].mxu0 }
 0xe92   :  { %v7392_v46 = vsel %vm6688_vm6, %v7384_v55, -inf }
 0xe93   :  { %v7378_v18 = vpop.f32.mrb[38].mxu1  ;;  %7393 = vmax.xlane.f32.xlu0 %v7392_v46 }
 0xe94   :  { %v7385_v14 = vmul.f32 0.35355338, %v7378_v18  ;;  %v14609_v38 = vpop.f32.mrb[39].mxu1 }
 0xe96   :  { %v7395_v25 = vsel %vm6688_vm6, %v7385_v14, -inf }
 0xe97   :  { %7396 = vmax.xlane.f32.xlu0 %v7395_v25 }
 0xe9c   :  { %328 = vrot.lane.b32.xlu1 %v16765_v41, %s15553_s20 }
 0xea0   :  { %343 = vrot.lane.b32.xlu1 %v16765_v41, %s15570_s30 }
 0xea4   :  { %345 = vrot.lane.b32.xlu1 %v16772_v6, %s15570_s30 }
 0xea8   :  { %360 = vrot.lane.b32.xlu1 %v16772_v6, %s15571_s10 }
 0xeac   :  { %375 = vrot.lane.b32.xlu1 %v16772_v6, %s15572_s11 }
 0xead   :  { %330 = vrot.lane.b32.xlu0 %v16772_v6, %s15553_s20 }
 0xeb1   :  { %358 = vrot.lane.b32.xlu0 %v16765_v41, %s15571_s10 }
 0xeb5   :  { %373 = vrot.lane.b32.xlu0 %v16765_v41, %s15572_s11 }
 0xf14   :  { %v7388_v33 = vpop.xlane.xlu0 %7387 }
 0xf15   :  { %v7398_v34 = vsub.f32 %v7382_v36, %v7388_v33 }
 0xf17   :  { %v7402_v22 = vmul.f32 1.442695, %v7398_v34 }
 0xf18   :  { %v7391_v15 = vpop.xlane.xlu1 %7390 }
 0xf19   :  { %15402 = vpow2.f32 %v7402_v22  ;;  %v7399_v63 = vsub.f32 %v7383_v62, %v7391_v15 }
 0xf1b   :  { %v7404_v30 = vmul.f32 1.442695, %v7399_v63 }
 0xf1c   :  { %v329_v40 = vpop.permute.xlu1 %328 }
 0xf1d   :  { %15404 = vpow2.f32 %v7404_v30 }
 0xf20   :  { %v344_v21 = vpop.permute.xlu1 %343  ;;  %v7394_v50 = vpop.xlane.xlu0 %7393 }
 0xf21   :  { %v7400_v19 = vsub.f32 %v7384_v55, %v7394_v50 }
 0xf23   :  { %v16786_v2 = vpop.eup %15402  ;;  %v7406_v4 = vmul.f32 1.442695, %v7400_v19 }
 0xf24   :  { %v346_v47 = vpop.permute.xlu1 %345  ;;  %v7397_v48 = vpop.xlane.xlu0 %7396  ;;  %v7410_v10 = vsel %vm6688_vm6, %v16786_v2, 0.0 }
 0xf25   :  { %15406 = vpow2.f32 %v7406_v4  ;;  %v7401_v36 = vsub.f32 %v7385_v14, %v7397_v48  ;;  %7411 = vadd.xlane.f32.xlu0 %v7410_v10 }
 0xf27   :  { %v16790_v45 = vpop.eup %15404  ;;  %v7408_v62 = vmul.f32 1.442695, %v7401_v36 }
 0xf28   :  { %v361_v56 = vpop.permute.xlu1 %360  ;;  %v7413_v32 = vsel %vm6688_vm6, %v16790_v45, 0.0  ;;  %v331_v53 = vpop.permute.xlu0 %330 }
 0xf29   :  { %15408 = vpow2.f32 %v7408_v62  ;;  %7414 = vadd.xlane.f32.xlu1 %v7413_v32  ;;  %v1666_v55 = vcombine.low %v331_v53, %v361_v56  ;;  %v1667_v52 = vcombine.high %v331_v53, %v361_v56  ;;  %v15512_v56 = vld [vmem:[%s18169_s5] sm:$0xff] }
 0xf2b   :  { %v1674_v14 = vrot.slane %v1666_v55, %v15762_v60  ;;  %v1681_v34 = vrot.slane %v1667_v52, %v15762_v60 }
 0xf2c   :  { %v376_v46 = vpop.permute.xlu1 %375  ;;  %v359_v18 = vpop.permute.xlu0 %358 }
 0xf2d   :  { %v1682_v38 = vcombine.low %v346_v47, %v376_v46  ;;  %v1683_v25 = vcombine.high %v346_v47, %v376_v46  ;;  %v1530_v7 = vcombine.low %v329_v40, %v359_v18  ;;  %v1531_v63 = vcombine.high %v329_v40, %v359_v18  ;;  %v15513_v40 = vld [vmem:[%s18169_s5 + $0x8] sm:$0xff] }
 0xf2e   :  { %v16809_v32 = vpack.i.bf16 %v15513_v40, %v15512_v56 }
 0xf2f   :  { %v16794_v33 = vpop.eup %15406  ;;  %v1690_v22 = vrot.slane %v1682_v38, %v15762_v60  ;;  %v1697_v15 = vrot.slane %v1683_v25, %v15762_v60  ;;  %v1538_v10 = vrot.slane %v1530_v7, %v15762_v60  ;;  %v1545_v18 = vrot.slane %v1531_v63, %v15762_v60 }
 0xf30   :  { %v374_v30 = vpop.permute.xlu0 %373  ;;  %v7416_v50 = vsel %vm6688_vm6, %v16794_v33, 0.0 }
 0xf31   :  { %v1730_v19 = vcombine.low %v1674_v14, %v1690_v22  ;;  %v1731_v4 = vcombine.high %v1674_v14, %v1690_v22  ;;  %v1746_v48 = vcombine.low %v1681_v34, %v1697_v15  ;;  %v1747_v47 = vcombine.high %v1681_v34, %v1697_v15  ;;  %7417 = vadd.xlane.f32.xlu0 %v7416_v50 }
 0xf32   :  { %v1546_v36 = vcombine.low %v344_v21, %v374_v30  ;;  %v1547_v62 = vcombine.high %v344_v21, %v374_v30 }
 0xf33   :  { %v16811_v53 = vpop.eup %15408  ;;  %v1738_v55 = vrot.slane %v1730_v19, %v15765_v3  ;;  %v1745_v52 = vrot.slane %v1731_v4, %v15765_v3  ;;  %v1754_v46 = vrot.slane %v1746_v48, %v15765_v3  ;;  %v1761_v21 = vrot.slane %v1747_v47, %v15765_v3 }
 0xf34   :  { %v1554_v38 = vrot.slane %v1546_v36, %v15762_v60  ;;  %v1561_v25 = vrot.slane %v1547_v62, %v15762_v60  ;;  %v7419_v7 = vsel %vm6688_vm6, %v16811_v53, 0.0 }
 0xf35   :  { %v13796_v14 = vcombine.low %v1738_v55, %v1745_v52  ;;  %v13798_v34 = vcombine.high %v1738_v55, %v1745_v52  ;;  %v13800_v22 = vcombine.low %v1754_v46, %v1761_v21  ;;  %v13802_v15 = vcombine.high %v1754_v46, %v1761_v21  ;;  %7420 = vadd.xlane.f32.xlu0 %v7419_v7 }
 0xf36   :  { %v1594_v30 = vcombine.low %v1538_v10, %v1554_v38  ;;  %v1595_v50 = vcombine.high %v1538_v10, %v1554_v38  ;;  %v1610_v19 = vcombine.low %v1545_v18, %v1561_v25  ;;  %v1611_v4 = vcombine.high %v1545_v18, %v1561_v25 }
 0xf37   :  { %v3034_v48 = vrot.slane %v13796_v14, %v15762_v60  ;;  %v3050_v63 = vrot.slane %v13798_v34, %v15762_v60  ;;  %v3066_v47 = vrot.slane %v13800_v22, %v15762_v60  ;;  %v3082_v36 = vrot.slane %v13802_v15, %v15762_v60 }
 0xf38   :  { %v1602_v62 = vrot.slane %v1594_v30, %v15765_v3  ;;  %v1609_v56 = vrot.slane %v1595_v50, %v15765_v3  ;;  %v1618_v40 = vrot.slane %v1610_v19, %v15765_v3  ;;  %v1625_v55 = vrot.slane %v1611_v4, %v15765_v3 }
 0xf39   :  { %v3090_v52 = vcombine.low %v3034_v48, %v3050_v63  ;;  %v3091_v10 = vcombine.high %v3034_v48, %v3050_v63  ;;  %v3122_v46 = vcombine.low %v3066_v47, %v3082_v36  ;;  %v3123_v21 = vcombine.high %v3066_v47, %v3082_v36 }
 0xf3a   :  { %v13788_v18 = vcombine.low %v1602_v62, %v1609_v56  ;;  %v13790_v38 = vcombine.high %v1602_v62, %v1609_v56  ;;  %v13792_v25 = vcombine.low %v1618_v40, %v1625_v55  ;;  %v13794_v7 = vcombine.high %v1618_v40, %v1625_v55  ;;  %15291 = vrot.lane.b32.xlu1 %v16809_v32, %s15555_s28 }
 0xf3b   :  { %v3098_v14 = vrot.slane %v3090_v52, %v15765_v3  ;;  %v3130_v34 = vrot.slane %v3122_v46, %v15765_v3  ;;  %v3105_v22 = vrot.slane %v3091_v10, %v15765_v3  ;;  %v3137_v15 = vrot.slane %v3123_v21, %v15765_v3 }
 0xf3c   :  { %v2898_v30 = vrot.slane %v13788_v18, %v15762_v60  ;;  %v2914_v50 = vrot.slane %v13790_v38, %v15762_v60  ;;  %v2930_v19 = vrot.slane %v13792_v25, %v15762_v60  ;;  %v2946_v4 = vrot.slane %v13794_v7, %v15762_v60 }
 0xf3d   :  { %v3156_v48 = vcombine.low %v3105_v22, %v3137_v15  ;;  %v3157_v63 = vcombine.high %v3105_v22, %v3137_v15  ;;  %v3154_v40 = vcombine.low %v3098_v14, %v3130_v34  ;;  %v3155_v55 = vcombine.high %v3098_v14, %v3130_v34 }
 0xf3e   :  { %v2954_v47 = vcombine.low %v2898_v30, %v2914_v50  ;;  %v2955_v36 = vcombine.high %v2898_v30, %v2914_v50  ;;  %v2986_v62 = vcombine.low %v2930_v19, %v2946_v4  ;;  %v2987_v56 = vcombine.high %v2930_v19, %v2946_v4  ;;  %8040 = vrot.lane.b32.xlu1 %v7967_v39, %s15566_s25 }
 0xf3f   :  { %v7432_v18 = vrot.slane %v16567_v59, 4  ;;  %v7435_v15 = vrot.slane %v3154_v40, 4  ;;  %v7516_v30 = vrot.slane %v16569_v27, 4  ;;  %v7519_v39 = vrot.slane %v3155_v55, 4  ;;  %v15515_v59 = vld [vmem:[%s18169_s5 + $0x18] sm:$0xff] }
 0xf40   :  { %v2962_v52 = vrot.slane %v2954_v47, %v15765_v3  ;;  %v2994_v10 = vrot.slane %v2986_v62, %v15765_v3  ;;  %v2969_v46 = vrot.slane %v2955_v36, %v15765_v3  ;;  %v3001_v21 = vrot.slane %v2987_v56, %v15765_v3  ;;  %v15514_v47 = vld [vmem:[%s18169_s5 + $0x10] sm:$0xff] }
 0xf41   :  { %v7600_v14 = vrot.slane %v16583_v26, 4  ;;  %v16857_v36 = vpack.i.bf16 %v15515_v59, %v15514_v47  ;;  %v7603_v62 = vrot.slane %v3156_v48, 4  ;;  %v7684_v27 = vrot.slane %v16585_v23, 4 }
 0xf42   :  { %v3018_v38 = vcombine.low %v2962_v52, %v2994_v10  ;;  %v3019_v25 = vcombine.high %v2962_v52, %v2994_v10  ;;  %v3020_v7 = vcombine.low %v2969_v46, %v3001_v21  ;;  %v3021_v22 = vcombine.high %v2969_v46, %v3001_v21 }
 0xf43   :  { %v7687_v56 = vrot.slane %v3157_v63, 4 }
 0xf44   :  { %v7433_v34 = vrot.slane %v3018_v38, 4  ;;  %v7517_v50 = vrot.slane %v3019_v25, 4  ;;  %v7601_v19 = vrot.slane %v3020_v7, 4  ;;  %v7685_v4 = vrot.slane %v3021_v22, 4 }
 0xf46   :  { %v7434_v26 = vsel %vm6736_vm7, %v7432_v18, %v7433_v34  ;;  %v7436_v40 = vsel %vm6736_vm7, %v7433_v34, %v7435_v15  ;;  %v7518_v55 = vsel %vm6736_vm7, %v7516_v30, %v7517_v50  ;;  %v7520_v52 = vsel %vm6736_vm7, %v7517_v50, %v7519_v39 }
 0xf47   :  { %v15081_v10 = vpack.c.bf16 %v7436_v40, %v7434_v26  ;;  %v15084_v46 = vpack.c.bf16 %v7520_v52, %v7518_v55  ;;  %v7602_v21 = vsel %vm6736_vm7, %v7600_v14, %v7601_v19  ;;  %v7604_v38 = vsel %vm6736_vm7, %v7601_v19, %v7603_v62 }
 0xf48   :  { %v15087_v25 = vpack.c.bf16 %v7604_v38, %v7602_v21  ;;  %v7686_v48 = vsel %vm6736_vm7, %v7684_v27, %v7685_v4  ;;  %v7688_v23 = vsel %vm6736_vm7, %v7685_v4, %v7687_v56 }
 0xf49   :  { %15082 = vmatpush3.bf16.msra.mxu0 %v15081_v10  ;;  %15085 = vmatpush3.bf16.msra.mxu1 %v15084_v46  ;;  %v15090_v63 = vpack.c.bf16 %v7688_v23, %v7686_v48 }
 0xf4a   :  { %14614 = vmatprep.subr.mxu0 %v15560_v51  ;;  %14623 = vmatprep.subr.mxu1 %v15560_v51 }
 0xf4b   :  { %15296 = vrot.lane.b32.xlu0 %v16857_v36, %s15555_s28 }
 0xf4d   :  { %14615 = vmatpush3.msk.msra.mxu0 %vm6736_vm7, %v7435_v15  ;;  %14624 = vmatpush3.msk.msra.mxu1 %vm6736_vm7, %v7519_v39 }
 0xf4e   :  { %15086 = vmatprep.subr.bf16.mxu0 %v15569_v5  ;;  %15089 = vmatprep.subr.bf16.mxu1 %v15569_v5 }
 0xf4f   :  { %8048 = vrot.lane.b32.xlu0 %v7968_v37, %s15567_s26 }
 0xf53   :  { %8056 = vrot.lane.b32.xlu0 %v7969_v24, %s15568_s29 }
 0xf57   :  { %8085 = vrot.lane.b32.xlu0 %v16355_v0, %s15555_s28 }
 0xfb2   :  { %v7412_v18 = vpop.xlane.xlu0 %7411 }
 0xfb3   :  { %15410 = vrcp.f32 %v7412_v18 }
 0xfb6   :  { %v7415_v7 = vpop.xlane.xlu1 %7414 }
 0xfb7   :  { %15412 = vrcp.f32 %v7415_v7 }
 0xfba   :  { %v15292_v24 = vpop.permute.xlu1 %15291 }
 0xfbb   :  { %v15293_v27 = vunpack.i.l.bf16 %v15292_v24 }
 0xfbd   :  { %v15411_v22 = vpop.eup %15410 }
 0xfbe   :  { %v7418_v15 = vpop.xlane.xlu0 %7417  ;;  %v7423_v30 = vmul.f32 %v15411_v22, %v16786_v2  ;;  %v8041_v14 = vpop.permute.xlu1 %8040 }
 0xfbf   :  { %15414 = vrcp.f32 %v7418_v15  ;;  %v8062_v19 = vsel %vm4247_vm2, %v7966_v42, %v8041_v14 }
 0xfc0   :  { %14617 = vmatmul.mubr.msk.f32.vlgmr.msra.gmra.mrb[34].mxu0 %vm6688_vm6, %v7423_v30 }
 0xfc1   :  { %v15413_v37 = vpop.eup %15412  ;;  %15088 = vmatpush3.bf16.msra.mxu0 %v15087_v25  ;;  %14634 = vmatprep.mubr.msk.f32.mxu0 %vm15562_vm1, %v15560_v51 }
 0xfc2   :  { %v7421_v17 = vpop.xlane.xlu0 %7420  ;;  %v7425_v54 = vmul.f32 %v15413_v37, %v16790_v45  ;;  %14632 = vmatprep.subr.mxu0 %v15560_v51 }
 0xfc3   :  { %15416 = vrcp.f32 %v7421_v17 }
 0xfc4   :  { %14626 = vmatmul.mubr.msk.f32.vlgmr.msra.gmra.mrb[40].mxu1 %vm6688_vm6, %v7425_v54 }
 0xfc5   :  { %15091 = vmatpush3.bf16.msra.mxu1 %v15090_v63  ;;  %14633 = vmatpush3.msk.msra.mxu0 %vm6736_vm7, %v7603_v62 }
 0xfc6   :  { %14641 = vmatprep.subr.mxu1 %v15560_v51  ;;  %v15297_v2 = vpop.permute.xlu0 %15296  ;;  %14643 = vmatprep.mubr.msk.f32.mxu1 %vm15562_vm1, %v15560_v51 }
 0xfc7   :  { %v15299_v25 = vunpack.i.h.bf16 %v15297_v2  ;;  %v15298_v48 = vunpack.i.l.bf16 %v15297_v2 }
 0xfc9   :  { %v15415_v39 = vpop.eup %15414  ;;  %14642 = vmatpush3.msk.msra.mxu1 %vm6736_vm7, %v7687_v56  ;;  %v15096_v17 = vpack.c.bf16 %v15299_v25, %v15298_v48 }
 0xfca   :  { %v8049_v45 = vpop.permute.xlu0 %8048  ;;  %v7427_v34 = vmul.f32 %v15415_v39, %v16794_v33  ;;  %v15294_v33 = vunpack.i.h.bf16 %v15292_v24 }
 0xfcb   :  { %v8064_v4 = vsel %vm5834_vm3, %v8062_v19, %v8049_v45 }
 0xfcc   :  { %14635 = vmatmul.mubr.msk.f32.vlgmr.msra.gmra.mrb[36].mxu0 %vm6688_vm6, %v7427_v34  ;;  %v15092_v56 = vpack.c.bf16 %v15294_v33, %v15293_v27 }
 0xfcd   :  { %v15417_v50 = vpop.eup %15416 }
 0xfce   :  { %v8057_v47 = vpop.permute.xlu0 %8056  ;;  %v7429_v59 = vmul.f32 %v15417_v50, %v16811_v53  ;;  %15093 = vmatprep.subr.bf16.mxu0 %v15092_v56 }
 0xfcf   :  { %v8066_v62 = vsel %vm5837_vm4, %v8064_v4, %v8057_v47  ;;  %15095 = vmatpush3.bf16.msra.mxu0 %v15092_v56 }
 0xfd0   :  { %14644 = vmatmul.mubr.msk.f32.vlgmr.msra.gmra.mrb[42].mxu1 %vm6688_vm6, %v7429_v59  ;;  %14654 = vmatprep.mubr.msk.f32.mxu0 %vm61_vm0, %v8066_v62 }
 0xfd1   :  { %15097 = vmatprep.subr.bf16.mxu0 %v15096_v17 }
 0xfd3   :  { %15099 = vmatpush3.bf16.msra.mxu0 %v15096_v17 }
0x1093   :  { %v7510_v26 = vpop.f32.mrb[34].mxu0 }
0x1094   :  { %v14618_v43 = vpop.f32.mrb[35].mxu0 }
0x1097   :  { %v7594_v20 = vpop.f32.mrb[40].mxu1 }
0x1098   :  { %v14627_v42 = vpop.f32.mrb[41].mxu1 }
0x109f   :  { %v7678_v40 = vpop.f32.mrb[36].mxu0 }
0x10a0   :  { %v7834_v55 = vcombine.low %v7510_v26, %v7678_v40  ;;  %v7835_v52 = vcombine.high %v7510_v26, %v7678_v40  ;;  %v14636_v10 = vpop.f32.mrb[37].mxu0 }
0x10a2   :  { %v7842_v23 = vrot.slane %v7834_v55, %v15762_v60  ;;  %v7849_v63 = vrot.slane %v7835_v52, %v15762_v60 }
0x10a3   :  { %v7762_v53 = vpop.f32.mrb[42].mxu1 }
0x10a4   :  { %v7850_v46 = vcombine.low %v7594_v20, %v7762_v53  ;;  %v7851_v21 = vcombine.high %v7594_v20, %v7762_v53  ;;  %v14645_v38 = vpop.f32.mrb[43].mxu1 }
0x10a6   :  { %v7858_v18 = vrot.slane %v7850_v46, %v15762_v60  ;;  %v7865_v7 = vrot.slane %v7851_v21, %v15762_v60 }
0x10a8   :  { %v7866_v22 = vcombine.low %v7842_v23, %v7858_v18  ;;  %v7867_v15 = vcombine.high %v7842_v23, %v7858_v18  ;;  %v7882_v30 = vcombine.low %v7849_v63, %v7865_v7  ;;  %v7883_v37 = vcombine.high %v7849_v63, %v7865_v7  ;;  %v8086_v23 = vpop.permute.xlu0 %8085 }
0x10aa   :  { %v7874_v54 = vrot.slane %v7866_v22, %v15765_v3  ;;  %v7881_v24 = vrot.slane %v7867_v15, %v15765_v3  ;;  %v7890_v39 = vrot.slane %v7882_v30, %v15765_v3  ;;  %v7897_v2 = vrot.slane %v7883_v37, %v15765_v3 }
0x10ac   :  { %v7970_v14 = vcombine.low %v7874_v54, %v7881_v24  ;;  %v13914_v45 = vcombine.high %v7874_v54, %v7881_v24  ;;  %v7986_v34 = vcombine.low %v7890_v39, %v7897_v2  ;;  %v13915_v50 = vcombine.high %v7890_v39, %v7897_v2 }
0x10ae   :  { %v7977_v19 = vrot.slane %v7970_v14, %v15762_v60  ;;  %v7985_v4 = vrot.slane %v13914_v45, %v15762_v60  ;;  %v7993_v47 = vrot.slane %v7986_v34, %v15762_v60  ;;  %v8001_v59 = vrot.slane %v13915_v50, %v15762_v60 }
0x10b0   :  { %v8002_v62 = vcombine.low %v7977_v19, %v7985_v4  ;;  %v8018_v33 = vcombine.low %v7993_v47, %v8001_v59  ;;  %v8003_v27 = vcombine.high %v7977_v19, %v7985_v4  ;;  %v8019_v56 = vcombine.high %v7993_v47, %v8001_v59  ;;  %v3172_v4 = vld [vmem:[%s18171_s7 + $0x10] sm:$0xff]  ;;  %v3175_v59 = vld [vmem:[%s18171_s7 + $0x28] sm:$0xff] }
0x10b2   :  { %v8010_v26 = vrot.slane %v8002_v62, %v15765_v3  ;;  %v8026_v43 = vrot.slane %v8018_v33, %v15765_v3  ;;  %v8017_v20 = vrot.slane %v8003_v27, %v15765_v3  ;;  %v8033_v42 = vrot.slane %v8019_v56, %v15765_v3 }
0x10b4   :  { %v8035_v40 = vcombine.high %v8010_v26, %v8026_v43  ;;  %v8036_v55 = vcombine.low %v8017_v20, %v8033_v42  ;;  %v8037_v52 = vcombine.high %v8017_v20, %v8033_v42  ;;  %v8034_v10 = vcombine.low %v8010_v26, %v8026_v43 }
0x10b6   :  { %8042 = vrot.lane.b32.xlu1 %v8035_v40, %s15566_s25 }
0x10ba   :  { %8050 = vrot.lane.b32.xlu1 %v8036_v55, %s15567_s26 }
0x10be   :  { %8058 = vrot.lane.b32.xlu1 %v8037_v52, %s15568_s29 }
0x1128   :  { %v8043_v53 = vpop.permute.xlu1 %8042 }
0x1129   :  { %v8063_v21 = vsel %vm4247_vm2, %v8034_v10, %v8043_v53 }
0x112c   :  { %v8051_v46 = vpop.permute.xlu1 %8050 }
0x112d   :  { %v8065_v38 = vsel %vm5834_vm3, %v8063_v21, %v8051_v46 }
0x1130   :  { %v8059_v25 = vpop.permute.xlu1 %8058 }
0x1131   :  { %v8067_v48 = vsel %vm5837_vm4, %v8065_v38, %v8059_v25 }
0x1132   :  { %14655 = vmatmul.mubr.msk.f32.vlgmr.msra.gmra.mrb[38].mxu0 %vm61_vm0, %v8067_v48 }
0x1205   :  { %v14656_v63 = vpop.f32.mrb[38].mxu0 }
0x1206   :  { %v8166_v18 = vadd.f32 %v14656_v63, %v8086_v23  ;;  %v8160_v7 = vpop.f32.mrb[39].mxu0 }
0x1207   :  { %v8161_v22 = vadd.f32 %v8160_v7, %v8086_v23 }
0x1208   :  { %v8170_v15 = vadd.f32 %v8166_v18, %v16284_v16 }
0x1209   :  { %v8169_v30 = vadd.f32 %v8161_v22, %v16263_v44  ;;  %v3170_v44 = vld [vmem:[%s18171_s7] sm:$0xff] }
0x120a   :  { %v8174_v37 = vsel %vm61_vm0, %v8170_v15, 0.0 }
0x120b   :  { %8175 = vadd.xlane.f32.xlu0 %v8174_v37  ;;  %v8171_v17 = vsel %vm61_vm0, %v8169_v30, 0.0  ;;  %v3176_v37 = vld [vmem:[%s18171_s7 + $0x30] sm:$0xff] }
0x120c   :  { %8172 = vadd.xlane.f32.xlu1 %v8171_v17  ;;  %v3177_v17 = vld [vmem:[%s18171_s7 + $0x38] sm:$0xff] }
0x1298   :  { %v8176_v54 = vpop.xlane.xlu0 %8175 }
0x1299   :  { %v8178_v24 = vmul.f32 0.03125, %v8176_v54  ;;  %v8173_v39 = vpop.xlane.xlu1 %8172  ;;  %v15120_v54 = vpack.c.bf16 %v3177_v17, %v3176_v37 }
0x129a   :  { %v8177_v2 = vmul.f32 0.03125, %v8173_v39  ;;  %v15516_v39 = vld [vmem:[%s18172_s8] sm:$0xf] }
0x129b   :  { %v8180_v14 = vsub.f32 %v8170_v15, %v8178_v24  ;;  %v8307_v24 = vsub.s32 3, %v15693_v28 }
0x129c   :  { %v8179_v45 = vsub.f32 %v8169_v30, %v8177_v2 }
0x129d   :  { %v8182_v34 = vmul.f32 %v8180_v14, %v8180_v14  ;;  %v16980_v2 = vrot.slane %v15516_v39, %v8307_v24 }
0x129e   :  { %v8181_v50 = vmul.f32 %v8179_v45, %v8179_v45 }
0x129f   :  { %v8186_v19 = vsel %vm61_vm0, %v8182_v34, 0.0 }
0x12a0   :  { %8187 = vadd.xlane.f32.xlu1 %v8186_v19  ;;  %v8183_v16 = vsel %vm61_vm0, %v8181_v50, 0.0 }
0x12a1   :  { %8184 = vadd.xlane.f32.xlu0 %v8183_v16 }
0x12b1   :  { %15306 = vrot.lane.b32.xlu1 %v16857_v36, %s15553_s20  ;;  %v3171_v36 = vld [vmem:[%s18171_s7 + $0x8] sm:$0xff] }
0x12b2   :  { %v15108_v47 = vpack.c.bf16 %v3171_v36, %v3170_v44 }
0x12b4   :  { %15109 = vmatprep.subr.bf16.mxu0 %v15108_v47 }
0x12b5   :  { %8197 = vrot.lane.b32.xlu1 %v16160_v58, %s15553_s20  ;;  %15111 = vmatpush3.bf16.msra.mxu0 %v15108_v47 }
0x12b7   :  { %15301 = vrot.lane.b32.xlu0 %v16809_v32, %s15553_s20 }
0x12b9   :  { %8219 = vrot.lane.b32.xlu1 %v16355_v0, %s15553_s20  ;;  %v3173_v0 = vld [vmem:[%s18171_s7 + $0x18] sm:$0xff] }
0x12ba   :  { %v15112_v32 = vpack.c.bf16 %v3173_v0, %v3172_v4 }
0x12bb   :  { %8202 = vrot.lane.b32.xlu0 %v16160_v58, %s15565_s24  ;;  %v3174_v58 = vld [vmem:[%s18171_s7 + $0x20] sm:$0xff] }
0x12bc   :  { %15113 = vmatprep.subr.bf16.mxu0 %v15112_v32  ;;  %v15116_v62 = vpack.c.bf16 %v3175_v59, %v3174_v58 }
0x12bd   :  { %15115 = vmatpush3.bf16.msra.mxu0 %v15112_v32 }
0x12be   :  { %15117 = vmatprep.subr.bf16.mxu0 %v15116_v62 }
0x12bf   :  { %8310 = vrot.lane.b32.xlu0 %v16980_v2, %s15553_s20 }
0x12c1   :  { %15119 = vmatpush3.bf16.msra.mxu0 %v15116_v62 }
0x12c2   :  { %15121 = vmatprep.subr.bf16.mxu0 %v15120_v54 }
0x12c5   :  { %15123 = vmatpush3.bf16.msra.mxu0 %v15120_v54 }
0x12c6   :  { %14709 = vmatprep.subr.mxu0 %v15560_v51 }
0x132d   :  { %v8188_v33 = vpop.xlane.xlu1 %8187 }
0x132e   :  { %v8190_v27 = vmul.f32 0.03125, %v8188_v33  ;;  %v8185_v56 = vpop.xlane.xlu0 %8184 }
0x132f   :  { %v8189_v26 = vmul.f32 0.03125, %v8185_v56 }
0x1330   :  { %v8192_v43 = vadd.f32 1e-05, %v8190_v27 }
0x1331   :  { %v8191_v20 = vadd.f32 1e-05, %v8189_v26  ;;  %v15307_v42 = vpop.permute.xlu1 %15306 }
0x1332   :  { %15418 = vrsqrt.f32 %v8192_v43  ;;  %v15302_v40 = vpop.permute.xlu0 %15301  ;;  %v15309_v55 = vunpack.i.h.bf16 %v15307_v42  ;;  %v15308_v52 = vunpack.i.l.bf16 %v15307_v42 }
0x1333   :  { %15420 = vrsqrt.f32 %v8191_v20  ;;  %v15304_v10 = vunpack.i.h.bf16 %v15302_v40  ;;  %v15303_v53 = vunpack.i.l.bf16 %v15302_v40 }
0x1334   :  { %v15104_v21 = vpack.c.bf16 %v15309_v55, %v15308_v52 }
0x1335   :  { %v15100_v46 = vpack.c.bf16 %v15304_v10, %v15303_v53  ;;  %v8198_v25 = vpop.permute.xlu1 %8197  ;;  %v13922_v53 = vld [vmem:[%s18168_s4 + $0x20] sm:$0xff] }
0x1336   :  { %v8203_v7 = vpop.permute.xlu0 %8202 }
0x1337   :  { %15101 = vmatprep.subr.bf16.mxu1 %v15100_v46 }
0x1338   :  { %15103 = vmatpush3.bf16.msra.mxu1 %v15100_v46  ;;  %v13923_v46 = vld [vmem:[%s18168_s4 + $0x28] sm:$0xff] }
0x1339   :  { %15105 = vmatprep.subr.bf16.mxu1 %v15104_v21 }
0x133a   :  { %v8311_v36 = vpop.permute.xlu0 %8310 }
0x133c   :  { %v15419_v38 = vpop.eup %15418  ;;  %15107 = vmatpush3.bf16.msra.mxu1 %v15104_v21  ;;  %v15124_v21 = vpack.c.bf16 %v13923_v46, %v13922_v53 }
0x133d   :  { %v15421_v48 = vpop.eup %15420  ;;  %v8196_v23 = vmul.f32 %v15419_v38, %v8180_v14  ;;  %v8220_v14 = vpop.permute.xlu1 %8219  ;;  %v13924_v38 = vld [vmem:[%s18168_s4 + $0x30] sm:$0xff] }
0x133e   :  { %v8195_v63 = vmul.f32 %v15421_v48, %v8179_v45  ;;  %15125 = vmatprep.subr.bf16.mxu1 %v15124_v21 }
0x133f   :  { %v8201_v18 = vmul.f32 %v8198_v25, %v8196_v23  ;;  %v17007_v23 = vpack.i.bf16 %v13923_v46, %v13922_v53 }
0x1340   :  { %v8200_v22 = vmul.f32 %v8198_v25, %v8195_v63  ;;  %v13925_v25 = vld [vmem:[%s18168_s4 + $0x38] sm:$0xff] }
0x1341   :  { %v8206_v30 = vadd.f32 %v8203_v7, %v8201_v18  ;;  %v15128_v48 = vpack.c.bf16 %v13925_v25, %v13924_v38 }
0x1342   :  { %v8205_v15 = vadd.f32 %v8203_v7, %v8200_v22 }
0x1344   :  { %14665 = vmatprep.mubr.msk.f32.mxu1 %vm61_vm0, %v8205_v15 }
0x1345   :  { %14666 = vmatmul.mubr.msk.f32.vlgmr.msra.gmra.mrb[44].mxu1 %vm61_vm0, %v8206_v30 }
0x1346   :  { %15127 = vmatpush3.bf16.msra.mxu1 %v15124_v21 }
0x1347   :  { %15129 = vmatprep.subr.bf16.mxu1 %v15128_v48 }
0x134a   :  { %15131 = vmatpush3.bf16.msra.mxu1 %v15128_v48 }
0x1418   :  { %v14667_v45 = vpop.f32.mrb[44].mxu1 }
0x1419   :  { %v8300_v34 = vadd.f32 %v14667_v45, %v8220_v14  ;;  %v8294_v50 = vpop.f32.mrb[45].mxu1 }
0x141a   :  { %v8295_v19 = vadd.f32 %v8294_v50, %v8220_v14 }
0x141b   :  { %v8304_v44 = vmax.f32 %v8300_v34, 0.0 }
0x141c   :  { %v8303_v16 = vmax.f32 %v8295_v19, 0.0 }
0x141e   :  { %14684 = vmatprep.mubr.msk.f32.mxu0 %vm8313_vm8, %v8303_v16  ;;  %v15517_v16 = vld [vmem:[%s18165_s1] sm:$0xff] }
0x141f   :  { %14685 = vmatmul.mubr.msk.f32.vlgmr.msra.gmra.mrb[40].mxu0 %vm8313_vm8, %v8304_v44 }
0x1420   :  { %14711 = vmatprep.mubr.msk.f32.mxu0 %vm15562_vm1, %v15560_v51 }
0x14f2   :  { %v14686_v4 = vpop.f32.mrb[40].mxu0 }
0x14f3   :  { %v8392_v47 = vadd.f32 %v14686_v4, %v8311_v36  ;;  %v8386_v0 = vpop.f32.mrb[41].mxu0 }
0x14f4   :  { %v8387_v32 = vadd.f32 %v8386_v0, %v8311_v36  ;;  %v15518_v36 = vld [vmem:[%s18165_s1 + $0x8] sm:$0xff] }
0x14f5   :  { %v8396_v58 = vadd.f32 %v8392_v47, %v8206_v30 }
0x14f6   :  { %v8395_v59 = vadd.f32 %v8387_v32, %v8205_v15 }
0x14f7   :  { %v8400_v62 = vsel %vm61_vm0, %v8396_v58, 0.0 }
0x14f8   :  { %8401 = vadd.xlane.f32.xlu0 %v8400_v62  ;;  %v8397_v33 = vsel %vm61_vm0, %v8395_v59, 0.0 }
0x14f9   :  { %8398 = vadd.xlane.f32.xlu1 %v8397_v33 }
0x1585   :  { %v8402_v27 = vpop.xlane.xlu0 %8401 }
0x1586   :  { %v8404_v56 = vmul.f32 0.03125, %v8402_v27  ;;  %v8399_v26 = vpop.xlane.xlu1 %8398  ;;  %v15315_v27 = vpack.i.bf16 %v13925_v25, %v13924_v38 }
0x1587   :  { %v8403_v43 = vmul.f32 0.03125, %v8399_v26 }
0x1588   :  { %v8406_v20 = vsub.f32 %v8396_v58, %v8404_v56 }
0x1589   :  { %v8405_v42 = vsub.f32 %v8395_v59, %v8403_v43 }
0x158a   :  { %v8408_v40 = vmul.f32 %v8406_v20, %v8406_v20 }
0x158b   :  { %v8407_v55 = vmul.f32 %v8405_v42, %v8405_v42 }
0x158c   :  { %v8412_v52 = vsel %vm61_vm0, %v8408_v40, 0.0 }
0x158d   :  { %8413 = vadd.xlane.f32.xlu1 %v8412_v52  ;;  %v8409_v10 = vsel %vm61_vm0, %v8407_v55, 0.0 }
0x158e   :  { %8410 = vadd.xlane.f32.xlu0 %v8409_v10 }
0x15a4   :  { %8425 = vrot.lane.b32.xlu0 %v16980_v2, %s15555_s28 }
0x15a8   :  { %15311 = vrot.lane.b32.xlu0 %v17007_v23, %s15553_s20 }
0x161a   :  { %v8414_v63 = vpop.xlane.xlu1 %8413 }
0x161b   :  { %v8416_v18 = vmul.f32 0.03125, %v8414_v63  ;;  %v8411_v7 = vpop.xlane.xlu0 %8410 }
0x161c   :  { %v8415_v22 = vmul.f32 0.03125, %v8411_v7 }
0x161d   :  { %v8418_v15 = vadd.f32 1e-05, %v8416_v18 }
0x161e   :  { %v8417_v30 = vadd.f32 1e-05, %v8415_v22 }
0x161f   :  { %15422 = vrsqrt.f32 %v8418_v15  ;;  %v8426_v14 = vpop.permute.xlu0 %8425 }
0x1620   :  { %15424 = vrsqrt.f32 %v8417_v30 }
0x1623   :  { %v15312_v59 = vpop.permute.xlu0 %15311 }
0x1624   :  { %v15314_v62 = vunpack.i.h.bf16 %v15312_v59  ;;  %v15313_v33 = vunpack.i.l.bf16 %v15312_v59 }
0x1626   :  { %v15132_v56 = vpack.c.bf16 %v15314_v62, %v15313_v33 }
0x1628   :  { %15133 = vmatprep.subr.bf16.mxu1 %v15132_v56 }
0x1629   :  { %v15423_v37 = vpop.eup %15422 }
0x162a   :  { %v15425_v17 = vpop.eup %15424  ;;  %v8422_v54 = vmul.f32 %v15423_v37, %v8406_v20 }
0x162b   :  { %v8421_v39 = vmul.f32 %v15425_v17, %v8405_v42 }
0x162c   :  { %v8424_v45 = vmul.f32 %v8422_v54, %v16980_v2 }
0x162d   :  { %v8423_v34 = vmul.f32 %v8421_v39, %v16980_v2  ;;  %v13938_v2 = vld [vmem:[%s18172_s8 + $0x4] sm:$0xf] }
0x162e   :  { %v17013_v50 = vadd.f32 %v8426_v14, %v8424_v45  ;;  %v17034_v47 = vrot.slane %v13938_v2, %v3183_v31 }
0x162f   :  { %v17015_v19 = vadd.f32 %v8426_v14, %v8423_v34 }
0x1630   :  { %v8452_v4 = vadd.f32 %v15518_v36, %v17013_v50 }
0x1631   :  { %v8451_v44 = vadd.f32 %v15517_v16, %v17015_v19 }
0x1633   :  { %14695 = vmatprep.mubr.msk.f32.mxu1 %vm61_vm0, %v8451_v44 }
0x1634   :  { %14696 = vmatmul.mubr.msk.f32.vlgmr.msra.gmra.mrb[46].mxu1 %vm61_vm0, %v8452_v4 }
0x1635   :  { %14706 = vmatprep.mubr.msk.f32.mxu1 %vm61_vm0, %v17015_v19  ;;  %15135 = vmatpush3.bf16.msra.mxu1 %v15132_v56 }
0x1707   :  { %v17036_v0 = vpop.f32.mrb[46].mxu1 }
0x1708   :  { %v8529_v32 = vpop.f32.mrb[47].mxu1 }
0x1709   :  { %v8530_v58 = vadd.f32 %v8529_v32, %v17034_v47 }
0x170b   :  { %8671 = vrot.lane.b32.xlu0 %v8530_v58, %s15554_s27  ;;  %8659 = vrot.lane.b32.xlu1 %v8530_v58, %s15555_s28 }
0x170f   :  { %8647 = vrot.lane.b32.xlu0 %v8530_v58, %s15559_s3  ;;  %8665 = vrot.lane.b32.xlu1 %v8530_v58, %s15557_s17 }
0x1713   :  { %15316 = vrot.lane.b32.xlu0 %v15315_v27, %s15553_s20  ;;  %8677 = vrot.lane.b32.xlu1 %v8530_v58, %s15556_s16 }
0x1717   :  { %8641 = vrot.lane.b32.xlu1 %v8530_v58, %s15558_s2 }
0x171b   :  { %8653 = vrot.lane.b32.xlu1 %v8530_v58, %s15561_s18 }
0x177d   :  { %v8672_v31 = vpop.permute.xlu0 %8671  ;;  %v8660_v26 = vpop.permute.xlu1 %8659 }
0x177e   :  { %v8715_v42 = vcombine.low %v8660_v26, %v8672_v31  ;;  %v8716_v40 = vcombine.high %v8660_v26, %v8672_v31 }
0x1780   :  { %v8723_v38 = vrot.slane %v8715_v42, %v15762_v60  ;;  %v8730_v25 = vrot.slane %v8716_v40, %v15762_v60 }
0x1781   :  { %v8648_v43 = vpop.permute.xlu0 %8647  ;;  %v8666_v20 = vpop.permute.xlu1 %8665 }
0x1782   :  { %v8683_v45 = vcombine.low %v8530_v58, %v8648_v43  ;;  %v8684_v34 = vcombine.high %v8530_v58, %v8648_v43 }
0x1784   :  { %v8691_v56 = vrot.slane %v8683_v45, %v15762_v60  ;;  %v8698_v31 = vrot.slane %v8684_v34, %v15762_v60 }
0x1785   :  { %v15317_v55 = vpop.permute.xlu0 %15316  ;;  %v8678_v52 = vpop.permute.xlu1 %8677 }
0x1786   :  { %v15319_v10 = vunpack.i.h.bf16 %v15317_v55  ;;  %v15318_v53 = vunpack.i.l.bf16 %v15317_v55  ;;  %v8731_v46 = vcombine.low %v8666_v20, %v8678_v52  ;;  %v8732_v21 = vcombine.high %v8666_v20, %v8678_v52 }
0x1788   :  { %v8739_v48 = vrot.slane %v8731_v46, %v15762_v60  ;;  %v8746_v63 = vrot.slane %v8732_v21, %v15762_v60  ;;  %v15136_v18 = vpack.c.bf16 %v15319_v10, %v15318_v53 }
0x1789   :  { %v8642_v7 = vpop.permute.xlu1 %8641 }
0x178a   :  { %v8779_v22 = vcombine.low %v8723_v38, %v8739_v48  ;;  %v8780_v15 = vcombine.high %v8723_v38, %v8739_v48  ;;  %v8795_v30 = vcombine.low %v8730_v25, %v8746_v63  ;;  %v8796_v37 = vcombine.high %v8730_v25, %v8746_v63  ;;  %15137 = vmatprep.subr.bf16.mxu1 %v15136_v18 }
0x178b   :  { %15139 = vmatpush3.bf16.msra.mxu1 %v15136_v18 }
0x178c   :  { %v8787_v17 = vrot.slane %v8779_v22, %v15765_v3  ;;  %v8794_v54 = vrot.slane %v8780_v15, %v15765_v3  ;;  %v8803_v39 = vrot.slane %v8795_v30, %v15765_v3  ;;  %v8810_v14 = vrot.slane %v8796_v37, %v15765_v3  ;;  %14714 = vmatprep.subr.mxu1 %v15560_v51 }
0x178d   :  { %v8654_v16 = vpop.permute.xlu1 %8653 }
0x178e   :  { %v13944_v44 = vcombine.low %v8787_v17, %v8794_v54  ;;  %v13946_v36 = vcombine.high %v8787_v17, %v8794_v54  ;;  %v13948_v4 = vcombine.low %v8803_v39, %v8810_v14  ;;  %v13950_v2 = vcombine.high %v8803_v39, %v8810_v14  ;;  %14707 = vmatmul.mubr.msk.f32.vlgmr.msra.gmra.mrb[48].mxu1 %vm61_vm0, %v17013_v50 }
0x178f   :  { %v8699_v32 = vcombine.low %v8642_v7, %v8654_v16  ;;  %v8700_v59 = vcombine.high %v8642_v7, %v8654_v16  ;;  %14716 = vmatprep.mubr.msk.f32.mxu1 %vm15562_vm1, %v15560_v51 }
0x1790   :  { %v8970_v62 = vrot.slane %v13944_v44, %v15762_v60  ;;  %v8986_v33 = vrot.slane %v13946_v36, %v15762_v60  ;;  %v9002_v27 = vrot.slane %v13948_v4, %v15762_v60  ;;  %v9018_v58 = vrot.slane %v13950_v2, %v15762_v60 }
0x1791   :  { %v8707_v26 = vrot.slane %v8699_v32, %v15762_v60  ;;  %v8714_v43 = vrot.slane %v8700_v59, %v15762_v60 }
0x1792   :  { %v9035_v20 = vcombine.low %v8970_v62, %v8986_v33  ;;  %v9067_v42 = vcombine.low %v9002_v27, %v9018_v58  ;;  %v9036_v37 = vcombine.high %v8970_v62, %v8986_v33  ;;  %v9068_v17 = vcombine.high %v9002_v27, %v9018_v58 }
0x1793   :  { %v8747_v40 = vcombine.low %v8691_v56, %v8707_v26  ;;  %v8748_v55 = vcombine.high %v8691_v56, %v8707_v26  ;;  %v8763_v52 = vcombine.low %v8698_v31, %v8714_v43  ;;  %v8764_v10 = vcombine.high %v8698_v31, %v8714_v43 }
0x1794   :  { %v9043_v53 = vrot.slane %v9035_v20, %v15765_v3  ;;  %v9075_v46 = vrot.slane %v9067_v42, %v15765_v3  ;;  %v9050_v4 = vrot.slane %v9036_v37, %v15765_v3  ;;  %v9082_v2 = vrot.slane %v9068_v17, %v15765_v3 }
0x1795   :  { %v8755_v21 = vrot.slane %v8747_v40, %v15765_v3  ;;  %v8762_v38 = vrot.slane %v8748_v55, %v15765_v3  ;;  %v8771_v25 = vrot.slane %v8763_v52, %v15765_v3  ;;  %v8778_v48 = vrot.slane %v8764_v10, %v15765_v3 }
0x1796   :  { %v9087_v63 = vcombine.low %v9043_v53, %v9075_v46  ;;  %v9088_v18 = vcombine.high %v9043_v53, %v9075_v46  ;;  %v9089_v56 = vcombine.low %v9050_v4, %v9082_v2  ;;  %v9090_v31 = vcombine.high %v9050_v4, %v9082_v2 }
0x1797   :  { %v13943_v7 = vcombine.low %v8755_v21, %v8762_v38  ;;  %v13945_v22 = vcombine.high %v8755_v21, %v8762_v38  ;;  %v13947_v15 = vcombine.low %v8771_v25, %v8778_v48  ;;  %v13949_v30 = vcombine.high %v8771_v25, %v8778_v48 }
0x1798   :  { %14710 = vmatpush3.xpose.msk.msra.mxu0 %vm4247_vm2, %v9087_v63  ;;  %14715 = vmatpush3.xpose.msk.msra.mxu1 %vm4247_vm2, %v9088_v18 }
0x1799   :  { %v8963_v54 = vrot.slane %v13943_v7, %v15762_v60  ;;  %v8979_v39 = vrot.slane %v13945_v22, %v15762_v60  ;;  %v8995_v14 = vrot.slane %v13947_v15, %v15762_v60  ;;  %v9011_v45 = vrot.slane %v13949_v30, %v15762_v60  ;;  %14719 = vmatprep.subr.mxu0 %v15560_v51 }
0x179a   :  { %14724 = vmatprep.subr.mxu1 %v15560_v51 }
0x179b   :  { %v9019_v34 = vcombine.low %v8963_v54, %v8979_v39  ;;  %v9020_v16 = vcombine.high %v8963_v54, %v8979_v39  ;;  %v9051_v44 = vcombine.low %v8995_v14, %v9011_v45  ;;  %v9052_v36 = vcombine.high %v8995_v14, %v9011_v45 }
0x179c   :  { %v17118_v54 = vadd.f32 %v17036_v0, %v17034_v47 }
0x179d   :  { %v9027_v32 = vrot.slane %v9019_v34, %v15765_v3  ;;  %v9059_v59 = vrot.slane %v9051_v44, %v15765_v3  ;;  %v9034_v27 = vrot.slane %v9020_v16, %v15765_v3  ;;  %v9066_v58 = vrot.slane %v9052_v36, %v15765_v3 }
0x179f   :  { %v9083_v62 = vcombine.low %v9027_v32, %v9059_v59  ;;  %v9084_v33 = vcombine.high %v9027_v32, %v9059_v59  ;;  %v9085_v26 = vcombine.low %v9034_v27, %v9066_v58  ;;  %v9086_v43 = vcombine.high %v9034_v27, %v9066_v58 }
0x17a1   :  { %14712 = vmatmul.mubr.msk.f32.vlgmr.msra.gmra.mrb[42].mxu0 %vm4247_vm2, %v9083_v62  ;;  %14717 = vmatmul.mubr.msk.f32.vlgmr.msra.gmra.mrb[50].mxu1 %vm4247_vm2, %v9084_v33 }
0x17a2   :  { %14720 = vmatpush3.xpose.msk.msra.mxu0 %vm4247_vm2, %v9089_v56  ;;  %14725 = vmatpush3.xpose.msk.msra.mxu1 %vm4247_vm2, %v9090_v31 }
0x17a3   :  { %14721 = vmatprep.mubr.msk.f32.mxu0 %vm15562_vm1, %v15560_v51  ;;  %14726 = vmatprep.mubr.msk.f32.mxu1 %vm15562_vm1, %v15560_v51 }
0x17a4   :  { %14729 = vmatprep.subr.mxu0 %v15560_v51  ;;  %14734 = vmatprep.subr.mxu1 %v15560_v51 }
0x17a5   :  { %14722 = vmatmul.mubr.msk.f32.vlgmr.msra.gmra.mrb[44].mxu0 %vm4247_vm2, %v9085_v26  ;;  %14727 = vmatmul.mubr.msk.f32.vlgmr.msra.gmra.mrb[52].mxu1 %vm4247_vm2, %v9086_v43 }
0x17a6   :  { %14731 = vmatprep.mubr.msk.f32.mxu0 %vm15562_vm1, %v15560_v51  ;;  %14736 = vmatprep.mubr.msk.f32.mxu1 %vm15562_vm1, %v15560_v51 }
0x1861   :  { %v17104_v20 = vpop.f32.mrb[48].mxu1 }
0x1862   :  { %v8630_v42 = vpop.f32.mrb[49].mxu1 }
0x1874   :  { %v9591_v40 = vpop.f32.mrb[42].mxu0  ;;  %v9667_v55 = vpop.f32.mrb[50].mxu1 }
0x1875   :  { %v9823_v52 = vmul.f32 0.35355338, %v9591_v40  ;;  %v9824_v10 = vmul.f32 0.35355338, %v9667_v55  ;;  %v14713_v53 = vpop.f32.mrb[43].mxu0  ;;  %v14718_v46 = vpop.f32.mrb[51].mxu1 }
0x1877   :  { %v9830_v21 = vsel %vm4247_vm2, %v9824_v10, -inf  ;;  %v9827_v38 = vsel %vm4247_vm2, %v9823_v52, -inf }
0x1878   :  { %9831 = vmax.xlane.f32.xlu0 %v9830_v21  ;;  %v9819_v25 = vpop.f32.mrb[52].mxu1  ;;  %9828 = vmax.xlane.f32.xlu1 %v9827_v38  ;;  %v9743_v48 = vpop.f32.mrb[44].mxu0 }
0x1879   :  { %v9825_v63 = vmul.f32 0.35355338, %v9743_v48  ;;  %v14723_v18 = vpop.f32.mrb[45].mxu0  ;;  %v14728_v7 = vpop.f32.mrb[53].mxu1  ;;  %v17131_v39 = vmul.f32 0.35355338, %v9819_v25 }
0x187b   :  { %v9833_v22 = vsel %vm4247_vm2, %v9825_v63, -inf  ;;  %v9836_v0 = vsel %vm4247_vm2, %v17131_v39, -inf }
0x187c   :  { %9834 = vmax.xlane.f32.xlu0 %v9833_v22 }
0x1892   :  { %8555 = vrot.lane.b32.xlu0 %v17034_v47, %s15553_s20 }
0x1905   :  { %v9832_v15 = vpop.xlane.xlu0 %9831  ;;  %v9829_v14 = vpop.xlane.xlu1 %9828 }
0x1906   :  { %v9839_v45 = vsub.f32 %v9823_v52, %v9829_v14  ;;  %v9840_v34 = vsub.f32 %v9824_v10, %v9832_v15 }
0x1908   :  { %v9843_v16 = vmul.f32 1.442695, %v9839_v45  ;;  %v9845_v44 = vmul.f32 1.442695, %v9840_v34 }
0x1909   :  { %v9835_v30 = vpop.xlane.xlu0 %9834 }
0x190a   :  { %15426 = vpow2.f32 %v9843_v16  ;;  %v9841_v36 = vsub.f32 %v9825_v63, %v9835_v30 }
0x190b   :  { %15428 = vpow2.f32 %v9845_v44 }
0x190c   :  { %v9847_v4 = vmul.f32 1.442695, %v9841_v36 }
0x190d   :  { %v17111_v37 = vpop.permute.xlu0 %8555 }
0x190e   :  { %v8631_v17 = vadd.f32 %v8630_v42, %v17111_v37  ;;  %15430 = vpow2.f32 %v9847_v4 }
0x1910   :  { %9235 = vrot.lane.b32.xlu0 %v8631_v17, %s15559_s3  ;;  %9229 = vrot.lane.b32.xlu1 %v8631_v17, %s15558_s2 }
0x1914   :  { %9241 = vrot.lane.b32.xlu0 %v8631_v17, %s15561_s18  ;;  %8673 = vrot.lane.b32.xlu1 %v17118_v54, %s15554_s27  ;;  %v17137_v2 = vpop.eup %15426 }
0x1915   :  { %v9851_v32 = vsel %vm4247_vm2, %v17137_v2, 0.0  ;;  %v17141_v59 = vpop.eup %15428 }
0x1916   :  { %v9854_v62 = vsel %vm4247_vm2, %v17141_v59, 0.0 }
0x1918   :  { %8661 = vrot.lane.b32.xlu0 %v17118_v54, %s15555_s28  ;;  %v17145_v33 = vpop.eup %15430 }
0x1919   :  { %v9857_v27 = vsel %vm4247_vm2, %v17145_v33, 0.0 }
0x191c   :  { %8667 = vrot.lane.b32.xlu0 %v17118_v54, %s15557_s17 }
0x1920   :  { %8679 = vrot.lane.b32.xlu0 %v17118_v54, %s15556_s16 }
0x1924   :  { %8649 = vrot.lane.b32.xlu0 %v17118_v54, %s15559_s3 }
0x1938   :  { %9837 = vmax.xlane.f32.xlu1 %v9836_v0 }
0x1949   :  { %8643 = vrot.lane.b32.xlu1 %v17118_v54, %s15558_s2 }
0x196d   :  { %9852 = vadd.xlane.f32.xlu1 %v9851_v32 }
0x1971   :  { %9855 = vadd.xlane.f32.xlu1 %v9854_v62 }
0x1975   :  { %9858 = vadd.xlane.f32.xlu1 %v9857_v27 }
0x1982   :  { %v9236_v58 = vpop.permute.xlu0 %9235  ;;  %v9230_v26 = vpop.permute.xlu1 %9229 }
0x1983   :  { %v9247_v56 = vcombine.low %v8631_v17, %v9236_v58  ;;  %v9248_v31 = vcombine.high %v8631_v17, %v9236_v58 }
0x1985   :  { %v9255_v55 = vrot.slane %v9247_v56, %v15762_v60  ;;  %v9262_v52 = vrot.slane %v9248_v31, %v15762_v60 }
0x1986   :  { %v9242_v43 = vpop.permute.xlu0 %9241  ;;  %v8674_v45 = vpop.permute.xlu1 %8673 }
0x1987   :  { %v9263_v42 = vcombine.low %v9230_v26, %v9242_v43  ;;  %v9264_v40 = vcombine.high %v9230_v26, %v9242_v43 }
0x1989   :  { %v9271_v10 = vrot.slane %v9263_v42, %v15762_v60  ;;  %v9278_v53 = vrot.slane %v9264_v40, %v15762_v60 }
0x198a   :  { %v8662_v46 = vpop.permute.xlu0 %8661 }
0x198b   :  { %v9279_v21 = vcombine.low %v9255_v55, %v9271_v10  ;;  %v9280_v38 = vcombine.high %v9255_v55, %v9271_v10  ;;  %v9295_v25 = vcombine.low %v9262_v52, %v9278_v53  ;;  %v9296_v48 = vcombine.high %v9262_v52, %v9278_v53 }
0x198c   :  { %v8851_v34 = vcombine.low %v8662_v46, %v8674_v45  ;;  %v8852_v16 = vcombine.high %v8662_v46, %v8674_v45 }
0x198d   :  { %v9287_v63 = vrot.slane %v9279_v21, %v15765_v3  ;;  %v9294_v18 = vrot.slane %v9280_v38, %v15765_v3  ;;  %v9303_v7 = vrot.slane %v9295_v25, %v15765_v3  ;;  %v9310_v22 = vrot.slane %v9296_v48, %v15765_v3 }
0x198e   :  { %v8668_v15 = vpop.permute.xlu0 %8667  ;;  %v8859_v26 = vrot.slane %v8851_v34, %v15762_v60  ;;  %v8866_v43 = vrot.slane %v8852_v16, %v15762_v60 }
0x198f   :  { %v9383_v30 = vcombine.low %v9287_v63, %v9294_v18  ;;  %v13959_v17 = vcombine.high %v9287_v63, %v9294_v18  ;;  %v9399_v0 = vcombine.low %v9303_v7, %v9310_v22  ;;  %v13960_v14 = vcombine.high %v9303_v7, %v9310_v22 }
0x1991   :  { %v9390_v44 = vrot.slane %v9383_v30, %v15762_v60  ;;  %v9398_v36 = vrot.slane %v13959_v17, %v15762_v60  ;;  %v9406_v4 = vrot.slane %v9399_v0, %v15762_v60  ;;  %v9414_v32 = vrot.slane %v13960_v14, %v15762_v60 }
0x1992   :  { %v8680_v62 = vpop.permute.xlu0 %8679 }
0x1993   :  { %v8867_v27 = vcombine.low %v8668_v15, %v8680_v62  ;;  %v8868_v58 = vcombine.high %v8668_v15, %v8680_v62  ;;  %v9415_v56 = vcombine.low %v9390_v44, %v9398_v36  ;;  %v9431_v31 = vcombine.low %v9406_v4, %v9414_v32 }
0x1994   :  { %v9416_v42 = vcombine.high %v9390_v44, %v9398_v36  ;;  %v9432_v40 = vcombine.high %v9406_v4, %v9414_v32 }
0x1995   :  { %v8875_v55 = vrot.slane %v8867_v27, %v15762_v60  ;;  %v8882_v52 = vrot.slane %v8868_v58, %v15762_v60  ;;  %v9423_v10 = vrot.slane %v9415_v56, %v15765_v3  ;;  %v9439_v53 = vrot.slane %v9431_v31, %v15765_v3 }
0x1996   :  { %v9430_v46 = vrot.slane %v9416_v42, %v15765_v3  ;;  %v9446_v21 = vrot.slane %v9432_v40, %v15765_v3 }
0x1997   :  { %v8915_v38 = vcombine.low %v8859_v26, %v8875_v55  ;;  %v8916_v25 = vcombine.high %v8859_v26, %v8875_v55  ;;  %v8931_v48 = vcombine.low %v8866_v43, %v8882_v52  ;;  %v8932_v63 = vcombine.high %v8866_v43, %v8882_v52 }
0x1998   :  { %v9447_v18 = vcombine.low %v9423_v10, %v9439_v53  ;;  %v9448_v7 = vcombine.high %v9423_v10, %v9439_v53  ;;  %v9449_v0 = vcombine.low %v9430_v46, %v9446_v21  ;;  %v9450_v44 = vcombine.high %v9430_v46, %v9446_v21 }
0x1999   :  { %v8923_v22 = vrot.slane %v8915_v38, %v15765_v3  ;;  %v8930_v15 = vrot.slane %v8916_v25, %v15765_v3  ;;  %v8939_v30 = vrot.slane %v8931_v48, %v15765_v3  ;;  %v8946_v17 = vrot.slane %v8932_v63, %v15765_v3 }
0x199a   :  { %14730 = vmatpush3.msra.mxu0 %v9447_v18  ;;  %14735 = vmatpush3.msra.mxu1 %v9448_v7 }
0x199b   :  { %v13952_v14 = vcombine.low %v8923_v22, %v8930_v15  ;;  %v13954_v45 = vcombine.high %v8923_v22, %v8930_v15  ;;  %v13956_v34 = vcombine.low %v8939_v30, %v8946_v17  ;;  %v13958_v16 = vcombine.high %v8939_v30, %v8946_v17  ;;  %14739 = vmatprep.subr.mxu0 %v15560_v51 }
0x199c   :  { %14744 = vmatprep.subr.mxu1 %v15560_v51 }
0x199d   :  { %v9106_v36 = vrot.slane %v13952_v14, %v15762_v60  ;;  %v9122_v4 = vrot.slane %v13954_v45, %v15762_v60  ;;  %v9138_v32 = vrot.slane %v13956_v34, %v15762_v60  ;;  %v9154_v62 = vrot.slane %v13958_v16, %v15762_v60 }
0x199f   :  { %v9171_v27 = vcombine.low %v9106_v36, %v9122_v4  ;;  %v9172_v58 = vcombine.high %v9106_v36, %v9122_v4  ;;  %v9203_v56 = vcombine.low %v9138_v32, %v9154_v62  ;;  %v9204_v31 = vcombine.high %v9138_v32, %v9154_v62 }
0x19a1   :  { %v17180_v26 = vrot.slane %v9171_v27, %v15765_v3  ;;  %v17183_v43 = vrot.slane %v9203_v56, %v15765_v3  ;;  %v17186_v42 = vrot.slane %v9172_v58, %v15765_v3  ;;  %v17189_v40 = vrot.slane %v9204_v31, %v15765_v3 }
0x19a3   :  { %v9224_v55 = vcombine.high %v17180_v26, %v17183_v43  ;;  %v9225_v52 = vcombine.low %v17186_v42, %v17189_v40  ;;  %v9226_v10 = vcombine.high %v17186_v42, %v17189_v40 }
0x19c5   :  { %v9838_v53 = vpop.xlane.xlu1 %9837 }
0x19c6   :  { %v9842_v46 = vsub.f32 %v17131_v39, %v9838_v53 }
0x19c8   :  { %v9849_v21 = vmul.f32 1.442695, %v9842_v46 }
0x19c9   :  { %v8644_v48 = vpop.permute.xlu1 %8643 }
0x19ca   :  { %15432 = vpow2.f32 %v9849_v21 }
0x19d4   :  { %v15433_v38 = vpop.eup %15432 }
0x19d5   :  { %v9860_v25 = vsel %vm4247_vm2, %v15433_v38, 0.0 }
0x19d6   :  { %9861 = vadd.xlane.f32.xlu1 %v9860_v25 }
0x19e7   :  { %8655 = vrot.lane.b32.xlu1 %v17118_v54, %s15561_s18 }
0x19fa   :  { %v9853_v63 = vpop.xlane.xlu1 %9852 }
0x19fb   :  { %15434 = vrcp.f32 %v9853_v63 }
0x19fe   :  { %v9856_v18 = vpop.xlane.xlu1 %9855 }
0x19ff   :  { %15436 = vrcp.f32 %v9856_v18 }
0x1a02   :  { %v9859_v7 = vpop.xlane.xlu1 %9858 }
0x1a03   :  { %15438 = vrcp.f32 %v9859_v7 }
0x1a05   :  { %v15435_v22 = vpop.eup %15434 }
0x1a06   :  { %v9864_v15 = vmul.f32 %v15435_v22, %v17137_v2 }
0x1a08   :  { %14732 = vmatmul.mubr.msk.f32.vlgmr.msra.gmra.mrb[46].mxu0 %vm4247_vm2, %v9864_v15 }
0x1a09   :  { %v15437_v39 = vpop.eup %15436  ;;  %14740 = vmatpush3.msra.mxu0 %v9449_v0  ;;  %14741 = vmatprep.mubr.msk.f32.mxu0 %vm15562_vm1, %v15560_v51  ;;  %v9223_v0 = vcombine.low %v17180_v26, %v17183_v43 }
0x1a0a   :  { %v9866_v30 = vmul.f32 %v15437_v39, %v17141_v59  ;;  %14749 = vmatprep.subr.mxu0 %v15560_v51  ;;  %v8650_v59 = vpop.permute.xlu0 %8649 }
0x1a0b   :  { %v8819_v45 = vcombine.low %v17118_v54, %v8650_v59 }
0x1a0c   :  { %14737 = vmatmul.mubr.msk.f32.vlgmr.msra.gmra.mrb[54].mxu1 %vm4247_vm2, %v9866_v30 }
0x1a0d   :  { %v15439_v17 = vpop.eup %15438  ;;  %14745 = vmatpush3.msra.mxu1 %v9450_v44  ;;  %14746 = vmatprep.mubr.msk.f32.mxu1 %vm15562_vm1, %v15560_v51  ;;  %v8827_v36 = vrot.slane %v8819_v45, %v15762_v60 }
0x1a0e   :  { %v9868_v2 = vmul.f32 %v15439_v17, %v17145_v33  ;;  %14754 = vmatprep.subr.mxu1 %v15560_v51  ;;  %v8820_v33 = vcombine.high %v17118_v54, %v8650_v59 }
0x1a10   :  { %14742 = vmatmul.mubr.msk.f32.vlgmr.msra.gmra.mrb[48].mxu0 %vm4247_vm2, %v9868_v2  ;;  %v8834_v4 = vrot.slane %v8820_v33, %v15762_v60 }
0x1a11   :  { %14750 = vmatpush3.xpose.msk.msra.mxu0 %vm4247_vm2, %v9223_v0  ;;  %14751 = vmatprep.mubr.msk.f32.mxu0 %vm15562_vm1, %v15560_v51 }
0x1a12   :  { %14759 = vmatprep.subr.mxu0 %v15560_v51 }
0x1a63   :  { %v9862_v14 = vpop.xlane.xlu1 %9861 }
0x1a64   :  { %15440 = vrcp.f32 %v9862_v14 }
0x1a67   :  { %v8656_v34 = vpop.permute.xlu1 %8655 }
0x1a68   :  { %v8835_v16 = vcombine.low %v8644_v48, %v8656_v34  ;;  %v8836_v44 = vcombine.high %v8644_v48, %v8656_v34 }
0x1a6a   :  { %v8843_v32 = vrot.slane %v8835_v16, %v15762_v60  ;;  %v8850_v62 = vrot.slane %v8836_v44, %v15762_v60 }
0x1a6c   :  { %v8883_v27 = vcombine.low %v8827_v36, %v8843_v32  ;;  %v8884_v58 = vcombine.high %v8827_v36, %v8843_v32  ;;  %v8899_v56 = vcombine.low %v8834_v4, %v8850_v62  ;;  %v8900_v31 = vcombine.high %v8834_v4, %v8850_v62 }
0x1a6e   :  { %v15441_v53 = vpop.eup %15440  ;;  %v8891_v46 = vrot.slane %v8883_v27, %v15765_v3  ;;  %v8898_v54 = vrot.slane %v8884_v58, %v15765_v3  ;;  %v8907_v21 = vrot.slane %v8899_v56, %v15765_v3  ;;  %v8914_v25 = vrot.slane %v8900_v31, %v15765_v3 }
0x1a6f   :  { %v9870_v48 = vmul.f32 %v15441_v53, %v15433_v38 }
0x1a70   :  { %v13951_v63 = vcombine.low %v8891_v46, %v8898_v54  ;;  %v13953_v18 = vcombine.high %v8891_v46, %v8898_v54  ;;  %v13955_v7 = vcombine.low %v8907_v21, %v8914_v25  ;;  %v13957_v22 = vcombine.high %v8907_v21, %v8914_v25 }
0x1a71   :  { %14747 = vmatmul.mubr.msk.f32.vlgmr.msra.gmra.mrb[56].mxu1 %vm4247_vm2, %v9870_v48 }
0x1a72   :  { %v9099_v15 = vrot.slane %v13951_v63, %v15762_v60  ;;  %v9115_v39 = vrot.slane %v13953_v18, %v15762_v60  ;;  %v9131_v30 = vrot.slane %v13955_v7, %v15762_v60  ;;  %v9147_v17 = vrot.slane %v13957_v22, %v15762_v60  ;;  %14755 = vmatpush3.xpose.msk.msra.mxu1 %vm4247_vm2, %v9224_v55 }
0x1a73   :  { %14756 = vmatprep.mubr.msk.f32.mxu1 %vm15562_vm1, %v15560_v51  ;;  %14764 = vmatprep.subr.mxu1 %v15560_v51 }
0x1a74   :  { %v9155_v38 = vcombine.low %v9099_v15, %v9115_v39  ;;  %v9156_v2 = vcombine.high %v9099_v15, %v9115_v39  ;;  %v9187_v0 = vcombine.low %v9131_v30, %v9147_v17  ;;  %v9188_v59 = vcombine.high %v9131_v30, %v9147_v17 }
0x1a76   :  { %v9163_v14 = vrot.slane %v9155_v38, %v15765_v3  ;;  %v9195_v45 = vrot.slane %v9187_v0, %v15765_v3  ;;  %v9170_v16 = vrot.slane %v9156_v2, %v15765_v3  ;;  %v9202_v26 = vrot.slane %v9188_v59, %v15765_v3 }
0x1a78   :  { %v9219_v33 = vcombine.low %v9163_v14, %v9195_v45  ;;  %v9220_v34 = vcombine.high %v9163_v14, %v9195_v45  ;;  %v9221_v43 = vcombine.low %v9170_v16, %v9202_v26  ;;  %v9222_v55 = vcombine.high %v9170_v16, %v9202_v26 }
0x1a7a   :  { %14752 = vmatmul.mubr.msk.f32.vlgmr.msra.gmra.mrb[50].mxu0 %vm4247_vm2, %v9219_v33  ;;  %14757 = vmatmul.mubr.msk.f32.vlgmr.msra.gmra.mrb[58].mxu1 %vm4247_vm2, %v9220_v34 }
0x1a7b   :  { %14760 = vmatpush3.xpose.msk.msra.mxu0 %vm4247_vm2, %v9225_v52  ;;  %14765 = vmatpush3.xpose.msk.msra.mxu1 %vm4247_vm2, %v9226_v10 }
0x1a7c   :  { %14761 = vmatprep.mubr.msk.f32.mxu0 %vm15562_vm1, %v15560_v51  ;;  %14766 = vmatprep.mubr.msk.f32.mxu1 %vm15562_vm1, %v15560_v51 }
0x1a7d   :  { %14769 = vmatprep.subr.mxu0 %v15560_v51  ;;  %14774 = vmatprep.subr.mxu1 %v15560_v51 }
0x1a7e   :  { %14762 = vmatmul.mubr.msk.f32.vlgmr.msra.gmra.mrb[52].mxu0 %vm4247_vm2, %v9221_v43  ;;  %14767 = vmatmul.mubr.msk.f32.vlgmr.msra.gmra.mrb[60].mxu1 %vm4247_vm2, %v9222_v55 }
0x1a7f   :  { %14771 = vmatprep.mubr.msk.f32.mxu0 %vm15562_vm1, %v15560_v51  ;;  %14776 = vmatprep.mubr.msk.f32.mxu1 %vm15562_vm1, %v15560_v51 }
0x1adb   :  { %v9940_v42 = vpop.f32.mrb[46].mxu0 }
0x1adc   :  { %v14733_v40 = vpop.f32.mrb[47].mxu0 }
0x1adf   :  { %v10013_v52 = vpop.f32.mrb[54].mxu1 }
0x1ae0   :  { %v14738_v10 = vpop.f32.mrb[55].mxu1 }
0x1ae3   :  { %v10086_v44 = vpop.f32.mrb[48].mxu0 }
0x1ae4   :  { %v10807_v36 = vcombine.low %v9940_v42, %v10086_v44  ;;  %v10808_v4 = vcombine.high %v9940_v42, %v10086_v44  ;;  %v14743_v32 = vpop.f32.mrb[49].mxu0 }
0x1ae6   :  { %v10815_v31 = vrot.slane %v10807_v36, %v15762_v60  ;;  %v10822_v53 = vrot.slane %v10808_v4, %v15762_v60 }
0x1b44   :  { %v10159_v62 = vpop.f32.mrb[56].mxu1 }
0x1b45   :  { %v10823_v27 = vcombine.low %v10013_v52, %v10159_v62  ;;  %v10824_v58 = vcombine.high %v10013_v52, %v10159_v62  ;;  %v14748_v56 = vpop.f32.mrb[57].mxu1 }
0x1b47   :  { %v10831_v46 = vrot.slane %v10823_v27, %v15762_v60  ;;  %v10838_v54 = vrot.slane %v10824_v58, %v15762_v60 }
0x1b49   :  { %v10839_v21 = vcombine.low %v10815_v31, %v10831_v46  ;;  %v10840_v25 = vcombine.high %v10815_v31, %v10831_v46  ;;  %v10855_v48 = vcombine.low %v10822_v53, %v10838_v54  ;;  %v10856_v63 = vcombine.high %v10822_v53, %v10838_v54 }
0x1b4b   :  { %v10847_v18 = vrot.slane %v10839_v21, %v15765_v3  ;;  %v10854_v7 = vrot.slane %v10840_v25, %v15765_v3  ;;  %v10863_v22 = vrot.slane %v10855_v48, %v15765_v3  ;;  %v10870_v15 = vrot.slane %v10856_v63, %v15765_v3 }
0x1b4d   :  { %v10943_v39 = vcombine.low %v10847_v18, %v10854_v7  ;;  %v13987_v30 = vcombine.high %v10847_v18, %v10854_v7  ;;  %v10959_v17 = vcombine.low %v10863_v22, %v10870_v15  ;;  %v13988_v38 = vcombine.high %v10863_v22, %v10870_v15  ;;  %v10235_v2 = vpop.f32.mrb[50].mxu0  ;;  %v10311_v0 = vpop.f32.mrb[58].mxu1 }
0x1b4e   :  { %v10467_v59 = vmul.f32 0.35355338, %v10235_v2  ;;  %v10468_v14 = vmul.f32 0.35355338, %v10311_v0  ;;  %v14753_v45 = vpop.f32.mrb[51].mxu0  ;;  %v14758_v33 = vpop.f32.mrb[59].mxu1  ;;  %v8636_v7 = vadd.f32 %v17104_v20, %v17111_v37 }
0x1b4f   :  { %v10950_v34 = vrot.slane %v10943_v39, %v15762_v60  ;;  %v10958_v16 = vrot.slane %v13987_v30, %v15762_v60  ;;  %v10966_v26 = vrot.slane %v10959_v17, %v15762_v60  ;;  %v10974_v43 = vrot.slane %v13988_v38, %v15762_v60 }
0x1b50   :  { %v10474_v55 = vsel %vm4247_vm2, %v10468_v14, -inf  ;;  %v10471_v42 = vsel %vm4247_vm2, %v10467_v59, -inf }
0x1b51   :  { %10475 = vmax.xlane.f32.xlu1 %v10474_v55  ;;  %v10463_v40 = vpop.f32.mrb[60].mxu1  ;;  %10472 = vmax.xlane.f32.xlu0 %v10471_v42  ;;  %v10387_v52 = vpop.f32.mrb[52].mxu0  ;;  %v10975_v10 = vcombine.low %v10950_v34, %v10958_v16  ;;  %v10991_v44 = vcombine.low %v10966_v26, %v10974_v43  ;;  %v10976_v36 = vcombine.high %v10950_v34, %v10958_v16 }
0x1b52   :  { %v10469_v4 = vmul.f32 0.35355338, %v10387_v52  ;;  %v14763_v32 = vpop.f32.mrb[53].mxu0  ;;  %v14768_v62 = vpop.f32.mrb[61].mxu1  ;;  %v10992_v27 = vcombine.high %v10966_v26, %v10974_v43  ;;  %v10470_v53 = vmul.f32 0.35355338, %v10463_v40 }
0x1b53   :  { %v17282_v58 = vrot.slane %v10975_v10, %v15765_v3  ;;  %v17285_v56 = vrot.slane %v10991_v44, %v15765_v3  ;;  %v10990_v31 = vrot.slane %v10976_v36, %v15765_v3 }
0x1b54   :  { %v10477_v46 = vsel %vm4247_vm2, %v10469_v4, -inf  ;;  %v11006_v54 = vrot.slane %v10992_v27, %v15765_v3  ;;  %v10480_v18 = vsel %vm4247_vm2, %v10470_v53, -inf }
0x1b55   :  { %10478 = vmax.xlane.f32.xlu0 %v10477_v46  ;;  %v11008_v21 = vcombine.high %v17282_v58, %v17285_v56  ;;  %v11007_v25 = vcombine.low %v17282_v58, %v17285_v56  ;;  %v15519_v58 = vld [vmem:[%s18168_s4 + $0x30] sm:$0xff]  ;;  %v15520_v56 = vld [vmem:[%s18168_s4 + $0x38] sm:$0xff] }
0x1b56   :  { %v11009_v48 = vcombine.low %v10990_v31, %v11006_v54  ;;  %v11010_v63 = vcombine.high %v10990_v31, %v11006_v54 }
0x1b59   :  { %10481 = vmax.xlane.f32.xlu0 %v10480_v18 }
0x1b62   :  { %9231 = vrot.lane.b32.xlu1 %v8636_v7, %s15558_s2 }
0x1bde   :  { %v10476_v22 = vpop.xlane.xlu1 %10475  ;;  %v10473_v15 = vpop.xlane.xlu0 %10472 }
0x1bdf   :  { %v10484_v39 = vsub.f32 %v10468_v14, %v10476_v22  ;;  %v10483_v30 = vsub.f32 %v10467_v59, %v10473_v15 }
0x1be1   :  { %v10489_v17 = vmul.f32 1.442695, %v10484_v39  ;;  %v10487_v38 = vmul.f32 1.442695, %v10483_v30 }
0x1be2   :  { %v10479_v2 = vpop.xlane.xlu0 %10478  ;;  %v9232_v40 = vpop.permute.xlu1 %9231 }
0x1be3   :  { %15442 = vpow2.f32 %v10489_v17  ;;  %v10485_v0 = vsub.f32 %v10469_v4, %v10479_v2 }
0x1be4   :  { %15444 = vpow2.f32 %v10487_v38 }
0x1be5   :  { %v10491_v45 = vmul.f32 1.442695, %v10485_v0 }
0x1be6   :  { %v10482_v33 = vpop.xlane.xlu0 %10481 }
0x1be7   :  { %15446 = vpow2.f32 %v10491_v45  ;;  %v10486_v34 = vsub.f32 %v10470_v53, %v10482_v33 }
0x1be9   :  { %v10493_v16 = vmul.f32 1.442695, %v10486_v34 }
0x1beb   :  { %15448 = vpow2.f32 %v10493_v16 }
0x1bed   :  { %v17298_v26 = vpop.eup %15442 }
0x1bee   :  { %v17300_v20 = vpop.eup %15444  ;;  %v10498_v37 = vsel %vm4247_vm2, %v17298_v26, 0.0 }
0x1bef   :  { %v10495_v59 = vsel %vm4247_vm2, %v17300_v20, 0.0  ;;  %10499 = vadd.xlane.f32.xlu0 %v10498_v37 }
0x1bf0   :  { %10496 = vadd.xlane.f32.xlu1 %v10495_v59 }
0x1bf1   :  { %v17306_v14 = vpop.eup %15446 }
0x1bf2   :  { %v10501_v43 = vsel %vm4247_vm2, %v17306_v14, 0.0 }
0x1bf4   :  { %10502 = vadd.xlane.f32.xlu1 %v10501_v43 }
0x1bf5   :  { %v17310_v55 = vpop.eup %15448 }
0x1bf6   :  { %v10504_v42 = vsel %vm4247_vm2, %v17310_v55, 0.0 }
0x1bf7   :  { %10505 = vadd.xlane.f32.xlu0 %v10504_v42 }
0x1c05   :  { %9243 = vrot.lane.b32.xlu1 %v8636_v7, %s15561_s18 }
0x1c09   :  { %15321 = vrot.lane.b32.xlu1 %v17007_v23, %s15565_s24 }
0x1c0d   :  { %11081 = vrot.lane.b32.xlu1 %v11008_v21, %s15566_s25  ;;  %9237 = vrot.lane.b32.xlu0 %v8636_v7, %s15559_s3 }
0x1c11   :  { %11089 = vrot.lane.b32.xlu1 %v11009_v48, %s15567_s26 }
0x1c15   :  { %11097 = vrot.lane.b32.xlu1 %v11010_v63, %s15568_s29 }
0x1c19   :  { %11121 = vrot.lane.b32.xlu1 %v17034_v47, %s15565_s24 }
0x1c7c   :  { %v10500_v10 = vpop.xlane.xlu0 %10499 }
0x1c7d   :  { %v10497_v52 = vpop.xlane.xlu1 %10496  ;;  %15450 = vrcp.f32 %v10500_v10 }
0x1c7e   :  { %15452 = vrcp.f32 %v10497_v52 }
0x1c81   :  { %v10503_v44 = vpop.xlane.xlu1 %10502 }
0x1c82   :  { %15454 = vrcp.f32 %v10503_v44 }
0x1c84   :  { %v10506_v36 = vpop.xlane.xlu0 %10505 }
0x1c85   :  { %v9244_v4 = vpop.permute.xlu1 %9243  ;;  %15456 = vrcp.f32 %v10506_v36 }
0x1c86   :  { %v9331_v32 = vcombine.low %v9232_v40, %v9244_v4  ;;  %v9332_v62 = vcombine.high %v9232_v40, %v9244_v4 }
0x1c87   :  { %v15451_v59 = vpop.eup %15450 }
0x1c88   :  { %v9238_v23 = vpop.permute.xlu0 %9237  ;;  %v9339_v53 = vrot.slane %v9331_v32, %v15762_v60  ;;  %v9346_v46 = vrot.slane %v9332_v62, %v15762_v60  ;;  %v15453_v10 = vpop.eup %15452 }
0x1c89   :  { %v9315_v27 = vcombine.low %v8636_v7, %v9238_v23  ;;  %v9316_v31 = vcombine.high %v8636_v7, %v9238_v23  ;;  %v17325_v54 = vpop.permute.xlu1 %15321 }
0x1c8b   :  { %v9323_v47 = vrot.slane %v9315_v27, %v15762_v60  ;;  %v9330_v21 = vrot.slane %v9316_v31, %v15762_v60 }
0x1c8c   :  { %v15455_v32 = vpop.eup %15454 }
0x1c8d   :  { %v9347_v48 = vcombine.low %v9323_v47, %v9339_v53  ;;  %v9348_v63 = vcombine.high %v9323_v47, %v9339_v53  ;;  %v9363_v18 = vcombine.low %v9330_v21, %v9346_v46  ;;  %v9364_v22 = vcombine.high %v9330_v21, %v9346_v46  ;;  %v11082_v45 = vpop.permute.xlu1 %11081 }
0x1c8e   :  { %v10508_v46 = vmul.f32 %v15453_v10, %v17300_v20  ;;  %v10510_v47 = vmul.f32 %v15451_v59, %v17298_v26  ;;  %v11103_v20 = vsel %vm4247_vm2, %v11007_v25, %v11082_v45  ;;  %v10512_v26 = vmul.f32 %v15455_v32, %v17306_v14 }
0x1c8f   :  { %v9355_v15 = vrot.slane %v9347_v48, %v15765_v3  ;;  %v9362_v7 = vrot.slane %v9348_v63, %v15765_v3  ;;  %v9371_v39 = vrot.slane %v9363_v18, %v15765_v3  ;;  %v9378_v30 = vrot.slane %v9364_v22, %v15765_v3  ;;  %v15457_v53 = vpop.eup %15456 }
0x1c90   :  { %v10514_v18 = vmul.f32 %v15457_v53, %v17310_v55  ;;  %v15325_v25 = vpack.i.bf16 %v15520_v56, %v15519_v58  ;;  %v15324_v14 = vunpack.i.h.bf16 %v17325_v54  ;;  %v15323_v55 = vunpack.i.l.bf16 %v17325_v54 }
0x1c91   :  { %v9451_v17 = vcombine.low %v9355_v15, %v9362_v7  ;;  %v13961_v38 = vcombine.high %v9355_v15, %v9362_v7  ;;  %v9467_v2 = vcombine.low %v9371_v39, %v9378_v30  ;;  %v13962_v0 = vcombine.high %v9371_v39, %v9378_v30  ;;  %v11090_v44 = vpop.permute.xlu1 %11089 }
0x1c92   :  { %v11105_v22 = vsel %vm5834_vm3, %v11103_v20, %v11090_v44  ;;  %15326 = vrot.lane.b32.xlu0 %v15325_v25, %s15565_s24  ;;  %v15140_v7 = vpack.c.bf16 %v15324_v14, %v15323_v55 }
0x1c93   :  { %v9458_v33 = vrot.slane %v9451_v17, %v15762_v60  ;;  %v9466_v34 = vrot.slane %v13961_v38, %v15762_v60  ;;  %v9474_v16 = vrot.slane %v9467_v2, %v15762_v60  ;;  %v9482_v37 = vrot.slane %v13962_v0, %v15762_v60 }
0x1c95   :  { %v9483_v43 = vcombine.low %v9458_v33, %v9466_v34  ;;  %v9499_v42 = vcombine.low %v9474_v16, %v9482_v37  ;;  %v9484_v40 = vcombine.high %v9458_v33, %v9466_v34  ;;  %v9500_v52 = vcombine.high %v9474_v16, %v9482_v37  ;;  %v11098_v63 = vpop.permute.xlu1 %11097 }
0x1c96   :  { %v11107_v15 = vsel %vm5837_vm4, %v11105_v22, %v11098_v63 }
0x1c97   :  { %v9491_v36 = vrot.slane %v9483_v43, %v15765_v3  ;;  %v9507_v4 = vrot.slane %v9499_v42, %v15765_v3  ;;  %v9498_v62 = vrot.slane %v9484_v40, %v15765_v3  ;;  %v9514_v23 = vrot.slane %v9500_v52, %v15765_v3 }
0x1c99   :  { %v9515_v27 = vcombine.low %v9491_v36, %v9507_v4  ;;  %v9516_v31 = vcombine.high %v9491_v36, %v9507_v4  ;;  %v9517_v21 = vcombine.low %v9498_v62, %v9514_v23  ;;  %v9518_v48 = vcombine.high %v9498_v62, %v9514_v23 }
0x1c9b   :  { %14770 = vmatpush3.msra.mxu0 %v9515_v27  ;;  %14775 = vmatpush3.msra.mxu1 %v9516_v31 }
0x1c9c   :  { %14772 = vmatmul.mubr.msk.f32.vlgmr.msra.gmra.mrb[54].mxu0 %vm4247_vm2, %v10508_v46  ;;  %14777 = vmatmul.mubr.msk.f32.vlgmr.msra.gmra.mrb[62].mxu1 %vm4247_vm2, %v10510_v47 }
0x1c9d   :  { %14779 = vmatprep.subr.mxu0 %v15560_v51  ;;  %14784 = vmatprep.subr.mxu1 %v15560_v51 }
0x1c9e   :  { %14780 = vmatpush3.msra.mxu0 %v9517_v21  ;;  %14785 = vmatpush3.msra.mxu1 %v9518_v48 }
0x1c9f   :  { %14781 = vmatprep.mubr.msk.f32.mxu0 %vm15562_vm1, %v15560_v51  ;;  %14786 = vmatprep.mubr.msk.f32.mxu1 %vm15562_vm1, %v15560_v51 }
0x1ca0   :  { %14782 = vmatmul.mubr.msk.f32.vlgmr.msra.gmra.mrb[56].mxu0 %vm4247_vm2, %v10512_v26  ;;  %14787 = vmatmul.mubr.msk.f32.vlgmr.msra.gmra.mrb[64].mxu1 %vm4247_vm2, %v10514_v18 }
0x1ca1   :  { %14797 = vmatprep.mubr.msk.f32.mxu0 %vm61_vm0, %v11107_v15  ;;  %15141 = vmatprep.subr.bf16.mxu0 %v15140_v7 }
0x1ca2   :  { %15143 = vmatpush3.bf16.msra.mxu0 %v15140_v7 }
0x1d04   :  { %v15327_v2 = vpop.permute.xlu0 %15326 }
0x1d05   :  { %v15329_v42 = vunpack.i.h.bf16 %v15327_v2  ;;  %v15328_v40 = vunpack.i.l.bf16 %v15327_v2 }
0x1d07   :  { %v15144_v23 = vpack.c.bf16 %v15329_v42, %v15328_v40 }
0x1d09   :  { %15145 = vmatprep.subr.bf16.mxu0 %v15144_v23 }
0x1d0a   :  { %15147 = vmatpush3.bf16.msra.mxu0 %v15144_v23 }
0x1d0b   :  { %15156 = vmatprep.subr.bf16.mxu0 %v15569_v5 }
0x1d6f   :  { %v10584_v39 = vpop.f32.mrb[54].mxu0  ;;  %v10657_v30 = vpop.f32.mrb[62].mxu1 }
0x1d70   :  { %v14773_v17 = vpop.f32.mrb[55].mxu0  ;;  %v14778_v38 = vpop.f32.mrb[63].mxu1 }
0x1d73   :  { %v10730_v0 = vpop.f32.mrb[56].mxu0  ;;  %v10803_v45 = vpop.f32.mrb[64].mxu1 }
0x1d74   :  { %v10875_v33 = vcombine.low %v10584_v39, %v10730_v0  ;;  %v10876_v34 = vcombine.high %v10584_v39, %v10730_v0  ;;  %v10891_v16 = vcombine.low %v10657_v30, %v10803_v45  ;;  %v10892_v37 = vcombine.high %v10657_v30, %v10803_v45  ;;  %v14783_v59 = vpop.f32.mrb[57].mxu0  ;;  %v14788_v43 = vpop.f32.mrb[65].mxu1 }
0x1d75   :  { %v11122_v59 = vpop.permute.xlu1 %11121 }
0x1d76   :  { %v10883_v54 = vrot.slane %v10875_v33, %v15762_v60  ;;  %v10890_v52 = vrot.slane %v10876_v34, %v15762_v60  ;;  %v10899_v10 = vrot.slane %v10891_v16, %v15762_v60  ;;  %v10906_v44 = vrot.slane %v10892_v37, %v15762_v60 }
0x1d78   :  { %v10907_v36 = vcombine.low %v10883_v54, %v10899_v10  ;;  %v10908_v4 = vcombine.high %v10883_v54, %v10899_v10  ;;  %v10923_v32 = vcombine.low %v10890_v52, %v10906_v44  ;;  %v10924_v62 = vcombine.high %v10890_v52, %v10906_v44 }
0x1d7a   :  { %v10915_v27 = vrot.slane %v10907_v36, %v15765_v3  ;;  %v10922_v31 = vrot.slane %v10908_v4, %v15765_v3  ;;  %v10931_v53 = vrot.slane %v10923_v32, %v15765_v3  ;;  %v10938_v46 = vrot.slane %v10924_v62, %v15765_v3  ;;  %v17404_v4 = vld [vmem:[%s18172_s8 + $0x4] sm:$0xf] }
0x1d7b   :  { %v17409_v32 = vrot.slane %v17404_v4, %v5967_v11 }
0x1d7c   :  { %v11011_v47 = vcombine.low %v10915_v27, %v10922_v31  ;;  %v13989_v21 = vcombine.high %v10915_v27, %v10922_v31  ;;  %v11027_v48 = vcombine.low %v10931_v53, %v10938_v46  ;;  %v13990_v63 = vcombine.high %v10931_v53, %v10938_v46 }
0x1d7e   :  { %v11018_v20 = vrot.slane %v11011_v47, %v15762_v60  ;;  %v11026_v26 = vrot.slane %v13989_v21, %v15762_v60  ;;  %v11034_v18 = vrot.slane %v11027_v48, %v15762_v60  ;;  %v11042_v22 = vrot.slane %v13990_v63, %v15762_v60  ;;  %v13926_v21 = vld [vmem:[%s18169_s5 + $0x20] sm:$0xff]  ;;  %v13927_v48 = vld [vmem:[%s18169_s5 + $0x28] sm:$0xff] }
0x1d7f   :  { %v15148_v63 = vpack.c.bf16 %v13927_v48, %v13926_v21 }
0x1d80   :  { %v11043_v15 = vcombine.low %v11018_v20, %v11026_v26  ;;  %v11059_v58 = vcombine.low %v11034_v18, %v11042_v22  ;;  %v11044_v56 = vcombine.high %v11018_v20, %v11026_v26  ;;  %v11060_v25 = vcombine.high %v11034_v18, %v11042_v22  ;;  %v13929_v20 = vld [vmem:[%s18169_s5 + $0x38] sm:$0xff] }
0x1d81   :  { %15149 = vmatprep.subr.bf16.mxu1 %v15148_v63 }
0x1d82   :  { %v11051_v14 = vrot.slane %v11043_v15, %v15765_v3  ;;  %v11067_v55 = vrot.slane %v11059_v58, %v15765_v3  ;;  %v11058_v7 = vrot.slane %v11044_v56, %v15765_v3  ;;  %v11074_v39 = vrot.slane %v11060_v25, %v15765_v3  ;;  %15151 = vmatpush3.bf16.msra.mxu1 %v15148_v63 }
0x1d84   :  { %v11076_v30 = vcombine.high %v11051_v14, %v11067_v55  ;;  %v11077_v17 = vcombine.low %v11058_v7, %v11074_v39  ;;  %v11078_v38 = vcombine.high %v11058_v7, %v11074_v39  ;;  %v11075_v2 = vcombine.low %v11051_v14, %v11067_v55 }
0x1d86   :  { %11083 = vrot.lane.b32.xlu0 %v11076_v30, %s15566_s25 }
0x1d8a   :  { %11091 = vrot.lane.b32.xlu0 %v11077_v17, %s15567_s26 }
0x1d8e   :  { %11099 = vrot.lane.b32.xlu0 %v11078_v38, %s15568_s29 }
0x1df8   :  { %v11084_v0 = vpop.permute.xlu0 %11083 }
0x1df9   :  { %v11104_v33 = vsel %vm4247_vm2, %v11075_v2, %v11084_v0 }
0x1dfc   :  { %v11092_v45 = vpop.permute.xlu0 %11091 }
0x1dfd   :  { %v11106_v34 = vsel %vm5834_vm3, %v11104_v33, %v11092_v45 }
0x1e00   :  { %v11100_v16 = vpop.permute.xlu0 %11099 }
0x1e01   :  { %v11108_v37 = vsel %vm5837_vm4, %v11106_v34, %v11100_v16 }
0x1e02   :  { %14798 = vmatmul.mubr.msk.f32.vlgmr.msra.gmra.mrb[58].mxu0 %vm61_vm0, %v11108_v37 }
0x1e03   :  { %14817 = vmatprep.mubr.msk.f32.mxu0 %vm15562_vm1, %v15560_v51 }
0x1ed5   :  { %v14799_v43 = vpop.f32.mrb[58].mxu0 }
0x1ed6   :  { %v11202_v42 = vadd.f32 %v14799_v43, %v11122_v59  ;;  %v11196_v40 = vpop.f32.mrb[59].mxu0 }
0x1ed7   :  { %v11197_v54 = vadd.f32 %v11196_v40, %v11122_v59 }
0x1ed8   :  { %v11206_v52 = vadd.f32 %v11202_v42, %v17013_v50 }
0x1ed9   :  { %v11205_v10 = vadd.f32 %v11197_v54, %v17015_v19 }
0x1eda   :  { %v11210_v44 = vsel %vm61_vm0, %v11206_v52, 0.0 }
0x1edb   :  { %11211 = vadd.xlane.f32.xlu1 %v11210_v44  ;;  %v11207_v36 = vsel %vm61_vm0, %v11205_v10, 0.0 }
0x1edc   :  { %11208 = vadd.xlane.f32.xlu0 %v11207_v36 }
0x1eec   :  { %11240 = vrot.lane.b32.xlu1 %v17409_v32, %s15555_s28 }
0x1ef0   :  { %264 = vrot.lane.b32.xlu1 %v16171_v61, %s15555_s28 }
0x1ef4   :  { %277 = vrot.lane.b32.xlu1 %v16177_v8, %s15557_s17 }
0x1ef8   :  { %292 = vrot.lane.b32.xlu1 %v16177_v8, %s15554_s27 }
0x1efc   :  { %307 = vrot.lane.b32.xlu1 %v16177_v8, %s15556_s16 }
0x1f00   :  { %266 = vrot.lane.b32.xlu1 %v16185_v12, %s15555_s28 }
0x1f04   :  { %296 = vrot.lane.b32.xlu1 %v16185_v12, %s15554_s27 }
0x1f68   :  { %v11212_v11 = vpop.xlane.xlu1 %11211 }
0x1f69   :  { %v11214_v50 = vmul.f32 0.03125, %v11212_v11  ;;  %v11209_v19 = vpop.xlane.xlu0 %11208 }
0x1f6a   :  { %v11213_v62 = vmul.f32 0.03125, %v11209_v19 }
0x1f6b   :  { %v17425_v23 = vsub.f32 %v11206_v52, %v11214_v50 }
0x1f6c   :  { %v11215_v27 = vsub.f32 %v11205_v10, %v11213_v62 }
0x1f6d   :  { %v11218_v46 = vmul.f32 %v17425_v23, %v17425_v23 }
0x1f6e   :  { %v11217_v31 = vmul.f32 %v11215_v27, %v11215_v27 }
0x1f6f   :  { %v11222_v47 = vsel %vm61_vm0, %v11218_v46, 0.0 }
0x1f70   :  { %v11219_v53 = vsel %vm61_vm0, %v11217_v31, 0.0 }
0x1f71   :  { %11220 = vadd.xlane.f32.xlu0 %v11219_v53 }
0x1f75   :  { %11223 = vadd.xlane.f32.xlu0 %v11222_v47 }
0x1f8b   :  { %262 = vrot.lane.b32.xlu0 %v16177_v8, %s15555_s28  ;;  %v13928_v8 = vld [vmem:[%s18169_s5 + $0x30] sm:$0xff] }
0x1f8c   :  { %v15152_v26 = vpack.c.bf16 %v13929_v20, %v13928_v8 }
0x1f8e   :  { %15153 = vmatprep.subr.bf16.mxu1 %v15152_v26 }
0x1f8f   :  { %279 = vrot.lane.b32.xlu0 %v16171_v61, %s15557_s17  ;;  %15155 = vmatpush3.bf16.msra.mxu1 %v15152_v26 }
0x1f90   :  { %15160 = vmatprep.subr.bf16.mxu1 %v15569_v5 }
0x1f93   :  { %294 = vrot.lane.b32.xlu0 %v16171_v61, %s15554_s27 }
0x1f97   :  { %309 = vrot.lane.b32.xlu0 %v16171_v61, %s15556_s16  ;;  %v17456_v61 = vpop.permute.xlu1 %11240 }
0x1f9b   :  { %281 = vrot.lane.b32.xlu0 %v16185_v12, %s15557_s17  ;;  %v17458_v18 = vpop.permute.xlu1 %264 }
0x1f9f   :  { %311 = vrot.lane.b32.xlu0 %v16185_v12, %s15556_s16  ;;  %v278_v22 = vpop.permute.xlu1 %277 }
0x1fa3   :  { %v293_v15 = vpop.permute.xlu1 %292 }
0x1fa7   :  { %v308_v25 = vpop.permute.xlu1 %307 }
0x1fa8   :  { %v490_v7 = vcombine.low %v278_v22, %v308_v25  ;;  %v491_v39 = vcombine.high %v278_v22, %v308_v25 }
0x1faa   :  { %v498_v0 = vrot.slane %v490_v7, %v15762_v60  ;;  %v505_v45 = vrot.slane %v491_v39, %v15762_v60  ;;  %v15522_v39 = vld [vmem:[%s18165_s1] sm:$0xff] }
0x1fab   :  { %v267_v36 = vpop.permute.xlu1 %266 }
0x1faf   :  { %v297_v25 = vpop.permute.xlu1 %296 }
0x1ffe   :  { %v11221_v12 = vpop.xlane.xlu0 %11220 }
0x1fff   :  { %v11225_v58 = vmul.f32 0.03125, %v11221_v12 }
0x2001   :  { %v11227_v56 = vadd.f32 1e-05, %v11225_v58 }
0x2002   :  { %v11224_v14 = vpop.xlane.xlu0 %11223 }
0x2003   :  { %15458 = vrsqrt.f32 %v11227_v56  ;;  %v11226_v55 = vmul.f32 0.03125, %v11224_v14 }
0x2005   :  { %v11228_v30 = vadd.f32 1e-05, %v11226_v55 }
0x2006   :  { %v263_v17 = vpop.permute.xlu0 %262 }
0x2007   :  { %15460 = vrsqrt.f32 %v11228_v30  ;;  %v474_v38 = vcombine.low %v263_v17, %v293_v15  ;;  %v475_v2 = vcombine.high %v263_v17, %v293_v15 }
0x2009   :  { %v482_v33 = vrot.slane %v474_v38, %v15762_v60  ;;  %v489_v34 = vrot.slane %v475_v2, %v15762_v60 }
0x200a   :  { %v280_v16 = vpop.permute.xlu0 %279 }
0x200b   :  { %v538_v37 = vcombine.low %v482_v33, %v498_v0  ;;  %v539_v59 = vcombine.high %v482_v33, %v498_v0  ;;  %v554_v43 = vcombine.low %v489_v34, %v505_v45  ;;  %v555_v42 = vcombine.high %v489_v34, %v505_v45 }
0x200d   :  { %v15459_v40 = vpop.eup %15458  ;;  %v546_v54 = vrot.slane %v538_v37, %v15765_v3  ;;  %v553_v52 = vrot.slane %v539_v59, %v15765_v3  ;;  %v562_v10 = vrot.slane %v554_v43, %v15765_v3  ;;  %v569_v44 = vrot.slane %v555_v42, %v15765_v3 }
0x200e   :  { %v11231_v11 = vmul.f32 %v15459_v40, %v11215_v27  ;;  %v295_v50 = vpop.permute.xlu0 %294  ;;  %v747_v37 = vcombine.high %v267_v36, %v297_v25 }
0x200f   :  { %v13725_v19 = vcombine.low %v546_v54, %v553_v52  ;;  %v13727_v62 = vcombine.high %v546_v54, %v553_v52  ;;  %v13729_v31 = vcombine.low %v562_v10, %v569_v44  ;;  %v13731_v53 = vcombine.high %v562_v10, %v569_v44 }
0x2010   :  { %v610_v46 = vcombine.low %v17458_v18, %v295_v50  ;;  %v11237_v47 = vmul.f32 %v17409_v32, %v11231_v11  ;;  %v611_v26 = vcombine.high %v17458_v18, %v295_v50 }
0x2011   :  { %v15461_v21 = vpop.eup %15460  ;;  %v1817_v48 = vrot.slane %v13725_v19, %v15762_v60  ;;  %v1833_v63 = vrot.slane %v13727_v62, %v15762_v60  ;;  %v1849_v8 = vrot.slane %v13729_v31, %v15762_v60  ;;  %v1865_v20 = vrot.slane %v13731_v53, %v15762_v60 }
0x2012   :  { %v11232_v27 = vmul.f32 %v15461_v21, %v17425_v23  ;;  %v310_v22 = vpop.permute.xlu0 %309  ;;  %v17477_v15 = vadd.f32 %v17456_v61, %v11237_v47  ;;  %v618_v56 = vrot.slane %v610_v46, %v15762_v60  ;;  %v625_v2 = vrot.slane %v611_v26, %v15762_v60 }
0x2013   :  { %v1883_v12 = vcombine.high %v1817_v48, %v1833_v63  ;;  %v1915_v58 = vcombine.high %v1849_v8, %v1865_v20  ;;  %v626_v55 = vcombine.low %v280_v16, %v310_v22  ;;  %v627_v7 = vcombine.high %v280_v16, %v310_v22 }
0x2014   :  { %v11238_v14 = vmul.f32 %v17409_v32, %v11232_v27  ;;  %v11245_v23 = vadd.f32 %v15522_v39, %v17477_v15  ;;  %v1882_v18 = vcombine.low %v1817_v48, %v1833_v63  ;;  %v1914_v17 = vcombine.low %v1849_v8, %v1865_v20 }
0x2015   :  { %v17486_v30 = vrot.slane %v1883_v12, %v15765_v3  ;;  %v17489_v38 = vrot.slane %v1915_v58, %v15765_v3  ;;  %v634_v0 = vrot.slane %v626_v55, %v15762_v60  ;;  %v641_v45 = vrot.slane %v627_v7, %v15762_v60 }
0x2016   :  { %14808 = vmatprep.mubr.msk.f32.mxu1 %vm61_vm0, %v11245_v23  ;;  %v282_v33 = vpop.permute.xlu0 %281  ;;  %v17496_v34 = vadd.f32 %v17456_v61, %v11238_v14  ;;  %v746_v16 = vcombine.low %v267_v36, %v297_v25  ;;  %v1890_v10 = vrot.slane %v1882_v18, %v15765_v3  ;;  %v1922_v44 = vrot.slane %v1914_v17, %v15765_v3  ;;  %v15523_v61 = vld [vmem:[%s18165_s1 + $0x8] sm:$0xff] }
0x2017   :  { %v1936_v59 = vcombine.low %v17486_v30, %v17489_v38  ;;  %v1937_v43 = vcombine.high %v17486_v30, %v17489_v38  ;;  %v674_v42 = vcombine.low %v618_v56, %v634_v0  ;;  %v675_v40 = vcombine.high %v618_v56, %v634_v0 }
0x2018   :  { %v690_v54 = vcombine.low %v625_v2, %v641_v45  ;;  %v691_v52 = vcombine.high %v625_v2, %v641_v45  ;;  %v11246_v36 = vadd.f32 %v15523_v61, %v17496_v34  ;;  %v754_v53 = vrot.slane %v746_v16, %v15762_v60 }
0x2019   :  { %v682_v11 = vrot.slane %v674_v42, %v15765_v3  ;;  %v689_v50 = vrot.slane %v675_v40, %v15765_v3  ;;  %v761_v46 = vrot.slane %v747_v37, %v15762_v60  ;;  %v1934_v22 = vcombine.low %v1890_v10, %v1922_v44 }
0x201a   :  { %v698_v19 = vrot.slane %v690_v54, %v15765_v3  ;;  %v705_v62 = vrot.slane %v691_v52, %v15765_v3  ;;  %v312_v31 = vpop.permute.xlu0 %311  ;;  %14809 = vmatmul.mubr.msk.f32.vlgmr.msra.gmra.mrb[66].mxu1 %vm61_vm0, %v11246_v36  ;;  %v1935_v12 = vcombine.high %v1890_v10, %v1922_v44 }
0x201b   :  { %v762_v47 = vcombine.low %v282_v33, %v312_v31  ;;  %v763_v21 = vcombine.high %v282_v33, %v312_v31  ;;  %v13733_v48 = vcombine.low %v682_v11, %v689_v50  ;;  %v13735_v63 = vcombine.high %v682_v11, %v689_v50  ;;  %14826 = vmatprep.mubr.msk.f32.mxu1 %vm15562_vm1, %v15560_v51 }
0x201c   :  { %v13737_v8 = vcombine.low %v698_v19, %v705_v62  ;;  %v13739_v20 = vcombine.high %v698_v19, %v705_v62 }
0x201d   :  { %v770_v27 = vrot.slane %v762_v47, %v15762_v60  ;;  %v777_v26 = vrot.slane %v763_v21, %v15762_v60  ;;  %v1953_v58 = vrot.slane %v13733_v48, %v15762_v60  ;;  %v1969_v56 = vrot.slane %v13735_v63, %v15762_v60 }
0x201e   :  { %v1985_v25 = vrot.slane %v13737_v8, %v15762_v60  ;;  %v2001_v14 = vrot.slane %v13739_v20, %v15762_v60 }
0x201f   :  { %v810_v55 = vcombine.low %v754_v53, %v770_v27  ;;  %v811_v7 = vcombine.high %v754_v53, %v770_v27  ;;  %v826_v39 = vcombine.low %v761_v46, %v777_v26  ;;  %v827_v23 = vcombine.high %v761_v46, %v777_v26 }
0x2020   :  { %v2018_v18 = vcombine.low %v1953_v58, %v1969_v56  ;;  %v2019_v17 = vcombine.high %v1953_v58, %v1969_v56  ;;  %v2050_v2 = vcombine.low %v1985_v25, %v2001_v14  ;;  %v2051_v0 = vcombine.high %v1985_v25, %v2001_v14 }
0x2021   :  { %v818_v45 = vrot.slane %v810_v55, %v15765_v3  ;;  %v825_v33 = vrot.slane %v811_v7, %v15765_v3  ;;  %v834_v16 = vrot.slane %v826_v39, %v15765_v3  ;;  %v841_v37 = vrot.slane %v827_v23, %v15765_v3 }
0x2022   :  { %v2026_v42 = vrot.slane %v2018_v18, %v15765_v3  ;;  %v2033_v40 = vrot.slane %v2019_v17, %v15765_v3  ;;  %v2058_v54 = vrot.slane %v2050_v2, %v15765_v3  ;;  %v2065_v52 = vrot.slane %v2051_v0, %v15765_v3 }
0x2023   :  { %v13741_v10 = vcombine.low %v818_v45, %v825_v33  ;;  %v13743_v44 = vcombine.high %v818_v45, %v825_v33  ;;  %v13745_v61 = vcombine.low %v834_v16, %v841_v37  ;;  %v13747_v36 = vcombine.high %v834_v16, %v841_v37 }
0x2024   :  { %v2070_v11 = vcombine.low %v2026_v42, %v2058_v54  ;;  %v2071_v50 = vcombine.high %v2026_v42, %v2058_v54  ;;  %v2072_v19 = vcombine.low %v2033_v40, %v2065_v52  ;;  %v2073_v62 = vcombine.high %v2033_v40, %v2065_v52 }
0x2025   :  { %v2089_v31 = vrot.slane %v13741_v10, %v15762_v60  ;;  %v2105_v53 = vrot.slane %v13743_v44, %v15762_v60  ;;  %v2121_v46 = vrot.slane %v13745_v61, %v15762_v60  ;;  %v2137_v47 = vrot.slane %v13747_v36, %v15762_v60 }
0x2026   :  { %v15157_v21 = vpack.c.bf16 %v2070_v11, %v1934_v22  ;;  %v15161_v48 = vpack.c.bf16 %v2071_v50, %v1935_v12  ;;  %v17538_v63 = vpack.c.bf16 %v2072_v19, %v1936_v59  ;;  %v17543_v8 = vpack.c.bf16 %v2073_v62, %v1937_v43 }
0x2027   :  { %v2154_v20 = vcombine.low %v2089_v31, %v2105_v53  ;;  %v2155_v27 = vcombine.high %v2089_v31, %v2105_v53  ;;  %v2186_v26 = vcombine.low %v2121_v46, %v2137_v47  ;;  %v2187_v58 = vcombine.high %v2121_v46, %v2137_v47 }
0x2028   :  { %15159 = vmatpush3.bf16.xpose.msk.msra.mxu0 %vm16321_vm5, %v15157_v21  ;;  %15163 = vmatpush3.bf16.xpose.msk.msra.mxu1 %vm16321_vm5, %v15161_v48  ;;  %v17572_v14 = vrot.slane %v17404_v4, %v5981_v13 }
0x2029   :  { %14815 = vmatprep.subr.mxu0 %v15560_v51  ;;  %14824 = vmatprep.subr.mxu1 %v15560_v51  ;;  %v2169_v59 = vrot.slane %v2155_v27, %v15765_v3  ;;  %v2162_v30 = vrot.slane %v2154_v20, %v15765_v3  ;;  %v2194_v38 = vrot.slane %v2186_v26, %v15765_v3 }
0x202a   :  { %v2201_v43 = vrot.slane %v2187_v58, %v15765_v3 }
0x202b   :  { %v17559_v56 = vcombine.low %v2162_v30, %v2194_v38  ;;  %v17561_v25 = vcombine.high %v2162_v30, %v2194_v38 }
0x202c   :  { %v17555_v22 = vcombine.low %v2169_v59, %v2201_v43  ;;  %v17557_v12 = vcombine.high %v2169_v59, %v2201_v43 }
0x2030   :  { %14816 = vmatpush3.xpose.msk.msra.mxu0 %vm4247_vm2, %v17559_v56  ;;  %14825 = vmatpush3.xpose.msk.msra.mxu1 %vm4247_vm2, %v17561_v25 }
0x2031   :  { %15164 = vmatprep.subr.bf16.mxu0 %v15569_v5  ;;  %15168 = vmatprep.subr.bf16.mxu1 %v15569_v5 }
0x20ed   :  { %v17574_v55 = vpop.f32.mrb[66].mxu1 }
0x20ee   :  { %v11323_v7 = vpop.f32.mrb[67].mxu1 }
0x20ef   :  { %v11324_v39 = vadd.f32 %v11323_v7, %v17572_v14 }
0x20f1   :  { %11340 = vrot.lane.b32.xlu0 %v11324_v39, %s15559_s3  ;;  %11334 = vrot.lane.b32.xlu1 %v11324_v39, %s15558_s2 }
0x20f5   :  { %384 = vrot.lane.b32.xlu0 %v16364_v49, %s15565_s24  ;;  %11346 = vrot.lane.b32.xlu1 %v11324_v39, %s15561_s18 }
0x20f9   :  { %412 = vrot.lane.b32.xlu0 %v16371_v57, %s15567_s26  ;;  %382 = vrot.lane.b32.xlu1 %v16371_v57, %s15565_s24 }
0x20fd   :  { %397 = vrot.lane.b32.xlu1 %v16371_v57, %s15568_s29 }
0x2101   :  { %399 = vrot.lane.b32.xlu1 %v16364_v49, %s15568_s29 }
0x2163   :  { %v11335_v13 = vpop.permute.xlu1 %11334  ;;  %v11341_v4 = vpop.permute.xlu0 %11340 }
0x2164   :  { %v11352_v23 = vcombine.low %v11324_v39, %v11341_v4  ;;  %v11353_v18 = vcombine.high %v11324_v39, %v11341_v4 }
0x2166   :  { %v11360_v45 = vrot.slane %v11352_v23, %v15762_v60  ;;  %v11367_v33 = vrot.slane %v11353_v18, %v15762_v60 }
0x2167   :  { %v11347_v17 = vpop.permute.xlu1 %11346 }
0x2168   :  { %v11368_v2 = vcombine.low %v11335_v13, %v11347_v17  ;;  %v11369_v0 = vcombine.high %v11335_v13, %v11347_v17 }
0x216a   :  { %v11376_v16 = vrot.slane %v11368_v2, %v15762_v60  ;;  %v11383_v37 = vrot.slane %v11369_v0, %v15762_v60 }
0x216c   :  { %v11384_v42 = vcombine.low %v11360_v45, %v11376_v16  ;;  %v11385_v40 = vcombine.high %v11360_v45, %v11376_v16  ;;  %v11400_v54 = vcombine.low %v11367_v33, %v11383_v37  ;;  %v11401_v52 = vcombine.high %v11367_v33, %v11383_v37 }
0x216e   :  { %v11392_v10 = vrot.slane %v11384_v42, %v15765_v3  ;;  %v11399_v44 = vrot.slane %v11385_v40, %v15765_v3  ;;  %v11408_v61 = vrot.slane %v11400_v54, %v15765_v3  ;;  %v11415_v36 = vrot.slane %v11401_v52, %v15765_v3  ;;  %v385_v40 = vpop.permute.xlu0 %384 }
0x2170   :  { %v11488_v11 = vcombine.low %v11392_v10, %v11399_v44  ;;  %v13995_v50 = vcombine.high %v11392_v10, %v11399_v44  ;;  %v11504_v19 = vcombine.low %v11408_v61, %v11415_v36  ;;  %v13996_v62 = vcombine.high %v11408_v61, %v11415_v36 }
0x2172   :  { %v11495_v31 = vrot.slane %v11488_v11, %v15762_v60  ;;  %v11503_v53 = vrot.slane %v13995_v50, %v15762_v60  ;;  %v11511_v46 = vrot.slane %v11504_v19, %v15762_v60  ;;  %v11519_v47 = vrot.slane %v13996_v62, %v15762_v60  ;;  %v413_v52 = vpop.permute.xlu0 %412 }
0x2174   :  { %v11520_v21 = vcombine.low %v11495_v31, %v11503_v53  ;;  %v11536_v48 = vcombine.low %v11511_v46, %v11519_v47  ;;  %v11521_v59 = vcombine.high %v11495_v31, %v11503_v53  ;;  %v11537_v30 = vcombine.high %v11511_v46, %v11519_v47 }
0x2176   :  { %v11528_v20 = vrot.slane %v11520_v21, %v15765_v3  ;;  %v11544_v27 = vrot.slane %v11536_v48, %v15765_v3  ;;  %v11535_v38 = vrot.slane %v11521_v59, %v15765_v3 }
0x2178   :  { %v11552_v26 = vcombine.low %v11528_v20, %v11544_v27  ;;  %v11553_v58 = vcombine.high %v11528_v20, %v11544_v27 }
0x217a   :  { %14818 = vmatmul.mubr.msk.f32.vlgmr.msra.gmra.mrb[60].mxu0 %vm4247_vm2, %v11552_v26  ;;  %14827 = vmatmul.mubr.msk.f32.vlgmr.msra.gmra.mrb[68].mxu1 %vm4247_vm2, %v11553_v58 }
0x217b   :  { %15167 = vmatpush3.bf16.xpose.msk.msra.mxu0 %vm16321_vm5, %v17538_v63  ;;  %15171 = vmatpush3.bf16.xpose.msk.msra.mxu1 %vm16321_vm5, %v17543_v8  ;;  %v11551_v63 = vrot.slane %v11537_v30, %v15765_v3 }
0x217c   :  { %14833 = vmatprep.subr.mxu0 %v15560_v51  ;;  %14842 = vmatprep.subr.mxu1 %v15560_v51 }
0x217d   :  { %14835 = vmatprep.mubr.msk.f32.mxu0 %vm15562_vm1, %v15560_v51  ;;  %14844 = vmatprep.mubr.msk.f32.mxu1 %vm15562_vm1, %v15560_v51  ;;  %v11554_v8 = vcombine.low %v11535_v38, %v11551_v63  ;;  %v11555_v43 = vcombine.high %v11535_v38, %v11551_v63 }
0x2183   :  { %14834 = vmatpush3.xpose.msk.msra.mxu0 %vm4247_vm2, %v17555_v22  ;;  %14843 = vmatpush3.xpose.msk.msra.mxu1 %vm4247_vm2, %v17557_v12 }
0x2184   :  { %15175 = vmatprep.subr.bf16.mxu1 %v15569_v5  ;;  %15172 = vmatprep.subr.bf16.mxu0 %v15569_v5 }
0x2186   :  { %14836 = vmatmul.mubr.msk.f32.vlgmr.msra.gmra.mrb[62].mxu0 %vm4247_vm2, %v11554_v8  ;;  %14845 = vmatmul.mubr.msk.f32.vlgmr.msra.gmra.mrb[70].mxu1 %vm4247_vm2, %v11555_v43 }
0x2187   :  { %14853 = vmatprep.mubr.msk.f32.mxu0 %vm15562_vm1, %v15560_v51  ;;  %14862 = vmatprep.mubr.msk.f32.mxu1 %vm15562_vm1, %v15560_v51 }
0x224d   :  { %v11702_v7 = vpop.f32.mrb[60].mxu0  ;;  %v11784_v39 = vpop.f32.mrb[68].mxu1 }
0x224e   :  { %v11952_v13 = vmul.f32 0.35355338, %v11702_v7  ;;  %v11953_v4 = vmul.f32 0.35355338, %v11784_v39  ;;  %v14819_v23 = vpop.f32.mrb[61].mxu0  ;;  %v14828_v18 = vpop.f32.mrb[69].mxu1 }
0x2250   :  { %v11959_v17 = vsel %vm6688_vm6, %v11953_v4, -inf  ;;  %v11956_v2 = vsel %vm6688_vm6, %v11952_v13, -inf }
0x2251   :  { %11960 = vmax.xlane.f32.xlu1 %v11959_v17  ;;  %11957 = vmax.xlane.f32.xlu0 %v11956_v2 }
0x2259   :  { %v11866_v0 = vpop.f32.mrb[62].mxu0  ;;  %v11948_v45 = vpop.f32.mrb[70].mxu1 }
0x225a   :  { %v14837_v33 = vpop.f32.mrb[63].mxu0  ;;  %v14846_v16 = vpop.f32.mrb[71].mxu1 }
0x2262   :  { %414 = vrot.lane.b32.xlu1 %v16364_v49, %s15567_s26 }
0x2266   :  { %429 = vrot.lane.b32.xlu1 %v16364_v49, %s15566_s25  ;;  %v17652_v49 = vmul.f32 0.35355338, %v11866_v0 }
0x2267   :  { %427 = vrot.lane.b32.xlu0 %v16371_v57, %s15566_s25  ;;  %v17654_v57 = vmul.f32 0.35355338, %v11948_v45 }
0x2268   :  { %v11962_v37 = vsel %vm6688_vm6, %v17652_v49, -inf }
0x2269   :  { %v11965_v42 = vsel %vm6688_vm6, %v17654_v57, -inf }
0x226a   :  { %401 = vrot.lane.b32.xlu1 %v16427_v9, %s15568_s29 }
0x226e   :  { %431 = vrot.lane.b32.xlu1 %v16427_v9, %s15566_s25 }
0x2272   :  { %270 = vrot.lane.b32.xlu1 %v16447_v29, %s15555_s28 }
0x2276   :  { %285 = vrot.lane.b32.xlu1 %v16447_v29, %s15557_s17 }
0x227a   :  { %300 = vrot.lane.b32.xlu1 %v16447_v29, %s15554_s27 }
0x227e   :  { %315 = vrot.lane.b32.xlu1 %v16447_v29, %s15556_s16  ;;  %v17674_v29 = vadd.f32 %v17574_v55, %v17572_v14 }
0x2286   :  { %11963 = vmax.xlane.f32.xlu0 %v11962_v37 }
0x228a   :  { %11966 = vmax.xlane.f32.xlu0 %v11965_v42 }
0x22a0   :  { %386 = vrot.lane.b32.xlu0 %v16427_v9, %s15565_s24 }
0x22a4   :  { %416 = vrot.lane.b32.xlu0 %v16427_v9, %s15567_s26  ;;  %v383_v9 = vpop.permute.xlu1 %382 }
0x22a5   :  { %v1154_v50 = vcombine.low %v383_v9, %v413_v52 }
0x22a7   :  { %v1162_v21 = vrot.slane %v1154_v50, %v15762_v60 }
0x22a8   :  { %268 = vrot.lane.b32.xlu0 %v16455_v35, %s15555_s28  ;;  %v398_v54 = vpop.permute.xlu1 %397 }
0x22ac   :  { %283 = vrot.lane.b32.xlu0 %v16455_v35, %s15557_s17  ;;  %v400_v10 = vpop.permute.xlu1 %399 }
0x22b0   :  { %298 = vrot.lane.b32.xlu0 %v16455_v35, %s15554_s27 }
0x22b4   :  { %313 = vrot.lane.b32.xlu0 %v16455_v35, %s15556_s16  ;;  %v1155_v35 = vcombine.high %v383_v9, %v413_v52 }
0x22b6   :  { %v1169_v20 = vrot.slane %v1155_v35, %v15762_v60 }
0x22b8   :  { %11336 = vrot.lane.b32.xlu0 %v17674_v29, %s15558_s2 }
0x22de   :  { %v11961_v44 = vpop.xlane.xlu1 %11960  ;;  %v11958_v61 = vpop.xlane.xlu0 %11957 }
0x22df   :  { %v11969_v36 = vsub.f32 %v11953_v4, %v11961_v44  ;;  %v11968_v11 = vsub.f32 %v11952_v13, %v11958_v61 }
0x22e1   :  { %v11974_v19 = vmul.f32 1.442695, %v11969_v36  ;;  %v11972_v62 = vmul.f32 1.442695, %v11968_v11 }
0x22e2   :  { %v415_v31 = vpop.permute.xlu1 %414  ;;  %v428_v53 = vpop.permute.xlu0 %427 }
0x22e3   :  { %15462 = vpow2.f32 %v11974_v19  ;;  %v1170_v55 = vcombine.low %v398_v54, %v428_v53  ;;  %v1290_v46 = vcombine.low %v385_v40, %v415_v31  ;;  %v1171_v47 = vcombine.high %v398_v54, %v428_v53 }
0x22e4   :  { %15464 = vpow2.f32 %v11972_v62  ;;  %v1291_v27 = vcombine.high %v385_v40, %v415_v31 }
0x22e5   :  { %v1178_v48 = vrot.slane %v1170_v55, %v15762_v60  ;;  %v1185_v26 = vrot.slane %v1171_v47, %v15762_v60  ;;  %v1298_v8 = vrot.slane %v1290_v46, %v15762_v60 }
0x22e6   :  { %v430_v58 = vpop.permute.xlu1 %429  ;;  %v1305_v18 = vrot.slane %v1291_v27, %v15762_v60 }
0x22e7   :  { %v1218_v59 = vcombine.low %v1162_v21, %v1178_v48  ;;  %v1219_v30 = vcombine.high %v1162_v21, %v1178_v48  ;;  %v1306_v38 = vcombine.low %v400_v10, %v430_v58  ;;  %v1307_v63 = vcombine.high %v400_v10, %v430_v58 }
0x22e8   :  { %v1234_v43 = vcombine.low %v1169_v20, %v1185_v26  ;;  %v1235_v7 = vcombine.high %v1169_v20, %v1185_v26 }
0x22e9   :  { %v1226_v39 = vrot.slane %v1218_v59, %v15765_v3  ;;  %v1233_v13 = vrot.slane %v1219_v30, %v15765_v3  ;;  %v1314_v4 = vrot.slane %v1306_v38, %v15762_v60  ;;  %v1321_v23 = vrot.slane %v1307_v63, %v15762_v60 }
0x22ea   :  { %v1242_v17 = vrot.slane %v1234_v43, %v15765_v3  ;;  %v1249_v2 = vrot.slane %v1235_v7, %v15765_v3 }
0x22eb   :  { %v13765_v0 = vcombine.low %v1226_v39, %v1233_v13  ;;  %v13767_v45 = vcombine.high %v1226_v39, %v1233_v13  ;;  %v1354_v33 = vcombine.low %v1298_v8, %v1314_v4  ;;  %v1355_v16 = vcombine.high %v1298_v8, %v1314_v4 }
0x22ec   :  { %v13769_v37 = vcombine.low %v1242_v17, %v1249_v2  ;;  %v13771_v42 = vcombine.high %v1242_v17, %v1249_v2  ;;  %v1370_v9 = vcombine.low %v1305_v18, %v1321_v23  ;;  %v1371_v40 = vcombine.high %v1305_v18, %v1321_v23 }
0x22ed   :  { %v17690_v54 = vpop.eup %15462  ;;  %v2497_v52 = vrot.slane %v13765_v0, %v15762_v60  ;;  %v2513_v10 = vrot.slane %v13767_v45, %v15762_v60  ;;  %v1362_v44 = vrot.slane %v1354_v33, %v15765_v3  ;;  %v1369_v61 = vrot.slane %v1355_v16, %v15765_v3 }
0x22ee   :  { %v17696_v36 = vpop.eup %15464  ;;  %v2529_v11 = vrot.slane %v13769_v37, %v15762_v60  ;;  %v2545_v50 = vrot.slane %v13771_v42, %v15762_v60  ;;  %v1378_v19 = vrot.slane %v1370_v9, %v15765_v3  ;;  %v1385_v62 = vrot.slane %v1371_v40, %v15765_v3 }
0x22ef   :  { %v13773_v35 = vcombine.low %v1362_v44, %v1369_v61  ;;  %v13775_v31 = vcombine.high %v1362_v44, %v1369_v61  ;;  %v11983_v46 = vsel %vm6688_vm6, %v17690_v54, 0.0  ;;  %v11980_v47 = vsel %vm6688_vm6, %v17696_v36, 0.0 }
0x22f0   :  { %v13777_v53 = vcombine.low %v1378_v19, %v1385_v62  ;;  %v13779_v55 = vcombine.high %v1378_v19, %v1385_v62  ;;  %11984 = vadd.xlane.f32.xlu0 %v11983_v46  ;;  %11981 = vadd.xlane.f32.xlu1 %v11980_v47  ;;  %v2562_v26 = vcombine.low %v2497_v52, %v2513_v10  ;;  %v402_v19 = vpop.permute.xlu1 %401 }
0x22f1   :  { %v2633_v21 = vrot.slane %v13773_v35, %v15762_v60  ;;  %v2649_v48 = vrot.slane %v13775_v31, %v15762_v60  ;;  %v2594_v58 = vcombine.low %v2529_v11, %v2545_v50  ;;  %v2563_v30 = vcombine.high %v2497_v52, %v2513_v10 }
0x22f2   :  { %v2665_v20 = vrot.slane %v13777_v53, %v15762_v60  ;;  %v2681_v27 = vrot.slane %v13779_v55, %v15762_v60  ;;  %v2595_v38 = vcombine.high %v2529_v11, %v2545_v50  ;;  %v2570_v8 = vrot.slane %v2562_v26, %v15765_v3 }
0x22f3   :  { %v2698_v59 = vcombine.low %v2633_v21, %v2649_v48  ;;  %v2699_v63 = vcombine.high %v2633_v21, %v2649_v48  ;;  %v2602_v43 = vrot.slane %v2594_v58, %v15765_v3  ;;  %v2577_v4 = vrot.slane %v2563_v30, %v15765_v3 }
0x22f4   :  { %v2730_v7 = vcombine.low %v2665_v20, %v2681_v27  ;;  %v2731_v39 = vcombine.high %v2665_v20, %v2681_v27  ;;  %v2609_v23 = vrot.slane %v2595_v38, %v15765_v3  ;;  %v432_v55 = vpop.permute.xlu1 %431 }
0x22f5   :  { %v2706_v13 = vrot.slane %v2698_v59, %v15765_v3  ;;  %v2713_v18 = vrot.slane %v2699_v63, %v15765_v3  ;;  %v2614_v0 = vcombine.low %v2570_v8, %v2602_v43  ;;  %v2615_v45 = vcombine.high %v2570_v8, %v2602_v43 }
0x22f6   :  { %v2738_v17 = vrot.slane %v2730_v7, %v15765_v3  ;;  %v2745_v2 = vrot.slane %v2731_v39, %v15765_v3  ;;  %v2616_v33 = vcombine.low %v2577_v4, %v2609_v23  ;;  %v2617_v16 = vcombine.high %v2577_v4, %v2609_v23 }
0x22f7   :  { %v1442_v47 = vcombine.low %v402_v19, %v432_v55  ;;  %v1443_v21 = vcombine.high %v402_v19, %v432_v55 }
0x22f8   :  { %v2750_v37 = vcombine.low %v2706_v13, %v2738_v17  ;;  %v2751_v42 = vcombine.high %v2706_v13, %v2738_v17  ;;  %v2752_v9 = vcombine.low %v2713_v18, %v2745_v2  ;;  %v2753_v40 = vcombine.high %v2713_v18, %v2745_v2 }
0x22f9   :  { %v1450_v58 = vrot.slane %v1442_v47, %v15762_v60 }
0x22fa   :  { %v15173_v52 = vpack.c.bf16 %v2750_v37, %v2614_v0  ;;  %v15176_v10 = vpack.c.bf16 %v2751_v42, %v2615_v45  ;;  %v17718_v44 = vpack.c.bf16 %v2752_v9, %v2616_v33  ;;  %v17720_v61 = vpack.c.bf16 %v2753_v40, %v2617_v16 }
0x22fc   :  { %15174 = vmatpush3.bf16.msra.mxu0 %v15173_v52  ;;  %15177 = vmatpush3.bf16.msra.mxu1 %v15176_v10 }
0x22fd   :  { %14851 = vmatprep.subr.mxu0 %v15560_v51  ;;  %14860 = vmatprep.subr.mxu1 %v15560_v51 }
0x2313   :  { %v11964_v11 = vpop.xlane.xlu0 %11963 }
0x2314   :  { %v11970_v50 = vsub.f32 %v17652_v49, %v11964_v11  ;;  %v1457_v49 = vrot.slane %v1443_v21, %v15762_v60  ;;  %v271_v21 = vpop.permute.xlu1 %270 }
0x2316   :  { %v11976_v62 = vmul.f32 1.442695, %v11970_v50 }
0x2317   :  { %v11967_v35 = vpop.xlane.xlu0 %11966 }
0x2318   :  { %15466 = vpow2.f32 %v11976_v62  ;;  %v11971_v31 = vsub.f32 %v17654_v57, %v11967_v35 }
0x231a   :  { %v11978_v53 = vmul.f32 1.442695, %v11971_v31 }
0x231b   :  { %v387_v46 = vpop.permute.xlu0 %386 }
0x231c   :  { %15468 = vpow2.f32 %v11978_v53 }
0x231f   :  { %v417_v48 = vpop.permute.xlu0 %416 }
0x2320   :  { %v1426_v20 = vcombine.low %v387_v46, %v417_v48  ;;  %v1427_v27 = vcombine.high %v387_v46, %v417_v48 }
0x2322   :  { %v17726_v26 = vpop.eup %15466  ;;  %v1434_v59 = vrot.slane %v1426_v20, %v15762_v60  ;;  %v1441_v30 = vrot.slane %v1427_v27, %v15762_v60  ;;  %v286_v20 = vpop.permute.xlu1 %285 }
0x2323   :  { %v11986_v57 = vsel %vm6688_vm6, %v17726_v26, 0.0  ;;  %v269_v46 = vpop.permute.xlu0 %268 }
0x2324   :  { %v1490_v38 = vcombine.low %v1434_v59, %v1450_v58  ;;  %v1491_v63 = vcombine.high %v1434_v59, %v1450_v58  ;;  %v1506_v8 = vcombine.low %v1441_v30, %v1457_v49  ;;  %v1507_v43 = vcombine.high %v1441_v30, %v1457_v49  ;;  %11987 = vadd.xlane.f32.xlu0 %v11986_v57 }
0x2326   :  { %v17734_v7 = vpop.eup %15468  ;;  %v1498_v39 = vrot.slane %v1490_v38, %v15765_v3  ;;  %v1505_v13 = vrot.slane %v1491_v63, %v15765_v3  ;;  %v1514_v4 = vrot.slane %v1506_v8, %v15765_v3  ;;  %v1521_v23 = vrot.slane %v1507_v43, %v15765_v3  ;;  %v301_v58 = vpop.permute.xlu1 %300 }
0x2327   :  { %v11989_v18 = vsel %vm6688_vm6, %v17734_v7, 0.0  ;;  %v284_v47 = vpop.permute.xlu0 %283 }
0x2328   :  { %v13781_v17 = vcombine.low %v1498_v39, %v1505_v13  ;;  %v13783_v2 = vcombine.high %v1498_v39, %v1505_v13  ;;  %v13785_v0 = vcombine.low %v1514_v4, %v1521_v23  ;;  %v13787_v45 = vcombine.high %v1514_v4, %v1521_v23  ;;  %11990 = vadd.xlane.f32.xlu1 %v11989_v18 }
0x2329   :  { %v1018_v4 = vcombine.low %v271_v21, %v301_v58  ;;  %v1019_v23 = vcombine.high %v271_v21, %v301_v58 }
0x232a   :  { %v2769_v33 = vrot.slane %v13781_v17, %v15762_v60  ;;  %v2785_v16 = vrot.slane %v13783_v2, %v15762_v60  ;;  %v2801_v37 = vrot.slane %v13785_v0, %v15762_v60  ;;  %v2817_v42 = vrot.slane %v13787_v45, %v15762_v60  ;;  %v316_v59 = vpop.permute.xlu1 %315 }
0x232b   :  { %v299_v48 = vpop.permute.xlu0 %298 }
0x232c   :  { %v2834_v9 = vcombine.low %v2769_v33, %v2785_v16  ;;  %v2835_v40 = vcombine.high %v2769_v33, %v2785_v16  ;;  %v2866_v52 = vcombine.low %v2801_v37, %v2817_v42  ;;  %v2867_v10 = vcombine.high %v2801_v37, %v2817_v42 }
0x232d   :  { %v882_v39 = vcombine.low %v269_v46, %v299_v48  ;;  %v883_v13 = vcombine.high %v269_v46, %v299_v48  ;;  %v1026_v16 = vrot.slane %v1018_v4, %v15762_v60  ;;  %v1033_v37 = vrot.slane %v1019_v23, %v15762_v60 }
0x232e   :  { %v2842_v11 = vrot.slane %v2834_v9, %v15765_v3  ;;  %v2874_v50 = vrot.slane %v2866_v52, %v15765_v3  ;;  %v2849_v19 = vrot.slane %v2835_v40, %v15765_v3  ;;  %v2881_v62 = vrot.slane %v2867_v10, %v15765_v3 }
0x232f   :  { %v314_v27 = vpop.permute.xlu0 %313  ;;  %v890_v45 = vrot.slane %v882_v39, %v15762_v60  ;;  %v897_v33 = vrot.slane %v883_v13, %v15762_v60 }
0x2330   :  { %v17750_v35 = vcombine.low %v2842_v11, %v2874_v50  ;;  %v17752_v31 = vcombine.high %v2842_v11, %v2874_v50  ;;  %v17754_v53 = vcombine.low %v2849_v19, %v2881_v62  ;;  %v17756_v55 = vcombine.high %v2849_v19, %v2881_v62 }
0x2332   :  { %14852 = vmatpush3.msk.msra.mxu0 %vm6736_vm7, %v17750_v35  ;;  %14861 = vmatpush3.msk.msra.mxu1 %vm6736_vm7, %v17752_v31 }
0x2333   :  { %15178 = vmatprep.subr.bf16.mxu0 %v15569_v5  ;;  %15181 = vmatprep.subr.bf16.mxu1 %v15569_v5  ;;  %v17768_v49 = vpop.permute.xlu0 %11336 }
0x2339   :  { %11342 = vrot.lane.b32.xlu1 %v17674_v29, %s15559_s3 }
0x233a   :  { %11348 = vrot.lane.b32.xlu0 %v17674_v29, %s15561_s18 }
0x237d   :  { %v11985_v30 = vpop.xlane.xlu0 %11984  ;;  %v11982_v57 = vpop.xlane.xlu1 %11981 }
0x237e   :  { %15470 = vrcp.f32 %v11985_v30 }
0x237f   :  { %15472 = vrcp.f32 %v11982_v57 }
0x2388   :  { %v15471_v38 = vpop.eup %15470 }
0x2389   :  { %v15473_v63 = vpop.eup %15472  ;;  %v11995_v8 = vmul.f32 %v15471_v38, %v17690_v54  ;;  %v898_v54 = vcombine.low %v284_v47, %v314_v27 }
0x238a   :  { %v11993_v43 = vmul.f32 %v15473_v63, %v17696_v36  ;;  %v899_v36 = vcombine.high %v284_v47, %v314_v27 }
0x238b   :  { %14863 = vmatmul.mubr.msk.f32.vlgmr.msra.gmra.mrb[72].mxu1 %vm6688_vm6, %v11995_v8  ;;  %v906_v18 = vrot.slane %v898_v54, %v15762_v60 }
0x238c   :  { %14854 = vmatmul.mubr.msk.f32.vlgmr.msra.gmra.mrb[64].mxu0 %vm6688_vm6, %v11993_v43  ;;  %15183 = vmatpush3.bf16.msra.mxu1 %v17720_v61  ;;  %v1035_v61 = vcombine.high %v286_v20, %v316_v59  ;;  %v913_v17 = vrot.slane %v899_v36, %v15762_v60 }
0x238d   :  { %15180 = vmatpush3.bf16.msra.mxu0 %v17718_v44  ;;  %14878 = vmatprep.subr.mxu1 %v15560_v51  ;;  %v1034_v44 = vcombine.low %v286_v20, %v316_v59  ;;  %v946_v42 = vcombine.low %v890_v45, %v906_v18  ;;  %v947_v9 = vcombine.high %v890_v45, %v906_v18 }
0x238e   :  { %14869 = vmatprep.subr.mxu0 %v15560_v51  ;;  %14871 = vmatprep.mubr.msk.f32.mxu0 %vm15562_vm1, %v15560_v51  ;;  %v1049_v0 = vrot.slane %v1035_v61, %v15762_v60  ;;  %v962_v40 = vcombine.low %v897_v33, %v913_v17  ;;  %v963_v52 = vcombine.high %v897_v33, %v913_v17 }
0x238f   :  { %14880 = vmatprep.mubr.msk.f32.mxu1 %vm15562_vm1, %v15560_v51  ;;  %v1042_v2 = vrot.slane %v1034_v44, %v15762_v60  ;;  %v954_v62 = vrot.slane %v946_v42, %v15765_v3  ;;  %v961_v46 = vrot.slane %v947_v9, %v15765_v3 }
0x2390   :  { %14879 = vmatpush3.msk.msra.mxu1 %vm6736_vm7, %v17756_v55  ;;  %v1098_v50 = vcombine.low %v1033_v37, %v1049_v0  ;;  %v1099_v19 = vcombine.high %v1033_v37, %v1049_v0  ;;  %v970_v47 = vrot.slane %v962_v40, %v15765_v3  ;;  %v977_v21 = vrot.slane %v963_v52, %v15765_v3 }
0x2391   :  { %14870 = vmatpush3.msk.msra.mxu0 %vm6736_vm7, %v17754_v53  ;;  %15188 = vmatprep.subr.bf16.mxu1 %v15569_v5  ;;  %v1082_v10 = vcombine.low %v1026_v16, %v1042_v2  ;;  %v1083_v11 = vcombine.high %v1026_v16, %v1042_v2  ;;  %v13749_v59 = vcombine.low %v954_v62, %v961_v46 }
0x2392   :  { %15184 = vmatprep.subr.bf16.mxu0 %v15569_v5  ;;  %v1106_v27 = vrot.slane %v1098_v50, %v15765_v3  ;;  %v1113_v58 = vrot.slane %v1099_v19, %v15765_v3  ;;  %v13751_v30 = vcombine.high %v954_v62, %v961_v46  ;;  %v13753_v57 = vcombine.low %v970_v47, %v977_v21 }
0x2393   :  { %v1090_v48 = vrot.slane %v1082_v10, %v15765_v3  ;;  %v1097_v20 = vrot.slane %v1083_v11, %v15765_v3  ;;  %v13755_v38 = vcombine.high %v970_v47, %v977_v21  ;;  %v2225_v36 = vrot.slane %v13749_v59, %v15762_v60 }
0x2394   :  { %v13761_v43 = vcombine.low %v1106_v27, %v1113_v58  ;;  %v13763_v54 = vcombine.high %v1106_v27, %v1113_v58  ;;  %v2241_v44 = vrot.slane %v13751_v30, %v15762_v60  ;;  %v2257_v61 = vrot.slane %v13753_v57, %v15762_v60 }
0x2395   :  { %v13757_v63 = vcombine.low %v1090_v48, %v1097_v20  ;;  %v13759_v8 = vcombine.high %v1090_v48, %v1097_v20  ;;  %v2273_v39 = vrot.slane %v13755_v38, %v15762_v60  ;;  %v12306_v20 = vrot.slane %v17559_v56, 4 }
0x2396   :  { %v2393_v23 = vrot.slane %v13761_v43, %v15762_v60  ;;  %v2409_v18 = vrot.slane %v13763_v54, %v15762_v60  ;;  %v2290_v17 = vcombine.low %v2225_v36, %v2241_v44  ;;  %v2291_v21 = vcombine.high %v2225_v36, %v2241_v44 }
0x2397   :  { %v2361_v13 = vrot.slane %v13757_v63, %v15762_v60  ;;  %v2377_v4 = vrot.slane %v13759_v8, %v15762_v60  ;;  %v2322_v2 = vcombine.low %v2257_v61, %v2273_v39  ;;  %v2323_v48 = vcombine.high %v2257_v61, %v2273_v39 }
0x2398   :  { %v2458_v45 = vcombine.low %v2393_v23, %v2409_v18  ;;  %v2298_v33 = vrot.slane %v2290_v17, %v15765_v3  ;;  %v2459_v46 = vcombine.high %v2393_v23, %v2409_v18  ;;  %v12392_v30 = vrot.slane %v17561_v25, 4 }
0x2399   :  { %v2426_v0 = vcombine.low %v2361_v13, %v2377_v4  ;;  %v2330_v16 = vrot.slane %v2322_v2, %v15765_v3  ;;  %v2427_v10 = vcombine.high %v2361_v13, %v2377_v4  ;;  %v2337_v44 = vrot.slane %v2323_v48, %v15765_v3 }
0x239a   :  { %v2466_v42 = vrot.slane %v2458_v45, %v15765_v3  ;;  %v2473_v36 = vrot.slane %v2459_v46, %v15765_v3 }
0x239b   :  { %v2434_v37 = vrot.slane %v2426_v0, %v15765_v3  ;;  %v2342_v40 = vcombine.low %v2298_v33, %v2330_v16  ;;  %v2343_v11 = vcombine.high %v2298_v33, %v2330_v16  ;;  %v17821_v57 = vrot.slane %v2427_v10, %v15765_v3 }
0x239d   :  { %v2478_v52 = vcombine.low %v2434_v37, %v2466_v42  ;;  %v12307_v62 = vrot.slane %v2342_v40, 4  ;;  %v2479_v47 = vcombine.high %v2434_v37, %v2466_v42  ;;  %v12393_v63 = vrot.slane %v2343_v11, 4 }
0x239e   :  { %v2480_v10 = vcombine.low %v17821_v57, %v2473_v36 }
0x239f   :  { %v12309_v59 = vrot.slane %v2478_v52, 4  ;;  %v12308_v54 = vsel %vm6736_vm7, %v12306_v20, %v12307_v62  ;;  %v12395_v25 = vrot.slane %v2479_v47, 4  ;;  %v12394_v17 = vsel %vm6736_vm7, %v12392_v30, %v12393_v63 }
0x23a0   :  { %v2481_v30 = vcombine.high %v17821_v57, %v2473_v36  ;;  %v12564_v36 = vrot.slane %v17557_v12, 4 }
0x23a1   :  { %v12310_v56 = vsel %vm6736_vm7, %v12307_v62, %v12309_v59  ;;  %v12396_v2 = vsel %vm6736_vm7, %v12393_v63, %v12395_v25 }
0x23a2   :  { %v15185_v18 = vpack.c.bf16 %v12310_v56, %v12308_v54 }
0x23b1   :  { %v11988_v9 = vpop.xlane.xlu0 %11987 }
0x23b2   :  { %15474 = vrcp.f32 %v11988_v9 }
0x23b5   :  { %v11991_v50 = vpop.xlane.xlu1 %11990  ;;  %v11349_v19 = vpop.permute.xlu0 %11348 }
0x23b6   :  { %15476 = vrcp.f32 %v11991_v50  ;;  %v11436_v27 = vcombine.low %v17768_v49, %v11349_v19  ;;  %v11437_v58 = vcombine.high %v17768_v49, %v11349_v19  ;;  %v2305_v49 = vrot.slane %v2291_v21, %v15765_v3 }
0x23b7   :  { %v15189_v50 = vpack.c.bf16 %v12396_v2, %v12394_v17 }
0x23b8   :  { %v11444_v39 = vrot.slane %v11436_v27, %v15762_v60  ;;  %v11451_v13 = vrot.slane %v11437_v58, %v15762_v60  ;;  %v2344_v37 = vcombine.low %v2305_v49, %v2337_v44  ;;  %v2345_v21 = vcombine.high %v2305_v49, %v2337_v44 }
0x23b9   :  { %v11343_v38 = vpop.permute.xlu1 %11342 }
0x23ba   :  { %v11420_v8 = vcombine.low %v17674_v29, %v11343_v38  ;;  %v11421_v43 = vcombine.high %v17674_v29, %v11343_v38  ;;  %v12479_v48 = vrot.slane %v2344_v37, 4  ;;  %v12478_v38 = vrot.slane %v17555_v22, 4 }
0x23bb   :  { %v12565_v54 = vrot.slane %v2345_v21, 4 }
0x23bc   :  { %v15475_v61 = vpop.eup %15474  ;;  %v11428_v4 = vrot.slane %v11420_v8, %v15762_v60  ;;  %v11435_v29 = vrot.slane %v11421_v43, %v15762_v60  ;;  %v12481_v43 = vrot.slane %v2480_v10, 4  ;;  %v12480_v44 = vsel %vm6736_vm7, %v12478_v38, %v12479_v48 }
0x23bd   :  { %v11997_v23 = vmul.f32 %v15475_v61, %v17726_v26  ;;  %v12567_v61 = vrot.slane %v2481_v30, 4 }
0x23be   :  { %v11452_v0 = vcombine.low %v11428_v4, %v11444_v39  ;;  %v11453_v45 = vcombine.high %v11428_v4, %v11444_v39  ;;  %v11468_v33 = vcombine.low %v11435_v29, %v11451_v13  ;;  %v11469_v16 = vcombine.high %v11435_v29, %v11451_v13 }
0x23bf   :  { %14872 = vmatmul.mubr.msk.f32.vlgmr.msra.gmra.mrb[66].mxu0 %vm6688_vm6, %v11997_v23  ;;  %v12482_v57 = vsel %vm6736_vm7, %v12479_v48, %v12481_v43  ;;  %v12566_v13 = vsel %vm6736_vm7, %v12564_v36, %v12565_v54  ;;  %v12568_v4 = vsel %vm6736_vm7, %v12565_v54, %v12567_v61 }
0x23c0   :  { %v15477_v42 = vpop.eup %15476  ;;  %v11460_v9 = vrot.slane %v11452_v0, %v15765_v3  ;;  %v11467_v40 = vrot.slane %v11453_v45, %v15765_v3  ;;  %v11476_v52 = vrot.slane %v11468_v33, %v15765_v3  ;;  %v11483_v26 = vrot.slane %v11469_v16, %v15765_v3  ;;  %15187 = vmatpush3.bf16.xpose.msk.msra.mxu0 %vm16321_vm5, %v15185_v18 }
0x23c1   :  { %v11999_v11 = vmul.f32 %v15477_v42, %v17734_v7  ;;  %14887 = vmatprep.subr.mxu0 %v15560_v51  ;;  %14889 = vmatprep.mubr.msk.f32.mxu0 %vm15562_vm1, %v15560_v51  ;;  %v15193_v39 = vpack.c.bf16 %v12482_v57, %v12480_v44  ;;  %v15197_v23 = vpack.c.bf16 %v12568_v4, %v12566_v13 }
0x23c2   :  { %v11556_v19 = vcombine.low %v11460_v9, %v11467_v40  ;;  %v13997_v62 = vcombine.high %v11460_v9, %v11467_v40  ;;  %v11572_v46 = vcombine.low %v11476_v52, %v11483_v26  ;;  %v13998_v47 = vcombine.high %v11476_v52, %v11483_v26 }
0x23c3   :  { %14881 = vmatmul.mubr.msk.f32.vlgmr.msra.gmra.mrb[74].mxu1 %vm6688_vm6, %v11999_v11 }
0x23c4   :  { %v11563_v20 = vrot.slane %v11556_v19, %v15762_v60  ;;  %v11571_v27 = vrot.slane %v13997_v62, %v15762_v60  ;;  %v11579_v7 = vrot.slane %v11572_v46, %v15762_v60  ;;  %v11587_v58 = vrot.slane %v13998_v47, %v15762_v60  ;;  %15191 = vmatpush3.bf16.xpose.msk.msra.mxu1 %vm16321_vm5, %v15189_v50 }
0x23c5   :  { %14896 = vmatprep.subr.mxu1 %v15560_v51  ;;  %14898 = vmatprep.mubr.msk.f32.mxu1 %vm15562_vm1, %v15560_v51 }
0x23c6   :  { %v11588_v63 = vcombine.low %v11563_v20, %v11571_v27  ;;  %v11604_v8 = vcombine.low %v11579_v7, %v11587_v58  ;;  %v11589_v12 = vcombine.high %v11563_v20, %v11571_v27  ;;  %v11605_v29 = vcombine.high %v11579_v7, %v11587_v58 }
0x23c8   :  { %14888 = vmatpush3.xpose.msk.msra.mxu0 %vm4247_vm2, %v12309_v59  ;;  %v11596_v56 = vrot.slane %v11588_v63, %v15765_v3  ;;  %v11612_v49 = vrot.slane %v11604_v8, %v15765_v3  ;;  %v11619_v18 = vrot.slane %v11605_v29, %v15765_v3 }
0x23c9   :  { %15192 = vmatprep.subr.bf16.mxu0 %v15569_v5 }
0x23ca   :  { %v11620_v22 = vcombine.low %v11596_v56, %v11612_v49  ;;  %v11621_v59 = vcombine.high %v11596_v56, %v11612_v49 }
0x23cc   :  { %14897 = vmatpush3.xpose.msk.msra.mxu1 %vm4247_vm2, %v12395_v25  ;;  %14890 = vmatmul.mubr.msk.f32.vlgmr.msra.gmra.mrb[68].mxu0 %vm4247_vm2, %v11620_v22  ;;  %v11603_v25 = vrot.slane %v11589_v12, %v15765_v3 }
0x23cd   :  { %15195 = vmatpush3.bf16.xpose.msk.msra.mxu0 %vm16321_vm5, %v15193_v39  ;;  %15196 = vmatprep.subr.bf16.mxu1 %v15569_v5 }
0x23ce   :  { %14905 = vmatprep.subr.mxu0 %v15560_v51  ;;  %14907 = vmatprep.mubr.msk.f32.mxu0 %vm15562_vm1, %v15560_v51  ;;  %v11622_v17 = vcombine.low %v11603_v25, %v11619_v18  ;;  %v11623_v1 = vcombine.high %v11603_v25, %v11619_v18 }
0x23cf   :  { %14899 = vmatmul.mubr.msk.f32.vlgmr.msra.gmra.mrb[76].mxu1 %vm4247_vm2, %v11621_v59 }
0x23d0   :  { %15199 = vmatpush3.bf16.xpose.msk.msra.mxu1 %vm16321_vm5, %v15197_v23  ;;  %14916 = vmatprep.mubr.msk.f32.mxu1 %vm15562_vm1, %v15560_v51 }
0x23d1   :  { %14914 = vmatprep.subr.mxu1 %v15560_v51 }
0x23d5   :  { %14906 = vmatpush3.xpose.msk.msra.mxu0 %vm4247_vm2, %v12481_v43 }
0x23d6   :  { %15200 = vmatprep.subr.bf16.mxu0 %v15569_v5 }
0x23d8   :  { %14908 = vmatmul.mubr.msk.f32.vlgmr.msra.gmra.mrb[70].mxu0 %vm4247_vm2, %v11622_v17  ;;  %14915 = vmatpush3.xpose.msk.msra.mxu1 %vm4247_vm2, %v12567_v61 }
0x23d9   :  { %15203 = vmatprep.subr.bf16.mxu1 %v15569_v5  ;;  %14925 = vmatprep.mubr.msk.f32.mxu0 %vm15562_vm1, %v15560_v51 }
0x23db   :  { %14917 = vmatmul.mubr.msk.f32.vlgmr.msra.gmra.mrb[78].mxu1 %vm4247_vm2, %v11623_v1 }
0x23dc   :  { %14934 = vmatprep.mubr.msk.f32.mxu1 %vm15562_vm1, %v15560_v51 }
0x245e   :  { %v12148_v2 = vpop.f32.mrb[72].mxu1 }
0x245f   :  { %v12072_v0 = vpop.f32.mrb[64].mxu0  ;;  %v14864_v45 = vpop.f32.mrb[73].mxu1 }
0x2460   :  { %v14855_v33 = vpop.f32.mrb[65].mxu0 }
0x2492   :  { %v12224_v16 = vpop.f32.mrb[66].mxu0 }
0x2493   :  { %v13032_v37 = vcombine.low %v12072_v0, %v12224_v16  ;;  %v13033_v42 = vcombine.high %v12072_v0, %v12224_v16  ;;  %v14873_v9 = vpop.f32.mrb[67].mxu0 }
0x2495   :  { %v13040_v11 = vrot.slane %v13032_v37, %v15762_v60  ;;  %v13047_v50 = vrot.slane %v13033_v42, %v15762_v60 }
0x2496   :  { %v12300_v40 = vpop.f32.mrb[74].mxu1 }
0x2497   :  { %v13048_v52 = vcombine.low %v12148_v2, %v12300_v40  ;;  %v13049_v26 = vcombine.high %v12148_v2, %v12300_v40  ;;  %v14882_v10 = vpop.f32.mrb[75].mxu1 }
0x2499   :  { %v13056_v19 = vrot.slane %v13048_v52, %v15762_v60  ;;  %v13063_v62 = vrot.slane %v13049_v26, %v15762_v60 }
0x249b   :  { %v13064_v46 = vcombine.low %v13040_v11, %v13056_v19  ;;  %v13065_v47 = vcombine.high %v13040_v11, %v13056_v19  ;;  %v13080_v21 = vcombine.low %v13047_v50, %v13063_v62  ;;  %v13081_v48 = vcombine.high %v13047_v50, %v13063_v62 }
0x249d   :  { %v13072_v20 = vrot.slane %v13064_v46, %v15765_v3  ;;  %v13079_v27 = vrot.slane %v13065_v47, %v15765_v3  ;;  %v13088_v7 = vrot.slane %v13080_v21, %v15765_v3  ;;  %v13095_v58 = vrot.slane %v13081_v48, %v15765_v3 }
0x249f   :  { %v13168_v30 = vcombine.low %v13072_v20, %v13079_v27  ;;  %v14047_v38 = vcombine.high %v13072_v20, %v13079_v27  ;;  %v13184_v63 = vcombine.low %v13088_v7, %v13095_v58  ;;  %v14048_v8 = vcombine.high %v13088_v7, %v13095_v58  ;;  %v12386_v43 = vpop.f32.mrb[68].mxu0 }
0x24a0   :  { %v12648_v54 = vmul.f32 0.35355338, %v12386_v43  ;;  %v14891_v56 = vpop.f32.mrb[69].mxu0 }
0x24a1   :  { %v13175_v49 = vrot.slane %v13168_v30, %v15762_v60  ;;  %v13183_v44 = vrot.slane %v14047_v38, %v15762_v60  ;;  %v13191_v57 = vrot.slane %v13184_v63, %v15762_v60  ;;  %v13199_v36 = vrot.slane %v14048_v8, %v15762_v60 }
0x24a2   :  { %v12472_v61 = vpop.f32.mrb[76].mxu1  ;;  %v12652_v22 = vsel %vm6688_vm6, %v12648_v54, -inf }
0x24a3   :  { %v12649_v39 = vmul.f32 0.35355338, %v12472_v61  ;;  %v14900_v13 = vpop.f32.mrb[77].mxu1  ;;  %12653 = vmax.xlane.f32.xlu1 %v12652_v22  ;;  %v13200_v4 = vcombine.low %v13175_v49, %v13183_v44  ;;  %v13216_v59 = vcombine.low %v13191_v57, %v13199_v36  ;;  %v13201_v12 = vcombine.high %v13175_v49, %v13183_v44 }
0x24a4   :  { %v13217_v29 = vcombine.high %v13191_v57, %v13199_v36 }
0x24a5   :  { %v12655_v23 = vsel %vm6688_vm6, %v12649_v39, -inf  ;;  %v17911_v25 = vrot.slane %v13200_v4, %v15765_v3  ;;  %v17914_v18 = vrot.slane %v13216_v59, %v15765_v3  ;;  %v17917_v17 = vrot.slane %v13201_v12, %v15765_v3 }
0x24a6   :  { %12656 = vmax.xlane.f32.xlu0 %v12655_v23  ;;  %v17920_v1 = vrot.slane %v13217_v29, %v15765_v3 }
0x24a7   :  { %v13233_v2 = vcombine.high %v17911_v25, %v17914_v18  ;;  %v13232_v0 = vcombine.low %v17911_v25, %v17914_v18 }
0x24a8   :  { %v13234_v45 = vcombine.low %v17917_v17, %v17920_v1  ;;  %v13235_v33 = vcombine.high %v17917_v17, %v17920_v1 }
0x24ab   :  { %v12558_v16 = vpop.f32.mrb[70].mxu0 }
0x24ac   :  { %v12650_v37 = vmul.f32 0.35355338, %v12558_v16  ;;  %v14909_v42 = vpop.f32.mrb[71].mxu0 }
0x24ae   :  { %v12644_v9 = vpop.f32.mrb[78].mxu1  ;;  %v12658_v40 = vsel %vm6688_vm6, %v12650_v37, -inf }
0x24af   :  { %v12651_v52 = vmul.f32 0.35355338, %v12644_v9  ;;  %v14918_v26 = vpop.f32.mrb[79].mxu1  ;;  %12659 = vmax.xlane.f32.xlu0 %v12658_v40 }
0x24b0   :  { %v15524_v26 = vld [vmem:[%s18169_s5 + $0x30] sm:$0xff] }
0x24b1   :  { %v12661_v10 = vsel %vm6688_vm6, %v12651_v52, -inf }
0x24b2   :  { %12662 = vmax.xlane.f32.xlu1 %v12661_v10  ;;  %v15525_v10 = vld [vmem:[%s18169_s5 + $0x38] sm:$0xff] }
0x24c3   :  { %390 = vrot.lane.b32.xlu1 %v16772_v6, %s15565_s24 }
0x24c5   :  { %388 = vrot.lane.b32.xlu0 %v16765_v41, %s15565_s24 }
0x24c7   :  { %403 = vrot.lane.b32.xlu1 %v16765_v41, %s15568_s29 }
0x24c9   :  { %405 = vrot.lane.b32.xlu0 %v16772_v6, %s15568_s29 }
0x24cb   :  { %418 = vrot.lane.b32.xlu1 %v16765_v41, %s15567_s26 }
0x24cd   :  { %420 = vrot.lane.b32.xlu0 %v16772_v6, %s15567_s26 }
0x24cf   :  { %433 = vrot.lane.b32.xlu1 %v16765_v41, %s15566_s25 }
0x24d1   :  { %435 = vrot.lane.b32.xlu0 %v16772_v6, %s15566_s25 }
0x2530   :  { %v12654_v11 = vpop.xlane.xlu1 %12653 }
0x2531   :  { %v12664_v50 = vsub.f32 %v12648_v54, %v12654_v11  ;;  %v17974_v11 = vpack.i.bf16 %v15525_v10, %v15524_v26 }
0x2533   :  { %v12668_v19 = vmul.f32 1.442695, %v12664_v50  ;;  %v12657_v62 = vpop.xlane.xlu0 %12656 }
0x2534   :  { %v12665_v46 = vsub.f32 %v12649_v39, %v12657_v62 }
0x2535   :  { %15478 = vpow2.f32 %v12668_v19 }
0x2536   :  { %v12670_v47 = vmul.f32 1.442695, %v12665_v46 }
0x2538   :  { %15480 = vpow2.f32 %v12670_v47 }
0x253c   :  { %v12660_v21 = vpop.xlane.xlu0 %12659 }
0x253d   :  { %v12666_v48 = vsub.f32 %v12650_v37, %v12660_v21 }
0x253f   :  { %v17948_v20 = vpop.eup %15478  ;;  %v12672_v27 = vmul.f32 1.442695, %v12666_v48  ;;  %v12663_v7 = vpop.xlane.xlu1 %12662 }
0x2540   :  { %v12667_v58 = vsub.f32 %v12651_v52, %v12663_v7  ;;  %v389_v30 = vpop.permute.xlu0 %388  ;;  %v12676_v41 = vsel %vm6688_vm6, %v17948_v20, 0.0 }
0x2541   :  { %15482 = vpow2.f32 %v12672_v27  ;;  %12677 = vadd.xlane.f32.xlu1 %v12676_v41 }
0x2542   :  { %v17952_v6 = vpop.eup %15480  ;;  %v12674_v38 = vmul.f32 1.442695, %v12667_v58 }
0x2543   :  { %v391_v63 = vpop.permute.xlu1 %390  ;;  %v12679_v8 = vsel %vm6688_vm6, %v17952_v6, 0.0 }
0x2544   :  { %15484 = vpow2.f32 %v12674_v38  ;;  %12680 = vadd.xlane.f32.xlu0 %v12679_v8  ;;  %v406_v43 = vpop.permute.xlu0 %405 }
0x2547   :  { %v404_v54 = vpop.permute.xlu1 %403 }
0x2548   :  { %v421_v56 = vpop.permute.xlu0 %420 }
0x2549   :  { %v1698_v49 = vcombine.low %v391_v63, %v421_v56  ;;  %v1699_v57 = vcombine.high %v391_v63, %v421_v56 }
0x254b   :  { %v17956_v44 = vpop.eup %15482  ;;  %v419_v36 = vpop.permute.xlu1 %418  ;;  %v1706_v59 = vrot.slane %v1698_v49, %v15762_v60  ;;  %v1713_v23 = vrot.slane %v1699_v57, %v15762_v60 }
0x254c   :  { %v436_v61 = vpop.permute.xlu0 %435  ;;  %v12682_v22 = vsel %vm6688_vm6, %v17956_v44, 0.0  ;;  %v1562_v12 = vcombine.low %v389_v30, %v419_v36  ;;  %v1563_v29 = vcombine.high %v389_v30, %v419_v36 }
0x254d   :  { %v1714_v39 = vcombine.low %v406_v43, %v436_v61  ;;  %v1715_v13 = vcombine.high %v406_v43, %v436_v61  ;;  %12683 = vadd.xlane.f32.xlu0 %v12682_v22 }
0x254e   :  { %v17960_v4 = vpop.eup %15484  ;;  %v1570_v47 = vrot.slane %v1562_v12, %v15762_v60  ;;  %v1577_v21 = vrot.slane %v1563_v29, %v15762_v60 }
0x254f   :  { %v1722_v16 = vrot.slane %v1714_v39, %v15762_v60  ;;  %v1729_v37 = vrot.slane %v1715_v13, %v15762_v60  ;;  %v434_v42 = vpop.permute.xlu1 %433  ;;  %v12685_v9 = vsel %vm6688_vm6, %v17960_v4, 0.0 }
0x2550   :  { %v1578_v40 = vcombine.low %v404_v54, %v434_v42  ;;  %v1579_v52 = vcombine.high %v404_v54, %v434_v42  ;;  %12686 = vadd.xlane.f32.xlu1 %v12685_v9 }
0x2551   :  { %v1762_v50 = vcombine.low %v1706_v59, %v1722_v16  ;;  %v1763_v19 = vcombine.high %v1706_v59, %v1722_v16  ;;  %v1778_v62 = vcombine.low %v1713_v23, %v1729_v37  ;;  %v1779_v46 = vcombine.high %v1713_v23, %v1729_v37 }
0x2552   :  { %v1586_v48 = vrot.slane %v1578_v40, %v15762_v60  ;;  %v1593_v27 = vrot.slane %v1579_v52, %v15762_v60 }
0x2553   :  { %v1770_v7 = vrot.slane %v1762_v50, %v15765_v3  ;;  %v1777_v58 = vrot.slane %v1763_v19, %v15765_v3  ;;  %v1786_v30 = vrot.slane %v1778_v62, %v15765_v3  ;;  %v1793_v41 = vrot.slane %v1779_v46, %v15765_v3 }
0x2554   :  { %v1626_v38 = vcombine.low %v1570_v47, %v1586_v48  ;;  %v1627_v63 = vcombine.high %v1570_v47, %v1586_v48  ;;  %v1642_v8 = vcombine.low %v1577_v21, %v1593_v27  ;;  %v1643_v43 = vcombine.high %v1577_v21, %v1593_v27 }
0x2555   :  { %v13797_v54 = vcombine.low %v1770_v7, %v1777_v58  ;;  %v13799_v56 = vcombine.high %v1770_v7, %v1777_v58  ;;  %v13801_v49 = vcombine.low %v1786_v30, %v1793_v41  ;;  %v13803_v57 = vcombine.high %v1786_v30, %v1793_v41 }
0x2556   :  { %v1634_v36 = vrot.slane %v1626_v38, %v15765_v3  ;;  %v1641_v61 = vrot.slane %v1627_v63, %v15765_v3  ;;  %v1650_v22 = vrot.slane %v1642_v8, %v15765_v3  ;;  %v1657_v39 = vrot.slane %v1643_v43, %v15765_v3 }
0x2557   :  { %v3041_v13 = vrot.slane %v13797_v54, %v15762_v60  ;;  %v3057_v59 = vrot.slane %v13799_v56, %v15762_v60  ;;  %v3073_v12 = vrot.slane %v13801_v49, %v15762_v60  ;;  %v3089_v29 = vrot.slane %v13803_v57, %v15762_v60 }
0x2558   :  { %v13789_v23 = vcombine.low %v1634_v36, %v1641_v61  ;;  %v13791_v16 = vcombine.high %v1634_v36, %v1641_v61  ;;  %v13793_v37 = vcombine.low %v1650_v22, %v1657_v39  ;;  %v13795_v42 = vcombine.high %v1650_v22, %v1657_v39 }
0x2559   :  { %v3106_v9 = vcombine.low %v3041_v13, %v3057_v59  ;;  %v3107_v40 = vcombine.high %v3041_v13, %v3057_v59  ;;  %v3138_v52 = vcombine.low %v3073_v12, %v3089_v29  ;;  %v3139_v26 = vcombine.high %v3073_v12, %v3089_v29 }
0x255a   :  { %v2905_v10 = vrot.slane %v13789_v23, %v15762_v60  ;;  %v2921_v50 = vrot.slane %v13791_v16, %v15762_v60  ;;  %v2937_v19 = vrot.slane %v13793_v37, %v15762_v60  ;;  %v2953_v62 = vrot.slane %v13795_v42, %v15762_v60 }
0x255b   :  { %v3114_v46 = vrot.slane %v3106_v9, %v15765_v3  ;;  %v3146_v47 = vrot.slane %v3138_v52, %v15765_v3  ;;  %v3121_v21 = vrot.slane %v3107_v40, %v15765_v3  ;;  %v3153_v48 = vrot.slane %v3139_v26, %v15765_v3 }
0x255c   :  { %v2970_v27 = vcombine.low %v2905_v10, %v2921_v50  ;;  %v2971_v7 = vcombine.high %v2905_v10, %v2921_v50  ;;  %v3002_v58 = vcombine.low %v2937_v19, %v2953_v62  ;;  %v3003_v30 = vcombine.high %v2937_v19, %v2953_v62 }
0x255d   :  { %v3158_v41 = vcombine.low %v3114_v46, %v3146_v47  ;;  %v3159_v38 = vcombine.high %v3114_v46, %v3146_v47  ;;  %v3160_v63 = vcombine.low %v3121_v21, %v3153_v48  ;;  %v3161_v8 = vcombine.high %v3121_v21, %v3153_v48 }
0x255e   :  { %v2978_v43 = vrot.slane %v2970_v27, %v15765_v3  ;;  %v3010_v54 = vrot.slane %v3002_v58, %v15765_v3  ;;  %v2985_v56 = vrot.slane %v2971_v7, %v15765_v3  ;;  %v3017_v49 = vrot.slane %v3003_v30, %v15765_v3 }
0x255f   :  { %v12698_v39 = vrot.slane %v17750_v35, 4  ;;  %v12701_v13 = vrot.slane %v3158_v41, 4  ;;  %v12782_v59 = vrot.slane %v17752_v31, 4  ;;  %v12785_v12 = vrot.slane %v3159_v38, 4 }
0x2560   :  { %v3022_v57 = vcombine.low %v2978_v43, %v3010_v54  ;;  %v3023_v36 = vcombine.high %v2978_v43, %v3010_v54  ;;  %v3024_v61 = vcombine.low %v2985_v56, %v3017_v49  ;;  %v3025_v22 = vcombine.high %v2985_v56, %v3017_v49 }
0x2561   :  { %15336 = vrot.lane.b32.xlu1 %v17974_v11, %s15555_s28  ;;  %v12866_v42 = vrot.slane %v17754_v53, 4  ;;  %v12869_v9 = vrot.slane %v3160_v63, 4  ;;  %v12950_v40 = vrot.slane %v17756_v55, 4  ;;  %v12953_v52 = vrot.slane %v3161_v8, 4 }
0x2562   :  { %v12699_v29 = vrot.slane %v3022_v57, 4  ;;  %v12783_v23 = vrot.slane %v3023_v36, 4  ;;  %v12867_v16 = vrot.slane %v3024_v61, 4  ;;  %v12951_v37 = vrot.slane %v3025_v22, 4 }
0x2564   :  { %v12700_v26 = vsel %vm6736_vm7, %v12698_v39, %v12699_v29  ;;  %v12702_v10 = vsel %vm6736_vm7, %v12699_v29, %v12701_v13  ;;  %v12784_v35 = vsel %vm6736_vm7, %v12782_v59, %v12783_v23  ;;  %v12786_v50 = vsel %vm6736_vm7, %v12783_v23, %v12785_v12 }
0x2565   :  { %13306 = vrot.lane.b32.xlu1 %v13233_v2, %s15566_s25  ;;  %v15201_v31 = vpack.c.bf16 %v12702_v10, %v12700_v26  ;;  %v15204_v19 = vpack.c.bf16 %v12786_v50, %v12784_v35  ;;  %v12868_v53 = vsel %vm6736_vm7, %v12866_v42, %v12867_v16  ;;  %v12870_v55 = vsel %vm6736_vm7, %v12867_v16, %v12869_v9 }
0x2566   :  { %v15207_v62 = vpack.c.bf16 %v12870_v55, %v12868_v53  ;;  %v12952_v46 = vsel %vm6736_vm7, %v12950_v40, %v12951_v37  ;;  %v12954_v47 = vsel %vm6736_vm7, %v12951_v37, %v12953_v52 }
0x2567   :  { %15202 = vmatpush3.bf16.msra.mxu0 %v15201_v31  ;;  %15205 = vmatpush3.bf16.msra.mxu1 %v15204_v19  ;;  %v15210_v21 = vpack.c.bf16 %v12954_v47, %v12952_v46 }
0x2568   :  { %14923 = vmatprep.subr.mxu0 %v15560_v51  ;;  %14932 = vmatprep.subr.mxu1 %v15560_v51 }
0x2569   :  { %13314 = vrot.lane.b32.xlu1 %v13234_v45, %s15567_s26 }
0x256b   :  { %14924 = vmatpush3.msk.msra.mxu0 %vm6736_vm7, %v12701_v13  ;;  %14933 = vmatpush3.msk.msra.mxu1 %vm6736_vm7, %v12785_v12 }
0x256c   :  { %15206 = vmatprep.subr.bf16.mxu0 %v15569_v5  ;;  %15209 = vmatprep.subr.bf16.mxu1 %v15569_v5 }
0x256d   :  { %13322 = vrot.lane.b32.xlu1 %v13235_v33, %s15568_s29 }
0x2571   :  { %13351 = vrot.lane.b32.xlu1 %v17572_v14, %s15555_s28 }
0x25ce   :  { %v12678_v2 = vpop.xlane.xlu1 %12677 }
0x25cf   :  { %15486 = vrcp.f32 %v12678_v2 }
0x25d1   :  { %v12681_v48 = vpop.xlane.xlu0 %12680 }
0x25d2   :  { %15488 = vrcp.f32 %v12681_v48 }
0x25d9   :  { %v15487_v45 = vpop.eup %15486 }
0x25da   :  { %v12689_v27 = vmul.f32 %v15487_v45, %v17948_v20  ;;  %v12684_v7 = vpop.xlane.xlu0 %12683 }
0x25db   :  { %15490 = vrcp.f32 %v12684_v7 }
0x25dc   :  { %v15489_v58 = vpop.eup %15488  ;;  %14926 = vmatmul.mubr.msk.f32.vlgmr.msra.gmra.mrb[72].mxu0 %vm6688_vm6, %v12689_v27 }
0x25dd   :  { %v12691_v5 = vmul.f32 %v15489_v58, %v17952_v6  ;;  %v12687_v30 = vpop.xlane.xlu1 %12686  ;;  %15208 = vmatpush3.bf16.msra.mxu0 %v15207_v62  ;;  %14943 = vmatprep.mubr.msk.f32.mxu0 %vm15562_vm1, %v15560_v51 }
0x25de   :  { %15492 = vrcp.f32 %v12687_v30  ;;  %14941 = vmatprep.subr.mxu0 %v15560_v51 }
0x25df   :  { %14935 = vmatmul.mubr.msk.f32.vlgmr.msra.gmra.mrb[80].mxu1 %vm6688_vm6, %v12691_v5 }
0x25e0   :  { %15211 = vmatpush3.bf16.msra.mxu1 %v15210_v21  ;;  %14952 = vmatprep.mubr.msk.f32.mxu1 %vm15562_vm1, %v15560_v51 }
0x25e1   :  { %v15337_v17 = vpop.permute.xlu1 %15336  ;;  %14942 = vmatpush3.msk.msra.mxu0 %vm6736_vm7, %v12869_v9  ;;  %14950 = vmatprep.subr.mxu1 %v15560_v51 }
0x25e2   :  { %v15339_v57 = vunpack.i.h.bf16 %v15337_v17  ;;  %v15338_v36 = vunpack.i.l.bf16 %v15337_v17 }
0x25e4   :  { %14951 = vmatpush3.msk.msra.mxu1 %vm6736_vm7, %v12953_v52  ;;  %v15216_v42 = vpack.c.bf16 %v15339_v57, %v15338_v36 }
0x25e5   :  { %v15491_v1 = vpop.eup %15490  ;;  %v13307_v33 = vpop.permute.xlu1 %13306 }
0x25e6   :  { %v12693_v20 = vmul.f32 %v15491_v1, %v17956_v44  ;;  %v13328_v63 = vsel %vm4247_vm2, %v13232_v0, %v13307_v33  ;;  %v15526_v44 = vld [vmem:[%s18169_s5 + $0x20] sm:$0xff] }
0x25e8   :  { %v15493_v6 = vpop.eup %15492  ;;  %14944 = vmatmul.mubr.msk.f32.vlgmr.msra.gmra.mrb[74].mxu0 %vm6688_vm6, %v12693_v20 }
0x25e9   :  { %v12695_v41 = vmul.f32 %v15493_v6, %v17960_v4  ;;  %v13315_v38 = vpop.permute.xlu1 %13314  ;;  %v15527_v4 = vld [vmem:[%s18169_s5 + $0x28] sm:$0xff] }
0x25ea   :  { %v13330_v51 = vsel %vm5834_vm3, %v13328_v63, %v13315_v38  ;;  %v18067_v54 = vpack.i.bf16 %v15527_v4, %v15526_v44 }
0x25eb   :  { %14953 = vmatmul.mubr.msk.f32.vlgmr.msra.gmra.mrb[82].mxu1 %vm6688_vm6, %v12695_v41 }
0x25ec   :  { %15331 = vrot.lane.b32.xlu0 %v18067_v54, %s15555_s28 }
0x25ed   :  { %v13323_v8 = vpop.permute.xlu1 %13322 }
0x25ee   :  { %v13332_v43 = vsel %vm5837_vm4, %v13330_v51, %v13323_v8 }
0x25ef   :  { %14963 = vmatprep.mubr.msk.f32.mxu0 %vm61_vm0, %v13332_v43 }
0x265e   :  { %v15332_v13 = vpop.permute.xlu0 %15331 }
0x265f   :  { %v15334_v12 = vunpack.i.h.bf16 %v15332_v13  ;;  %v15333_v29 = vunpack.i.l.bf16 %v15332_v13 }
0x2661   :  { %v15212_v9 = vpack.c.bf16 %v15334_v12, %v15333_v29 }
0x2663   :  { %15213 = vmatprep.subr.bf16.mxu0 %v15212_v9 }
0x2664   :  { %15215 = vmatpush3.bf16.msra.mxu0 %v15212_v9 }
0x2665   :  { %15217 = vmatprep.subr.bf16.mxu0 %v15216_v42 }
0x2668   :  { %15219 = vmatpush3.bf16.msra.mxu0 %v15216_v42 }
0x26af   :  { %v12776_v25 = vpop.f32.mrb[72].mxu0 }
0x26b0   :  { %v14927_v18 = vpop.f32.mrb[73].mxu0 }
0x26b2   :  { %v12860_v0 = vpop.f32.mrb[80].mxu1 }
0x26b3   :  { %v14936_v56 = vpop.f32.mrb[81].mxu1 }
0x26bb   :  { %v12944_v49 = vpop.f32.mrb[74].mxu0 }
0x26bc   :  { %v13100_v61 = vcombine.low %v12776_v25, %v12944_v49  ;;  %v13101_v22 = vcombine.high %v12776_v25, %v12944_v49  ;;  %v14945_v39 = vpop.f32.mrb[75].mxu0 }
0x26be   :  { %v13028_v59 = vpop.f32.mrb[82].mxu1  ;;  %v13108_v40 = vrot.slane %v13100_v61, %v15762_v60  ;;  %v13115_v52 = vrot.slane %v13101_v22, %v15762_v60 }
0x26bf   :  { %v13116_v23 = vcombine.low %v12860_v0, %v13028_v59  ;;  %v13117_v16 = vcombine.high %v12860_v0, %v13028_v59  ;;  %v14954_v37 = vpop.f32.mrb[83].mxu1 }
0x26c1   :  { %v13124_v26 = vrot.slane %v13116_v23, %v15762_v60  ;;  %v13131_v10 = vrot.slane %v13117_v16, %v15762_v60 }
0x26c3   :  { %v13132_v35 = vcombine.low %v13108_v40, %v13124_v26  ;;  %v13133_v50 = vcombine.high %v13108_v40, %v13124_v26  ;;  %v13148_v31 = vcombine.low %v13115_v52, %v13131_v10  ;;  %v13149_v19 = vcombine.high %v13115_v52, %v13131_v10  ;;  %v13931_v26 = vld [vmem:[%s18171_s7 + $0x48] sm:$0xff]  ;;  %v13932_v10 = vld [vmem:[%s18171_s7 + $0x50] sm:$0xff] }
0x26c5   :  { %v13140_v53 = vrot.slane %v13132_v35, %v15765_v3  ;;  %v13147_v55 = vrot.slane %v13133_v50, %v15765_v3  ;;  %v13156_v62 = vrot.slane %v13148_v31, %v15765_v3  ;;  %v13163_v46 = vrot.slane %v13149_v19, %v15765_v3  ;;  %v13935_v31 = vld [vmem:[%s18171_s7 + $0x68] sm:$0xff] }
0x26c7   :  { %v13236_v47 = vcombine.low %v13140_v53, %v13147_v55  ;;  %v14049_v21 = vcombine.high %v13140_v53, %v13147_v55  ;;  %v13252_v2 = vcombine.low %v13156_v62, %v13163_v46  ;;  %v14050_v48 = vcombine.high %v13156_v62, %v13163_v46 }
0x26c9   :  { %v13243_v45 = vrot.slane %v13236_v47, %v15762_v60  ;;  %v13251_v27 = vrot.slane %v14049_v21, %v15762_v60  ;;  %v13259_v7 = vrot.slane %v13252_v2, %v15762_v60  ;;  %v13267_v58 = vrot.slane %v14050_v48, %v15762_v60 }
0x26cb   :  { %v13268_v5 = vcombine.low %v13243_v45, %v13251_v27  ;;  %v13284_v30 = vcombine.low %v13259_v7, %v13267_v58  ;;  %v13269_v17 = vcombine.high %v13243_v45, %v13251_v27  ;;  %v13285_v1 = vcombine.high %v13259_v7, %v13267_v58 }
0x26cd   :  { %v13276_v33 = vrot.slane %v13268_v5, %v15765_v3  ;;  %v13292_v20 = vrot.slane %v13284_v30, %v15765_v3  ;;  %v13283_v6 = vrot.slane %v13269_v17, %v15765_v3  ;;  %v13299_v41 = vrot.slane %v13285_v1, %v15765_v3  ;;  %v13352_v3 = vpop.permute.xlu1 %13351 }
0x26cf   :  { %v13301_v38 = vcombine.high %v13276_v33, %v13292_v20  ;;  %v13302_v63 = vcombine.low %v13283_v6, %v13299_v41  ;;  %v13303_v51 = vcombine.high %v13283_v6, %v13299_v41  ;;  %v13300_v8 = vcombine.low %v13276_v33, %v13292_v20 }
0x26d1   :  { %13308 = vrot.lane.b32.xlu0 %v13301_v38, %s15566_s25  ;;  %v13936_v38 = vld [vmem:[%s18171_s7 + $0x70] sm:$0xff] }
0x26d5   :  { %13316 = vrot.lane.b32.xlu0 %v13302_v63, %s15567_s26  ;;  %v13937_v63 = vld [vmem:[%s18171_s7 + $0x78] sm:$0xff] }
0x26d9   :  { %13324 = vrot.lane.b32.xlu0 %v13303_v51, %s15568_s29  ;;  %v15240_v51 = vpack.c.bf16 %v13937_v63, %v13936_v38 }
0x2743   :  { %v13309_v60 = vpop.permute.xlu0 %13308 }
0x2744   :  { %v13329_v44 = vsel %vm4247_vm2, %v13300_v8, %v13309_v60  ;;  %v15528_v8 = vld [vmem:[%s18172_s8 + $0x4] sm:$0xf] }
0x2745   :  { %v13574_v60 = vrot.slane %v15528_v8, %v8307_v24 }
0x2747   :  { %v13317_v43 = vpop.permute.xlu0 %13316 }
0x2748   :  { %v13331_v4 = vsel %vm5834_vm3, %v13329_v44, %v13317_v43 }
0x274b   :  { %v13325_v25 = vpop.permute.xlu0 %13324 }
0x274c   :  { %v13333_v18 = vsel %vm5837_vm4, %v13331_v4, %v13325_v25 }
0x274d   :  { %14964 = vmatmul.mubr.msk.f32.vlgmr.msra.gmra.mrb[76].mxu0 %vm61_vm0, %v13333_v18 }
0x2820   :  { %v14965_v0 = vpop.f32.mrb[76].mxu0 }
0x2821   :  { %v13432_v56 = vadd.f32 %v14965_v0, %v13352_v3  ;;  %v13426_v49 = vpop.f32.mrb[77].mxu0 }
0x2822   :  { %v13427_v57 = vadd.f32 %v13426_v49, %v13352_v3 }
0x2823   :  { %v13436_v36 = vadd.f32 %v13432_v56, %v17496_v34 }
0x2824   :  { %v13435_v61 = vadd.f32 %v13427_v57, %v17477_v15 }
0x2825   :  { %v13440_v22 = vsel %vm61_vm0, %v13436_v36, 0.0 }
0x2826   :  { %13441 = vadd.xlane.f32.xlu1 %v13440_v22  ;;  %v13437_v39 = vsel %vm61_vm0, %v13435_v61, 0.0 }
0x2827   :  { %13438 = vadd.xlane.f32.xlu0 %v13437_v39 }
0x2837   :  { %15341 = vrot.lane.b32.xlu1 %v18067_v54, %s15553_s20 }
0x283b   :  { %13463 = vrot.lane.b32.xlu1 %v17409_v32, %s15553_s20 }
0x283f   :  { %13468 = vrot.lane.b32.xlu1 %v17409_v32, %s15565_s24  ;;  %v13930_v32 = vld [vmem:[%s18171_s7 + $0x40] sm:$0xff] }
0x2840   :  { %v15228_v35 = vpack.c.bf16 %v13931_v26, %v13930_v32 }
0x2842   :  { %15229 = vmatprep.subr.bf16.mxu0 %v15228_v35 }
0x2843   :  { %15231 = vmatpush3.bf16.msra.mxu0 %v15228_v35  ;;  %13576 = vrot.lane.b32.xlu1 %v13574_v60, %s15553_s20 }
0x28b3   :  { %v13442_v13 = vpop.xlane.xlu1 %13441 }
0x28b4   :  { %v13444_v59 = vmul.f32 0.03125, %v13442_v13  ;;  %v13439_v34 = vpop.xlane.xlu0 %13438 }
0x28b5   :  { %v13443_v12 = vmul.f32 0.03125, %v13439_v34 }
0x28b6   :  { %v13446_v15 = vsub.f32 %v13436_v36, %v13444_v59 }
0x28b7   :  { %v13445_v29 = vsub.f32 %v13435_v61, %v13443_v12  ;;  %v15342_v54 = vpop.permute.xlu1 %15341 }
0x28b8   :  { %v13448_v23 = vmul.f32 %v13446_v15, %v13446_v15  ;;  %v15344_v9 = vunpack.i.h.bf16 %v15342_v54  ;;  %v15343_v40 = vunpack.i.l.bf16 %v15342_v54 }
0x28b9   :  { %v13447_v37 = vmul.f32 %v13445_v29, %v13445_v29 }
0x28ba   :  { %v13452_v16 = vsel %vm61_vm0, %v13448_v23, 0.0  ;;  %v15220_v52 = vpack.c.bf16 %v15344_v9, %v15343_v40 }
0x28bb   :  { %13453 = vadd.xlane.f32.xlu0 %v13452_v16  ;;  %v13449_v42 = vsel %vm61_vm0, %v13447_v37, 0.0  ;;  %v13464_v58 = vpop.permute.xlu1 %13463 }
0x28bc   :  { %15221 = vmatprep.subr.bf16.mxu1 %v15220_v52 }
0x28bd   :  { %15223 = vmatpush3.bf16.msra.mxu1 %v15220_v52 }
0x28bf   :  { %13450 = vadd.xlane.f32.xlu0 %v13449_v42  ;;  %v13469_v20 = vpop.permute.xlu1 %13468 }
0x28c3   :  { %v13577_v56 = vpop.permute.xlu1 %13576 }
0x28d5   :  { %15346 = vrot.lane.b32.xlu0 %v17974_v11, %s15553_s20  ;;  %v13933_v11 = vld [vmem:[%s18171_s7 + $0x58] sm:$0xff] }
0x28d6   :  { %v15232_v50 = vpack.c.bf16 %v13933_v11, %v13932_v10 }
0x28d8   :  { %15233 = vmatprep.subr.bf16.mxu0 %v15232_v50 }
0x28d9   :  { %13485 = vrot.lane.b32.xlu0 %v17572_v14, %s15553_s20  ;;  %v13934_v14 = vld [vmem:[%s18171_s7 + $0x60] sm:$0xff]  ;;  %15235 = vmatpush3.bf16.msra.mxu0 %v15232_v50  ;;  %s15573_s7 = smov [#allocation2]  }
0x28da   :  { %v15236_v19 = vpack.c.bf16 %v13935_v31, %v13934_v14  ;;  %s13702_s8 = sshll.u32 %s15573_s7, 4  ;;  %s13703_s8 = int_to_ptr.vmem [resolvable:$true] %s13702_s8 }
0x28db   :  { %s15529_s20 = scalar_lea.vmem %s13703_s8, 256  ;;  %p15534_p1 = scmp.lt.s32.totalorder %s13703_s8, %s13703_s8 }
0x28dc   :  { %15237 = vmatprep.subr.bf16.mxu0 %v15236_v19  ;;  %p15530_p0 = scmp.ne.s32.totalorder %s13703_s8, %s15529_s20  ;;  %p15535_p2 = scmp.lt.s32.totalorder %s15529_s20, %s15529_s20 }
0x28dd   :  { %15239 = vmatpush3.bf16.msra.mxu0 %v15236_v19 }
0x28de   :  { %15241 = vmatprep.subr.bf16.mxu0 %v15240_v51  ;;  %p15536_p3 = por %p15535_p2, %p15534_p1 }
0x28e0   :  { %p15537_p4 = pnand %p15536_p3, %p15530_p0 }
0x28e1   :  { %15243 = vmatpush3.bf16.msra.mxu0 %v15240_v51 }
0x2948   :  { %v13454_v53 = vpop.xlane.xlu0 %13453 }
0x2949   :  { %v13456_v55 = vmul.f32 0.03125, %v13454_v53 }
0x294b   :  { %v13458_v62 = vadd.f32 1e-05, %v13456_v55 }
0x294c   :  { %v13451_v46 = vpop.xlane.xlu0 %13450 }
0x294d   :  { %15494 = vrsqrt.f32 %v13458_v62  ;;  %v13455_v47 = vmul.f32 0.03125, %v13451_v46 }
0x294f   :  { %v13457_v21 = vadd.f32 1e-05, %v13455_v47 }
0x2950   :  { %v15347_v2 = vpop.permute.xlu0 %15346 }
0x2951   :  { %15496 = vrsqrt.f32 %v13457_v21  ;;  %v15349_v48 = vunpack.i.h.bf16 %v15347_v2  ;;  %v15348_v45 = vunpack.i.l.bf16 %v15347_v2 }
0x2953   :  { %v15224_v27 = vpack.c.bf16 %v15349_v48, %v15348_v45 }
0x2954   :  { %v13486_v43 = vpop.permute.xlu0 %13485 }
0x2955   :  { %15225 = vmatprep.subr.bf16.mxu1 %v15224_v27 }
0x2956   :  { %15227 = vmatpush3.bf16.msra.mxu1 %v15224_v27 }
0x2957   :  { %v15495_v7 = vpop.eup %15494 }
0x2958   :  { %v13462_v5 = vmul.f32 %v15495_v7, %v13446_v15 }
0x295a   :  { %v13467_v1 = vmul.f32 %v13464_v58, %v13462_v5 }
0x295b   :  { %v15497_v30 = vpop.eup %15496 }
0x295c   :  { %v13461_v17 = vmul.f32 %v15497_v30, %v13445_v29  ;;  %v13472_v41 = vadd.f32 %v13469_v20, %v13467_v1 }
0x295e   :  { %v13466_v33 = vmul.f32 %v13464_v58, %v13461_v17 }
0x2960   :  { %v13471_v6 = vadd.f32 %v13469_v20, %v13466_v33 }
0x2962   :  { %14974 = vmatprep.mubr.msk.f32.mxu1 %vm61_vm0, %v13471_v6 }
0x2963   :  { %14975 = vmatmul.mubr.msk.f32.vlgmr.msra.gmra.mrb[84].mxu1 %vm61_vm0, %v13472_v41 }
0x2a36   :  { %v14976_v44 = vpop.f32.mrb[84].mxu1 }
0x2a37   :  { %v13566_v4 = vadd.f32 %v14976_v44, %v13486_v43  ;;  %v13560_v25 = vpop.f32.mrb[85].mxu1 }
0x2a38   :  { %v13561_v18 = vadd.f32 %v13560_v25, %v13486_v43 }
0x2a39   :  { %v13570_v0 = vmax.f32 %v13566_v4, 0.0 }
0x2a3a   :  { %v13569_v3 = vmax.f32 %v13561_v18, 0.0 }
0x2a3c   :  { %14993 = vmatprep.mubr.msk.f32.mxu0 %vm8313_vm8, %v13569_v3 }
0x2a3d   :  { %14994 = vmatmul.mubr.msk.f32.vlgmr.msra.gmra.mrb[78].mxu0 %vm8313_vm8, %v13570_v0 }
0x2b10   :  { %v14995_v49 = vpop.f32.mrb[78].mxu0 }
0x2b11   :  { %v13657_v57 = vadd.f32 %v14995_v49, %v13577_v56  ;;  %v13651_v36 = vpop.f32.mrb[79].mxu0 }
0x2b12   :  { %v13652_v28 = vadd.f32 %v13651_v36, %v13577_v56 }
0x2b13   :  { %v13661_v24 = vadd.f32 %v13657_v57, %v13472_v41 }
0x2b14   :  { %v13660_v61 = vadd.f32 %v13652_v28, %v13471_v6 }
0x2b15   :  { %v13665_v22 = vsel %vm61_vm0, %v13661_v24, 0.0 }
0x2b16   :  { %13666 = vadd.xlane.f32.xlu1 %v13665_v22  ;;  %v13662_v39 = vsel %vm61_vm0, %v13660_v61, 0.0 }
0x2b17   :  { %13663 = vadd.xlane.f32.xlu0 %v13662_v39 }
0x2b27   :  { %13690 = vrot.lane.b32.xlu1 %v13574_v60, %s15555_s28 }
0x2ba3   :  { %v13667_v13 = vpop.xlane.xlu1 %13666 }
0x2ba4   :  { %v13669_v59 = vmul.f32 0.03125, %v13667_v13  ;;  %v13664_v34 = vpop.xlane.xlu0 %13663 }
0x2ba5   :  { %v13668_v12 = vmul.f32 0.03125, %v13664_v34 }
0x2ba6   :  { %v13671_v15 = vsub.f32 %v13661_v24, %v13669_v59 }
0x2ba7   :  { %v13670_v29 = vsub.f32 %v13660_v61, %v13668_v12  ;;  %v13691_v11 = vpop.permute.xlu1 %13690 }
0x2ba8   :  { %v13673_v37 = vmul.f32 %v13671_v15, %v13671_v15 }
0x2ba9   :  { %v13672_v23 = vmul.f32 %v13670_v29, %v13670_v29 }
0x2baa   :  { %v13677_v42 = vsel %vm61_vm0, %v13673_v37, 0.0 }
0x2bab   :  { %v13674_v16 = vsel %vm61_vm0, %v13672_v23, 0.0 }
0x2bac   :  { %13675 = vadd.xlane.f32.xlu0 %v13674_v16 }
0x2bb0   :  { %13678 = vadd.xlane.f32.xlu0 %v13677_v42 }
0x2c39   :  { %v13676_v54 = vpop.xlane.xlu0 %13675 }
0x2c3a   :  { %v13680_v9 = vmul.f32 0.03125, %v13676_v54 }
0x2c3c   :  { %v13682_v40 = vadd.f32 1e-05, %v13680_v9 }
0x2c3d   :  { %v13679_v52 = vpop.xlane.xlu0 %13678 }
0x2c3e   :  { %15498 = vrsqrt.f32 %v13682_v40  ;;  %v13681_v32 = vmul.f32 0.03125, %v13679_v52 }
0x2c40   :  { %v13683_v26 = vadd.f32 1e-05, %v13681_v32 }
0x2c42   :  { %15500 = vrsqrt.f32 %v13683_v26 }
0x2c48   :  { %v15499_v10 = vpop.eup %15498 }
0x2c49   :  { %v13686_v35 = vmul.f32 %v15499_v10, %v13670_v29 }
0x2c4b   :  { %v13688_v50 = vmul.f32 %v13686_v35, %v13574_v60 }
0x2c4c   :  { %v15501_v14 = vpop.eup %15500 }
0x2c4d   :  { %v13687_v31 = vmul.f32 %v15501_v14, %v13671_v15  ;;  %v13693_v19 = vadd.f32 %v13691_v11, %v13688_v50 }
0x2c4f   :  { %v13689_v53 = vmul.f32 %v13687_v31, %v13574_v60  ;;  %13695 = vst.msk [vmem:[#allocation2] sm:$0xff] %vm61_vm0, %v13693_v19 }
0x2c51   :  { %v13694_v55 = vadd.f32 %v13691_v11, %v13689_v53 }
0x2c53   :  { %13696 = vst.msk [vmem:[#allocation2 + $0x8] sm:$0xff] %vm61_vm0, %v13694_v55 }
0x2c54   :  { %15540 = shalt.err (!%p15537_p4)
}
0x2c55   :  { %s15541_s16 = scalar_lea.hbm %s18173_s9, 256 }
0x2c56   :  { %p15542_p5 = scmp.ne.s32.totalorder %s18173_s9, %s15541_s16  ;;  %p15545_p6 = scmp.lt.u32.totalorder %s15541_s16, %s18173_s9 }
0x2c58   :  { %p15547_p7 = pnand %p15545_p6, %p15542_p5 }
0x2c5a   :  { %15550 = shalt.err (!%p15547_p7)
}
0x2c5b   :  { %s15574_s4 = smov 128  }
0x2c5c   :  { %13708 = dma.vmem_to_hbm [thread:$0]  %s13703_s8, 256, %s18173_s9, [#allocation3], %s15574_s4, %s15574_s4, %s15566_s25  }
0x2c5d   :  { %15551 = dma.done.wait [#allocation3], 256  }
0x2c5e   :  { %15552 = vsyncadd [#allocation3], 4294967040 }
0x2c5f   :  { %13712 = vsyncpa [#allocation3], 1 }

</bundles_post_ra>
